<compile_context>
chip_gen: v6e
topology: v6e:2x2x1
jax: 0.10.0
libtpu: 0.0.40
codegen_flags: <defaults>
</compile_context>

<pallas_src>
import functools

import numpy as np
import jax
import jax.numpy as jnp
from jax.experimental import pallas as pl
from jax.experimental.pallas import tpu as pltpu


def _round_up(x, m):
    return (int(x) + m - 1) // m * m


def _softplus(x):
    # matches torch.nn.functional.softplus (beta=1, threshold=20)
    return jnp.where(x > 20.0, x, jnp.log1p(jnp.exp(jnp.minimum(x, 20.0))))


# ----------------------------------------------------------------------------
# Kernel
# ----------------------------------------------------------------------------
def _zl_encoder_kernel(n_layers, s_ref, sp_ref, *refs):
    """Argument layout (after s, species):
       refs = [w0_s, w0_sp, w0_sum, b0,
               (w_l, b_l) for l = 1..n_layers-1,
               softplus_mask,                 # last input
               out_ref,                       # output
               acc_ref, rsum_ref]             # VMEM scratch
    Grid = (batch_tiles, k_tiles); axis 1 is the first-layer K reduction
    (marked "arbitrary"), axis 0 is the batch ("parallel")."""
    n_hidden = 2 * (n_layers - 1)
    w0_s_ref, w0_sp_ref, w0_sum_ref, b0_ref = refs[:4]
    hidden_refs = refs[4:4 + n_hidden]
    mask_ref = refs[4 + n_hidden]
    out_ref = refs[5 + n_hidden]
    acc_ref = refs[6 + n_hidden]
    rsum_ref = refs[7 + n_hidden]

    k = pl.program_id(1)
    nk = pl.num_programs(1)

    @pl.when(k == 0)
    def _init():
        acc_ref[...] = jnp.zeros_like(acc_ref)
        rsum_ref[...] = jnp.zeros_like(rsum_ref)

    # ---- K-tiled first-layer partial product: acc += log1p(s_k) @ W0_s[k] ----
    w0_s_blk = w0_s_ref[...]                                # (TK, H0p) compute dtype
    s_f32 = s_ref[...].astype(jnp.float32)                  # (TB, TK); elementwise/EUP in f32
    rsum_ref[...] += jnp.sum(s_f32, axis=-1, keepdims=True)  # f32 running row-sum
    s_log = jnp.log1p(s_f32).astype(w0_s_blk.dtype)         # downcast once for MXU
    acc_ref[...] += jnp.dot(s_log, w0_s_blk, preferred_element_type=jnp.float32)

    # ---- epilogue (only on the last K step): species/s_sum/bias, hidden
    #      layers, output transform, single lane-dense store ------------------
    @pl.when(k == nk - 1)
    def _epilogue():
        w0_sp = w0_sp_ref[...]
        s_sum = jnp.log1p(rsum_ref[...])                    # (TB, 1) f32
        h = (acc_ref[...]
             + jnp.dot(sp_ref[...].astype(w0_sp.dtype), w0_sp,
                       preferred_element_type=jnp.float32)
             + s_sum * w0_sum_ref[...]
             + b0_ref[...])
        if n_layers > 1:
            h = jnp.maximum(h, 0.0)          # ReLU (BN folded into W0, b0)
        for layer in range(1, n_layers):
            w = hidden_refs[2 * (layer - 1)][...]
            b = hidden_refs[2 * (layer - 1) + 1][...]
            h = jnp.dot(h.astype(w.dtype), w,
                        preferred_element_type=jnp.float32) + b
            if layer < n_layers - 1:
                h = jnp.maximum(h, 0.0)
        mask = mask_ref[...]                 # (1, out_pad): 1 -> softplus column
        out_ref[...] = jnp.where(mask > 0.5, _softplus(h), h)


# ----------------------------------------------------------------------------
# Host-side parameter construction (mirrors ZLEncoder.__init__ shapes)
# ----------------------------------------------------------------------------
def init_zl_encoder_params(key, num_var, outputs, hidden_dims,
                           num_cat_input=0, conv_out_channels=1):
    output_dim = [o[0] for o in outputs]
    cumsums = np.insert(np.cumsum(output_dim), 0, 0).astype(np.int64)
    dims = ([conv_out_channels * num_var + num_cat_input + 1]
            + list(hidden_dims) + [int(cumsums[-1])])
    n_layers = len(dims) - 1
    eps = 1e-5
    params = []
    for l in range(n_layers):
        d_in, d_out = dims[l], dims[l + 1]
        key, k_w, k_b = jax.random.split(key, 3)
        bound = 1.0 / np.sqrt(d_in)
        w = jax.random.uniform(k_w, (d_in, d_out), jnp.float32, -bound, bound)
        b = jax.random.uniform(k_b, (1, d_out), jnp.float32, -bound, bound)
        if l < n_layers - 1:
            # fold eval-mode BatchNorm1d (fresh init: gamma=1, beta=0,
            # running_mean=0, running_var=1)
            gamma = jnp.ones((d_out,), jnp.float32)
            beta = jnp.zeros((d_out,), jnp.float32)
            rmean = jnp.zeros((d_out,), jnp.float32)
            rvar = jnp.ones((d_out,), jnp.float32)
            scale = gamma / jnp.sqrt(rvar + eps)
            w = w * scale[None, :]
            b = b * scale[None, :] + (beta - rmean * scale)[None, :]
        params.append((w, b))
    return params, cumsums, dims


def _vmem_limit_bytes():
    # generation-aware scoped-VMEM cap: 128 MiB physical on v5e/v6e, 64 MiB on v7x
    cap = 128 * 1024 * 1024
    try:
        info = pltpu.get_tpu_info()
        cap = int(getattr(info, "vmem_capacity_bytes", cap))
    except Exception:
        pass
    if cap <= 64 * 1024 * 1024:
        return 48 * 1024 * 1024      # v7x-class: leave headroom, rely on K-tiling
    return 100 * 1024 * 1024         # v5e / v6e


# ----------------------------------------------------------------------------
# Pallas-backed forward (host side does only padding / parameter plumbing)
# ----------------------------------------------------------------------------
def zl_encoder_forward(s, species, params, cumsums, output_transforms,
                       num_var, num_cat_input, *,
                       tile_b=512, tile_k=512, compute_dtype=jnp.bfloat16):
    B, V = s.shape
    assert V == num_var
    n_layers = len(params)
    w0, b0 = params[0]
    h0 = w0.shape[1]

    if species is None:
        # species=None path: only valid for a model built with num_cat_input==0.
        assert w0.shape[0] == V + 1, (
            "species=None requires a model built with num_cat_input == 0")
        species = jnp.zeros((B, 1), jnp.float32)
        C = 1
        w0_s, w0_sum = w0[:V], w0[V:V + 1]
        w0_sp = jnp.zeros((C, h0), jnp.float32)
    else:
        C = species.shape[-1]
        assert C == num_cat_input and w0.shape[0] == V + C + 1
        w0_s = w0[:V]
        w0_sp = w0[V:V + C]
        w0_sum = w0[V + C:V + C + 1]

    def pad_cols(a, n):
        return jnp.pad(a, ((0, 0), (0, n - a.shape[1])))

    def pad_rows(a, n):
        return jnp.pad(a, ((0, n - a.shape[0]), (0, 0)))

    # ---- K tiling of the first-layer reduction (num_var axis) ---------------
    TK = min(_round_up(int(tile_k), 128), _round_up(V, 128))
    V_pad = _round_up(V, TK)
    n_k = V_pad // TK

    # ---- pad feature widths to multiples of 128 (lane-dense, semantics kept) -
    h0_pad = _round_up(h0, 128)
    w0_s_p = pad_cols(pad_rows(w0_s, V_pad), h0_pad).astype(compute_dtype)
    w0_sp_p = pad_cols(w0_sp, h0_pad).astype(compute_dtype)
    w0_sum_p = pad_cols(w0_sum, h0_pad).astype(jnp.float32)
    b0_p = pad_cols(b0, h0_pad).astype(jnp.float32)

    padded_layers = []
    padded_dims = [(V_pad + C, h0_pad)]
    d_prev_pad = h0_pad
    for l in range(1, n_layers):
        w, b = params[l]
        d_out_pad = _round_up(w.shape[1], 128)
        w_p = pad_cols(pad_rows(w, d_prev_pad), d_out_pad).astype(compute_dtype)
        b_p = pad_cols(b, d_out_pad).astype(jnp.float32)
        padded_layers.append((w_p, b_p))
        padded_dims.append((d_prev_pad, d_out_pad))
        d_prev_pad = d_out_pad
    out_pad = d_prev_pad

    # softplus mask: 1.0 -> softplus column, 0.0 -> identity column
    mask_np = np.zeros((1, out_pad), np.float32)
    for i, tr in enumerate(output_transforms):
        if tr == "softplus":
            mask_np[0, int(cumsums[i]):int(cumsums[i + 1])] = 1.0
        elif tr is not None:
            raise NotImplementedError("only None / softplus transforms supported")
    softplus_mask = jnp.asarray(mask_np)

    # ---- batch tiling --------------------------------------------------------
    B8 = _round_up(B, 8)
    TB = min(_round_up(int(tile_b), 8), B8)
    # guarantee >= 2 batch tiles where possible so the "parallel" grid axis can
    # feed both TensorCores on v7x (harmless on single-TC v5e/v6e)
    if B8 > 8 and TB >= B8:
        TB = _round_up((B8 + 1) // 2, 8)
    B_pad = _round_up(B, TB)
    n_b = B_pad // TB

    # stream s in the compute dtype (bf16 fast path halves the dominant HBM
    # traffic); species is tiny so it stays f32.
    s_p = jnp.pad(s.astype(jnp.float32),
                  ((0, B_pad - B), (0, V_pad - V))).astype(compute_dtype)
    sp_p = jnp.pad(species.astype(jnp.float32), ((0, B_pad - B), (0, 0)))

    flat_inputs = [s_p, sp_p, w0_s_p, w0_sp_p, w0_sum_p, b0_p]
    for w_p, b_p in padded_layers:
        flat_inputs.extend([w_p, b_p])
    flat_inputs.append(softplus_mask)

    # advisory cost estimate for the XLA scheduler
    flops = 2 * B_pad * (V_pad + C) * h0_pad
    for d_in_p, d_out_p in padded_dims[1:]:
        flops += 2 * B_pad * d_in_p * d_out_p
    transcendentals = B_pad * (V_pad + 1 + out_pad)        # log1p's + softplus exp
    bytes_accessed = int(sum(int(np.prod(a.shape)) * a.dtype.itemsize
                             for a in flat_inputs)) + B_pad * out_pad * 4

    def _call(single_buffer_consts):
        const_kw = ({"pipeline_mode": pl.Buffered(1)}
                    if single_buffer_consts else {})
        in_specs = [
            pl.BlockSpec((TB, TK), lambda i, k: (i, k)),       # s: streamed per (i,k)
            pl.BlockSpec((TB, C), lambda i, k: (i, 0)),        # species: per batch tile
            pl.BlockSpec((TK, h0_pad), lambda i, k: (k, 0)),   # w0_s: K-tiled
        ]
        # all remaining operands are grid-constant -> single-buffered when possible
        for a in flat_inputs[3:]:
            in_specs.append(pl.BlockSpec(a.shape, lambda i, k: (0, 0), **const_kw))
        out_spec = pl.BlockSpec((TB, out_pad), lambda i, k: (i, 0))

        fn = pl.pallas_call(
            functools.partial(_zl_encoder_kernel, n_layers),
            grid=(n_b, n_k),
            in_specs=in_specs,
            out_specs=out_spec,
            out_shape=jax.ShapeDtypeStruct((B_pad, out_pad), jnp.float32),
            scratch_shapes=[pltpu.VMEM((TB, h0_pad), jnp.float32),   # first-layer acc
                            pltpu.VMEM((TB, 1), jnp.float32)],       # running row-sum
            compiler_params=pltpu.CompilerParams(
                dimension_semantics=("parallel", "arbitrary"),
                vmem_limit_bytes=_vmem_limit_bytes()),
            cost_estimate=pl.CostEstimate(
                flops=int(flops),
                transcendentals=int(transcendentals),
                bytes_accessed=int(bytes_accessed)),
        )
        return jax.block_until_ready(fn(*flat_inputs))

    try:
        x = _call(True)
    except Exception:
        # pipeline_mode=pl.Buffered(1) not accepted on this jax build:
        # fall back to default double-buffering (correctness unchanged).
        x = _call(False)

    # slicing the padded result back into the return list is pure glue
    x = x[:B]
    return [x[:, int(cumsums[i]):int(cumsums[i + 1])]
            for i in range(len(cumsums) - 1)]


# ----------------------------------------------------------------------------
# Pure-JAX f32 reference (mirrors the PyTorch forward) for correctness checking
# ----------------------------------------------------------------------------
def zl_encoder_reference(s, species, params, cumsums, output_transforms):
    s_sum = jnp.log1p(jnp.sum(s, axis=-1, keepdims=True))
    s_log = jnp.log1p(s)
    feats = [s_log] + ([species] if species is not None else []) + [s_sum]
    h = jnp.concatenate(feats, axis=-1)
    n_layers = len(params)
    for l, (w, b) in enumerate(params):
        h = h @ w + b
        if l < n_layers - 1:
            h = jax.nn.relu(h)
    outs = []
    for i, tr in enumerate(output_transforms):
        sl = h[:, int(cumsums[i]):int(cumsums[i + 1])]
        outs.append(jax.nn.softplus(sl) if tr == "softplus" else sl)
    return outs


# ----------------------------------------------------------------------------
if __name__ == "__main__":
    key = jax.random.PRNGKey(0)

    # small, module-consistent shapes; batch=512 -> 2 "parallel" batch tiles,
    # num_var=300 with tile_k=128 -> 3-step K reduction (exercises the
    # accumulator init / epilogue pattern).
    batch = 512
    num_var = 300
    num_cat_input = 2
    hidden_dims = [64, 64]
    z_dim = 4
    outputs = [(z_dim, None), (z_dim, "softplus"), (1, None), (1, "softplus")]
    transforms = [o[1] for o in outputs]

    k_param, k_s, k_sp = jax.random.split(key, 3)
    params, cumsums, dims = init_zl_encoder_params(
        k_param, num_var, outputs, hidden_dims,
        num_cat_input=num_cat_input, conv_out_channels=1)

    # counts-like nonnegative input (as expected by log1p of gene counts)
    s = jax.random.uniform(k_s, (batch, num_var), jnp.float32, 0.0, 50.0)
    species = jax.random.uniform(k_sp, (batch, num_cat_input),
                                 jnp.float32, 0.0, 1.0)

    refs = zl_encoder_reference(s, species, params, cumsums, transforms)

    # (1) exact-semantics check: f32 streaming + f32 weights vs f32 reference
    outs_f32 = zl_encoder_forward(s, species, params, cumsums, transforms,
                                  num_var, num_cat_input,
                                  tile_b=512, tile_k=128,
                                  compute_dtype=jnp.float32)
    outs_f32 = [jax.block_until_ready(o) for o in outs_f32]
    for got, ref in zip(outs_f32, refs):
        np.testing.assert_allclose(np.asarray(got), np.asarray(ref),
                                   rtol=1e-4, atol=1e-4)

    # (2) performance path: bf16-streamed s + bf16 weights (f32 accumulate)
    outs_bf16 = zl_encoder_forward(s, species, params, cumsums, transforms,
                                   num_var, num_cat_input,
                                   tile_b=512, tile_k=128,
                                   compute_dtype=jnp.bfloat16)
    outs_bf16 = [jax.block_until_ready(o) for o in outs_bf16]
    for got, ref in zip(outs_bf16, refs):
        np.testing.assert_allclose(np.asarray(got), np.asarray(ref),
                                   rtol=5e-2, atol=1e-1)

    print("KERNEL_OK")
</pallas_src>

<mosaic_0001>
module attributes {stable_mosaic.version = 11 : i64} {
  func.func @_zl_encoder_kernel(%arg0: i32, %arg1: i32, %arg2: memref<256x128xf32, #tpu.memory_space<vmem>>, %arg3: memref<256x2xf32, #tpu.memory_space<vmem>>, %arg4: memref<128x128xf32, #tpu.memory_space<vmem>>, %arg5: memref<2x128xf32, #tpu.memory_space<vmem>>, %arg6: memref<1x128xf32, #tpu.memory_space<vmem>>, %arg7: memref<1x128xf32, #tpu.memory_space<vmem>>, %arg8: memref<128x128xf32, #tpu.memory_space<vmem>>, %arg9: memref<1x128xf32, #tpu.memory_space<vmem>>, %arg10: memref<128x128xf32, #tpu.memory_space<vmem>>, %arg11: memref<1x128xf32, #tpu.memory_space<vmem>>, %arg12: memref<1x128xf32, #tpu.memory_space<vmem>>, %arg13: memref<256x128xf32, #tpu.memory_space<vmem>>, %arg14: memref<256x128xf32, #tpu.memory_space<vmem>>, %arg15: memref<256x1xf32, #tpu.memory_space<vmem>>) attributes {dimension_semantics = [#tpu.dimension_semantics<parallel>, #tpu.dimension_semantics<arbitrary>], iteration_bounds = array<i64: 2, 3>, scalar_prefetch = 0 : i64, scratch_operands = 2 : i64, tpu.core_type = #tpu.core_type<tc>, window_params = [{transform_indices = @transform_0, window_bounds = array<i64: 256, 128>}, {transform_indices = @transform_1, window_bounds = array<i64: 256, 2>}, {transform_indices = @transform_2, window_bounds = array<i64: 128, 128>}, {pipeline_mode = #tpu.pipeline_mode<synchronous>, transform_indices = @transform_3, window_bounds = array<i64: 2, 128>}, {pipeline_mode = #tpu.pipeline_mode<synchronous>, transform_indices = @transform_4, window_bounds = array<i64: 1, 128>}, {pipeline_mode = #tpu.pipeline_mode<synchronous>, transform_indices = @transform_5, window_bounds = array<i64: 1, 128>}, {pipeline_mode = #tpu.pipeline_mode<synchronous>, transform_indices = @transform_6, window_bounds = array<i64: 128, 128>}, {pipeline_mode = #tpu.pipeline_mode<synchronous>, transform_indices = @transform_7, window_bounds = array<i64: 1, 128>}, {pipeline_mode = #tpu.pipeline_mode<synchronous>, transform_indices = @transform_8, window_bounds = array<i64: 128, 128>}, {pipeline_mode = #tpu.pipeline_mode<synchronous>, transform_indices = @transform_9, window_bounds = array<i64: 1, 128>}, {pipeline_mode = #tpu.pipeline_mode<synchronous>, transform_indices = @transform_10, window_bounds = array<i64: 1, 128>}, {transform_indices = @transform_11, window_bounds = array<i64: 256, 128>}]} {
    %c0_i32 = arith.constant 0 : i32
    %0 = arith.cmpi eq, %arg1, %c0_i32 : i32
    %1 = arith.extui %0 : i1 to i32
    %c0_i32_0 = arith.constant 0 : i32
    %2 = arith.cmpi ne, %1, %c0_i32_0 : i32
    scf.if %2 {
      %cst_14 = arith.constant 0.000000e+00 : f32
      %18 = vector.broadcast %cst_14 : f32 to vector<256x128xf32>
      %c0_15 = arith.constant 0 : index
      %c0_16 = arith.constant 0 : index
      %19 = vector.load %arg14[%c0_15, %c0_16] : memref<256x128xf32, #tpu.memory_space<vmem>>, vector<256x128xf32>
      tpu.vector_store %arg14[%c0_15, %c0_16], %18 {strides = array<i32>} : memref<256x128xf32, #tpu.memory_space<vmem>>, vector<256x128xf32>,
      %cst_17 = arith.constant 0.000000e+00 : f32
      %20 = vector.broadcast %cst_17 : f32 to vector<256x1xf32>
      %c0_18 = arith.constant 0 : index
      %c0_19 = arith.constant 0 : index
      %21 = vector.load %arg15[%c0_18, %c0_19] : memref<256x1xf32, #tpu.memory_space<vmem>>, vector<256x1xf32>
      tpu.vector_store %arg15[%c0_18, %c0_19], %20 {strides = array<i32>} : memref<256x1xf32, #tpu.memory_space<vmem>>, vector<256x1xf32>,
    } else {
    }
    %c0 = arith.constant 0 : index
    %c0_1 = arith.constant 0 : index
    %3 = vector.load %arg4[%c0, %c0_1] : memref<128x128xf32, #tpu.memory_space<vmem>>, vector<128x128xf32>
    %c0_2 = arith.constant 0 : index
    %c0_3 = arith.constant 0 : index
    %4 = vector.load %arg2[%c0_2, %c0_3] : memref<256x128xf32, #tpu.memory_space<vmem>>, vector<256x128xf32>
    %c0_4 = arith.constant 0 : index
    %c0_5 = arith.constant 0 : index
    %5 = vector.load %arg15[%c0_4, %c0_5] : memref<256x1xf32, #tpu.memory_space<vmem>>, vector<256x1xf32>
    %cst = arith.constant dense<0.000000e+00> : vector<256xf32>
    %6 = vector.multi_reduction <add>, %4, %cst [1] : vector<256x128xf32> to vector<256xf32>
    %7 = vector.shape_cast %6 : vector<256xf32> to vector<256x1xf32>
    %8 = arith.addf %5, %7 : vector<256x1xf32>
    %c0_6 = arith.constant 0 : index
    %c0_7 = arith.constant 0 : index
    %9 = vector.load %arg15[%c0_6, %c0_7] : memref<256x1xf32, #tpu.memory_space<vmem>>, vector<256x1xf32>
    tpu.vector_store %arg15[%c0_6, %c0_7], %8 {strides = array<i32>} : memref<256x1xf32, #tpu.memory_space<vmem>>, vector<256x1xf32>,
    %10 = math.log1p %4 : vector<256x128xf32>
    %c0_8 = arith.constant 0 : index
    %c0_9 = arith.constant 0 : index
    %11 = vector.load %arg14[%c0_8, %c0_9] : memref<256x128xf32, #tpu.memory_space<vmem>>, vector<256x128xf32>
    %cst_10 = arith.constant dense<0.000000e+00> : vector<256x128xf32>
    %12 = tpu.matmul %10, %3, %cst_10 {dimension_numbers = #tpu.dot_dimension_numbers<[1], [0], [0], [1], [0, 0, 1, 1], [], []>} : vector<256x128xf32>, vector<128x128xf32>, vector<256x128xf32> -> vector<256x128xf32>
    %13 = arith.addf %11, %12 : vector<256x128xf32>
    %c0_11 = arith.constant 0 : index
    %c0_12 = arith.constant 0 : index
    %14 = vector.load %arg14[%c0_11, %c0_12] : memref<256x128xf32, #tpu.memory_space<vmem>>, vector<256x128xf32>
    tpu.vector_store %arg14[%c0_11, %c0_12], %13 {strides = array<i32>} : memref<256x128xf32, #tpu.memory_space<vmem>>, vector<256x128xf32>,
    %c2_i32 = arith.constant 2 : i32
    %15 = arith.cmpi eq, %arg1, %c2_i32 : i32
    %16 = arith.extui %15 : i1 to i32
    %c0_i32_13 = arith.constant 0 : i32
    %17 = arith.cmpi ne, %16, %c0_i32_13 : i32
    scf.if %17 {
      %c0_14 = arith.constant 0 : index
      %c0_15 = arith.constant 0 : index
      %18 = vector.load %arg5[%c0_14, %c0_15] : memref<2x128xf32, #tpu.memory_space<vmem>>, vector<2x128xf32>
      %c0_16 = arith.constant 0 : index
      %c0_17 = arith.constant 0 : index
      %19 = vector.load %arg15[%c0_16, %c0_17] : memref<256x1xf32, #tpu.memory_space<vmem>>, vector<256x1xf32>
      %20 = math.log1p %19 : vector<256x1xf32>
      %c0_18 = arith.constant 0 : index
      %c0_19 = arith.constant 0 : index
      %21 = vector.load %arg14[%c0_18, %c0_19] : memref<256x128xf32, #tpu.memory_space<vmem>>, vector<256x128xf32>
      %c0_20 = arith.constant 0 : index
      %c0_21 = arith.constant 0 : index
      %22 = vector.load %arg3[%c0_20, %c0_21] : memref<256x2xf32, #tpu.memory_space<vmem>>, vector<256x2xf32>
      %cst_22 = arith.constant dense<0.000000e+00> : vector<256x128xf32>
      %23 = tpu.matmul %22, %18, %cst_22 {dimension_numbers = #tpu.dot_dimension_numbers<[1], [0], [0], [1], [0, 0, 1, 1], [], []>} : vector<256x2xf32>, vector<2x128xf32>, vector<256x128xf32> -> vector<256x128xf32>
      %24 = arith.addf %21, %23 : vector<256x128xf32>
      %c0_23 = arith.constant 0 : index
      %c0_24 = arith.constant 0 : index
      %25 = vector.load %arg6[%c0_23, %c0_24] : memref<1x128xf32, #tpu.memory_space<vmem>>, vector<1x128xf32>
      %26 = vector.broadcast %20 : vector<256x1xf32> to vector<256x128xf32>
      %27 = vector.broadcast %25 : vector<1x128xf32> to vector<256x128xf32>
      %28 = arith.mulf %26, %27 : vector<256x128xf32>
      %29 = arith.addf %24, %28 : vector<256x128xf32>
      %c0_25 = arith.constant 0 : index
      %c0_26 = arith.constant 0 : index
      %30 = vector.load %arg7[%c0_25, %c0_26] : memref<1x128xf32, #tpu.memory_space<vmem>>, vector<1x128xf32>
      %31 = vector.broadcast %30 : vector<1x128xf32> to vector<256x128xf32>
      %32 = arith.addf %29, %31 : vector<256x128xf32>
      %cst_27 = arith.constant 0.000000e+00 : f32
      %33 = vector.broadcast %cst_27 : f32 to vector<256x128xf32>
      %34 = arith.maximumf %32, %33 : vector<256x128xf32>
      %c0_28 = arith.constant 0 : index
      %c0_29 = arith.constant 0 : index
      %35 = vector.load %arg8[%c0_28, %c0_29] : memref<128x128xf32, #tpu.memory_space<vmem>>, vector<128x128xf32>
      %c0_30 = arith.constant 0 : index
      %c0_31 = arith.constant 0 : index
      %36 = vector.load %arg9[%c0_30, %c0_31] : memref<1x128xf32, #tpu.memory_space<vmem>>, vector<1x128xf32>
      %cst_32 = arith.constant dense<0.000000e+00> : vector<256x128xf32>
      %37 = tpu.matmul %34, %35, %cst_32 {dimension_numbers = #tpu.dot_dimension_numbers<[1], [0], [0], [1], [0, 0, 1, 1], [], []>} : vector<256x128xf32>, vector<128x128xf32>, vector<256x128xf32> -> vector<256x128xf32>
      %38 = vector.broadcast %36 : vector<1x128xf32> to vector<256x128xf32>
      %39 = arith.addf %37, %38 : vector<256x128xf32>
      %cst_33 = arith.constant 0.000000e+00 : f32
      %40 = vector.broadcast %cst_33 : f32 to vector<256x128xf32>
      %41 = arith.maximumf %39, %40 : vector<256x128xf32>
      %c0_34 = arith.constant 0 : index
      %c0_35 = arith.constant 0 : index
      %42 = vector.load %arg10[%c0_34, %c0_35] : memref<128x128xf32, #tpu.memory_space<vmem>>, vector<128x128xf32>
      %c0_36 = arith.constant 0 : index
      %c0_37 = arith.constant 0 : index
      %43 = vector.load %arg11[%c0_36, %c0_37] : memref<1x128xf32, #tpu.memory_space<vmem>>, vector<1x128xf32>
      %cst_38 = arith.constant dense<0.000000e+00> : vector<256x128xf32>
      %44 = tpu.matmul %41, %42, %cst_38 {dimension_numbers = #tpu.dot_dimension_numbers<[1], [0], [0], [1], [0, 0, 1, 1], [], []>} : vector<256x128xf32>, vector<128x128xf32>, vector<256x128xf32> -> vector<256x128xf32>
      %45 = vector.broadcast %43 : vector<1x128xf32> to vector<256x128xf32>
      %46 = arith.addf %44, %45 : vector<256x128xf32>
      %c0_39 = arith.constant 0 : index
      %c0_40 = arith.constant 0 : index
      %47 = vector.load %arg12[%c0_39, %c0_40] : memref<1x128xf32, #tpu.memory_space<vmem>>, vector<1x128xf32>
      %cst_41 = arith.constant 5.000000e-01 : f32
      %48 = vector.broadcast %cst_41 : f32 to vector<1x128xf32>
      %49 = arith.cmpf ogt, %47, %48 : vector<1x128xf32>
      %cst_42 = arith.constant 2.000000e+01 : f32
      %50 = vector.broadcast %cst_42 : f32 to vector<256x128xf32>
      %51 = arith.cmpf ogt, %46, %50 : vector<256x128xf32>
      %cst_43 = arith.constant 2.000000e+01 : f32
      %52 = vector.broadcast %cst_43 : f32 to vector<256x128xf32>
      %53 = arith.minimumf %46, %52 : vector<256x128xf32>
      %54 = math.exp %53 : vector<256x128xf32>
      %55 = math.log1p %54 : vector<256x128xf32>
      %56 = arith.select %51, %46, %55 : vector<256x128xi1>, vector<256x128xf32>
      %57 = vector.shape_cast %49 : vector<1x128xi1> to vector<1x128xi1>
      %58 = vector.broadcast %57 : vector<1x128xi1> to vector<256x128xi1>
      %59 = arith.select %58, %56, %46 : vector<256x128xi1>, vector<256x128xf32>
      %c0_44 = arith.constant 0 : index
      %c0_45 = arith.constant 0 : index
      %60 = vector.load %arg13[%c0_44, %c0_45] : memref<256x128xf32, #tpu.memory_space<vmem>>, vector<256x128xf32>
      tpu.vector_store %arg13[%c0_44, %c0_45], %59 {strides = array<i32>} : memref<256x128xf32, #tpu.memory_space<vmem>>, vector<256x128xf32>,
    } else {
    }
    return
  }
  func.func @transform_0(%arg0: i32, %arg1: i32) -> (i32, i32) {
    %c0_i32 = arith.constant 0 : i32
    return %arg0, %arg1 : i32, i32
  }
  func.func @transform_1(%arg0: i32, %arg1: i32) -> (i32, i32) {
    %c0_i32 = arith.constant 0 : i32
    %c0_i32_0 = arith.constant 0 : i32
    return %arg0, %c0_i32 : i32, i32
  }
  func.func @transform_2(%arg0: i32, %arg1: i32) -> (i32, i32) {
    %c0_i32 = arith.constant 0 : i32
    %c0_i32_0 = arith.constant 0 : i32
    return %arg1, %c0_i32 : i32, i32
  }
  func.func @transform_3(%arg0: i32, %arg1: i32) -> (i32, i32) {
    %c0_i32 = arith.constant 0 : i32
    %c0_i32_0 = arith.constant 0 : i32
    %c0_i32_1 = arith.constant 0 : i32
    return %c0_i32, %c0_i32_0 : i32, i32
  }
  func.func @transform_4(%arg0: i32, %arg1: i32) -> (i32, i32) {
    %c0_i32 = arith.constant 0 : i32
    %c0_i32_0 = arith.constant 0 : i32
    %c0_i32_1 = arith.constant 0 : i32
    return %c0_i32, %c0_i32_0 : i32, i32
  }
  func.func @transform_5(%arg0: i32, %arg1: i32) -> (i32, i32) {
    %c0_i32 = arith.constant 0 : i32
    %c0_i32_0 = arith.constant 0 : i32
    %c0_i32_1 = arith.constant 0 : i32
    return %c0_i32, %c0_i32_0 : i32, i32
  }
  func.func @transform_6(%arg0: i32, %arg1: i32) -> (i32, i32) {
    %c0_i32 = arith.constant 0 : i32
    %c0_i32_0 = arith.constant 0 : i32
    %c0_i32_1 = arith.constant 0 : i32
    return %c0_i32, %c0_i32_0 : i32, i32
  }
  func.func @transform_7(%arg0: i32, %arg1: i32) -> (i32, i32) {
    %c0_i32 = arith.constant 0 : i32
    %c0_i32_0 = arith.constant 0 : i32
    %c0_i32_1 = arith.constant 0 : i32
    return %c0_i32, %c0_i32_0 : i32, i32
  }
  func.func @transform_8(%arg0: i32, %arg1: i32) -> (i32, i32) {
    %c0_i32 = arith.constant 0 : i32
    %c0_i32_0 = arith.constant 0 : i32
    %c0_i32_1 = arith.constant 0 : i32
    return %c0_i32, %c0_i32_0 : i32, i32
  }
  func.func @transform_9(%arg0: i32, %arg1: i32) -> (i32, i32) {
    %c0_i32 = arith.constant 0 : i32
    %c0_i32_0 = arith.constant 0 : i32
    %c0_i32_1 = arith.constant 0 : i32
    return %c0_i32, %c0_i32_0 : i32, i32
  }
  func.func @transform_10(%arg0: i32, %arg1: i32) -> (i32, i32) {
    %c0_i32 = arith.constant 0 : i32
    %c0_i32_0 = arith.constant 0 : i32
    %c0_i32_1 = arith.constant 0 : i32
    return %c0_i32, %c0_i32_0 : i32, i32
  }
  func.func @transform_11(%arg0: i32, %arg1: i32) -> (i32, i32) {
    %c0_i32 = arith.constant 0 : i32
    %c0_i32_0 = arith.constant 0 : i32
    return %arg0, %c0_i32 : i32, i32
  }
}

module attributes {stable_mosaic.version = 11 : i64} {
  func.func @_zl_encoder_kernel(%arg0: i32, %arg1: i32, %arg2: memref<256x128xf32, #tpu.memory_space<vmem>>, %arg3: memref<256x2xf32, #tpu.memory_space<vmem>>, %arg4: memref<128x128xf32, #tpu.memory_space<vmem>>, %arg5: memref<2x128xf32, #tpu.memory_space<vmem>>, %arg6: memref<1x128xf32, #tpu.memory_space<vmem>>, %arg7: memref<1x128xf32, #tpu.memory_space<vmem>>, %arg8: memref<128x128xf32, #tpu.memory_space<vmem>>, %arg9: memref<1x128xf32, #tpu.memory_space<vmem>>, %arg10: memref<128x128xf32, #tpu.memory_space<vmem>>, %arg11: memref<1x128xf32, #tpu.memory_space<vmem>>, %arg12: memref<1x128xf32, #tpu.memory_space<vmem>>, %arg13: memref<256x128xf32, #tpu.memory_space<vmem>>, %arg14: memref<256x128xf32, #tpu.memory_space<vmem>>, %arg15: memref<256x1xf32, #tpu.memory_space<vmem>>) attributes {dimension_semantics = [#tpu.dimension_semantics<parallel>, #tpu.dimension_semantics<arbitrary>], iteration_bounds = array<i64: 2, 3>, scalar_prefetch = 0 : i64, scratch_operands = 2 : i64, tpu.core_type = #tpu.core_type<tc>, window_params = [{transform_indices = @transform_0, window_bounds = array<i64: 256, 128>}, {transform_indices = @transform_1, window_bounds = array<i64: 256, 2>}, {transform_indices = @transform_2, window_bounds = array<i64: 128, 128>}, {pipeline_mode = #tpu.pipeline_mode<synchronous>, transform_indices = @transform_3, window_bounds = array<i64: 2, 128>}, {pipeline_mode = #tpu.pipeline_mode<synchronous>, transform_indices = @transform_4, window_bounds = array<i64: 1, 128>}, {pipeline_mode = #tpu.pipeline_mode<synchronous>, transform_indices = @transform_5, window_bounds = array<i64: 1, 128>}, {pipeline_mode = #tpu.pipeline_mode<synchronous>, transform_indices = @transform_6, window_bounds = array<i64: 128, 128>}, {pipeline_mode = #tpu.pipeline_mode<synchronous>, transform_indices = @transform_7, window_bounds = array<i64: 1, 128>}, {pipeline_mode = #tpu.pipeline_mode<synchronous>, transform_indices = @transform_8, window_bounds = array<i64: 128, 128>}, {pipeline_mode = #tpu.pipeline_mode<synchronous>, transform_indices = @transform_9, window_bounds = array<i64: 1, 128>}, {pipeline_mode = #tpu.pipeline_mode<synchronous>, transform_indices = @transform_10, window_bounds = array<i64: 1, 128>}, {transform_indices = @transform_11, window_bounds = array<i64: 256, 128>}]} {
    %c0_i32 = arith.constant 0 : i32
    %0 = arith.cmpi eq, %arg1, %c0_i32 : i32
    %1 = arith.extui %0 : i1 to i32
    %c0_i32_0 = arith.constant 0 : i32
    %2 = arith.cmpi ne, %1, %c0_i32_0 : i32
    scf.if %2 {
      %cst_14 = arith.constant 0.000000e+00 : f32
      %18 = vector.broadcast %cst_14 : f32 to vector<256x128xf32>
      %c0_15 = arith.constant 0 : index
      %c0_16 = arith.constant 0 : index
      %19 = vector.load %arg14[%c0_15, %c0_16] : memref<256x128xf32, #tpu.memory_space<vmem>>, vector<256x128xf32>
      tpu.vector_store %arg14[%c0_15, %c0_16], %18 {strides = array<i32>} : memref<256x128xf32, #tpu.memory_space<vmem>>, vector<256x128xf32>,
      %cst_17 = arith.constant 0.000000e+00 : f32
      %20 = vector.broadcast %cst_17 : f32 to vector<256x1xf32>
      %c0_18 = arith.constant 0 : index
      %c0_19 = arith.constant 0 : index
      %21 = vector.load %arg15[%c0_18, %c0_19] : memref<256x1xf32, #tpu.memory_space<vmem>>, vector<256x1xf32>
      tpu.vector_store %arg15[%c0_18, %c0_19], %20 {strides = array<i32>} : memref<256x1xf32, #tpu.memory_space<vmem>>, vector<256x1xf32>,
    } else {
    }
    %c0 = arith.constant 0 : index
    %c0_1 = arith.constant 0 : index
    %3 = vector.load %arg4[%c0, %c0_1] : memref<128x128xf32, #tpu.memory_space<vmem>>, vector<128x128xf32>
    %c0_2 = arith.constant 0 : index
    %c0_3 = arith.constant 0 : index
    %4 = vector.load %arg2[%c0_2, %c0_3] : memref<256x128xf32, #tpu.memory_space<vmem>>, vector<256x128xf32>
    %c0_4 = arith.constant 0 : index
    %c0_5 = arith.constant 0 : index
    %5 = vector.load %arg15[%c0_4, %c0_5] : memref<256x1xf32, #tpu.memory_space<vmem>>, vector<256x1xf32>
    %cst = arith.constant dense<0.000000e+00> : vector<256xf32>
    %6 = vector.multi_reduction <add>, %4, %cst [1] : vector<256x128xf32> to vector<256xf32>
    %7 = vector.shape_cast %6 : vector<256xf32> to vector<256x1xf32>
    %8 = arith.addf %5, %7 : vector<256x1xf32>
    %c0_6 = arith.constant 0 : index
    %c0_7 = arith.constant 0 : index
    %9 = vector.load %arg15[%c0_6, %c0_7] : memref<256x1xf32, #tpu.memory_space<vmem>>, vector<256x1xf32>
    tpu.vector_store %arg15[%c0_6, %c0_7], %8 {strides = array<i32>} : memref<256x1xf32, #tpu.memory_space<vmem>>, vector<256x1xf32>,
    %10 = math.log1p %4 : vector<256x128xf32>
    %c0_8 = arith.constant 0 : index
    %c0_9 = arith.constant 0 : index
    %11 = vector.load %arg14[%c0_8, %c0_9] : memref<256x128xf32, #tpu.memory_space<vmem>>, vector<256x128xf32>
    %cst_10 = arith.constant dense<0.000000e+00> : vector<256x128xf32>
    %12 = tpu.matmul %10, %3, %cst_10 {dimension_numbers = #tpu.dot_dimension_numbers<[1], [0], [0], [1], [0, 0, 1, 1], [], []>} : vector<256x128xf32>, vector<128x128xf32>, vector<256x128xf32> -> vector<256x128xf32>
    %13 = arith.addf %11, %12 : vector<256x128xf32>
    %c0_11 = arith.constant 0 : index
    %c0_12 = arith.constant 0 : index
    %14 = vector.load %arg14[%c0_11, %c0_12] : memref<256x128xf32, #tpu.memory_space<vmem>>, vector<256x128xf32>
    tpu.vector_store %arg14[%c0_11, %c0_12], %13 {strides = array<i32>} : memref<256x128xf32, #tpu.memory_space<vmem>>, vector<256x128xf32>,
    %c2_i32 = arith.constant 2 : i32
    %15 = arith.cmpi eq, %arg1, %c2_i32 : i32
    %16 = arith.extui %15 : i1 to i32
    %c0_i32_13 = arith.constant 0 : i32
    %17 = arith.cmpi ne, %16, %c0_i32_13 : i32
    scf.if %17 {
      %c0_14 = arith.constant 0 : index
      %c0_15 = arith.constant 0 : index
      %18 = vector.load %arg5[%c0_14, %c0_15] : memref<2x128xf32, #tpu.memory_space<vmem>>, vector<2x128xf32>
      %c0_16 = arith.constant 0 : index
      %c0_17 = arith.constant 0 : index
      %19 = vector.load %arg15[%c0_16, %c0_17] : memref<256x1xf32, #tpu.memory_space<vmem>>, vector<256x1xf32>
      %20 = math.log1p %19 : vector<256x1xf32>
      %c0_18 = arith.constant 0 : index
      %c0_19 = arith.constant 0 : index
      %21 = vector.load %arg14[%c0_18, %c0_19] : memref<256x128xf32, #tpu.memory_space<vmem>>, vector<256x128xf32>
      %c0_20 = arith.constant 0 : index
      %c0_21 = arith.constant 0 : index
      %22 = vector.load %arg3[%c0_20, %c0_21] : memref<256x2xf32, #tpu.memory_space<vmem>>, vector<256x2xf32>
      %cst_22 = arith.constant dense<0.000000e+00> : vector<256x128xf32>
      %23 = tpu.matmul %22, %18, %cst_22 {dimension_numbers = #tpu.dot_dimension_numbers<[1], [0], [0], [1], [0, 0, 1, 1], [], []>} : vector<256x2xf32>, vector<2x128xf32>, vector<256x128xf32> -> vector<256x128xf32>
      %24 = arith.addf %21, %23 : vector<256x128xf32>
      %c0_23 = arith.constant 0 : index
      %c0_24 = arith.constant 0 : index
      %25 = vector.load %arg6[%c0_23, %c0_24] : memref<1x128xf32, #tpu.memory_space<vmem>>, vector<1x128xf32>
      %26 = vector.broadcast %20 : vector<256x1xf32> to vector<256x128xf32>
      %27 = vector.broadcast %25 : vector<1x128xf32> to vector<256x128xf32>
      %28 = arith.mulf %26, %27 : vector<256x128xf32>
      %29 = arith.addf %24, %28 : vector<256x128xf32>
      %c0_25 = arith.constant 0 : index
      %c0_26 = arith.constant 0 : index
      %30 = vector.load %arg7[%c0_25, %c0_26] : memref<1x128xf32, #tpu.memory_space<vmem>>, vector<1x128xf32>
      %31 = vector.broadcast %30 : vector<1x128xf32> to vector<256x128xf32>
      %32 = arith.addf %29, %31 : vector<256x128xf32>
      %cst_27 = arith.constant 0.000000e+00 : f32
      %33 = vector.broadcast %cst_27 : f32 to vector<256x128xf32>
      %34 = arith.maximumf %32, %33 : vector<256x128xf32>
      %c0_28 = arith.constant 0 : index
      %c0_29 = arith.constant 0 : index
      %35 = vector.load %arg8[%c0_28, %c0_29] : memref<128x128xf32, #tpu.memory_space<vmem>>, vector<128x128xf32>
      %c0_30 = arith.constant 0 : index
      %c0_31 = arith.constant 0 : index
      %36 = vector.load %arg9[%c0_30, %c0_31] : memref<1x128xf32, #tpu.memory_space<vmem>>, vector<1x128xf32>
      %cst_32 = arith.constant dense<0.000000e+00> : vector<256x128xf32>
      %37 = tpu.matmul %34, %35, %cst_32 {dimension_numbers = #tpu.dot_dimension_numbers<[1], [0], [0], [1], [0, 0, 1, 1], [], []>} : vector<256x128xf32>, vector<128x128xf32>, vector<256x128xf32> -> vector<256x128xf32>
      %38 = vector.broadcast %36 : vector<1x128xf32> to vector<256x128xf32>
      %39 = arith.addf %37, %38 : vector<256x128xf32>
      %cst_33 = arith.constant 0.000000e+00 : f32
      %40 = vector.broadcast %cst_33 : f32 to vector<256x128xf32>
      %41 = arith.maximumf %39, %40 : vector<256x128xf32>
      %c0_34 = arith.constant 0 : index
      %c0_35 = arith.constant 0 : index
      %42 = vector.load %arg10[%c0_34, %c0_35] : memref<128x128xf32, #tpu.memory_space<vmem>>, vector<128x128xf32>
      %c0_36 = arith.constant 0 : index
      %c0_37 = arith.constant 0 : index
      %43 = vector.load %arg11[%c0_36, %c0_37] : memref<1x128xf32, #tpu.memory_space<vmem>>, vector<1x128xf32>
      %cst_38 = arith.constant dense<0.000000e+00> : vector<256x128xf32>
      %44 = tpu.matmul %41, %42, %cst_38 {dimension_numbers = #tpu.dot_dimension_numbers<[1], [0], [0], [1], [0, 0, 1, 1], [], []>} : vector<256x128xf32>, vector<128x128xf32>, vector<256x128xf32> -> vector<256x128xf32>
      %45 = vector.broadcast %43 : vector<1x128xf32> to vector<256x128xf32>
      %46 = arith.addf %44, %45 : vector<256x128xf32>
      %c0_39 = arith.constant 0 : index
      %c0_40 = arith.constant 0 : index
      %47 = vector.load %arg12[%c0_39, %c0_40] : memref<1x128xf32, #tpu.memory_space<vmem>>, vector<1x128xf32>
      %cst_41 = arith.constant 5.000000e-01 : f32
      %48 = vector.broadcast %cst_41 : f32 to vector<1x128xf32>
      %49 = arith.cmpf ogt, %47, %48 : vector<1x128xf32>
      %cst_42 = arith.constant 2.000000e+01 : f32
      %50 = vector.broadcast %cst_42 : f32 to vector<256x128xf32>
      %51 = arith.cmpf ogt, %46, %50 : vector<256x128xf32>
      %cst_43 = arith.constant 2.000000e+01 : f32
      %52 = vector.broadcast %cst_43 : f32 to vector<256x128xf32>
      %53 = arith.minimumf %46, %52 : vector<256x128xf32>
      %54 = math.exp %53 : vector<256x128xf32>
      %55 = math.log1p %54 : vector<256x128xf32>
      %56 = arith.select %51, %46, %55 : vector<256x128xi1>, vector<256x128xf32>
      %57 = vector.shape_cast %49 : vector<1x128xi1> to vector<1x128xi1>
      %58 = vector.broadcast %57 : vector<1x128xi1> to vector<256x128xi1>
      %59 = arith.select %58, %56, %46 : vector<256x128xi1>, vector<256x128xf32>
      %c0_44 = arith.constant 0 : index
      %c0_45 = arith.constant 0 : index
      %60 = vector.load %arg13[%c0_44, %c0_45] : memref<256x128xf32, #tpu.memory_space<vmem>>, vector<256x128xf32>
      tpu.vector_store %arg13[%c0_44, %c0_45], %59 {strides = array<i32>} : memref<256x128xf32, #tpu.memory_space<vmem>>, vector<256x128xf32>,
    } else {
    }
    return
  }
  func.func @transform_0(%arg0: i32, %arg1: i32) -> (i32, i32) {
    %c0_i32 = arith.constant 0 : i32
    return %arg0, %arg1 : i32, i32
  }
  func.func @transform_1(%arg0: i32, %arg1: i32) -> (i32, i32) {
    %c0_i32 = arith.constant 0 : i32
    %c0_i32_0 = arith.constant 0 : i32
    return %arg0, %c0_i32 : i32, i32
  }
  func.func @transform_2(%arg0: i32, %arg1: i32) -> (i32, i32) {
    %c0_i32 = arith.constant 0 : i32
    %c0_i32_0 = arith.constant 0 : i32
    return %arg1, %c0_i32 : i32, i32
  }
  func.func @transform_3(%arg0: i32, %arg1: i32) -> (i32, i32) {
    %c0_i32 = arith.constant 0 : i32
    %c0_i32_0 = arith.constant 0 : i32
    %c0_i32_1 = arith.constant 0 : i32
    return %c0_i32, %c0_i32_0 : i32, i32
  }
  func.func @transform_4(%arg0: i32, %arg1: i32) -> (i32, i32) {
    %c0_i32 = arith.constant 0 : i32
    %c0_i32_0 = arith.constant 0 : i32
    %c0_i32_1 = arith.constant 0 : i32
    return %c0_i32, %c0_i32_0 : i32, i32
  }
  func.func @transform_5(%arg0: i32, %arg1: i32) -> (i32, i32) {
    %c0_i32 = arith.constant 0 : i32
    %c0_i32_0 = arith.constant 0 : i32
    %c0_i32_1 = arith.constant 0 : i32
    return %c0_i32, %c0_i32_0 : i32, i32
  }
  func.func @transform_6(%arg0: i32, %arg1: i32) -> (i32, i32) {
    %c0_i32 = arith.constant 0 : i32
    %c0_i32_0 = arith.constant 0 : i32
    %c0_i32_1 = arith.constant 0 : i32
    return %c0_i32, %c0_i32_0 : i32, i32
  }
  func.func @transform_7(%arg0: i32, %arg1: i32) -> (i32, i32) {
    %c0_i32 = arith.constant 0 : i32
    %c0_i32_0 = arith.constant 0 : i32
    %c0_i32_1 = arith.constant 0 : i32
    return %c0_i32, %c0_i32_0 : i32, i32
  }
  func.func @transform_8(%arg0: i32, %arg1: i32) -> (i32, i32) {
    %c0_i32 = arith.constant 0 : i32
    %c0_i32_0 = arith.constant 0 : i32
    %c0_i32_1 = arith.constant 0 : i32
    return %c0_i32, %c0_i32_0 : i32, i32
  }
  func.func @transform_9(%arg0: i32, %arg1: i32) -> (i32, i32) {
    %c0_i32 = arith.constant 0 : i32
    %c0_i32_0 = arith.constant 0 : i32
    %c0_i32_1 = arith.constant 0 : i32
    return %c0_i32, %c0_i32_0 : i32, i32
  }
  func.func @transform_10(%arg0: i32, %arg1: i32) -> (i32, i32) {
    %c0_i32 = arith.constant 0 : i32
    %c0_i32_0 = arith.constant 0 : i32
    %c0_i32_1 = arith.constant 0 : i32
    return %c0_i32, %c0_i32_0 : i32, i32
  }
  func.func @transform_11(%arg0: i32, %arg1: i32) -> (i32, i32) {
    %c0_i32 = arith.constant 0 : i32
    %c0_i32_0 = arith.constant 0 : i32
    return %arg0, %c0_i32 : i32, i32
  }
}

</mosaic_0001>

<bundles_post_ra>
// kernel: tpu_custom_call.1
= control target key start
LH: loop header
LB: loop body
LE: loop exit
PB: predicated region body
PF: predicated region fallthrough
CT: control target
= control target key end

     0   :  { %s7003_s0 = inlined_call_operand.hbm [shape: f32[512,384], index: 0, kind: input, shape index: {}]   ;;  %s7004_s1 = inlined_call_operand.vmem [shape: f32[512,2], index: 1, kind: input, shape index: {}]   ;;  %s7005_s2 = inlined_call_operand.vmem [shape: f32[384,128], index: 2, kind: input, shape index: {}]   ;;  %s7006_s3 = inlined_call_operand.vmem [shape: f32[2,128], index: 3, kind: input, shape index: {}]   ;;  %s7007_s4 = inlined_call_operand.vmem [shape: f32[1,128], index: 4, kind: input, shape index: {}]   ;;  %s7008_s5 = inlined_call_operand.vmem [shape: f32[1,128], index: 5, kind: input, shape index: {}]   ;;  %s7009_s6 = inlined_call_operand.vmem [shape: f32[128,128], index: 6, kind: input, shape index: {}]   ;;  %s7010_s7 = inlined_call_operand.vmem [shape: f32[1,128], index: 7, kind: input, shape index: {}]   ;;  %s7011_s8 = inlined_call_operand.hbm [shape: f32[128,128], index: 8, kind: input, shape index: {}]   ;;  %s7012_s9 = inlined_call_operand.vmem [shape: f32[1,128], index: 9, kind: input, shape index: {}]   ;;  %s7013_s10 = inlined_call_operand.vmem [shape: f32[1,128], index: 10, kind: input, shape index: {}]   ;;  %s7014_s11 = inlined_call_operand.hbm [shape: f32[512,128], index: 11, kind: output, shape index: {}]  }
   0x1   :  { %7030 = sst [smem:[#allocation19_spill]] %s7006_s3 }
   0x2   :  { %7031 = sst [smem:[#allocation20_spill]] %s7007_s4 }
   0x3   :  { %7032 = sst [smem:[#allocation21_spill]] %s7008_s5 }
   0x4   :  { %7033 = sst [smem:[#allocation22_spill]] %s7009_s6 }
   0x5   :  { %7034 = sst [smem:[#allocation23_spill]] %s7010_s7 }
   0x6   :  { %7035 = sst [smem:[#allocation24_spill]] %s7011_s8 }
   0x7   :  { %7036 = sst [smem:[#allocation25_spill]] %s7012_s9 }
   0x8   :  { %7037 = sst [smem:[#allocation26_spill]] %s7013_s10 }
   0x9   :  { %7038 = sst [smem:[#allocation27_spill]] %s7014_s11 }
   0xa   :  { %16 = vsyncpa [#allocation5], 0 }
   0xb   :  { %18 = vsyncpa [#allocation5 + $0x1], 0 }
   0xc   :  { %19 = vsyncpa [#allocation8], 0 }
   0xd   :  { %20 = vsyncpa [#allocation6], 0 }
   0xe   :  { %22 = vsyncpa [#allocation6 + $0x1], 0  ;;  %s4792_s17 = smov 0   ;;  %s4794_s18 = smov 0  }
   0xf   :  { %s4796_s19 = smov 0   ;;  %s4798_s20 = smov 0  }
  0x10   :  { %s4800_s21 = smov 0   ;;  %s4802_s22 = smov 0  }
  0x11   :  { %s4804_s23 = smov 0   ;;  %s4806_s24 = smov 0  }
  0x12   :  { %s4808_s25 = smov 0   ;;  %s4810_s26 = smov 0  }
  0x13   :  { %s4812_s27 = smov 0  }
  0x14 LB: > { %7039 = sst [smem:[#allocation13_spill]] %s4680_s17  ;;  %s3600_s28 = sadd.s32 4294967295, %s4720_s27   ;;  %s4720_s27 = sphi %s4812_s27, %s28_s27   ;;  %s4716_s26 = sphi %s4810_s26, %s7246_s26   ;;  %s4712_s25 = sphi %s4808_s25, %s7238_s25   ;;  %s4708_s24 = sphi %s4806_s24, %s7245_s24   ;;  %s4704_s23 = sphi %s4804_s23, %s7237_s23   ;;  %s4700_s22 = sphi %s4802_s22, %s7244_s22   ;;  %s4696_s21 = sphi %s4800_s21, %s7243_s21   ;;  %s4692_s20 = sphi %s4798_s20, %s7242_s20   ;;  %s4688_s19 = sphi %s4796_s19, %s7241_s19   ;;  %s4684_s18 = sphi %s4794_s18, %s7240_s18   ;;  %s4680_s17 = sphi %s4792_s17, %s7239_s17  }
  0x15   : > { %7040 = sst [smem:[#allocation14_spill]] %s4712_s25  ;;  %s3601_s29 = sadd.s32 4294967294, %s4720_s27  }
  0x16   : > { %7041 = sst [smem:[#allocation15_spill]] %s4720_s27  ;;  %p56_p0 = scmp.ne.s32.totalorder %s4700_s22, %s4696_s21 }
  0x17   : > { %p57_p1 = scmp.eq.s32.totalorder %s4720_s27, 0  ;;  %p62_p2 = scmp.ne.s32.totalorder %s4696_s21, %s4692_s20 }
  0x18   : > { %p4852_p3 = scmp.eq.s32.totalorder %s3600_s28, 0  ;;  %p305_p5 = scmp.ne.s32.totalorder %s4688_s19, %s4684_s18 }
  0x19   : > { %p4857_p4 = por %p57_p1, %p56_p0  ;;  %p306_p7 = scmp.eq.s32.totalorder %s3600_s28, 5 }
  0x1a   : > { %p4865_p6 = por %p4852_p3, %p62_p2  ;;  %p311_p8 = scmp.ne.s32.totalorder %s4684_s18, %s4680_s17 }
  0x1b   : > { %p312_p9 = scmp.eq.s32.totalorder %s3601_s29, 5  ;;  %p4871_p10 = por %p306_p7, %p305_p5 }
  0x1c   : > { %s7044_s15 = scalar_select %p4865_p6, 1, 0 }
  0x1d   : > { %s7045_s16 = scalar_select %p4871_p10, 1, 0 }
  0x1e   : > { %p3602_p11 = scmp.ge.s32.totalorder %s4720_s27, 1  ;;  %p4876_p12 = por %p312_p9, %p311_p8 }
  0x1f   : > { %7046 = sst [smem:[#allocation16_spill]] %s7045_s16  ;;  %p319_p13 = scmp.lt.s32.totalorder %s4720_s27, 7 }
  0x20   : > { %s7047_s20 = scalar_select %p4876_p12, 1, 0 }
  0x21   : > { %p4881_p0 = pnand %p3602_p11, %p319_p13  ;;  %s4722_s13 = smov [#allocation7]  }
  0x22   : > { %7048 = sst [smem:[#allocation17_spill]] %s7047_s20  ;;  %s346_s11 = sshll.u32 %s4722_s13, 4  ;;  %s347_s11 = int_to_ptr.vmem [resolvable:$true] %s346_s11 }
  0x23   : > { %s7049_s30 = scalar_select %p4881_p0, 1, 0 }
  0x24   : > { %p4172_p1 = pneg %p4881_p0  ;;  %p4185_p2 = scmp.lt.s32.totalorder %s4720_s27, 6 }
  0x25   : > { %s4553_s20 = scalar_lea.vmem %s347_s11, 2048  ;;  %p4561_p12 = scmp.lt.s32.totalorder %s347_s11, %s347_s11 }
  0x26   : > { %p4890_p5 = pnand %p4172_p1, %p4852_p3  ;;  %p4896_p7 = pnand %p4185_p2, %p4857_p4 }
  0x27   : > { %p4554_p9 = scmp.ne.s32.totalorder %s347_s11, %s4553_s20  ;;  %p4562_p10 = scmp.lt.s32.totalorder %s4553_s20, %s4553_s20 }
  0x28   : > { %p4544_p8 = pneg %p4890_p5 }
  0x29   : > { %p4563_p6 = por %p4562_p10, %p4561_p12 }
  0x2a   : > { %p4556_p11 = pnand %p4554_p9, %p4544_p8 }
  0x2c   : > { %p4557_p13 = pneg %p4556_p11 }
  0x2e   : > { %p4564_p0 = pnand %p4563_p6, %p4557_p13 }
  0x30   : > { %4567 = shalt.err (!%p4564_p0)
}
  0x31   : > { %s7025_s13 = smov 128   ;;  %s7026_s14 = smov 8  }
  0x32   : > { %s7052_s8 = sld [smem:[#allocation24_spill]]  ;;  %s37_s20 = sadd.s32 1, %s4712_s25 }
  0x33   : > { %s40_s16 = sadd.s32 1, %s4716_s26  ;;  %p38_p4 = scmp.ge.s32.totalorder %s37_s20, 3 }
  0x34   : > { %s366_s10 = sand.u32 1, %s4700_s22   ;;  %s4163_s7 = smul.u32 96, %s4716_s26 }
  0x35   : > { %s3605_s9 = sshll.u32 %s366_s10, 8  ;;  %s7248_s20 = smov (%p38_p4, %s37_s20), 0 }
  0x36   : > { %7053 = sst [smem:[#allocation18_spill]] %s7248_s20  ;;  %s7250_s16 = smov (!%p38_p4, %s40_s16), %s4716_s26 }
  0x37   : > { %s45_s28 = ssub.s32 %s4712_s25, %s7248_s20  ;;  %p42_p6 = scmp.ge.s32.totalorder %s7250_s16, 2 }
  0x38   : > { %4175 = dma.hbm_to_vmem [thread:$0]  (!%p4890_p5), %s7052_s8, 2048, %s347_s11, [#allocation8], %s7025_s13, %s7025_s13, %s7026_s14  }
  0x39   : > { %s370_s17 = scalar_lea.vmem [#allocation4], %s3605_s9  ;;  %s7252_s16 = smov (%p42_p6, %s7250_s16), 0 }
  0x3a   : > { %s379_s11 = sshll.u32 %s370_s17, 4  ;;  %s376_s27 = sadd.s32 %s4712_s25, %s4163_s7  ;;  %s4922_s11 = int_to_ptr.vmem [resolvable:$true] %s379_s11 }
  0x3b   : > { %s44_s13 = ssub.s32 %s4716_s26, %s7252_s16  ;;  %s3608_s14 = sshll.u32 %s376_s27, 7 }
  0x3c   : > { %s46_s8 = sor.u32 %s45_s28, %s44_s13  ;;  %p293_p10 = scmp.eq.s32.totalorder %s44_s13, 0 }
  0x3d   : > { %p47_p12 = scmp.eq.s32.totalorder %s46_s8, 0  ;;  %s378_s4 = scalar_lea.hbm %s7003_s0, %s3608_s14 }
  0x3e   : > { %s7054_s9 = sadd.s32 1, %s4688_s19  ;;  %s7055_s6 = sadd.s32 1, %s4700_s22 }
  0x3f   : > { %s4932_s17 = scalar_select %p293_p10, %s4688_s19, %s7054_s9  }
  0x40   : > { %s4937_s3 = scalar_select %p47_p12, %s4700_s22, %s7055_s6  }
  0x41   : > { %s367_s7 = scalar_lea.sflag [#allocation5], %s366_s10  ;;  %p4570_p0 = pneg %p4896_p7 }
  0x42   : > { %s4581_s25 = scalar_lea.vmem %s4922_s11, 4096  ;;  %s4725_s28 = smov [#allocation4]  }
  0x43   : > { %p4582_p1 = scmp.ne.s32.totalorder %s4922_s11, %s4581_s25  ;;  %s4586_s13 = sshll.u32 %s4725_s28, 4  ;;  %s4587_s13 = int_to_ptr.vmem [resolvable:$false] %s4586_s13 }
  0x44   : > { %s4588_s8 = scalar_lea.vmem %s4587_s13, 8192  ;;  %p4589_p8 = scmp.lt.s32.totalorder %s4922_s11, %s4587_s13 }
  0x45   : > { %p4584_p2 = pnand %p4582_p1, %p4570_p0  ;;  %p4590_p9 = scmp.lt.s32.totalorder %s4588_s8, %s4581_s25 }
  0x47   : > { %p4585_p5 = pneg %p4584_p2  ;;  %p4591_p11 = por %p4590_p9, %p4589_p8 }
  0x49   : > { %p4592_p13 = pnand %p4591_p11, %p4585_p5 }
  0x4b   : > { %4595 = shalt.err (!%p4592_p13)
}
  0x4c   : > { %s4726_s5 = smov 384   ;;  %s7056_s6 = smov 8  }
  0x4d   : > { %s7057_s10 = smov 128   ;;  %p7058_p4 = scmp.ne.s32.totalorder %s7049_s30, 0 }
  0x4e   : > { %4179 = dma.hbm_to_vmem [thread:$0]  (!%p4896_p7), %s378_s4, 4096, %s4922_s11, %s367_s7, %s4726_s5, %s7057_s10, %s7056_s6  }
  0x4f   : > { %409 = sbr.rel (%p7058_p4) target bundleno = 1192 (0x4a8), region = 64  ;;  %s411_s14 = sand.u32 (!%p7058_p4), 1, %s4696_s21  }
  0x50   : > { %s3610_s20 = sshll.u32 (!%p7058_p4), %s411_s14, 8  ;;  %s412_s27 = scalar_lea.sflag (!%p7058_p4), [#allocation5], %s411_s14 }
  0x51   : > { %s4952_s9 = scalar_lea.vmem (!%p7058_p4), [#allocation4], %s3610_s20  ;;  %p7059_p6 = scmp.ne.s32.totalorder (!%p7058_p4), %s7044_s15, 0 }
  0x54   : > { %4667 = dma.done.wait (%p7059_p6), %s412_s27, 4096  }
  0x55   : > { %4669 = vsyncadd (%p7059_p6), %s412_s27, 4294963200 }
  0x56   : > { %4671 = dma.done.wait (%p4852_p3), [#allocation8], 2048  }
  0x57   : > { %4673 = vsyncadd (%p4852_p3), [#allocation8], 4294965248  ;;  %s465_s4 = sand.u32 1, %s4684_s18   ;;  %s3613_s25 = sshll.u32 %s4708_s24, 5 }
  0x58   : > { %s3612_s30 = sshll.u32 %s465_s4, 8  ;;  %p470_p7 = scmp.lt.s32.totalorder %s3613_s25, 63 }
  0x59   : > { %s3615_s29 = sshll.u32 %s4704_s23, 4  ;;  %s4977_s6 = scalar_lea.vmem [#allocation9], %s3612_s30 }
  0x5a   : > { %s7254_s25 = smov (!%p470_p7, %s3613_s25), 63  ;;  %p476_p10 = scmp.lt.s32.totalorder %s3615_s29, 47 }
  0x5b   : > { %s3614_s15 = sshll.u32 %s7254_s25, 3  ;;  %p3617_p3 = scmp.ne.s32.totalorder %s4704_s23, 0 }
  0x5c   : > { %s4970_s28 = scalar_lea.vmem %s7004_s1, %s3614_s15  ;;  %s7256_s29 = smov (!%p476_p10, %s3615_s29), 47 }
  0x5d   : > { %s3616_s12 = sshll.u32 %s7256_s29, 3  ;;  %485 = sbr.rel (%p3617_p3) target bundleno = 131 (0x83), region = 76 }
  0x5e   : > { %s4975_s5 = scalar_lea.vmem %s7005_s2, %s3616_s12 }
  0x62   : > { %vm518_vm0 = vcmask 7168   ;;  %v4727_v0 = vmov 0.0  }
  0x63   : > { %486 = vst [vmem:[#allocation2 + $0xb0] sm:$0xff] %v4727_v0  ;;  %487 = vst [vmem:[#allocation2] sm:$0xff] %v4727_v0 }
  0x64   : > { %488 = vst [vmem:[#allocation2 + $0xd8] sm:$0xff] %v4727_v0  ;;  %489 = vst [vmem:[#allocation2 + $0x18] sm:$0xff] %v4727_v0 }
  0x65   : > { %490 = vst [vmem:[#allocation2 + $0x50] sm:$0xff] %v4727_v0  ;;  %491 = vst [vmem:[#allocation2 + $0x68] sm:$0xff] %v4727_v0 }
  0x66   : > { %492 = vst [vmem:[#allocation2 + $0x30] sm:$0xff] %v4727_v0  ;;  %493 = vst [vmem:[#allocation2 + $0x48] sm:$0xff] %v4727_v0 }
  0x67   : > { %494 = vst [vmem:[#allocation2 + $0x80] sm:$0xff] %v4727_v0  ;;  %495 = vst [vmem:[#allocation2 + $0x88] sm:$0xff] %v4727_v0 }
  0x68   : > { %496 = vst [vmem:[#allocation2 + $0xe8] sm:$0xff] %v4727_v0  ;;  %497 = vst [vmem:[#allocation2 + $0xb8] sm:$0xff] %v4727_v0 }
  0x69   : > { %498 = vst [vmem:[#allocation2 + $0x60] sm:$0xff] %v4727_v0  ;;  %499 = vst [vmem:[#allocation2 + $0xf0] sm:$0xff] %v4727_v0 }
  0x6a   : > { %500 = vst [vmem:[#allocation2 + $0x8] sm:$0xff] %v4727_v0  ;;  %501 = vst [vmem:[#allocation2 + $0x78] sm:$0xff] %v4727_v0 }
  0x6b   : > { %502 = vst [vmem:[#allocation2 + $0x38] sm:$0xff] %v4727_v0  ;;  %503 = vst [vmem:[#allocation2 + $0x58] sm:$0xff] %v4727_v0 }
  0x6c   : > { %504 = vst [vmem:[#allocation2 + $0x40] sm:$0xff] %v4727_v0  ;;  %505 = vst [vmem:[#allocation2 + $0xc8] sm:$0xff] %v4727_v0 }
  0x6d   : > { %506 = vst [vmem:[#allocation2 + $0xe0] sm:$0xff] %v4727_v0  ;;  %507 = vst [vmem:[#allocation2 + $0x90] sm:$0xff] %v4727_v0 }
  0x6e   : > { %508 = vst [vmem:[#allocation2 + $0x70] sm:$0xff] %v4727_v0  ;;  %509 = vst [vmem:[#allocation2 + $0xc0] sm:$0xff] %v4727_v0 }
  0x6f   : > { %510 = vst [vmem:[#allocation2 + $0xa8] sm:$0xff] %v4727_v0  ;;  %511 = vst [vmem:[#allocation2 + $0xd0] sm:$0xff] %v4727_v0 }
  0x70   : > { %512 = vst [vmem:[#allocation2 + $0x10] sm:$0xff] %v4727_v0  ;;  %513 = vst [vmem:[#allocation2 + $0x28] sm:$0xff] %v4727_v0 }
  0x71   : > { %514 = vst [vmem:[#allocation2 + $0xa0] sm:$0xff] %v4727_v0  ;;  %515 = vst [vmem:[#allocation2 + $0xf8] sm:$0xff] %v4727_v0 }
  0x72   : > { %516 = vst [vmem:[#allocation2 + $0x20] sm:$0xff] %v4727_v0  ;;  %517 = vst [vmem:[#allocation2 + $0x98] sm:$0xff] %v4727_v0 }
  0x73   : > { %519 = vst.msk [vmem:[#allocation3] sm:$0xff] %vm518_vm0, %v4727_v0  ;;  %520 = vst.msk [vmem:[#allocation3 + $0x8] sm:$0xff] %vm518_vm0, %v4727_v0 }
  0x74   : > { %521 = vst.msk [vmem:[#allocation3 + $0x10] sm:$0xff] %vm518_vm0, %v4727_v0  ;;  %522 = vst.msk [vmem:[#allocation3 + $0x18] sm:$0xff] %vm518_vm0, %v4727_v0 }
  0x75   : > { %523 = vst.msk [vmem:[#allocation3 + $0x20] sm:$0xff] %vm518_vm0, %v4727_v0  ;;  %524 = vst.msk [vmem:[#allocation3 + $0x28] sm:$0xff] %vm518_vm0, %v4727_v0 }
  0x76   : > { %525 = vst.msk [vmem:[#allocation3 + $0x30] sm:$0xff] %vm518_vm0, %v4727_v0  ;;  %526 = vst.msk [vmem:[#allocation3 + $0x38] sm:$0xff] %vm518_vm0, %v4727_v0 }
  0x77   : > { %527 = vst.msk [vmem:[#allocation3 + $0x40] sm:$0xff] %vm518_vm0, %v4727_v0  ;;  %528 = vst.msk [vmem:[#allocation3 + $0x48] sm:$0xff] %vm518_vm0, %v4727_v0 }
  0x78   : > { %529 = vst.msk [vmem:[#allocation3 + $0x50] sm:$0xff] %vm518_vm0, %v4727_v0  ;;  %530 = vst.msk [vmem:[#allocation3 + $0x58] sm:$0xff] %vm518_vm0, %v4727_v0 }
  0x79   : > { %531 = vst.msk [vmem:[#allocation3 + $0x60] sm:$0xff] %vm518_vm0, %v4727_v0  ;;  %532 = vst.msk [vmem:[#allocation3 + $0x68] sm:$0xff] %vm518_vm0, %v4727_v0 }
  0x7a   : > { %533 = vst.msk [vmem:[#allocation3 + $0x70] sm:$0xff] %vm518_vm0, %v4727_v0  ;;  %534 = vst.msk [vmem:[#allocation3 + $0x78] sm:$0xff] %vm518_vm0, %v4727_v0 }
  0x7b   : > { %535 = vst.msk [vmem:[#allocation3 + $0x80] sm:$0xff] %vm518_vm0, %v4727_v0  ;;  %536 = vst.msk [vmem:[#allocation3 + $0x88] sm:$0xff] %vm518_vm0, %v4727_v0 }
  0x7c   : > { %537 = vst.msk [vmem:[#allocation3 + $0x90] sm:$0xff] %vm518_vm0, %v4727_v0  ;;  %538 = vst.msk [vmem:[#allocation3 + $0x98] sm:$0xff] %vm518_vm0, %v4727_v0 }
  0x7d   : > { %539 = vst.msk [vmem:[#allocation3 + $0xa0] sm:$0xff] %vm518_vm0, %v4727_v0  ;;  %540 = vst.msk [vmem:[#allocation3 + $0xa8] sm:$0xff] %vm518_vm0, %v4727_v0 }
  0x7e   : > { %541 = vst.msk [vmem:[#allocation3 + $0xb0] sm:$0xff] %vm518_vm0, %v4727_v0  ;;  %542 = vst.msk [vmem:[#allocation3 + $0xb8] sm:$0xff] %vm518_vm0, %v4727_v0 }
  0x7f   : > { %543 = vst.msk [vmem:[#allocation3 + $0xc0] sm:$0xff] %vm518_vm0, %v4727_v0  ;;  %544 = vst.msk [vmem:[#allocation3 + $0xc8] sm:$0xff] %vm518_vm0, %v4727_v0 }
  0x80   : > { %545 = vst.msk [vmem:[#allocation3 + $0xd0] sm:$0xff] %vm518_vm0, %v4727_v0  ;;  %546 = vst.msk [vmem:[#allocation3 + $0xd8] sm:$0xff] %vm518_vm0, %v4727_v0 }
  0x81   : > { %547 = vst.msk [vmem:[#allocation3 + $0xe0] sm:$0xff] %vm518_vm0, %v4727_v0  ;;  %548 = vst.msk [vmem:[#allocation3 + $0xe8] sm:$0xff] %vm518_vm0, %v4727_v0 }
  0x82   : > { %549 = vst.msk [vmem:[#allocation3 + $0xf0] sm:$0xff] %vm518_vm0, %v4727_v0  ;;  %550 = vst.msk [vmem:[#allocation3 + $0xf8] sm:$0xff] %vm518_vm0, %v4727_v0 }
  0x83 PF: > { %v566_v1 = vld [vmem:[%s4975_s5 + $0x78] sm:$0xff]  ;;  %v565_v2 = vld [vmem:[%s4975_s5 + $0x70] sm:$0xff]  ;;  %v564_v3 = vld [vmem:[%s4975_s5 + $0x68] sm:$0xff]  ;;  %p3618_p12 = scmp.ne.s32.totalorder %s4704_s23, 2 }
  0x84   : > { %3839 = vmatprep.subr.mxu0 %v566_v1  ;;  %4129 = vmatprep.subr.mxu1 %v566_v1  ;;  %v563_v4 = vld [vmem:[%s4975_s5 + $0x60] sm:$0xff]  ;;  %v562_v7 = vld [vmem:[%s4975_s5 + $0x58] sm:$0xff]  ;;  %v5090_v10 = vld [vmem:[%s4952_s9 + $0x8] sm:$0xff]  ;;  %s7116_s20 = sld [smem:[#allocation19_spill]] (!%p3618_p12) }
  0x85   : > { %3840 = vmatpush3.msra.mxu0 %v566_v1  ;;  %4145 = vmatpush3.msra.mxu1 %v566_v1  ;;  %v5081_v5 = vld [vmem:[%s4952_s9] sm:$0xff]  ;;  %v769_v11 = vadd.f32 1.0, %v5090_v10  ;;  %v5094_v12 = vld [vmem:[%s4952_s9 + $0x88] sm:$0xff]  ;;  %v561_v13 = vld [vmem:[%s4975_s5 + $0x50] sm:$0xff]  ;;  %v772_v20 = vmul.f32 -0.5, %v5090_v10  ;;  %s7176_s25 = sld [smem:[#allocation20_spill]] (!%p3618_p12) }
  0x86   : > { %3841 = vmatprep.subr.mxu0 %v565_v2  ;;  %4130 = vmatprep.subr.mxu1 %v565_v2  ;;  %v5084_v6 = vld [vmem:[%s4952_s9 + $0x80] sm:$0xff]  ;;  %v760_v8 = vadd.f32 1.0, %v5081_v5  ;;  %v763_v14 = vmul.f32 -0.5, %v5081_v5  ;;  %v5100_v16 = vld [vmem:[%s4952_s9 + $0x10] sm:$0xff]  ;;  %v560_v17 = vld [vmem:[%s4975_s5 + $0x48] sm:$0xff]  ;;  %v913_v18 = vadd.f32 1.0, %v5094_v12 }
  0x87   : > { %3842 = vmatpush3.msra.mxu0 %v565_v2  ;;  %4146 = vmatpush3.msra.mxu1 %v565_v2  ;;  %v904_v9 = vadd.f32 1.0, %v5084_v6  ;;  %v907_v15 = vmul.f32 -0.5, %v5084_v6  ;;  %v5105_v19 = vld [vmem:[%s4952_s9 + $0x90] sm:$0xff]  ;;  %v559_v21 = vld [vmem:[%s4975_s5 + $0x40] sm:$0xff]  ;;  %v778_v24 = vadd.f32 1.0, %v5100_v16  ;;  %v5111_v25 = vld [vmem:[%s4952_s9 + $0x18] sm:$0xff] }
  0x88   : > { %3843 = vmatprep.subr.mxu0 %v564_v3  ;;  %4131 = vmatprep.subr.mxu1 %v564_v3  ;;  %4284 = vlog2.f32 %v760_v8  ;;  %v764_v22 = vadd.f32 1.0, %v763_v14  ;;  %v922_v26 = vadd.f32 1.0, %v5105_v19  ;;  %v558_v27 = vld [vmem:[%s4975_s5 + $0x38] sm:$0xff]  ;;  %v766_v28 = vand.u32 2147483647, %v5081_v5  ;;  %v5125_v35 = vld [vmem:[%s4952_s9 + $0x20] sm:$0xff] }
  0x89   : > { %3844 = vmatpush3.msra.mxu0 %v564_v3  ;;  %4147 = vmatpush3.msra.mxu1 %v564_v3  ;;  %4286 = vlog2.f32 %v904_v9  ;;  %v908_v23 = vadd.f32 1.0, %v907_v15  ;;  %v916_v29 = vmul.f32 -0.5, %v5094_v12  ;;  %v781_v30 = vmul.f32 -0.5, %v5100_v16  ;;  %v5119_v31 = vld [vmem:[%s4952_s9 + $0x98] sm:$0xff]  ;;  %v557_v36 = vld [vmem:[%s4975_s5 + $0x30] sm:$0xff]  ;;  %v5139_v44 = vld [vmem:[%s4952_s9 + $0xa0] sm:$0xff] }
  0x8a   : > { %3845 = vmatprep.subr.mxu0 %v563_v4  ;;  %4132 = vmatprep.subr.mxu1 %v563_v4  ;;  %4288 = vlog2.f32 %v769_v11  ;;  %v910_v32 = vand.u32 2147483647, %v5084_v6  ;;  %v925_v33 = vmul.f32 -0.5, %v5105_v19  ;;  %v787_v34 = vadd.f32 1.0, %v5111_v25  ;;  %v556_v45 = vld [vmem:[%s4975_s5 + $0x28] sm:$0xff]  ;;  %v555_v56 = vld [vmem:[%s4975_s5 + $0x20] sm:$0xff] }
  0x8b   : > { %3846 = vmatpush3.msra.mxu0 %v563_v4  ;;  %4148 = vmatpush3.msra.mxu1 %v563_v4  ;;  %4290 = vlog2.f32 %v913_v18  ;;  %v5129_v37 = vmul.f32 %v764_v22, %v5081_v5  ;;  %v5132_v38 = vmul.f32 %v908_v23, %v5084_v6  ;;  %v773_v39 = vadd.f32 1.0, %v772_v20  ;;  %v5155_v55 = vld [vmem:[%s4952_s9 + $0x28] sm:$0xff]  ;;  %v554_v2 = vld [vmem:[%s4975_s5 + $0x18] sm:$0xff]  ;;  %v553_v18 = vld [vmem:[%s4975_s5 + $0x10] sm:$0xff]  ;;  %s7177_s15 = sld [smem:[#allocation21_spill]] (!%p3618_p12) }
  0x8c   : > { %3847 = vmatprep.subr.mxu0 %v562_v7  ;;  %4133 = vmatprep.subr.mxu1 %v562_v7  ;;  %4292 = vlog2.f32 %v778_v24  ;;  %v775_v40 = vand.u32 2147483647, %v5090_v10  ;;  %v919_v41 = vand.u32 2147483647, %v5094_v12  ;;  %v790_v42 = vmul.f32 -0.5, %v5111_v25  ;;  %v5191_v15 = vld [vmem:[%s4952_s9 + $0xa8] sm:$0xff] }
  0x8d   : > { %3848 = vmatpush3.msra.mxu0 %v562_v7  ;;  %4149 = vmatpush3.msra.mxu1 %v562_v7  ;;  %4294 = vlog2.f32 %v922_v26  ;;  %v931_v43 = vadd.f32 1.0, %v5119_v31  ;;  %vm5142_vm1 = vcmp.lt.f32.partialorder %v766_v28, 0.0004427343  ;;  %v917_v47 = vadd.f32 1.0, %v916_v29  ;;  %v5202_v23 = vld [vmem:[%s4952_s9 + $0x30] sm:$0xff]  ;;  %v552_v26 = vld [vmem:[%s4975_s5 + $0x8] sm:$0xff] }
  0x8e   : > { %3849 = vmatprep.subr.mxu0 %v561_v13  ;;  %4134 = vmatprep.subr.mxu1 %v561_v13  ;;  %4296 = vlog2.f32 %v787_v34  ;;  %v782_v48 = vadd.f32 1.0, %v781_v30  ;;  %v784_v49 = vand.u32 2147483647, %v5100_v16  ;;  %v796_v50 = vadd.f32 1.0, %v5125_v35  ;;  %s7179_s8 = sld [smem:[#allocation25_spill]] (!%p3618_p12) }
  0x8f   : > { %3850 = vmatpush3.msra.mxu0 %v561_v13  ;;  %4150 = vmatpush3.msra.mxu1 %v561_v13  ;;  %vm5148_vm2 = vcmp.lt.f32.partialorder %v910_v32, 0.0004427343  ;;  %v926_v52 = vadd.f32 1.0, %v925_v33  ;;  %v928_v53 = vand.u32 2147483647, %v5105_v19  ;;  %4298 = vlog2.f32 %v931_v43  ;;  %s7180_s14 = sld [smem:[#allocation26_spill]] (!%p3618_p12) }
  0x90   : > { %3851 = vmatprep.subr.mxu0 %v560_v17  ;;  %4135 = vmatprep.subr.mxu1 %v560_v17  ;;  %v934_v54 = vmul.f32 -0.5, %v5119_v31  ;;  %vm5158_vm3 = vcmp.lt.f32.partialorder %v775_v40, 0.0004427343  ;;  %v793_v58 = vand.u32 2147483647, %v5111_v25  ;;  %4300 = vlog2.f32 %v796_v50 }
  0x91   : > { %3852 = vmatpush3.msra.mxu0 %v560_v17  ;;  %4151 = vmatpush3.msra.mxu1 %v560_v17  ;;  %v799_v59 = vmul.f32 -0.5, %v5125_v35  ;;  %v940_v60 = vadd.f32 1.0, %v5139_v44  ;;  %v5166_v61 = vmul.f32 %v773_v39, %v5090_v10  ;;  %vm5168_vm4 = vcmp.lt.f32.partialorder %v919_v41, 0.0004427343 }
  0x92   : > { %3853 = vmatprep.subr.mxu0 %v559_v21  ;;  %4136 = vmatprep.subr.mxu1 %v559_v21  ;;  %v791_v63 = vadd.f32 1.0, %v790_v42  ;;  %v937_v0 = vand.u32 2147483647, %v5119_v31  ;;  %vm5174_vm5 = vcmp.lt.f32.partialorder %v784_v49, 0.0004427343  ;;  %v805_v7 = vadd.f32 1.0, %v5155_v55 }
  0x93   : > { %3854 = vmatpush3.msra.mxu0 %v559_v21  ;;  %4152 = vmatpush3.msra.mxu1 %v559_v21  ;;  %v802_v4 = vand.u32 2147483647, %v5125_v35  ;;  %4302 = vlog2.f32 %v940_v60  ;;  %v5181_v9 = vmul.f32 %v917_v47, %v5094_v12  ;;  %v5184_v11 = vmul.f32 %v782_v48, %v5100_v16  ;;  %v551_v48 = vld [vmem:[%s4975_s5] sm:$0xff] }
  0x94   : > { %3855 = vmatprep.subr.mxu0 %v558_v27  ;;  %4137 = vmatprep.subr.mxu1 %v558_v27  ;;  %vm5186_vm6 = vcmp.lt.f32.partialorder %v928_v53, 0.0004427343  ;;  %v935_v14 = vadd.f32 1.0, %v934_v54  ;;  %v5195_v20 = vmul.f32 %v926_v52, %v5105_v19  ;;  %vm5197_vm7 = vcmp.lt.f32.partialorder %v793_v58, 0.0004427343  ;;  %v5235_v58 = vld [vmem:[%s4952_s9 + $0x38] sm:$0xff] }
  0x95   : > { %3856 = vmatpush3.msra.mxu0 %v558_v27  ;;  %4153 = vmatpush3.msra.mxu1 %v558_v27  ;;  %v4285_v1 = vpop.eup %4284  ;;  %v800_v22 = vadd.f32 1.0, %v799_v59  ;;  %4304 = vlog2.f32 %v805_v7  ;;  %v5206_v28 = vmul.f32 %v791_v63, %v5111_v25  ;;  %vm5208_vm8 = vcmp.lt.f32.partialorder %v937_v0, 0.0004427343 }
  0x96   : > { %3857 = vmatprep.subr.mxu0 %v557_v36  ;;  %4138 = vmatprep.subr.mxu1 %v557_v36  ;;  %v4287_v8 = vpop.eup %4286  ;;  %v762_v27 = vmul.f32 0.6931472, %v4285_v1  ;;  %v943_v30 = vmul.f32 -0.5, %v5139_v44  ;;  %vm5213_vm9 = vcmp.lt.f32.partialorder %v802_v4, 0.0004427343  ;;  %v808_v34 = vmul.f32 -0.5, %v5155_v55 }
  0x97   : > { %3858 = vmatpush3.msra.mxu0 %v557_v36  ;;  %4154 = vmatpush3.msra.mxu1 %v557_v36  ;;  %v4289_v17 = vpop.eup %4288  ;;  %v906_v32 = vmul.f32 0.6931472, %v4287_v8  ;;  %v949_v36 = vadd.f32 1.0, %v5191_v15  ;;  %v5220_v42 = vmul.f32 %v935_v14, %v5119_v31  ;;  %v814_v43 = vadd.f32 1.0, %v5202_v23 }
  0x98   : > { %3859 = vmatprep.subr.mxu0 %v556_v45  ;;  %4139 = vmatprep.subr.mxu1 %v556_v45  ;;  %v4291_v24 = vpop.eup %4290  ;;  %v771_v40 = vmul.f32 0.6931472, %v4289_v17  ;;  %v5228_v50 = vmul.f32 %v800_v22, %v5125_v35  ;;  %v946_v52 = vand.u32 2147483647, %v5139_v44  ;;  %v768_v53 = vsel %vm5142_vm1, %v5129_v37, %v762_v27 }
  0x99   : > { %3860 = vmatpush3.msra.mxu0 %v556_v45  ;;  %4155 = vmatpush3.msra.mxu1 %v556_v45  ;;  %v4293_v39 = vpop.eup %4292  ;;  %v915_v41 = vmul.f32 0.6931472, %v4291_v24  ;;  %v5224_v45 = vld [vmem:[%s4952_s9 + $0xb0] sm:$0xff]  ;;  %4306 = vlog2.f32 %v949_v36  ;;  %v912_v60 = vsel %vm5148_vm2, %v5132_v38, %v906_v32  ;;  %v809_v63 = vadd.f32 1.0, %v808_v34 }
  0x9a   : > { %3861 = vmatprep.subr.mxu0 %v555_v56  ;;  %4140 = vmatprep.subr.mxu1 %v555_v56  ;;  %v4295_v47 = vpop.eup %4294  ;;  %v780_v49 = vmul.f32 0.6931472, %v4293_v39  ;;  %4308 = vlog2.f32 %v814_v43  ;;  %v811_v0 = vand.u32 2147483647, %v5155_v55  ;;  %v958_v1 = vadd.f32 1.0, %v5224_v45 }
  0x9b   : > { %3862 = vmatpush3.msra.mxu0 %v555_v56  ;;  %4156 = vmatpush3.msra.mxu1 %v555_v56  ;;  %v924_v54 = vmul.f32 0.6931472, %v4295_v47  ;;  %v944_v56 = vadd.f32 1.0, %v943_v30  ;;  %v4297_v59 = vpop.eup %4296  ;;  %v777_v37 = vsel %vm5158_vm3, %v5166_v61, %v771_v40  ;;  %v921_v46 = vsel %vm5168_vm4, %v5181_v9, %v915_v41  ;;  %v5257_v61 = vld [vmem:[%s4952_s9 + $0xb8] sm:$0xff]  ;;  %v5290_v40 = vld [vmem:[%s4952_s9 + $0xc0] sm:$0xff] }
  0x9c   : > { %3863 = vmatprep.subr.mxu0 %v554_v2  ;;  %4141 = vmatprep.subr.mxu1 %v554_v2  ;;  %v952_v51 = vmul.f32 -0.5, %v5191_v15  ;;  %v4299_v38 = vpop.eup %4298  ;;  %v786_v4 = vsel %vm5174_vm5, %v5184_v11, %v780_v49  ;;  %4310 = vlog2.f32 %v958_v1  ;;  %v823_v57 = vadd.f32 1.0, %v5235_v58 }
  0x9d   : > { %3864 = vmatpush3.msra.mxu0 %v554_v2  ;;  %4157 = vmatpush3.msra.mxu1 %v554_v2  ;;  %v789_v2 = vmul.f32 0.6931472, %v4297_v59  ;;  %v930_v7 = vsel %vm5186_vm6, %v5195_v20, %v924_v54  ;;  %v4301_v62 = vpop.eup %4300  ;;  %v933_v8 = vmul.f32 0.6931472, %v4299_v38  ;;  %v945_v9 = vmul.f32 %v944_v56, %v5139_v44 }
  0x9e   : > { %3865 = vmatprep.subr.mxu0 %v553_v18  ;;  %4142 = vmatprep.subr.mxu1 %v553_v18  ;;  %vm5260_vm10 = vcmp.lt.f32.partialorder %v946_v52, 0.0004427343  ;;  %v817_v3 = vmul.f32 -0.5, %v5202_v23  ;;  %v798_v11 = vmul.f32 0.6931472, %v4301_v62  ;;  %v810_v13 = vmul.f32 %v809_v63, %v5155_v55 }
  0x9f   : > { %3866 = vmatpush3.msra.mxu0 %v553_v18  ;;  %4158 = vmatpush3.msra.mxu1 %v553_v18  ;;  %vm5266_vm11 = vcmp.lt.f32.partialorder %v811_v0, 0.0004427343  ;;  %4312 = vlog2.f32 %v823_v57  ;;  %v5271_v18 = vld [vmem:[%s4952_s9 + $0x40] sm:$0xff]  ;;  %v795_v22 = vsel %vm5197_vm7, %v5206_v28, %v789_v2  ;;  %v939_v24 = vsel %vm5208_vm8, %v5220_v42, %v933_v8  ;;  %v5326_v2 = vld [vmem:[%s4952_s9 + $0x50] sm:$0xff] }
  0xa0   : > { %3867 = vmatprep.subr.mxu0 %v552_v26  ;;  %4143 = vmatprep.subr.mxu1 %v552_v26  ;;  %v4303_v20 = vpop.eup %4302  ;;  %v967_v27 = vadd.f32 1.0, %v5257_v61  ;;  %v804_v30 = vsel %vm5213_vm9, %v5228_v50, %v798_v11  ;;  %v953_v34 = vadd.f32 1.0, %v952_v51  ;;  %v961_v36 = vmul.f32 -0.5, %v5224_v45 }
  0xa1   : > { %3868 = vmatpush3.msra.mxu0 %v552_v26  ;;  %4159 = vmatpush3.msra.mxu1 %v552_v26  ;;  %v955_v26 = vand.u32 2147483647, %v5191_v15  ;;  %v942_v32 = vmul.f32 0.6931472, %v4303_v20  ;;  %v818_v28 = vadd.f32 1.0, %v817_v3  ;;  %v832_v39 = vadd.f32 1.0, %v5271_v18 }
  0xa2   : > { %3869 = vmatprep.subr.mxu0 %v551_v48  ;;  %4144 = vmatprep.subr.mxu1 %v551_v48  ;;  %v4305_v21 = vpop.eup %4304  ;;  %v820_v29 = vand.u32 2147483647, %v5202_v23  ;;  %4314 = vlog2.f32 %v967_v27  ;;  %v964_v42 = vand.u32 2147483647, %v5224_v45  ;;  %v962_v49 = vadd.f32 1.0, %v961_v36  ;;  %v5433_v36 = vld [vmem:[%s4952_s9 + $0x70] sm:$0xff] }
  0xa3   : > { %3870 = vmatpush3.msra.mxu0 %v551_v48  ;;  %4160 = vmatpush3.msra.mxu1 %v551_v48  ;;  %v948_v33 = vsel %vm5260_vm10, %v945_v9, %v942_v32  ;;  %v807_v41 = vmul.f32 0.6931472, %v4305_v21  ;;  %vm5299_vm12 = vcmp.lt.f32.partialorder %v955_v26, 0.0004427343  ;;  %4316 = vlog2.f32 %v832_v39  ;;  %v5351_v26 = vld [vmem:[%s4952_s9 + $0x58] sm:$0xff] }
  0xa4   : > { %3871 = vmatprep.mubr.f32.mxu0 %v768_v53  ;;  %3895 = vmatprep.mubr.f32.mxu1 %v912_v60  ;;  %v954_v48 = vmul.f32 %v953_v34, %v5191_v15  ;;  %v976_v50 = vadd.f32 1.0, %v5290_v40  ;;  %v819_v53 = vmul.f32 %v818_v28, %v5202_v23  ;;  %vm5310_vm13 = vcmp.lt.f32.partialorder %v820_v29, 0.0004427343 }
  0xa5   : > { %3872 = vmatmul.mubr.f32.vlgmr.msra.gmra.mxu0 %v777_v37  ;;  %3896 = vmatmul.mubr.f32.vlgmr.msra.gmra.mxu1 %v921_v46  ;;  %v813_v47 = vsel %vm5266_vm11, %v810_v13, %v807_v41  ;;  %v970_v56 = vmul.f32 -0.5, %v5257_v61  ;;  %vm5316_vm14 = vcmp.lt.f32.partialorder %v964_v42, 0.0004427343  ;;  %v829_v37 = vand.u32 2147483647, %v5235_v58  ;;  %v5372_v41 = vld [vmem:[%s4952_s9 + $0xd8] sm:$0xff] }
  0xa6   : > { %3874 = vmatprep.mubr.f32.mxu0 %v786_v4  ;;  %3898 = vmatprep.mubr.f32.mxu1 %v930_v7  ;;  %v4307_v52 = vpop.eup %4306  ;;  %4318 = vlog2.f32 %v976_v50  ;;  %v835_v46 = vmul.f32 -0.5, %v5271_v18  ;;  %v963_v38 = vmul.f32 %v962_v49, %v5224_v45  ;;  %v973_v4 = vand.u32 2147483647, %v5257_v61 }
  0xa7   : > { %635 = vadd.xlane.f32.xlu1 %v5100_v16  ;;  %631 = vadd.xlane.f32.xlu0 %v5081_v5  ;;  %v826_v16 = vmul.f32 -0.5, %v5235_v58  ;;  %v5297_v5 = vld [vmem:[%s4952_s9 + $0x48] sm:$0xff]  ;;  %v4309_v60 = vpop.eup %4308  ;;  %v951_v63 = vmul.f32 0.6931472, %v4307_v52  ;;  %v979_v7 = vmul.f32 -0.5, %v5290_v40  ;;  %v971_v8 = vadd.f32 1.0, %v970_v56 }
  0xa8   : > { %v841_v59 = vadd.f32 1.0, %v5297_v5  ;;  %v816_v1 = vmul.f32 0.6931472, %v4309_v60  ;;  %v838_v9 = vand.u32 2147483647, %v5271_v18  ;;  %v844_v13 = vmul.f32 -0.5, %v5297_v5 }
  0xa9   : > { %3875 = vmatmul.mubr.f32.gmra.mxu0 %v795_v22  ;;  %3899 = vmatmul.mubr.f32.gmra.mxu1 %v939_v24  ;;  %v957_v51 = vsel %vm5299_vm12, %v954_v48, %v951_v63  ;;  %v4311_v57 = vpop.eup %4310  ;;  %vm5345_vm15 = vcmp.lt.f32.partialorder %v829_v37, 0.0004427343  ;;  %v836_v22 = vadd.f32 1.0, %v835_v46  ;;  %v982_v24 = vand.u32 2147483647, %v5290_v40  ;;  %v5383_v52 = vld [vmem:[%s4952_s9 + $0x60] sm:$0xff] }
  0xaa   : > { %3877 = vmatprep.mubr.f32.mxu0 %v804_v30  ;;  %3901 = vmatprep.mubr.f32.mxu1 %v948_v33  ;;  %4320 = vlog2.f32 %v841_v59  ;;  %v822_v62 = vsel %vm5310_vm13, %v819_v53, %v816_v1  ;;  %v960_v3 = vmul.f32 0.6931472, %v4311_v57  ;;  %v980_v32 = vadd.f32 1.0, %v979_v7  ;;  %v5406_v57 = vld [vmem:[%s4952_s9 + $0x68] sm:$0xff] }
  0xab   : > { %637 = vadd.xlane.f32.xlu1 %v5111_v25  ;;  %633 = vadd.xlane.f32.xlu0 %v5090_v10  ;;  %v827_v10 = vadd.f32 1.0, %v826_v16  ;;  %v5321_v25 = vld [vmem:[%s4952_s9 + $0xc8] sm:$0xff]  ;;  %v972_v34 = vmul.f32 %v971_v8, %v5257_v61  ;;  %vm5358_vm0 = vcmp.lt.f32.partialorder %v973_v4, 0.0004427343  ;;  %vm5362_vm1 = vcmp.lt.f32.partialorder %v838_v9, 0.0004427343 }
  0xac   : > { %v985_v14 = vadd.f32 1.0, %v5321_v25  ;;  %v4313_v17 = vpop.eup %4312  ;;  %v966_v27 = vsel %vm5316_vm14, %v963_v38, %v960_v3  ;;  %v845_v39 = vadd.f32 1.0, %v844_v13  ;;  %v859_v33 = vadd.f32 1.0, %v5351_v26  ;;  %v5479_v8 = vld [vmem:[%s4952_s9 + $0xf8] sm:$0xff] }
  0xad   : > { %3878 = vmatmul.mubr.f32.gmra.mxu0 %v813_v47  ;;  %3902 = vmatmul.mubr.f32.gmra.mxu1 %v957_v51  ;;  %v828_v11 = vmul.f32 %v827_v10, %v5235_v58  ;;  %v825_v30 = vmul.f32 0.6931472, %v4313_v17  ;;  %v837_v16 = vmul.f32 %v836_v22, %v5271_v18  ;;  %vm5375_vm2 = vcmp.lt.f32.partialorder %v982_v24, 0.0004427343  ;;  %v5399_v51 = vld [vmem:[%s4952_s9 + $0xe0] sm:$0xff] }
  0xae   : > { %3880 = vmatprep.mubr.f32.mxu0 %v822_v62  ;;  %4322 = vlog2.f32 %v985_v14  ;;  %3904 = vmatprep.mubr.f32.mxu1 %v966_v27  ;;  %v981_v48 = vmul.f32 %v980_v32, %v5290_v40  ;;  %v847_v49 = vand.u32 2147483647, %v5297_v5  ;;  %v853_v50 = vmul.f32 -0.5, %v5326_v2 }
  0xaf   : > { %641 = vadd.xlane.f32.xlu1 %v5155_v55  ;;  %639 = vadd.xlane.f32.xlu0 %v5125_v35  ;;  %v850_v55 = vadd.f32 1.0, %v5326_v2  ;;  %v5343_v35 = vld [vmem:[%s4952_s9 + $0xd0] sm:$0xff]  ;;  %v4315_v29 = vpop.eup %4314  ;;  %v991_v56 = vand.u32 2147483647, %v5321_v25  ;;  %v1003_v59 = vadd.f32 1.0, %v5372_v41  ;;  %v846_v60 = vmul.f32 %v845_v39, %v5297_v5 }
  0xb0   : > { %v994_v28 = vadd.f32 1.0, %v5343_v35  ;;  %v969_v42 = vmul.f32 0.6931472, %v4315_v29  ;;  %v4317_v47 = vpop.eup %4316  ;;  %v856_v0 = vand.u32 2147483647, %v5326_v2  ;;  %v997_v10 = vmul.f32 -0.5, %v5343_v35 }
  0xb1   : > { %4324 = vlog2.f32 %v850_v55  ;;  %v834_v54 = vmul.f32 0.6931472, %v4317_v47  ;;  %v862_v37 = vmul.f32 -0.5, %v5351_v26  ;;  %v868_v46 = vadd.f32 1.0, %v5383_v52  ;;  %v5449_v47 = vld [vmem:[%s4952_s9 + $0x78] sm:$0xff] }
  0xb2   : > { %4326 = vlog2.f32 %v994_v28  ;;  %v975_v53 = vsel %vm5358_vm0, %v972_v34, %v969_v42  ;;  %vm5401_vm3 = vcmp.lt.f32.partialorder %v847_v49, 0.0004427343  ;;  %v854_v7 = vadd.f32 1.0, %v853_v50  ;;  %v5430_v34 = vld [vmem:[%s4952_s9 + $0xe8] sm:$0xff] }
  0xb3   : > { %645 = vadd.xlane.f32.xlu1 %v5235_v58  ;;  %643 = vadd.xlane.f32.xlu0 %v5202_v23  ;;  %v831_v58 = vsel %vm5345_vm15, %v828_v11, %v825_v30  ;;  %v988_v23 = vmul.f32 -0.5, %v5321_v25  ;;  %4328 = vlog2.f32 %v859_v33  ;;  %v4319_v1 = vpop.eup %4318  ;;  %vm5409_vm4 = vcmp.lt.f32.partialorder %v991_v56, 0.0004427343  ;;  %v5456_v56 = vld [vmem:[%s4952_s9 + $0xf0] sm:$0xff]  ;;  %s7151_s9 = sld [smem:[#allocation22_spill]] (!%p3618_p12) }
  0xb4   : > { %3881 = vmatmul.mubr.f32.gmra.mxu0 %v831_v58  ;;  %3905 = vmatmul.mubr.f32.gmra.mxu1 %v975_v53  ;;  %4330 = vlog2.f32 %v1003_v59  ;;  %v978_v4 = vmul.f32 0.6931472, %v4319_v1  ;;  %v1000_v9 = vand.u32 2147483647, %v5343_v35  ;;  %v998_v11 = vadd.f32 1.0, %v997_v10 }
  0xb5   : > { %v989_v63 = vadd.f32 1.0, %v988_v23  ;;  %4332 = vlog2.f32 %v868_v46  ;;  %v1012_v13 = vadd.f32 1.0, %v5399_v51  ;;  %vm5421_vm5 = vcmp.lt.f32.partialorder %v856_v0, 0.0004427343 }
  0xb6   : > { %v984_v14 = vsel %vm5375_vm2, %v981_v48, %v978_v4  ;;  %v863_v20 = vadd.f32 1.0, %v862_v37  ;;  %v1006_v22 = vmul.f32 -0.5, %v5372_v41  ;;  %v855_v27 = vmul.f32 %v854_v7, %v5326_v2 }
  0xb7   : > { %649 = vadd.xlane.f32.xlu1 %v5297_v5  ;;  %647 = vadd.xlane.f32.xlu0 %v5271_v18  ;;  %v840_v18 = vsel %vm5362_vm1, %v837_v16, %v834_v54  ;;  %v4321_v38 = vpop.eup %4320  ;;  %v990_v3 = vmul.f32 %v989_v63, %v5321_v25  ;;  %v871_v30 = vmul.f32 -0.5, %v5383_v52  ;;  %4334 = vlog2.f32 %v1012_v13  ;;  %v600_v13 = vld [vmem:[#allocation3 + $0x8] sm:$0xff] }
  0xb8   : > { %3883 = vmatprep.mubr.f32.mxu0 %v840_v18  ;;  %v843_v62 = vmul.f32 0.6931472, %v4321_v38  ;;  %3907 = vmatprep.mubr.f32.mxu1 %v984_v14  ;;  %v877_v32 = vadd.f32 1.0, %v5406_v57  ;;  %vm5436_vm6 = vcmp.lt.f32.partialorder %v1000_v9, 0.0004427343  ;;  %v999_v39 = vmul.f32 %v998_v11, %v5343_v35 }
  0xb9   : > { %v1009_v23 = vand.u32 2147483647, %v5372_v41  ;;  %v864_v42 = vmul.f32 %v863_v20, %v5351_v26  ;;  %v1007_v16 = vadd.f32 1.0, %v1006_v22  ;;  %v1021_v43 = vadd.f32 1.0, %v5430_v34 }
  0xba   : > { %v849_v55 = vsel %vm5401_vm3, %v846_v60, %v843_v62  ;;  %4336 = vlog2.f32 %v877_v32  ;;  %v872_v50 = vadd.f32 1.0, %v871_v30  ;;  %v1015_v53 = vmul.f32 -0.5, %v5399_v51 }
  0xbb   : > { %653 = vadd.xlane.f32.xlu1 %v5351_v26  ;;  %651 = vadd.xlane.f32.xlu0 %v5326_v2  ;;  %v4323_v24 = vpop.eup %4322  ;;  %v865_v2 = vand.u32 2147483647, %v5351_v26  ;;  %v886_v54 = vadd.f32 1.0, %v5433_v36  ;;  %4338 = vlog2.f32 %v1021_v43  ;;  %v874_v0 = vand.u32 2147483647, %v5383_v52 }
  0xbc   : > { %3884 = vmatmul.mubr.f32.gmra.mxu0 %v849_v55  ;;  %v987_v28 = vmul.f32 0.6931472, %v4323_v24  ;;  %v880_v10 = vmul.f32 -0.5, %v5406_v57  ;;  %v1008_v18 = vmul.f32 %v1007_v16, %v5372_v41  ;;  %vm5469_vm8 = vcmp.lt.f32.partialorder %v1009_v23, 0.0004427343 }
  0xbd   : > { %vm5459_vm7 = vcmp.lt.f32.partialorder %v865_v2, 0.0004427343  ;;  %4340 = vlog2.f32 %v886_v54  ;;  %v1030_v46 = vadd.f32 1.0, %v5456_v56  ;;  %v873_v5 = vmul.f32 %v872_v50, %v5383_v52 }
  0xbe   : > { %v4325_v21 = vpop.eup %4324  ;;  %v993_v33 = vsel %vm5409_vm4, %v990_v3, %v987_v28  ;;  %v1016_v7 = vadd.f32 1.0, %v1015_v53  ;;  %v1018_v62 = vand.u32 2147483647, %v5399_v51  ;;  %v1024_v14 = vmul.f32 -0.5, %v5430_v34 }
  0xbf   : > { %657 = vadd.xlane.f32.xlu1 %v5406_v57  ;;  %655 = vadd.xlane.f32.xlu0 %v5383_v52  ;;  %v852_v58 = vmul.f32 0.6931472, %v4325_v21  ;;  %v4327_v48 = vpop.eup %4326  ;;  %4342 = vlog2.f32 %v1030_v46  ;;  %v895_v3 = vadd.f32 1.0, %v5449_v47  ;;  %vm5485_vm9 = vcmp.lt.f32.partialorder %v874_v0, 0.0004427343 }
  0xc0   : > { %3908 = vmatmul.mubr.f32.gmra.mxu1 %v993_v33  ;;  %v4329_v26 = vpop.eup %4328  ;;  %v996_v59 = vmul.f32 0.6931472, %v4327_v48  ;;  %v881_v52 = vadd.f32 1.0, %v880_v10  ;;  %v883_v55 = vand.u32 2147483647, %v5406_v57  ;;  %v889_v17 = vmul.f32 -0.5, %v5433_v36 }
  0xc1   : > { %v858_v49 = vsel %vm5421_vm5, %v855_v27, %v852_v58  ;;  %v861_v63 = vmul.f32 0.6931472, %v4329_v26  ;;  %v4331_v38 = vpop.eup %4330  ;;  %4344 = vlog2.f32 %v895_v3  ;;  %v1039_v22 = vadd.f32 1.0, %v5479_v8 }
  0xc2   : > { %3886 = vmatprep.mubr.f32.mxu0 %v858_v49  ;;  %v1002_v1 = vsel %vm5436_vm6, %v999_v39, %v996_v59  ;;  %v1005_v9 = vmul.f32 0.6931472, %v4331_v38  ;;  %v4333_v11 = vpop.eup %4332  ;;  %vm5495_vm10 = vcmp.lt.f32.partialorder %v1018_v62, 0.0004427343  ;;  %v1025_v32 = vadd.f32 1.0, %v1024_v14 }
  0xc3   : > { %661 = vadd.xlane.f32.xlu1 %v5449_v47  ;;  %659 = vadd.xlane.f32.xlu0 %v5433_v36  ;;  %v867_v4 = vsel %vm5459_vm7, %v864_v42, %v861_v63  ;;  %v870_v20 = vmul.f32 0.6931472, %v4333_v11  ;;  %v1033_v21 = vmul.f32 -0.5, %v5456_v56  ;;  %4346 = vlog2.f32 %v1039_v22  ;;  %v606_v22 = vld [vmem:[#allocation3 + $0x38] sm:$0xff] }
  0xc4   : > { %3910 = vmatprep.mubr.f32.mxu1 %v1002_v1  ;;  %3887 = vmatmul.mubr.f32.gmra.mxu0 %v867_v4  ;;  %v4335_v27 = vpop.eup %4334  ;;  %v882_v29 = vmul.f32 %v881_v52, %v5406_v57  ;;  %v1027_v2 = vand.u32 2147483647, %v5430_v34  ;;  %v890_v58 = vadd.f32 1.0, %v889_v17  ;;  %vm5506_vm11 = vcmp.lt.f32.partialorder %v883_v55, 0.0004427343  ;;  %v603_v55 = vld [vmem:[#allocation3 + $0x20] sm:$0xff] }
  0xc5   : > { %v876_v30 = vsel %vm5485_vm9, %v873_v5, %v870_v20  ;;  %v1014_v28 = vmul.f32 0.6931472, %v4335_v27  ;;  %v892_v23 = vand.u32 2147483647, %v5433_v36  ;;  %v898_v33 = vmul.f32 -0.5, %v5449_v47 }
  0xc6   : > { %3889 = vmatprep.mubr.f32.mxu0 %v876_v30  ;;  %v1026_v57 = vmul.f32 %v1025_v32, %v5430_v34  ;;  %v1034_v16 = vadd.f32 1.0, %v1033_v21  ;;  %v1042_v43 = vmul.f32 -0.5, %v5479_v8  ;;  %vm5520_vm12 = vcmp.lt.f32.partialorder %v1027_v2, 0.0004427343  ;;  %v608_v21 = vld [vmem:[#allocation3 + $0x48] sm:$0xff] }
  0xc7   : > { %665 = vadd.xlane.f32.xlu1 %v5094_v12  ;;  %663 = vadd.xlane.f32.xlu0 %v5084_v6  ;;  %v1011_v12 = vsel %vm5469_vm8, %v1008_v18, %v1005_v9  ;;  %v1017_v6 = vmul.f32 %v1016_v7, %v5399_v51  ;;  %v4337_v39 = vpop.eup %4336  ;;  %v891_v53 = vmul.f32 %v890_v58, %v5433_v36  ;;  %vm893_vm13 = vcmp.lt.f32.partialorder %v892_v23, 0.0004427343  ;;  %v609_v23 = vld [vmem:[#allocation3 + $0x50] sm:$0xff] }
  0xc8   : > { %3911 = vmatmul.mubr.f32.gmra.mxu1 %v1011_v12  ;;  %v4339_v48 = vpop.eup %4338  ;;  %v899_v59 = vadd.f32 1.0, %v898_v33  ;;  %v1035_v0 = vmul.f32 %v1034_v16, %v5456_v56  ;;  %v1043_v10 = vadd.f32 1.0, %v1042_v43  ;;  %v1045_v18 = vand.u32 2147483647, %v5479_v8  ;;  %v612_v16 = vld [vmem:[#allocation3 + $0x68] sm:$0xff]  ;;  %v611_v43 = vld [vmem:[#allocation3 + $0x60] sm:$0xff] }
  0xc9   : > { %v1020_v42 = vsel %vm5495_vm10, %v1017_v6, %v1014_v28  ;;  %v1023_v26 = vmul.f32 0.6931472, %v4339_v48  ;;  %vm727_vm1 = vcmask 7168   ;;  %v605_v6 = vld [vmem:[#allocation3 + $0x30] sm:$0xff]  ;;  %v607_v28 = vld [vmem:[#allocation3 + $0x40] sm:$0xff] }
  0xca   : > { %3913 = vmatprep.mubr.f32.mxu1 %v1020_v42  ;;  %v4341_v54 = vpop.eup %4340  ;;  %v900_v46 = vmul.f32 %v899_v59, %v5449_v47  ;;  %v1044_v5 = vmul.f32 %v1043_v10, %v5479_v8  ;;  %vm1046_vm0 = vcmp.lt.f32.partialorder %v1045_v18, 0.0004427343 }
  0xcb   : > { %669 = vadd.xlane.f32.xlu1 %v5119_v31  ;;  %667 = vadd.xlane.f32.xlu0 %v5105_v19  ;;  %v879_v19 = vmul.f32 0.6931472, %v4337_v39  ;;  %v888_v60 = vmul.f32 0.6931472, %v4341_v54  ;;  %v1029_v63 = vsel %vm5520_vm12, %v1026_v57, %v1023_v26  ;;  %v610_v31 = vld [vmem:[#allocation3 + $0x58] sm:$0xff]  ;;  %v613_v54 = vld [vmem:[#allocation3 + $0x70] sm:$0xff] }
  0xcc   : > { %v4343_v36 = vpop.eup %4342  ;;  %3914 = vmatmul.mubr.f32.gmra.mxu1 %v1029_v63  ;;  %v616_v63 = vld [vmem:[#allocation3 + $0x88] sm:$0xff] }
  0xcd   : > { %v885_v49 = vsel %vm5506_vm11, %v882_v29, %v879_v19  ;;  %v894_v1 = vsel %vm893_vm13, %v891_v53, %v888_v60  ;;  %v1032_v37 = vmul.f32 0.6931472, %v4343_v36 }
  0xce   : > { %3890 = vmatmul.mubr.f32.gmra.mxu0 %v885_v49  ;;  %v4345_v38 = vpop.eup %4344 }
  0xcf   : > { %673 = vadd.xlane.f32.xlu1 %v5191_v15  ;;  %671 = vadd.xlane.f32.xlu0 %v5139_v44  ;;  %v1036_v15 = vand.u32 2147483647, %v5456_v56  ;;  %v901_v44 = vand.u32 2147483647, %v5449_v47  ;;  %v897_v4 = vmul.f32 0.6931472, %v4345_v38 }
  0xd0   : > { %3892 = vmatprep.mubr.f32.mxu0 %v894_v1 }
  0xd1   : > { %vm1037_vm14 = vcmp.lt.f32.partialorder %v1036_v15, 0.0004427343  ;;  %vm902_vm15 = vcmp.lt.f32.partialorder %v901_v44, 0.0004427343  ;;  %v614_v15 = vld [vmem:[#allocation3 + $0x78] sm:$0xff] }
  0xd2   : > { %v903_v7 = vsel %vm902_vm15, %v900_v46, %v897_v4  ;;  %v617_v46 = vld [vmem:[#allocation3 + $0x90] sm:$0xff] }
  0xd3   : > { %677 = vadd.xlane.f32.xlu1 %v5257_v61  ;;  %675 = vadd.xlane.f32.xlu0 %v5224_v45  ;;  %v1038_v61 = vsel %vm1037_vm14, %v1035_v0, %v1032_v37  ;;  %v4347_v45 = vpop.eup %4346  ;;  %v615_v0 = vld [vmem:[#allocation3 + $0x80] sm:$0xff]  ;;  %v618_v37 = vld [vmem:[#allocation3 + $0x98] sm:$0xff] }
  0xd4   : > { %3916 = vmatprep.mubr.f32.mxu1 %v1038_v61  ;;  %v1041_v62 = vmul.f32 0.6931472, %v4347_v45  ;;  %3893 = vmatmul.mubr.f32.gmra.mxu0 %v903_v7  ;;  %v620_v45 = vld [vmem:[#allocation3 + $0xa8] sm:$0xff]  ;;  %v619_v7 = vld [vmem:[#allocation3 + $0xa0] sm:$0xff] }
  0xd6   : > { %v1047_v9 = vsel %vm1046_vm0, %v1044_v5, %v1041_v62 }
  0xd7   : > { %681 = vadd.xlane.f32.xlu1 %v5321_v25  ;;  %679 = vadd.xlane.f32.xlu0 %v5290_v40  ;;  %v601_v40 = vld [vmem:[#allocation3 + $0x10] sm:$0xff]  ;;  %v599_v25 = vld [vmem:[#allocation3] sm:$0xff] }
  0xd8   : > { %3917 = vmatmul.mubr.f32.gmra.mxu1 %v1047_v9 }
  0xdb   : > { %685 = vadd.xlane.f32.xlu1 %v5372_v41  ;;  %683 = vadd.xlane.f32.xlu0 %v5343_v35  ;;  %v602_v41 = vld [vmem:[#allocation3 + $0x18] sm:$0xff] }
  0xdf   : > { %689 = vadd.xlane.f32.xlu1 %v5430_v34  ;;  %687 = vadd.xlane.f32.xlu0 %v5399_v51 }
  0xe3   : > { %693 = vadd.xlane.f32.xlu1 %v5479_v8  ;;  %691 = vadd.xlane.f32.xlu0 %v5456_v56  ;;  %v604_v8 = vld [vmem:[#allocation3 + $0x28] sm:$0xff] }
 0x130   : > { %v636_v47 = vpop.xlane.xlu1 %635  ;;  %v632_v14 = vpop.xlane.xlu0 %631 }
 0x131   : > { %v697_v3 = vadd.f32 %v636_v47, %v601_v40  ;;  %v695_v11 = vadd.f32 %v632_v14, %v599_v25  ;;  %v622_v47 = vld [vmem:[#allocation3 + $0xb8] sm:$0xff]  ;;  %v621_v14 = vld [vmem:[#allocation3 + $0xb0] sm:$0xff] }
 0x133   : > { %730 = vst.msk [vmem:[#allocation3 + $0x10] sm:$0xff] %vm727_vm1, %v697_v3  ;;  %728 = vst.msk [vmem:[#allocation3] sm:$0xff] %vm727_vm1, %v695_v11 }
 0x134   : > { %v638_v35 = vpop.xlane.xlu1 %637  ;;  %v634_v34 = vpop.xlane.xlu0 %633 }
 0x135   : > { %v698_v51 = vadd.f32 %v638_v35, %v602_v41  ;;  %v696_v52 = vadd.f32 %v634_v34, %v600_v13  ;;  %v624_v35 = vld [vmem:[#allocation3 + $0xc8] sm:$0xff]  ;;  %v623_v34 = vld [vmem:[#allocation3 + $0xc0] sm:$0xff] }
 0x137   : > { %731 = vst.msk [vmem:[#allocation3 + $0x18] sm:$0xff] %vm727_vm1, %v698_v51  ;;  %729 = vst.msk [vmem:[#allocation3 + $0x8] sm:$0xff] %vm727_vm1, %v696_v52 }
 0x138   : > { %v642_v56 = vpop.xlane.xlu1 %641  ;;  %v640_v17 = vpop.xlane.xlu0 %639 }
 0x139   : > { %v700_v12 = vadd.f32 %v642_v56, %v604_v8  ;;  %v699_v20 = vadd.f32 %v640_v17, %v603_v55  ;;  %v626_v56 = vld [vmem:[#allocation3 + $0xd8] sm:$0xff]  ;;  %v1049_v17 = vld [vmem:[#allocation2] sm:$0xff] }
 0x13b   : > { %733 = vst.msk [vmem:[#allocation3 + $0x28] sm:$0xff] %vm727_vm1, %v700_v12  ;;  %732 = vst.msk [vmem:[#allocation3 + $0x20] sm:$0xff] %vm727_vm1, %v699_v20  ;;  %v1065_v12 = vld [vmem:[#allocation2 + $0x58] sm:$0xff] }
 0x13c   : > { %v646_v24 = vpop.xlane.xlu1 %645  ;;  %v644_v27 = vpop.xlane.xlu0 %643 }
 0x13d   : > { %v702_v30 = vadd.f32 %v646_v24, %v606_v22  ;;  %v701_v32 = vadd.f32 %v644_v27, %v605_v6  ;;  %v625_v22 = vld [vmem:[#allocation3 + $0xd0] sm:$0xff] }
 0x13e   : > { %v1048_v27 = vld [vmem:[#allocation2 + $0xb0] sm:$0xff] }
 0x13f   : > { %735 = vst.msk [vmem:[#allocation3 + $0x38] sm:$0xff] %vm727_vm1, %v702_v30  ;;  %734 = vst.msk [vmem:[#allocation3 + $0x30] sm:$0xff] %vm727_vm1, %v701_v32  ;;  %v1064_v30 = vld [vmem:[#allocation2 + $0x38] sm:$0xff] }
 0x140   : > { %v650_v29 = vpop.xlane.xlu1 %649  ;;  %v648_v2 = vpop.xlane.xlu0 %647 }
 0x141   : > { %v704_v58 = vadd.f32 %v650_v29, %v608_v21  ;;  %v703_v39 = vadd.f32 %v648_v2, %v607_v28  ;;  %v628_v2 = vld [vmem:[#allocation3 + $0xe8] sm:$0xff] }
 0x143   : > { %737 = vst.msk [vmem:[#allocation3 + $0x48] sm:$0xff] %vm727_vm1, %v704_v58  ;;  %736 = vst.msk [vmem:[#allocation3 + $0x40] sm:$0xff] %vm727_vm1, %v703_v39 }
 0x144   : > { %v654_v33 = vpop.xlane.xlu1 %653  ;;  %v652_v19 = vpop.xlane.xlu0 %651 }
 0x145   : > { %v706_v42 = vadd.f32 %v654_v33, %v610_v31  ;;  %v705_v57 = vadd.f32 %v652_v19, %v609_v23  ;;  %v1051_v31 = vld [vmem:[#allocation2 + $0x18] sm:$0xff]  ;;  %v1067_v23 = vld [vmem:[#allocation2 + $0xc8] sm:$0xff] }
 0x147   : > { %739 = vst.msk [vmem:[#allocation3 + $0x58] sm:$0xff] %vm727_vm1, %v706_v42  ;;  %738 = vst.msk [vmem:[#allocation3 + $0x50] sm:$0xff] %vm727_vm1, %v705_v57 }
 0x148   : > { %v658_v48 = vpop.xlane.xlu1 %657  ;;  %v656_v50 = vpop.xlane.xlu0 %655 }
 0x149   : > { %v708_v49 = vadd.f32 %v658_v48, %v612_v16  ;;  %v707_v53 = vadd.f32 %v656_v50, %v611_v43  ;;  %v627_v16 = vld [vmem:[#allocation3 + $0xe0] sm:$0xff] }
 0x14a   : > { %v1066_v50 = vld [vmem:[#allocation2 + $0x40] sm:$0xff] }
 0x14b   : > { %741 = vst.msk [vmem:[#allocation3 + $0x68] sm:$0xff] %vm727_vm1, %v708_v49  ;;  %740 = vst.msk [vmem:[#allocation3 + $0x60] sm:$0xff] %vm727_vm1, %v707_v53  ;;  %v1050_v49 = vld [vmem:[#allocation2 + $0xd8] sm:$0xff] }
 0x14c   : > { %v662_v26 = vpop.xlane.xlu1 %661  ;;  %v660_v60 = vpop.xlane.xlu0 %659 }
 0x14d   : > { %v710_v59 = vadd.f32 %v662_v26, %v614_v15  ;;  %v709_v44 = vadd.f32 %v660_v60, %v613_v54 }
 0x14f   : > { %743 = vst.msk [vmem:[#allocation3 + $0x78] sm:$0xff] %vm727_vm1, %v710_v59  ;;  %742 = vst.msk [vmem:[#allocation3 + $0x70] sm:$0xff] %vm727_vm1, %v709_v44  ;;  %v630_v59 = vld [vmem:[#allocation3 + $0xf8] sm:$0xff] }
 0x150   : > { %v666_v10 = vpop.xlane.xlu1 %665  ;;  %v664_v1 = vpop.xlane.xlu0 %663 }
 0x151   : > { %v712_v36 = vadd.f32 %v666_v10, %v616_v63  ;;  %v711_v18 = vadd.f32 %v664_v1, %v615_v0  ;;  %v1053_v63 = vld [vmem:[#allocation2 + $0x68] sm:$0xff] }
 0x153   : > { %745 = vst.msk [vmem:[#allocation3 + $0x88] sm:$0xff] %vm727_vm1, %v712_v36  ;;  %744 = vst.msk [vmem:[#allocation3 + $0x80] sm:$0xff] %vm727_vm1, %v711_v18  ;;  %v629_v18 = vld [vmem:[#allocation3 + $0xf0] sm:$0xff] }
 0x154   : > { %v670_v38 = vpop.xlane.xlu1 %669  ;;  %v668_v4 = vpop.xlane.xlu0 %667 }
 0x155   : > { %v714_v61 = vadd.f32 %v670_v38, %v618_v37  ;;  %v713_v5 = vadd.f32 %v668_v4, %v617_v46  ;;  %v1052_v46 = vld [vmem:[#allocation2 + $0x50] sm:$0xff] }
 0x156   : > { %v1069_v4 = vld [vmem:[#allocation2 + $0x90] sm:$0xff] }
 0x157   : > { %747 = vst.msk [vmem:[#allocation3 + $0x98] sm:$0xff] %vm727_vm1, %v714_v61  ;;  %746 = vst.msk [vmem:[#allocation3 + $0x90] sm:$0xff] %vm727_vm1, %v713_v5 }
 0x158   : > { %v674_v62 = vpop.xlane.xlu1 %673  ;;  %v672_v40 = vpop.xlane.xlu0 %671 }
 0x159   : > { %v716_v9 = vadd.f32 %v674_v62, %v620_v45  ;;  %v715_v25 = vadd.f32 %v672_v40, %v619_v7  ;;  %v1068_v40 = vld [vmem:[#allocation2 + $0xe0] sm:$0xff] }
 0x15b   : > { %749 = vst.msk [vmem:[#allocation3 + $0xa8] sm:$0xff] %vm727_vm1, %v716_v9  ;;  %748 = vst.msk [vmem:[#allocation3 + $0xa0] sm:$0xff] %vm727_vm1, %v715_v25 }
 0x15c   : > { %v678_v3 = vpop.xlane.xlu1 %677  ;;  %v676_v41 = vpop.xlane.xlu0 %675 }
 0x15d   : > { %v718_v11 = vadd.f32 %v678_v3, %v622_v47  ;;  %v717_v13 = vadd.f32 %v676_v41, %v621_v14  ;;  %v1055_v3 = vld [vmem:[#allocation2 + $0x48] sm:$0xff]  ;;  %v1054_v41 = vld [vmem:[#allocation2 + $0x30] sm:$0xff] }
 0x15f   : > { %751 = vst.msk [vmem:[#allocation3 + $0xb8] sm:$0xff] %vm727_vm1, %v718_v11  ;;  %750 = vst.msk [vmem:[#allocation3 + $0xb0] sm:$0xff] %vm727_vm1, %v717_v13 }
 0x160   : > { %v682_v51 = vpop.xlane.xlu1 %681  ;;  %v680_v8 = vpop.xlane.xlu0 %679 }
 0x161   : > { %v720_v52 = vadd.f32 %v682_v51, %v624_v35  ;;  %v719_v55 = vadd.f32 %v680_v8, %v623_v34  ;;  %v1071_v35 = vld [vmem:[#allocation2 + $0xc0] sm:$0xff]  ;;  %v1070_v8 = vld [vmem:[#allocation2 + $0x70] sm:$0xff] }
 0x163   : > { %753 = vst.msk [vmem:[#allocation3 + $0xc8] sm:$0xff] %vm727_vm1, %v720_v52  ;;  %752 = vst.msk [vmem:[#allocation3 + $0xc0] sm:$0xff] %vm727_vm1, %v719_v55 }
 0x164   : > { %v686_v20 = vpop.xlane.xlu1 %685  ;;  %v684_v29 = vpop.xlane.xlu0 %683 }
 0x165   : > { %v3873_v6 = vpop.f32.mrf.mxu0  ;;  %v3897_v24 = vpop.f32.mrf.mxu1  ;;  %v722_v32 = vadd.f32 %v686_v20, %v626_v56  ;;  %v721_v33 = vadd.f32 %v684_v29, %v625_v22  ;;  %v1056_v22 = vld [vmem:[#allocation2 + $0x80] sm:$0xff] }
 0x166   : > { %v1306_v21 = vadd.f32 %v3873_v6, %v1049_v17  ;;  %v1322_v28 = vadd.f32 %v3897_v24, %v1065_v12  ;;  %v1057_v12 = vld [vmem:[#allocation2 + $0x88] sm:$0xff]  ;;  %v1073_v24 = vld [vmem:[#allocation2 + $0xd0] sm:$0xff] }
 0x167   : > { %v1146_v58 = vpop.f32.mrf.mxu0  ;;  %v1226_v39 = vpop.f32.mrf.mxu1  ;;  %755 = vst.msk [vmem:[#allocation3 + $0xd8] sm:$0xff] %vm727_vm1, %v722_v32  ;;  %754 = vst.msk [vmem:[#allocation3 + $0xd0] sm:$0xff] %vm727_vm1, %v721_v33  ;;  %v1075_v33 = vld [vmem:[#allocation2 + $0x28] sm:$0xff] }
 0x168   : > { %1338 = vst [vmem:[#allocation2] sm:$0xff] %v1306_v21  ;;  %1354 = vst [vmem:[#allocation2 + $0x58] sm:$0xff] %v1322_v28  ;;  %v1305_v42 = vadd.f32 %v1146_v58, %v1048_v27  ;;  %v1321_v19 = vadd.f32 %v1226_v39, %v1064_v30  ;;  %v690_v57 = vpop.xlane.xlu1 %689  ;;  %v688_v26 = vpop.xlane.xlu0 %687  ;;  %v1072_v21 = vld [vmem:[#allocation2 + $0xa8] sm:$0xff]  ;;  %v1059_v58 = vld [vmem:[#allocation2 + $0xb8] sm:$0xff] }
 0x169   : > { %v3876_v43 = vpop.f32.mrf.mxu0  ;;  %v3900_v48 = vpop.f32.mrf.mxu1  ;;  %v724_v53 = vadd.f32 %v690_v57, %v628_v2  ;;  %v723_v0 = vadd.f32 %v688_v26, %v627_v16  ;;  %v1074_v16 = vld [vmem:[#allocation2 + $0x10] sm:$0xff]  ;;  %v1077_v26 = vld [vmem:[#allocation2 + $0xf8] sm:$0xff] }
 0x16a   : > { %1337 = vst [vmem:[#allocation2 + $0xb0] sm:$0xff] %v1305_v42  ;;  %1353 = vst [vmem:[#allocation2 + $0x38] sm:$0xff] %v1321_v19  ;;  %v1308_v15 = vadd.f32 %v3876_v43, %v1051_v31  ;;  %v1324_v54 = vadd.f32 %v3900_v48, %v1067_v23  ;;  %v1058_v31 = vld [vmem:[#allocation2 + $0xe8] sm:$0xff] }
 0x16b   : > { %v1156_v60 = vpop.f32.mrf.mxu0  ;;  %v1236_v44 = vpop.f32.mrf.mxu1  ;;  %757 = vst.msk [vmem:[#allocation3 + $0xe8] sm:$0xff] %vm727_vm1, %v724_v53  ;;  %756 = vst.msk [vmem:[#allocation3 + $0xe0] sm:$0xff] %vm727_vm1, %v723_v0 }
 0x16c   : > { %1340 = vst [vmem:[#allocation2 + $0x18] sm:$0xff] %v1308_v15  ;;  %1356 = vst [vmem:[#allocation2 + $0xc8] sm:$0xff] %v1324_v54  ;;  %v1307_v10 = vadd.f32 %v1156_v60, %v1050_v49  ;;  %v1323_v36 = vadd.f32 %v1236_v44, %v1066_v50  ;;  %v694_v1 = vpop.xlane.xlu1 %693  ;;  %v692_v5 = vpop.xlane.xlu0 %691  ;;  %v1061_v50 = vld [vmem:[#allocation2 + $0xf0] sm:$0xff]  ;;  %v1060_v15 = vld [vmem:[#allocation2 + $0x60] sm:$0xff] }
 0x16d   : > { %v3879_v37 = vpop.f32.mrf.mxu0  ;;  %v726_v38 = vadd.f32 %v694_v1, %v630_v59  ;;  %v725_v7 = vadd.f32 %v692_v5, %v629_v18  ;;  %v3903_v62 = vpop.f32.mrf.mxu1  ;;  %v1063_v1 = vld [vmem:[#allocation2 + $0x78] sm:$0xff]  ;;  %v1078_v5 = vld [vmem:[#allocation2 + $0x20] sm:$0xff] }
 0x16e   : > { %1339 = vst [vmem:[#allocation2 + $0xd8] sm:$0xff] %v1307_v10  ;;  %1355 = vst [vmem:[#allocation2 + $0x40] sm:$0xff] %v1323_v36  ;;  %v1310_v61 = vadd.f32 %v3879_v37, %v1053_v63  ;;  %v1326_v25 = vadd.f32 %v3903_v62, %v1069_v4  ;;  %v1076_v63 = vld [vmem:[#allocation2 + $0xa0] sm:$0xff]  ;;  %v1079_v37 = vld [vmem:[#allocation2 + $0x98] sm:$0xff] }
 0x16f   : > { %v1166_v45 = vpop.f32.mrf.mxu0  ;;  %759 = vst.msk [vmem:[#allocation3 + $0xf8] sm:$0xff] %vm727_vm1, %v726_v38  ;;  %758 = vst.msk [vmem:[#allocation3 + $0xf0] sm:$0xff] %vm727_vm1, %v725_v7  ;;  %v1246_v47 = vpop.f32.mrf.mxu1 }
 0x170   : > { %1342 = vst [vmem:[#allocation2 + $0x68] sm:$0xff] %v1310_v61  ;;  %v1309_v9 = vadd.f32 %v1166_v45, %v1052_v46  ;;  %1358 = vst [vmem:[#allocation2 + $0x90] sm:$0xff] %v1326_v25  ;;  %v1325_v14 = vadd.f32 %v1246_v47, %v1068_v40  ;;  %v1062_v46 = vld [vmem:[#allocation2 + $0x8] sm:$0xff] }
 0x172   : > { %1341 = vst [vmem:[#allocation2 + $0x50] sm:$0xff] %v1309_v9  ;;  %1357 = vst [vmem:[#allocation2 + $0xe0] sm:$0xff] %v1325_v14 }
 0x174   : > { %v3882_v11 = vpop.f32.mrf.mxu0  ;;  %v3906_v51 = vpop.f32.mrf.mxu1 }
 0x175   : > { %v1312_v13 = vadd.f32 %v3882_v11, %v1055_v3  ;;  %v1328_v55 = vadd.f32 %v3906_v51, %v1071_v35 }
 0x176   : > { %v1176_v34 = vpop.f32.mrf.mxu0  ;;  %v1256_v56 = vpop.f32.mrf.mxu1 }
 0x177   : > { %1344 = vst [vmem:[#allocation2 + $0x48] sm:$0xff] %v1312_v13  ;;  %v1311_v52 = vadd.f32 %v1176_v34, %v1054_v41  ;;  %1360 = vst [vmem:[#allocation2 + $0xc0] sm:$0xff] %v1328_v55  ;;  %v1327_v17 = vadd.f32 %v1256_v56, %v1070_v8 }
 0x179   : > { %1343 = vst [vmem:[#allocation2 + $0x30] sm:$0xff] %v1311_v52  ;;  %1359 = vst [vmem:[#allocation2 + $0x70] sm:$0xff] %v1327_v17 }
 0x17c   : > { %v3885_v20 = vpop.f32.mrf.mxu0 }
 0x17d   : > { %v1314_v6 = vadd.f32 %v3885_v20, %v1057_v12 }
 0x17e   : > { %v1186_v27 = vpop.f32.mrf.mxu0 }
 0x17f   : > { %1346 = vst [vmem:[#allocation2 + $0x88] sm:$0xff] %v1314_v6  ;;  %v1313_v30 = vadd.f32 %v1186_v27, %v1056_v22 }
 0x180   : > { %v3909_v32 = vpop.f32.mrf.mxu1 }
 0x181   : > { %v1330_v28 = vadd.f32 %v3909_v32, %v1073_v24  ;;  %1345 = vst [vmem:[#allocation2 + $0x80] sm:$0xff] %v1313_v30 }
 0x182   : > { %v1266_v29 = vpop.f32.mrf.mxu1 }
 0x183   : > { %1362 = vst [vmem:[#allocation2 + $0xd0] sm:$0xff] %v1330_v28  ;;  %v1329_v2 = vadd.f32 %v1266_v29, %v1072_v21 }
 0x184   : > { %v3888_v39 = vpop.f32.mrf.mxu0 }
 0x185   : > { %1361 = vst [vmem:[#allocation2 + $0xa8] sm:$0xff] %v1329_v2  ;;  %v1316_v23 = vadd.f32 %v3888_v39, %v1059_v58 }
 0x186   : > { %v1196_v42 = vpop.f32.mrf.mxu0 }
 0x187   : > { %1348 = vst [vmem:[#allocation2 + $0xb8] sm:$0xff] %v1316_v23  ;;  %v1315_v57 = vadd.f32 %v1196_v42, %v1058_v31 }
 0x188   : > { %v3912_v19 = vpop.f32.mrf.mxu1 }
 0x189   : > { %v1332_v43 = vadd.f32 %v3912_v19, %v1075_v33  ;;  %1347 = vst [vmem:[#allocation2 + $0xe8] sm:$0xff] %v1315_v57 }
 0x18a   : > { %v1276_v48 = vpop.f32.mrf.mxu1 }
 0x18b   : > { %1364 = vst [vmem:[#allocation2 + $0x28] sm:$0xff] %v1332_v43  ;;  %v1331_v49 = vadd.f32 %v1276_v48, %v1074_v16 }
 0x18c   : > { %v3915_v60 = vpop.f32.mrf.mxu1 }
 0x18d   : > { %1363 = vst [vmem:[#allocation2 + $0x10] sm:$0xff] %v1331_v49  ;;  %v1334_v0 = vadd.f32 %v3915_v60, %v1077_v26 }
 0x18e   : > { %v3891_v53 = vpop.f32.mrf.mxu0  ;;  %v1286_v10 = vpop.f32.mrf.mxu1 }
 0x18f   : > { %v1318_v54 = vadd.f32 %v3891_v53, %v1061_v50  ;;  %1366 = vst [vmem:[#allocation2 + $0xf8] sm:$0xff] %v1334_v0  ;;  %v1333_v36 = vadd.f32 %v1286_v10, %v1076_v63 }
 0x190   : > { %v1206_v59 = vpop.f32.mrf.mxu0 }
 0x191   : > { %1350 = vst [vmem:[#allocation2 + $0xf0] sm:$0xff] %v1318_v54  ;;  %v1317_v44 = vadd.f32 %v1206_v59, %v1060_v15  ;;  %1365 = vst [vmem:[#allocation2 + $0xa0] sm:$0xff] %v1333_v36 }
 0x193   : > { %1349 = vst [vmem:[#allocation2 + $0x60] sm:$0xff] %v1317_v44 }
 0x194   : > { %v3894_v18 = vpop.f32.mrf.mxu0 }
 0x195   : > { %v1320_v38 = vadd.f32 %v3894_v18, %v1063_v1 }
 0x196   : > { %v1216_v4 = vpop.f32.mrf.mxu0 }
 0x197   : > { %1352 = vst [vmem:[#allocation2 + $0x78] sm:$0xff] %v1320_v38  ;;  %v1319_v7 = vadd.f32 %v1216_v4, %v1062_v46 }
 0x198   : > { %v3918_v61 = vpop.f32.mrf.mxu1 }
 0x199   : > { %v1336_v45 = vadd.f32 %v3918_v61, %v1079_v37  ;;  %1351 = vst [vmem:[#allocation2 + $0x8] sm:$0xff] %v1319_v7  ;;  %1372 = sbr.rel (%p3618_p12) target bundleno = 1165 (0x48d), region = 80 }
 0x19a   : > { %v1296_v62 = vpop.f32.mrf.mxu1 }
 0x19b   : > { %1368 = vst [vmem:[#allocation2 + $0x98] sm:$0xff] %v1336_v45  ;;  %v1335_v9 = vadd.f32 %v1296_v62, %v1078_v5 }
 0x19d   : > { %1367 = vst [vmem:[#allocation2 + $0x20] sm:$0xff] %v1335_v9 }
 0x19e   : > { %v1373_v40 = vld [vmem:[%s7116_s20] sm:$0x3]  ;;  %vm1855_vm2 = vcmask 1041408   ;;  %vm1758_vm3 = vcmask 15360   ;;  %v1727_v14 = vld [vmem:[%s4970_s28 + $0x8] sm:$0xff]  ;;  %v1728_v11 = vld [vmem:[%s4970_s28 + $0x10] sm:$0xff] }
 0x19f   : > { %v1726_v25 = vld [vmem:[%s4970_s28] sm:$0xff]  ;;  %3919 = vmatprep.subr.msk.mxu0 %vm1855_vm2, %v1373_v40  ;;  %4161 = vmatprep.subr.msk.mxu1 %vm1855_vm2, %v1373_v40  ;;  %v1743_v3 = vld [vmem:[%s4970_s28 + $0x88] sm:$0xff]  ;;  %v1744_v41 = vld [vmem:[%s4970_s28 + $0x90] sm:$0xff]  ;;  %v4728_v52 = vmov 0  }
 0x1a0   : > { %v1742_v47 = vld [vmem:[%s4970_s28 + $0x80] sm:$0xff]  ;;  %3920 = vmatpush3.msk.msra.mxu0 %vm1855_vm2, %v1373_v40  ;;  %4162 = vmatpush3.msk.msra.mxu1 %vm1855_vm2, %v1373_v40  ;;  %v1729_v13 = vld [vmem:[%s4970_s28 + $0x18] sm:$0xff]  ;;  %v1376_v8 = vld [vmem:[#allocation3 + $0x10] sm:$0xff] }
 0x1a1   : > { %3921 = vmatprep.mubr.msk.f32.mxu0 %vm1758_vm3, %v1726_v25  ;;  %3945 = vmatprep.mubr.msk.f32.mxu1 %vm1758_vm3, %v1742_v47  ;;  %v1745_v35 = vld [vmem:[%s4970_s28 + $0x98] sm:$0xff]  ;;  %v1730_v34 = vld [vmem:[%s4970_s28 + $0x20] sm:$0xff]  ;;  %v1424_v56 = vadd.f32 1.0, %v1376_v8  ;;  %v1731_v17 = vld [vmem:[%s4970_s28 + $0x28] sm:$0xff]  ;;  %v1427_v30 = vmul.f32 -0.5, %v1376_v8 }
 0x1a2   : > { %3922 = vmatmul.mubr.msk.f32.vlgmr.msra.gmra.mxu0 %vm1758_vm3, %v1727_v14  ;;  %3946 = vmatmul.mubr.msk.f32.vlgmr.msra.gmra.mxu1 %vm1758_vm3, %v1743_v3  ;;  %v1746_v51 = vld [vmem:[%s4970_s28 + $0xa0] sm:$0xff]  ;;  %v1747_v12 = vld [vmem:[%s4970_s28 + $0xa8] sm:$0xff]  ;;  %v1732_v20 = vld [vmem:[%s4970_s28 + $0x30] sm:$0xff]  ;;  %v1430_v28 = vand.u32 2147483647, %v1376_v8 }
 0x1a3   : > { %3924 = vmatprep.mubr.msk.f32.mxu0 %vm1758_vm3, %v1728_v11  ;;  %3948 = vmatprep.mubr.msk.f32.mxu1 %vm1758_vm3, %v1744_v41  ;;  %v1374_v55 = vld [vmem:[#allocation3] sm:$0xff]  ;;  %v1748_v6 = vld [vmem:[%s4970_s28 + $0xb0] sm:$0xff]  ;;  %4350 = vlog2.f32 %v1424_v56  ;;  %v5605_v24 = vld [vmem:[#allocation3 + $0x18] sm:$0xff]  ;;  %v1428_v16 = vadd.f32 1.0, %v1427_v30 }
 0x1a4   : > { %4349 = vset.pattern.permute.xlu1 %v4728_v52  ;;  %4348 = vset.pattern.permute.xlu0 %v4728_v52  ;;  %v1406_v22 = vadd.f32 1.0, %v1374_v55  ;;  %v5607_v27 = vld [vmem:[#allocation3 + $0x8] sm:$0xff]  ;;  %v1409_v32 = vmul.f32 -0.5, %v1374_v55  ;;  %v1733_v21 = vld [vmem:[%s4970_s28 + $0x38] sm:$0xff]  ;;  %v1433_v29 = vadd.f32 1.0, %v5605_v24  ;;  %v5619_v31 = vld [vmem:[#allocation3 + $0x20] sm:$0xff] }
 0x1a5   : > { %v1749_v2 = vld [vmem:[%s4970_s28 + $0xb8] sm:$0xff]  ;;  %v1415_v58 = vadd.f32 1.0, %v5607_v27  ;;  %v5617_v39 = vld [vmem:[#allocation3 + $0x28] sm:$0xff]  ;;  %v1734_v23 = vld [vmem:[%s4970_s28 + $0x40] sm:$0xff]  ;;  %v1436_v42 = vmul.f32 -0.5, %v5605_v24  ;;  %v1418_v19 = vmul.f32 -0.5, %v5607_v27  ;;  %v1429_v37 = vmul.f32 %v1428_v16, %v1376_v8 }
 0x1a6   : > { %3925 = vmatmul.mubr.msk.f32.gmra.mxu0 %vm1758_vm3, %v1729_v13  ;;  %3949 = vmatmul.mubr.msk.f32.gmra.mxu1 %vm1758_vm3, %v1745_v35  ;;  %4352 = vlog2.f32 %v1406_v22  ;;  %v1750_v33 = vld [vmem:[%s4970_s28 + $0xc0] sm:$0xff]  ;;  %v1451_v57 = vadd.f32 1.0, %v5617_v39  ;;  %v1410_v43 = vadd.f32 1.0, %v1409_v32  ;;  %v1412_v48 = vand.u32 2147483647, %v1374_v55  ;;  %v1735_v49 = vld [vmem:[%s4970_s28 + $0x48] sm:$0xff] }
 0x1a7   : > { %3927 = vmatprep.mubr.msk.f32.mxu0 %vm1758_vm3, %v1730_v34  ;;  %3951 = vmatprep.mubr.msk.f32.mxu1 %vm1758_vm3, %v1746_v51  ;;  %4354 = vlog2.f32 %v1433_v29  ;;  %vm5629_vm4 = vcmp.lt.f32.partialorder %v1430_v28, 0.0004427343  ;;  %v1454_v53 = vmul.f32 -0.5, %v5617_v39  ;;  %v1442_v15 = vadd.f32 1.0, %v5619_v31  ;;  %v5635_v54 = vld [vmem:[#allocation3 + $0x38] sm:$0xff]  ;;  %v1751_v26 = vld [vmem:[%s4970_s28 + $0xc8] sm:$0xff] }
 0x1a8   : > { %4356 = vlog2.f32 %v1415_v58  ;;  %v1439_v59 = vand.u32 2147483647, %v5605_v24  ;;  %v1421_v60 = vand.u32 2147483647, %v5607_v27  ;;  %v5642_v44 = vld [vmem:[#allocation3 + $0x30] sm:$0xff]  ;;  %v1437_v10 = vadd.f32 1.0, %v1436_v42 }
 0x1a9   : > { %4358 = vlog2.f32 %v1451_v57  ;;  %v1736_v63 = vld [vmem:[%s4970_s28 + $0x50] sm:$0xff]  ;;  %v1419_v36 = vadd.f32 1.0, %v1418_v19  ;;  %v1469_v1 = vadd.f32 1.0, %v5635_v54  ;;  %v5647_v18 = vld [vmem:[#allocation3 + $0x48] sm:$0xff]  ;;  %v1411_v46 = vmul.f32 %v1410_v43, %v1374_v55  ;;  %v1737_v61 = vld [vmem:[%s4970_s28 + $0x58] sm:$0xff] }
 0x1aa   : > { %3928 = vmatmul.mubr.msk.f32.gmra.mxu0 %vm1758_vm3, %v1731_v17  ;;  %3952 = vmatmul.mubr.msk.f32.gmra.mxu1 %vm1758_vm3, %v1747_v12  ;;  %v1752_v0 = vld [vmem:[%s4970_s28 + $0xd0] sm:$0xff]  ;;  %4360 = vlog2.f32 %v1442_v15  ;;  %vm5649_vm5 = vcmp.lt.f32.partialorder %v1412_v48, 0.0004427343  ;;  %v1445_v4 = vmul.f32 -0.5, %v5619_v31  ;;  %v1753_v5 = vld [vmem:[%s4970_s28 + $0xd8] sm:$0xff]  ;;  %v1455_v45 = vadd.f32 1.0, %v1454_v53 }
 0x1ab   : > { %3930 = vmatprep.mubr.msk.f32.mxu0 %vm1758_vm3, %v1732_v20  ;;  %3954 = vmatprep.mubr.msk.f32.mxu1 %vm1758_vm3, %v1748_v6  ;;  %v1457_v7 = vand.u32 2147483647, %v5617_v39  ;;  %4362 = vlog2.f32 %v1469_v1  ;;  %v1460_v62 = vadd.f32 1.0, %v5642_v44  ;;  %v5660_v9 = vld [vmem:[#allocation3 + $0x40] sm:$0xff]  ;;  %vm5664_vm6 = vcmp.lt.f32.partialorder %v1439_v59, 0.0004427343 }
 0x1ac   : > { %vm5668_vm7 = vcmp.lt.f32.partialorder %v1421_v60, 0.0004427343  ;;  %v1472_v47 = vmul.f32 -0.5, %v5635_v54  ;;  %v1487_v14 = vadd.f32 1.0, %v5647_v18  ;;  %v5675_v3 = vmul.f32 %v1437_v10, %v5605_v24  ;;  %v1738_v41 = vld [vmem:[%s4970_s28 + $0x60] sm:$0xff]  ;;  %v5685_v56 = vld [vmem:[#allocation3 + $0x58] sm:$0xff] }
 0x1ad   : > { %v5678_v11 = vmul.f32 %v1419_v36, %v5607_v27  ;;  %v1754_v13 = vld [vmem:[%s4970_s28 + $0xe0] sm:$0xff]  ;;  %v1448_v35 = vand.u32 2147483647, %v5619_v31  ;;  %4364 = vlog2.f32 %v1460_v62  ;;  %v1446_v51 = vadd.f32 1.0, %v1445_v4  ;;  %v1739_v20 = vld [vmem:[%s4970_s28 + $0x68] sm:$0xff]  ;;  %v1740_v58 = vld [vmem:[%s4970_s28 + $0x70] sm:$0xff] }
 0x1ae   : > { %3931 = vmatmul.mubr.msk.f32.gmra.mxu0 %vm1758_vm3, %v1733_v21  ;;  %3955 = vmatmul.mubr.msk.f32.gmra.mxu1 %vm1758_vm3, %v1749_v2  ;;  %v1475_v8 = vand.u32 2147483647, %v5635_v54  ;;  %4366 = vlog2.f32 %v1487_v14  ;;  %v1478_v55 = vadd.f32 1.0, %v5660_v9  ;;  %v5691_v22 = vmul.f32 %v1455_v45, %v5617_v39  ;;  %v5701_v21 = vld [vmem:[#allocation3 + $0x50] sm:$0xff]  ;;  %v1755_v29 = vld [vmem:[%s4970_s28 + $0xe8] sm:$0xff]  ;;  %v1741_v50 = vld [vmem:[%s4970_s28 + $0x78] sm:$0xff] }
 0x1af   : > { %3933 = vmatprep.mubr.msk.f32.mxu0 %vm1758_vm3, %v1734_v23  ;;  %3957 = vmatprep.mubr.msk.f32.mxu1 %vm1758_vm3, %v1750_v33  ;;  %vm5693_vm8 = vcmp.lt.f32.partialorder %v1457_v7, 0.0004427343  ;;  %v1463_v24 = vmul.f32 -0.5, %v5642_v44  ;;  %v1473_v30 = vadd.f32 1.0, %v1472_v47  ;;  %v1466_v32 = vand.u32 2147483647, %v5642_v44 }
 0x1b0   : > { %v4351_v34 = vpop.eup %4350  ;;  %4368 = vlog2.f32 %v1478_v55  ;;  %vm5706_vm9 = vcmp.lt.f32.partialorder %v1448_v35, 0.0004427343  ;;  %v1490_v39 = vmul.f32 -0.5, %v5647_v18  ;;  %v1505_v23 = vadd.f32 1.0, %v5685_v56  ;;  %v1756_v57 = vld [vmem:[%s4970_s28 + $0xf0] sm:$0xff]  ;;  %v1757_v1 = vld [vmem:[%s4970_s28 + $0xf8] sm:$0xff] }
 0x1b1   : > { %v1426_v12 = vmul.f32 0.6931472, %v4351_v34  ;;  %v1447_v19 = vmul.f32 %v1446_v51, %v5619_v31  ;;  %vm5717_vm10 = vcmp.lt.f32.partialorder %v1475_v8, 0.0004427343  ;;  %v1481_v43 = vmul.f32 -0.5, %v5660_v9  ;;  %v5753_v47 = vld [vmem:[#allocation3 + $0x78] sm:$0xff] }
 0x1b2   : > { %3934 = vmatmul.mubr.msk.f32.gmra.mxu0 %vm1758_vm3, %v1735_v49  ;;  %3958 = vmatmul.mubr.msk.f32.gmra.mxu1 %vm1758_vm3, %v1751_v26  ;;  %v1464_v53 = vadd.f32 1.0, %v1463_v24  ;;  %4370 = vlog2.f32 %v1505_v23  ;;  %v1496_v15 = vadd.f32 1.0, %v5701_v21  ;;  %v5725_v26 = vld [vmem:[#allocation3 + $0x68] sm:$0xff]  ;;  %v1474_v60 = vmul.f32 %v1473_v30, %v5635_v54  ;;  %v5794_v16 = vld [vmem:[#allocation3 + $0x80] sm:$0xff]  ;;  %s7178_s28 = sld [smem:[#allocation23_spill]] }
 0x1b3   : > { %3936 = vmatprep.mubr.msk.f32.mxu0 %vm1758_vm3, %v1736_v63  ;;  %3960 = vmatprep.mubr.msk.f32.mxu1 %vm1758_vm3, %v1752_v0  ;;  %v4353_v17 = vpop.eup %4352  ;;  %v1432_v28 = vsel %vm5629_vm4, %v1429_v37, %v1426_v12  ;;  %vm5730_vm11 = vcmp.lt.f32.partialorder %v1466_v32, 0.0004427343  ;;  %v1493_v0 = vand.u32 2147483647, %v5647_v18  ;;  %v1491_v37 = vadd.f32 1.0, %v1490_v39  ;;  %v5781_v30 = vld [vmem:[#allocation3 + $0x88] sm:$0xff] }
 0x1b4   : > { %v1408_v27 = vmul.f32 0.6931472, %v4353_v17  ;;  %v4355_v33 = vpop.eup %4354  ;;  %2129 = vperm.xlu1 %4349, %v1432_v28   ;;  %4372 = vlog2.f32 %v1496_v15  ;;  %v1484_v4 = vand.u32 2147483647, %v5660_v9  ;;  %v1508_v62 = vmul.f32 -0.5, %v5685_v56  ;;  %v5772_v17 = vld [vmem:[#allocation3 + $0x70] sm:$0xff] }
 0x1b5   : > { %v4357_v48 = vpop.eup %4356  ;;  %v1435_v49 = vmul.f32 0.6931472, %v4355_v33  ;;  %v1511_v40 = vand.u32 2147483647, %v5685_v56  ;;  %v1465_v14 = vmul.f32 %v1464_v53, %v5642_v44  ;;  %v1492_v35 = vmul.f32 %v1491_v37, %v5647_v18 }
 0x1b6   : > { %3937 = vmatmul.mubr.msk.f32.gmra.mxu0 %vm1758_vm3, %v1737_v61  ;;  %3961 = vmatmul.mubr.msk.f32.gmra.mxu1 %vm1758_vm3, %v1753_v5  ;;  %v1414_v42 = vsel %vm5649_vm5, %v1411_v46, %v1408_v27  ;;  %v4359_v31 = vpop.eup %4358  ;;  %v1417_v59 = vmul.f32 0.6931472, %v4357_v48  ;;  %v5740_v46 = vld [vmem:[#allocation3 + $0x60] sm:$0xff]  ;;  %v1482_v61 = vadd.f32 1.0, %v1481_v43  ;;  %v1523_v5 = vadd.f32 1.0, %v5725_v26 }
 0x1b7   : > { %3939 = vmatprep.mubr.msk.f32.mxu0 %vm1758_vm3, %v1738_v41  ;;  %3963 = vmatprep.mubr.msk.f32.mxu1 %vm1758_vm3, %v1754_v13  ;;  %v1441_v10 = vsel %vm5664_vm6, %v5675_v3, %v1435_v49  ;;  %v1453_v36 = vmul.f32 0.6931472, %v4359_v31  ;;  %v4361_v38 = vpop.eup %4360  ;;  %v1499_v3 = vmul.f32 -0.5, %v5701_v21  ;;  %vm5762_vm12 = vcmp.lt.f32.partialorder %v1493_v0, 0.0004427343 }
 0x1b8   : > { %2119 = vperm.xlu0 %4348, %v1414_v42   ;;  %2134 = vperm.xlu1 %4349, %v1441_v10   ;;  %v1423_v54 = vsel %vm5668_vm7, %v5678_v11, %v1417_v59  ;;  %v1444_v7 = vmul.f32 0.6931472, %v4361_v38  ;;  %v4363_v25 = vpop.eup %4362  ;;  %4374 = vlog2.f32 %v1523_v5  ;;  %v1514_v11 = vadd.f32 1.0, %v5740_v46 }
 0x1b9   : > { %v1459_v45 = vsel %vm5693_vm8, %v5691_v22, %v1453_v36  ;;  %v1471_v13 = vmul.f32 0.6931472, %v4363_v25  ;;  %v1483_v8 = vmul.f32 %v1482_v61, %v5660_v9  ;;  %vm5767_vm13 = vcmp.lt.f32.partialorder %v1484_v4, 0.0004427343  ;;  %v2431_v4 = vld [vmem:[%s7151_s9 + $0x68] sm:$0xff] }
 0x1ba   : > { %3940 = vmatmul.mubr.msk.f32.gmra.mxu0 %vm1758_vm3, %v1739_v20  ;;  %3964 = vmatmul.mubr.msk.f32.gmra.mxu1 %vm1758_vm3, %v1755_v29  ;;  %v1450_v41 = vsel %vm5706_vm9, %v1447_v19, %v1444_v7  ;;  %v4365_v51 = vpop.eup %4364  ;;  %4376 = vlog2.f32 %v1514_v11  ;;  %v1541_v55 = vadd.f32 1.0, %v5753_v47  ;;  %v1509_v22 = vadd.f32 1.0, %v1508_v62 }
 0x1bb   : > { %3942 = vmatprep.mubr.msk.f32.mxu0 %vm1758_vm3, %v1740_v58  ;;  %3966 = vmatprep.mubr.msk.f32.mxu1 %vm1758_vm3, %v1756_v57  ;;  %v4367_v12 = vpop.eup %4366  ;;  %v1477_v18 = vsel %vm5717_vm10, %v1474_v60, %v1471_v13  ;;  %v1462_v20 = vmul.f32 0.6931472, %v4365_v51  ;;  %vm5776_vm14 = vcmp.lt.f32.partialorder %v1511_v40, 0.0004427343  ;;  %v1500_v24 = vadd.f32 1.0, %v1499_v3 }
 0x1bc   : > { %2124 = vperm.xlu0 %4348, %v1423_v54   ;;  %2144 = vperm.xlu1 %4349, %v1459_v45   ;;  %v1489_v9 = vmul.f32 0.6931472, %v4367_v12  ;;  %v1526_v27 = vmul.f32 -0.5, %v5725_v26  ;;  %4378 = vlog2.f32 %v1541_v55  ;;  %v1502_v29 = vand.u32 2147483647, %v5701_v21  ;;  %v5816_v54 = vld [vmem:[#allocation3 + $0x90] sm:$0xff] }
 0x1bd   : > { %v4369_v32 = vpop.eup %4368  ;;  %v1468_v28 = vsel %vm5730_vm11, %v1465_v14, %v1462_v20  ;;  %v1517_v2 = vmul.f32 -0.5, %v5740_v46  ;;  %v1532_v58 = vadd.f32 1.0, %v5772_v17  ;;  %v1529_v23 = vand.u32 2147483647, %v5725_v26  ;;  %v5841_v55 = vld [vmem:[#allocation3 + $0xa0] sm:$0xff] }
 0x1be   : > { %3943 = vmatmul.mubr.msk.f32.gmra.mxu0 %vm1758_vm3, %v1741_v50  ;;  %3967 = vmatmul.mubr.msk.f32.gmra.mxu1 %vm1758_vm3, %v1757_v1  ;;  %v1480_v39 = vmul.f32 0.6931472, %v4369_v32  ;;  %v1544_v33 = vmul.f32 -0.5, %v5753_v47  ;;  %v1495_v42 = vsel %vm5762_vm12, %v1492_v35, %v1489_v9  ;;  %v1510_v19 = vmul.f32 %v1509_v22, %v5685_v56  ;;  %v5801_v56 = vld [vmem:[#allocation3 + $0x98] sm:$0xff] }
 0x1bf   : > { %4380 = vlog2.f32 %v1532_v58  ;;  %v1559_v57 = vadd.f32 1.0, %v5781_v30  ;;  %v4371_v43 = vpop.eup %4370  ;;  %v1501_v49 = vmul.f32 %v1500_v24, %v5701_v21  ;;  %v1527_v50 = vadd.f32 1.0, %v1526_v27  ;;  %v5849_v22 = vld [vmem:[#allocation3 + $0xb8] sm:$0xff] }
 0x1c0   : > { %2139 = vperm.xlu0 %4348, %v1450_v41   ;;  %2154 = vperm.xlu1 %4349, %v1477_v18   ;;  %v1486_v48 = vsel %vm5767_vm13, %v1483_v8, %v1480_v39  ;;  %v1520_v53 = vand.u32 2147483647, %v5740_v46  ;;  %v1507_v15 = vmul.f32 0.6931472, %v4371_v43  ;;  %v1518_v31 = vadd.f32 1.0, %v1517_v2 }
 0x1c1   : > { %v1547_v59 = vand.u32 2147483647, %v5753_v47  ;;  %4382 = vlog2.f32 %v1559_v57  ;;  %v4373_v60 = vpop.eup %4372  ;;  %vm5803_vm15 = vcmp.lt.f32.partialorder %v1502_v29, 0.0004427343  ;;  %vm5807_vm0 = vcmp.lt.f32.partialorder %v1529_v23, 0.0004427343 }
 0x1c2   : > { %v1545_v21 = vadd.f32 1.0, %v1544_v33  ;;  %v1550_v10 = vadd.f32 1.0, %v5794_v16  ;;  %v1513_v36 = vsel %vm5776_vm14, %v1510_v19, %v1507_v15  ;;  %v1498_v1 = vmul.f32 0.6931472, %v4373_v60 }
 0x1c3   : > { %v1535_v37 = vmul.f32 -0.5, %v5772_v17  ;;  %v1562_v38 = vmul.f32 -0.5, %v5781_v30  ;;  %v1528_v61 = vmul.f32 %v1527_v50, %v5725_v26  ;;  %vm5819_vm1 = vcmp.lt.f32.partialorder %v1520_v53, 0.0004427343  ;;  %v5832_v26 = vld [vmem:[#allocation3 + $0xa8] sm:$0xff] }
 0x1c4   : > { %2149 = vperm.xlu0 %4348, %v1468_v28   ;;  %2164 = vperm.xlu1 %4349, %v1495_v42   ;;  %4384 = vlog2.f32 %v1550_v10  ;;  %v1577_v5 = vadd.f32 1.0, %v5801_v56  ;;  %v1504_v7 = vsel %vm5803_vm15, %v1501_v49, %v1498_v1  ;;  %v1519_v62 = vmul.f32 %v1518_v31, %v5740_v46  ;;  %v5865_v42 = vld [vmem:[#allocation3 + $0xb0] sm:$0xff]  ;;  %v5876_v53 = vld [vmem:[#allocation3 + $0xc8] sm:$0xff] }
 0x1c5   : > { %v4375_v45 = vpop.eup %4374  ;;  %vm5827_vm2 = vcmp.lt.f32.partialorder %v1547_v59, 0.0004427343  ;;  %v1538_v25 = vand.u32 2147483647, %v5772_v17  ;;  %v1546_v3 = vmul.f32 %v1545_v21, %v5753_v47  ;;  %v1568_v11 = vadd.f32 1.0, %v5816_v54 }
 0x1c6   : > { %v1525_v14 = vmul.f32 0.6931472, %v4375_v45  ;;  %4386 = vlog2.f32 %v1577_v5  ;;  %v1536_v13 = vadd.f32 1.0, %v1535_v37  ;;  %v1563_v35 = vadd.f32 1.0, %v1562_v38 }
 0x1c7   : > { %v4377_v41 = vpop.eup %4376  ;;  %v1565_v46 = vand.u32 2147483647, %v5781_v30  ;;  %v1553_v34 = vmul.f32 -0.5, %v5794_v16  ;;  %4388 = vlog2.f32 %v1568_v11  ;;  %v1595_v44 = vadd.f32 1.0, %v5832_v26 }
 0x1c8   : > { %2159 = vperm.xlu0 %4348, %v1486_v48   ;;  %2174 = vperm.xlu1 %4349, %v1513_v36   ;;  %v1531_v51 = vsel %vm5807_vm0, %v1528_v61, %v1525_v14  ;;  %v1516_v8 = vmul.f32 0.6931472, %v4377_v41  ;;  %vm5843_vm3 = vcmp.lt.f32.partialorder %v1538_v25, 0.0004427343  ;;  %v1556_v18 = vand.u32 2147483647, %v5794_v16 }
 0x1c9   : > { %v4379_v47 = vpop.eup %4378  ;;  %v1580_v20 = vmul.f32 -0.5, %v5801_v56  ;;  %v1571_v24 = vmul.f32 -0.5, %v5816_v54  ;;  %4390 = vlog2.f32 %v1595_v44  ;;  %v1537_v27 = vmul.f32 %v1536_v13, %v5772_v17  ;;  %v2433_v17 = vld [vmem:[%s7151_s9 + $0x78] sm:$0xff]  ;;  %v5885_v36 = vld [vmem:[#allocation3 + $0xc0] sm:$0xff] }
 0x1ca   : > { %v1522_v6 = vsel %vm5819_vm1, %v1519_v62, %v1516_v8  ;;  %v1543_v9 = vmul.f32 0.6931472, %v4379_v47  ;;  %v1564_v32 = vmul.f32 %v1563_v35, %v5781_v30  ;;  %vm5856_vm4 = vcmp.lt.f32.partialorder %v1565_v46, 0.0004427343  ;;  %3969 = vmatprep.subr.mxu1 %v2433_v17  ;;  %v5917_v46 = vld [vmem:[#allocation3 + $0xd0] sm:$0xff]  ;;  %v2430_v44 = vld [vmem:[%s7151_s9 + $0x60] sm:$0xff] }
 0x1cb   : > { %v1586_v29 = vadd.f32 1.0, %v5841_v55  ;;  %v1554_v39 = vadd.f32 1.0, %v1553_v34  ;;  %v1598_v23 = vmul.f32 -0.5, %v5832_v26  ;;  %v1613_v33 = vadd.f32 1.0, %v5849_v22  ;;  %3970 = vmatpush3.msra.mxu1 %v2433_v17  ;;  %v2701_v34 = vld [vmem:[#allocation7 + $0x18] sm:$0xff] }
 0x1cc   : > { %2169 = vperm.xlu0 %4348, %v1504_v7   ;;  %2184 = vperm.xlu1 %4349, %v1531_v51   ;;  %v4381_v2 = vpop.eup %4380  ;;  %v1549_v58 = vsel %vm5827_vm2, %v1546_v3, %v1543_v9  ;;  %vm5870_vm5 = vcmp.lt.f32.partialorder %v1556_v18, 0.0004427343  ;;  %v1583_v57 = vand.u32 2147483647, %v5801_v56  ;;  %v1581_v48 = vadd.f32 1.0, %v1580_v20 }
 0x1cd   : > { %v1534_v30 = vmul.f32 0.6931472, %v4381_v2  ;;  %4392 = vlog2.f32 %v1586_v29  ;;  %v1572_v49 = vadd.f32 1.0, %v1571_v24  ;;  %v1574_v50 = vand.u32 2147483647, %v5816_v54 }
 0x1ce   : > { %v4383_v43 = vpop.eup %4382  ;;  %4394 = vlog2.f32 %v1613_v33  ;;  %v1601_v59 = vand.u32 2147483647, %v5832_v26  ;;  %v1604_v60 = vadd.f32 1.0, %v5865_v42  ;;  %v1555_v63 = vmul.f32 %v1554_v39, %v5794_v16  ;;  %v2432_v16 = vld [vmem:[%s7151_s9 + $0x70] sm:$0xff]  ;;  %v5944_v33 = vld [vmem:[#allocation3 + $0xe0] sm:$0xff] }
 0x1cf   : > { %v1540_v15 = vsel %vm5843_vm3, %v1537_v27, %v1534_v30  ;;  %v1561_v31 = vmul.f32 0.6931472, %v4383_v43  ;;  %v1599_v0 = vadd.f32 1.0, %v1598_v23  ;;  %v1589_v21 = vmul.f32 -0.5, %v5841_v55  ;;  %3971 = vmatprep.subr.mxu1 %v2432_v16 }
 0x1d0   : > { %2179 = vperm.xlu0 %4348, %v1522_v6   ;;  %2194 = vperm.xlu1 %4349, %v1549_v58   ;;  %v1592_v10 = vand.u32 2147483647, %v5841_v55  ;;  %v1616_v38 = vmul.f32 -0.5, %v5849_v22  ;;  %4396 = vlog2.f32 %v1604_v60  ;;  %v1631_v61 = vadd.f32 1.0, %v5876_v53 }
 0x1d1   : > { %v4385_v1 = vpop.eup %4384  ;;  %v1567_v37 = vsel %vm5856_vm4, %v1564_v32, %v1561_v31  ;;  %v1582_v45 = vmul.f32 %v1581_v48, %v5801_v56  ;;  %vm5898_vm6 = vcmp.lt.f32.partialorder %v1583_v57, 0.0004427343  ;;  %vm5902_vm7 = vcmp.lt.f32.partialorder %v1574_v50, 0.0004427343  ;;  %v5912_v56 = vld [vmem:[#allocation3 + $0xd8] sm:$0xff]  ;;  %3972 = vmatpush3.msra.mxu1 %v2432_v16  ;;  %v5937_v32 = vld [vmem:[#allocation3 + $0xe8] sm:$0xff] }
 0x1d2   : > { %v1552_v5 = vmul.f32 0.6931472, %v4385_v1  ;;  %v1573_v25 = vmul.f32 %v1572_v49, %v5816_v54  ;;  %vm5907_vm8 = vcmp.lt.f32.partialorder %v1601_v59, 0.0004427343  ;;  %4398 = vlog2.f32 %v1631_v61  ;;  %3973 = vmatprep.subr.mxu1 %v2431_v4 }
 0x1d3   : > { %v4387_v40 = vpop.eup %4386  ;;  %v1622_v3 = vadd.f32 1.0, %v5885_v36  ;;  %v1600_v13 = vmul.f32 %v1599_v0, %v5832_v26  ;;  %v1590_v35 = vadd.f32 1.0, %v1589_v21  ;;  %vm5919_vm9 = vcmp.lt.f32.partialorder %v1592_v10, 0.0004427343  ;;  %3974 = vmatpush3.msra.mxu1 %v2431_v4  ;;  %v2429_v26 = vld [vmem:[%s7151_s9 + $0x58] sm:$0xff] }
 0x1d4   : > { %2189 = vperm.xlu0 %4348, %v1540_v15   ;;  %2204 = vperm.xlu1 %4349, %v1567_v37   ;;  %v1558_v11 = vsel %vm5870_vm5, %v1555_v63, %v1552_v5  ;;  %v1579_v41 = vmul.f32 0.6931472, %v4387_v40  ;;  %v4389_v54 = vpop.eup %4388  ;;  %v1617_v51 = vadd.f32 1.0, %v1616_v38  ;;  %v1607_v8 = vmul.f32 -0.5, %v5865_v42  ;;  %v5965_v63 = vld [vmem:[#allocation3 + $0xf8] sm:$0xff]  ;;  %v5972_v37 = vld [vmem:[#allocation3 + $0xf0] sm:$0xff] }
 0x1d5   : > { %4400 = vlog2.f32 %v1622_v3  ;;  %v1570_v12 = vmul.f32 0.6931472, %v4389_v54  ;;  %v1634_v18 = vmul.f32 -0.5, %v5876_v53  ;;  %v1649_v20 = vadd.f32 1.0, %v5912_v56  ;;  %3975 = vmatprep.subr.mxu1 %v2430_v44  ;;  %v2426_v5 = vld [vmem:[%s7151_s9 + $0x40] sm:$0xff] }
 0x1d6   : > { %v1585_v47 = vsel %vm5898_vm6, %v1582_v45, %v1579_v41  ;;  %v4391_v6 = vpop.eup %4390  ;;  %v1619_v9 = vand.u32 2147483647, %v5849_v22  ;;  %v1610_v24 = vand.u32 2147483647, %v5865_v42  ;;  %v1640_v27 = vadd.f32 1.0, %v5917_v46  ;;  %3976 = vmatpush3.msra.mxu1 %v2430_v44  ;;  %v2425_v45 = vld [vmem:[%s7151_s9 + $0x38] sm:$0xff] }
 0x1d7   : > { %v1576_v28 = vsel %vm5902_vm7, %v1573_v25, %v1570_v12  ;;  %v1597_v29 = vmul.f32 0.6931472, %v4391_v6  ;;  %v1625_v2 = vmul.f32 -0.5, %v5885_v36  ;;  %4402 = vlog2.f32 %v1649_v20  ;;  %3977 = vmatprep.subr.mxu1 %v2429_v26 }
 0x1d8   : > { %2199 = vperm.xlu0 %4348, %v1558_v11   ;;  %2214 = vperm.xlu1 %4349, %v1585_v47   ;;  %v1591_v58 = vmul.f32 %v1590_v35, %v5841_v55  ;;  %v1618_v39 = vmul.f32 %v1617_v51, %v5849_v22  ;;  %v1608_v23 = vadd.f32 1.0, %v1607_v8  ;;  %4404 = vlog2.f32 %v1640_v27  ;;  %v2428_v55 = vld [vmem:[%s7151_s9 + $0x50] sm:$0xff]  ;;  %v2427_v22 = vld [vmem:[%s7151_s9 + $0x48] sm:$0xff] }
 0x1d9   : > { %3978 = vmatpush3.msra.mxu1 %v2429_v26  ;;  %v1603_v30 = vsel %vm5907_vm8, %v1600_v13, %v1597_v29  ;;  %v1635_v19 = vadd.f32 1.0, %v1634_v18  ;;  %v1637_v57 = vand.u32 2147483647, %v5876_v53  ;;  %v1667_v43 = vadd.f32 1.0, %v5937_v32  ;;  %v2424_v51 = vld [vmem:[%s7151_s9 + $0x30] sm:$0xff]  ;;  %v2423_v8 = vld [vmem:[%s7151_s9 + $0x28] sm:$0xff] }
 0x1da   : > { %v4393_v17 = vpop.eup %4392  ;;  %vm5956_vm10 = vcmp.lt.f32.partialorder %v1619_v9, 0.0004427343  ;;  %vm5960_vm11 = vcmp.lt.f32.partialorder %v1610_v24, 0.0004427343  ;;  %3979 = vmatprep.subr.mxu1 %v2428_v55  ;;  %v1626_v59 = vadd.f32 1.0, %v1625_v2  ;;  %v1652_v60 = vmul.f32 -0.5, %v5912_v56 }
 0x1db   : > { %v4395_v48 = vpop.eup %4394  ;;  %v1588_v49 = vmul.f32 0.6931472, %v4393_v17  ;;  %4406 = vlog2.f32 %v1667_v43  ;;  %3980 = vmatpush3.msra.mxu1 %v2428_v55  ;;  %v1609_v21 = vmul.f32 %v1608_v23, %v5865_v42  ;;  %v1643_v10 = vmul.f32 -0.5, %v5917_v46  ;;  %v1694_v2 = vld [vmem:[#allocation2 + $0xb0] sm:$0xff] }
 0x1dc   : > { %2209 = vperm.xlu0 %4348, %v1576_v28   ;;  %2224 = vperm.xlu1 %4349, %v1603_v30   ;;  %v1615_v31 = vmul.f32 0.6931472, %v4395_v48  ;;  %v1658_v1 = vadd.f32 1.0, %v5944_v33  ;;  %v1636_v16 = vmul.f32 %v1635_v19, %v5876_v53  ;;  %vm5977_vm12 = vcmp.lt.f32.partialorder %v1637_v57, 0.0004427343  ;;  %v2421_v57 = vld [vmem:[%s7151_s9 + $0x18] sm:$0xff] }
 0x1dd   : > { %v1594_v0 = vsel %vm5919_vm9, %v1591_v58, %v1588_v49  ;;  %3981 = vmatprep.subr.mxu1 %v2427_v22  ;;  %v4397_v38 = vpop.eup %4396  ;;  %v1628_v42 = vand.u32 2147483647, %v5885_v36  ;;  %v1655_v62 = vand.u32 2147483647, %v5912_v56  ;;  %v1685_v53 = vadd.f32 1.0, %v5965_v63 }
 0x1de   : > { %v1621_v61 = vsel %vm5956_vm10, %v1618_v39, %v1615_v31  ;;  %3982 = vmatpush3.msra.mxu1 %v2427_v22  ;;  %v1606_v7 = vmul.f32 0.6931472, %v4397_v38  ;;  %4408 = vlog2.f32 %v1658_v1  ;;  %v1627_v25 = vmul.f32 %v1626_v59, %v5885_v36 }
 0x1df   : > { %3983 = vmatprep.subr.mxu1 %v2426_v5  ;;  %v4399_v40 = vpop.eup %4398  ;;  %v1653_v14 = vadd.f32 1.0, %v1652_v60  ;;  %v1670_v3 = vmul.f32 -0.5, %v5937_v32  ;;  %v1676_v11 = vadd.f32 1.0, %v5972_v37  ;;  %v1644_v35 = vadd.f32 1.0, %v1643_v10 }
 0x1e0   : > { %2219 = vperm.xlu0 %4348, %v1594_v0   ;;  %2234 = vperm.xlu1 %4349, %v1621_v61   ;;  %v1612_v41 = vsel %vm5960_vm11, %v1609_v21, %v1606_v7  ;;  %v1633_v13 = vmul.f32 0.6931472, %v4399_v40  ;;  %4410 = vlog2.f32 %v1685_v53  ;;  %vm5995_vm13 = vcmp.lt.f32.partialorder %v1628_v42, 0.0004427343  ;;  %v2420_v0 = vld [vmem:[%s7151_s9 + $0x10] sm:$0xff]  ;;  %v2710_v53 = vld [vmem:[#allocation7 + $0x60] sm:$0xff] }
 0x1e1   : > { %3984 = vmatpush3.msra.mxu1 %v2426_v5  ;;  %v1646_v36 = vand.u32 2147483647, %v5917_v46  ;;  %4412 = vlog2.f32 %v1676_v11  ;;  %v1661_v47 = vmul.f32 -0.5, %v5944_v33  ;;  %v1654_v12 = vmul.f32 %v1653_v14, %v5912_v56  ;;  %v2712_v7 = vld [vmem:[#allocation7 + $0x70] sm:$0xff]  ;;  %v2709_v40 = vld [vmem:[#allocation7 + $0x58] sm:$0xff]  ;;  %v2707_v14 = vld [vmem:[#allocation7 + $0x48] sm:$0xff] }
 0x1e2   : > { %3985 = vmatprep.subr.mxu1 %v2425_v45  ;;  %v4401_v54 = vpop.eup %4400  ;;  %v1639_v44 = vsel %vm5977_vm12, %v1636_v16, %v1633_v13  ;;  %vm6010_vm14 = vcmp.lt.f32.partialorder %v1655_v62, 0.0004427343  ;;  %v1671_v20 = vadd.f32 1.0, %v1670_v3  ;;  %v1645_v24 = vmul.f32 %v1644_v35, %v5917_v46  ;;  %v2422_v46 = vld [vmem:[%s7151_s9 + $0x20] sm:$0xff]  ;;  %v2711_v62 = vld [vmem:[#allocation7 + $0x68] sm:$0xff]  ;;  %v2705_v11 = vld [vmem:[#allocation7 + $0x38] sm:$0xff] }
 0x1e3   : > { %3986 = vmatpush3.msra.mxu1 %v2425_v45  ;;  %v1624_v26 = vmul.f32 0.6931472, %v4401_v54  ;;  %v1673_v27 = vand.u32 2147483647, %v5937_v32  ;;  %v1688_v28 = vmul.f32 -0.5, %v5965_v63  ;;  %v1679_v58 = vmul.f32 -0.5, %v5972_v37 }
 0x1e4   : > { %2229 = vperm.xlu0 %4348, %v1612_v41   ;;  %3987 = vmatprep.subr.mxu1 %v2424_v51  ;;  %v4403_v6 = vpop.eup %4402  ;;  %vm6019_vm15 = vcmp.lt.f32.partialorder %v1646_v36, 0.0004427343  ;;  %v1662_v23 = vadd.f32 1.0, %v1661_v47  ;;  %v1672_v30 = vmul.f32 %v1671_v20, %v5937_v32  ;;  %v1664_v19 = vand.u32 2147483647, %v5944_v33  ;;  %v2706_v3 = vld [vmem:[#allocation7 + $0x40] sm:$0xff] }
 0x1e5   : > { %2244 = vperm.xlu1 %4349, %v1639_v44   ;;  %3988 = vmatpush3.msra.mxu1 %v2424_v51  ;;  %v1630_v9 = vsel %vm5995_vm13, %v1627_v25, %v1624_v26  ;;  %v4405_v29 = vpop.eup %4404  ;;  %v1651_v56 = vmul.f32 0.6931472, %v4403_v6  ;;  %vm1674_vm0 = vcmp.lt.f32.partialorder %v1673_v27, 0.0004427343  ;;  %v1689_v22 = vadd.f32 1.0, %v1688_v28  ;;  %v2708_v25 = vld [vmem:[#allocation7 + $0x50] sm:$0xff] }
 0x1e6   : > { %3989 = vmatprep.subr.mxu1 %v2423_v8  ;;  %v1642_v39 = vmul.f32 0.6931472, %v4405_v29  ;;  %v1691_v49 = vand.u32 2147483647, %v5965_v63  ;;  %v1680_v32 = vadd.f32 1.0, %v1679_v58  ;;  %v1663_v50 = vmul.f32 %v1662_v23, %v5944_v33  ;;  %v2419_v33 = vld [vmem:[%s7151_s9 + $0x8] sm:$0xff] }
 0x1e7   : > { %3990 = vmatpush3.msra.mxu1 %v2423_v8  ;;  %v1657_v17 = vsel %vm6010_vm14, %v1654_v12, %v1651_v56  ;;  %v1682_v15 = vand.u32 2147483647, %v5972_v37  ;;  %vm6039_vm1 = vcmp.lt.f32.partialorder %v1664_v19, 0.0004427343  ;;  %v1690_v10 = vmul.f32 %v1689_v22, %v5965_v63  ;;  %v2418_v63 = vld [vmem:[%s7151_s9] sm:$0xff]  ;;  %v2704_v41 = vld [vmem:[#allocation7 + $0x30] sm:$0xff] }
 0x1e8   : > { %2239 = vperm.xlu0 %4348, %v1630_v9   ;;  %3991 = vmatprep.subr.mxu1 %v2422_v46  ;;  %v4407_v43 = vpop.eup %4406  ;;  %v1648_v55 = vsel %vm6019_vm15, %v1645_v24, %v1642_v39  ;;  %vm1692_vm2 = vcmp.lt.f32.partialorder %v1691_v49, 0.0004427343  ;;  %v1681_v38 = vmul.f32 %v1680_v32, %v5972_v37  ;;  %v2713_v37 = vld [vmem:[#allocation7 + $0x78] sm:$0xff]  ;;  %v2703_v13 = vld [vmem:[#allocation7 + $0x28] sm:$0xff]  ;;  %v2702_v54 = vld [vmem:[#allocation7 + $0x20] sm:$0xff] }
 0x1e9   : > { %2254 = vperm.xlu1 %4349, %v1657_v17   ;;  %3992 = vmatpush3.msra.mxu1 %v2422_v46  ;;  %v1669_v48 = vmul.f32 0.6931472, %v4407_v43  ;;  %vm1683_vm3 = vcmp.lt.f32.partialorder %v1682_v15, 0.0004427343  ;;  %v6067_v9 = vld [vmem:[%s7176_s25] ss:$0 sm:$0xff] }
 0x1ea   : > { %3993 = vmatprep.subr.mxu1 %v2421_v57  ;;  %4049 = vmatprep.subr.mxu0 %v2713_v37  ;;  %v1695_v27 = vld [vmem:[#allocation2] sm:$0xff]  ;;  %v1697_v46 = vld [vmem:[#allocation2 + $0x18] sm:$0xff] }
 0x1eb   : > { %3994 = vmatpush3.msra.mxu1 %v2421_v57  ;;  %v4409_v31 = vpop.eup %4408  ;;  %v1675_v59 = vsel %vm1674_vm0, %v1672_v30, %v1669_v48  ;;  %4050 = vmatpush3.msra.mxu0 %v2713_v37  ;;  %v6085_v22 = vld [vmem:[%s7177_s15] ss:$0 sm:$0xff]  ;;  %v1696_v49 = vld [vmem:[#allocation2 + $0xd8] sm:$0xff] }
 0x1ec   : > { %2249 = vperm.xlu0 %4348, %v1648_v55   ;;  %v1660_v21 = vmul.f32 0.6931472, %v4409_v31  ;;  %3995 = vmatprep.subr.mxu1 %v2420_v0 }
 0x1ed   : > { %2264 = vperm.xlu1 %4349, %v1675_v59   ;;  %v4411_v1 = vpop.eup %4410  ;;  %3996 = vmatpush3.msra.mxu1 %v2420_v0  ;;  %v1699_v59 = vld [vmem:[#allocation2 + $0x68] sm:$0xff] }
 0x1ee   : > { %v4413_v61 = vpop.eup %4412  ;;  %v1666_v16 = vsel %vm6039_vm1, %v1663_v50, %v1660_v21  ;;  %v1687_v4 = vmul.f32 0.6931472, %v4411_v1  ;;  %3997 = vmatprep.subr.mxu1 %v2419_v33  ;;  %4051 = vmatprep.subr.mxu0 %v2712_v7 }
 0x1ef   : > { %v1678_v42 = vmul.f32 0.6931472, %v4413_v61  ;;  %3998 = vmatpush3.msra.mxu1 %v2419_v33  ;;  %4052 = vmatpush3.msra.mxu0 %v2712_v7  ;;  %v1698_v61 = vld [vmem:[#allocation2 + $0x50] sm:$0xff] }
 0x1f0   : > { %2259 = vperm.xlu0 %4348, %v1666_v16   ;;  %v1693_v5 = vsel %vm1692_vm2, %v1690_v10, %v1687_v4  ;;  %3999 = vmatprep.subr.mxu1 %v2418_v63 }
 0x1f1   : > { %2274 = vperm.xlu1 %4349, %v1693_v5   ;;  %v1684_v45 = vsel %vm1683_vm3, %v1681_v38, %v1678_v42  ;;  %4000 = vmatpush3.msra.mxu1 %v2418_v63 }
 0x1f2   : > { %4053 = vmatprep.subr.mxu0 %v2711_v62 }
 0x1f3   : > { %4054 = vmatpush3.msra.mxu0 %v2711_v62 }
 0x1f4   : > { %2269 = vperm.xlu0 %4348, %v1684_v45   ;;  %4055 = vmatprep.subr.mxu0 %v2710_v53 }
 0x1f5   : > { %4056 = vmatpush3.msra.mxu0 %v2710_v53  ;;  %v1701_v53 = vld [vmem:[#allocation2 + $0x48] sm:$0xff] }
 0x1f6   : > { %4057 = vmatprep.subr.mxu0 %v2709_v40 }
 0x1f7   : > { %4058 = vmatpush3.msra.mxu0 %v2709_v40 }
 0x1f8   : > { %4059 = vmatprep.subr.mxu0 %v2708_v25 }
 0x1f9   : > { %4060 = vmatpush3.msra.mxu0 %v2708_v25 }
 0x1fa   : > { %4061 = vmatprep.subr.mxu0 %v2707_v14 }
 0x1fb   : > { %4062 = vmatpush3.msra.mxu0 %v2707_v14 }
 0x1fc   : > { %4063 = vmatprep.subr.mxu0 %v2706_v3 }
 0x1fd   : > { %4064 = vmatpush3.msra.mxu0 %v2706_v3 }
 0x1fe   : > { %4065 = vmatprep.subr.mxu0 %v2705_v11 }
 0x1ff   : > { %4066 = vmatpush3.msra.mxu0 %v2705_v11 }
 0x200   : > { %4067 = vmatprep.subr.mxu0 %v2704_v41 }
 0x201   : > { %4068 = vmatpush3.msra.mxu0 %v2704_v41 }
 0x202   : > { %4069 = vmatprep.subr.mxu0 %v2703_v13 }
 0x203   : > { %4070 = vmatpush3.msra.mxu0 %v2703_v13  ;;  %v1700_v13 = vld [vmem:[#allocation2 + $0x30] sm:$0xff] }
 0x204   : > { %4071 = vmatprep.subr.mxu0 %v2702_v54 }
 0x205   : > { %4072 = vmatpush3.msra.mxu0 %v2702_v54 }
 0x206   : > { %4073 = vmatprep.subr.mxu0 %v2701_v34 }
 0x207   : > { %4074 = vmatpush3.msra.mxu0 %v2701_v34 }
 0x22f   : > { %v2130_v36 = vpop.permute.xlu1 %2129 }
 0x230   : > { %v2285_v60 = vmul.f32 %v6067_v9, %v2130_v36 }
 0x233   : > { %v2120_v35 = vpop.permute.xlu0 %2119  ;;  %v2135_v8 = vpop.permute.xlu1 %2134 }
 0x234   : > { %v2283_v17 = vmul.f32 %v6067_v9, %v2120_v35  ;;  %v2286_v30 = vmul.f32 %v6067_v9, %v2135_v8 }
 0x237   : > { %v2125_v51 = vpop.permute.xlu0 %2124  ;;  %v2145_v26 = vpop.permute.xlu1 %2144 }
 0x238   : > { %v2284_v28 = vmul.f32 %v6067_v9, %v2125_v51  ;;  %v2288_v4 = vmul.f32 %v6067_v9, %v2145_v26 }
 0x23b   : > { %v2140_v44 = vpop.permute.xlu0 %2139  ;;  %v2155_v12 = vpop.permute.xlu1 %2154 }
 0x23c   : > { %v2287_v45 = vmul.f32 %v6067_v9, %v2140_v44  ;;  %v2290_v35 = vmul.f32 %v6067_v9, %v2155_v12 }
 0x23f   : > { %v6056_v47 = vpop.permute.xlu0 %2149  ;;  %v6060_v20 = vpop.permute.xlu1 %2164 }
 0x240   : > { %v2289_v44 = vmul.f32 %v6067_v9, %v6056_v47 }
 0x243   : > { %v6058_v18 = vpop.permute.xlu0 %2159  ;;  %v6069_v24 = vpop.permute.xlu1 %2174 }
 0x247   : > { %v6062_v6 = vpop.permute.xlu0 %2169  ;;  %v6080_v55 = vpop.permute.xlu1 %2184 }
 0x24b   : > { %v6074_v58 = vpop.permute.xlu0 %2179  ;;  %v6100_v37 = vpop.permute.xlu1 %2194 }
 0x24f   : > { %v6090_v0 = vpop.permute.xlu0 %2189 }
 0x253   : > { %v6105_v54 = vpop.permute.xlu0 %2199 }
 0x262   : > { %v3923_v29 = vpop.f32.mrf.mxu0  ;;  %v6072_v56 = vpop.f32.mrf.mxu1 }
 0x263   : > { %v2085_v39 = vadd.f32 %v3923_v29, %v1695_v27  ;;  %v1703_v27 = vld [vmem:[#allocation2 + $0x88] sm:$0xff] }
 0x264   : > { %v1925_v23 = vpop.f32.mrf.mxu0  ;;  %v6078_v43 = vpop.f32.mrf.mxu1 }
 0x265   : > { %v2316_v19 = vadd.f32 %v2284_v28, %v2085_v39  ;;  %v2084_v57 = vadd.f32 %v1925_v23, %v1694_v2  ;;  %v6113_v23 = vpop.permute.xlu1 %2204 }
 0x266   : > { %v3926_v48 = vpop.f32.mrf.mxu0  ;;  %v6087_v15 = vpop.f32.mrf.mxu1 }
 0x267   : > { %v2315_v32 = vadd.f32 %v2283_v17, %v2084_v57  ;;  %v2087_v50 = vadd.f32 %v3926_v48, %v1697_v46  ;;  %v2355_v21 = vadd.f32 %v6085_v22, %v2316_v19  ;;  %v1702_v17 = vld [vmem:[#allocation2 + $0x80] sm:$0xff] }
 0x268   : > { %v1935_v31 = vpop.f32.mrf.mxu0  ;;  %v6093_v1 = vpop.f32.mrf.mxu1 }
 0x269   : > { %v2318_v10 = vadd.f32 %v2286_v30, %v2087_v50  ;;  %v2086_v33 = vadd.f32 %v1935_v31, %v1696_v49  ;;  %v2354_v16 = vadd.f32 %v6085_v22, %v2315_v32  ;;  %v2387_v25 = vmax.f32 %v2355_v21, 0.0  ;;  %v1705_v50 = vld [vmem:[#allocation2 + $0xb8] sm:$0xff] }
 0x26a   : > { %v3929_v38 = vpop.f32.mrf.mxu0  ;;  %v6097_v5 = vpop.f32.mrf.mxu1  ;;  %v2292_v30 = vmul.f32 %v6067_v9, %v6060_v20  ;;  %v2291_v49 = vmul.f32 %v6067_v9, %v6058_v18 }
 0x26b   : > { %v2317_v42 = vadd.f32 %v2285_v60, %v2086_v33  ;;  %v2089_v63 = vadd.f32 %v3929_v38, %v1699_v59  ;;  %v2386_v62 = vmax.f32 %v2354_v16, 0.0  ;;  %v2357_v40 = vadd.f32 %v6085_v22, %v2318_v10  ;;  %v6122_v59 = vpop.permute.xlu0 %2209  ;;  %v1704_v38 = vld [vmem:[#allocation2 + $0xe8] sm:$0xff] }
 0x26c   : > { %v1945_v7 = vpop.f32.mrf.mxu0  ;;  %v6107_v36 = vpop.f32.mrf.mxu1 }
 0x26d   : > { %v2320_v14 = vadd.f32 %v2288_v4, %v2089_v63  ;;  %v2088_v3 = vadd.f32 %v1945_v7, %v1698_v61  ;;  %v2356_v11 = vadd.f32 %v6085_v22, %v2317_v42  ;;  %4001 = vmatprep.mubr.f32.mxu1 %v2386_v62  ;;  %v2389_v28 = vmax.f32 %v2357_v40, 0.0  ;;  %v1707_v62 = vld [vmem:[#allocation2 + $0xf0] sm:$0xff] }
 0x26e   : > { %v3932_v41 = vpop.f32.mrf.mxu0  ;;  %4002 = vmatmul.mubr.f32.vlgmr.msra.gmra.mxu1 %v2387_v25  ;;  %v6117_v19 = vpop.f32.mrf.mxu1  ;;  %v2294_v61 = vmul.f32 %v6067_v9, %v6069_v24  ;;  %v2293_v63 = vmul.f32 %v6067_v9, %v6062_v6 }
 0x26f   : > { %v2319_v34 = vadd.f32 %v2287_v45, %v2088_v3  ;;  %v2091_v51 = vadd.f32 %v3932_v41, %v1701_v53  ;;  %v2388_v8 = vmax.f32 %v2356_v11, 0.0  ;;  %v2359_v12 = vadd.f32 %v6085_v22, %v2320_v14  ;;  %v2215_v45 = vpop.permute.xlu1 %2214  ;;  %v1706_v11 = vld [vmem:[#allocation2 + $0x60] sm:$0xff] }
 0x270   : > { %v1955_v26 = vpop.f32.mrf.mxu0  ;;  %v6127_v16 = vpop.f32.mrf.mxu1  ;;  %v2296_v41 = vmul.f32 %v6067_v9, %v6080_v55 }
 0x271   : > { %v2322_v29 = vadd.f32 %v2290_v35, %v2091_v51  ;;  %v2090_v2 = vadd.f32 %v1955_v26, %v1700_v13  ;;  %4004 = vmatprep.mubr.f32.mxu1 %v2388_v8  ;;  %v2358_v39 = vadd.f32 %v6085_v22, %v2319_v34  ;;  %v2391_v10 = vmax.f32 %v2359_v12, 0.0  ;;  %v6135_v13 = vpop.permute.xlu0 %2219  ;;  %v1710_v35 = vld [vmem:[#allocation2 + $0x38] sm:$0xff] }
 0x272   : > { %v3935_v46 = vpop.f32.mrf.mxu0  ;;  %4005 = vmatmul.mubr.f32.gmra.mxu1 %v2389_v28  ;;  %v6137_v6 = vpop.f32.mrf.mxu1 }
 0x273   : > { %v2321_v47 = vadd.f32 %v2289_v44, %v2090_v2  ;;  %v2093_v57 = vadd.f32 %v3935_v46, %v1703_v27  ;;  %v2390_v48 = vmax.f32 %v2358_v39, 0.0  ;;  %v2361_v31 = vadd.f32 %v6085_v22, %v2322_v29  ;;  %v1709_v27 = vld [vmem:[#allocation2 + $0x78] sm:$0xff] }
 0x274   : > { %v1965_v32 = vpop.f32.mrf.mxu0  ;;  %v2295_v44 = vmul.f32 %v6067_v9, %v6074_v58  ;;  %v1711_v29 = vld [vmem:[#allocation2 + $0x58] sm:$0xff]  ;;  %v2298_v46 = vmul.f32 %v6067_v9, %v6100_v37  ;;  %v2297_v58 = vmul.f32 %v6067_v9, %v6090_v0  ;;  %v2299_v37 = vmul.f32 %v6067_v9, %v6105_v54 }
 0x275   : > { %v2324_v60 = vadd.f32 %v2292_v30, %v2093_v57  ;;  %v2092_v21 = vadd.f32 %v1965_v32, %v1702_v17  ;;  %4007 = vmatprep.mubr.f32.mxu1 %v2390_v48  ;;  %v2360_v20 = vadd.f32 %v6085_v22, %v2321_v47  ;;  %v2393_v53 = vmax.f32 %v2361_v31, 0.0  ;;  %v2225_v17 = vpop.permute.xlu1 %2224  ;;  %v1708_v57 = vld [vmem:[#allocation2 + $0x8] sm:$0xff]  ;;  %v1712_v48 = vld [vmem:[#allocation2 + $0x40] sm:$0xff] }
 0x276   : > { %v3938_v33 = vpop.f32.mrf.mxu0  ;;  %4008 = vmatmul.mubr.f32.gmra.mxu1 %v2391_v10  ;;  %v2100_v30 = vadd.f32 %v6078_v43, %v1710_v35  ;;  %v2101_v43 = vadd.f32 %v6072_v56, %v1711_v29 }
 0x277   : > { %v2323_v18 = vadd.f32 %v2291_v49, %v2092_v21  ;;  %v2095_v4 = vadd.f32 %v3938_v33, %v1705_v50  ;;  %v2392_v42 = vmax.f32 %v2360_v20, 0.0  ;;  %v2363_v24 = vadd.f32 %v6085_v22, %v2324_v60  ;;  %v6148_v49 = vpop.f32.mrf.mxu1  ;;  %v2230_v20 = vpop.permute.xlu0 %2229 }
 0x278   : > { %v1975_v7 = vpop.f32.mrf.mxu0  ;;  %v2300_v60 = vmul.f32 %v6067_v9, %v6113_v23  ;;  %v1714_v23 = vld [vmem:[#allocation2 + $0xe0] sm:$0xff] }
 0x279   : > { %v2326_v40 = vadd.f32 %v2294_v61, %v2095_v4  ;;  %v2094_v25 = vadd.f32 %v1975_v7, %v1704_v38  ;;  %4010 = vmatprep.mubr.f32.mxu1 %v2392_v42  ;;  %v2362_v14 = vadd.f32 %v6085_v22, %v2323_v18  ;;  %v2395_v55 = vmax.f32 %v2363_v24, 0.0  ;;  %v1713_v4 = vld [vmem:[#allocation2 + $0xc8] sm:$0xff] }
 0x27a   : > { %v3941_v3 = vpop.f32.mrf.mxu0  ;;  %4011 = vmatmul.mubr.f32.gmra.mxu1 %v2393_v53  ;;  %v2331_v18 = vadd.f32 %v2299_v37, %v2100_v30  ;;  %v2102_v42 = vadd.f32 %v6093_v1, %v1712_v48  ;;  %v2302_v7 = vmul.f32 %v6067_v9, %v2215_v45  ;;  %v2235_v53 = vpop.permute.xlu1 %2234  ;;  %v1720_v37 = vld [vmem:[#allocation2 + $0x10] sm:$0xff] }
 0x27b   : > { %v2325_v34 = vadd.f32 %v2293_v63, %v2094_v25  ;;  %v2097_v51 = vadd.f32 %v3941_v3, %v1707_v62  ;;  %v2394_v8 = vmax.f32 %v2362_v14, 0.0  ;;  %v2365_v28 = vadd.f32 %v6085_v22, %v2326_v40  ;;  %v6158_v63 = vpop.f32.mrf.mxu1  ;;  %v2240_v45 = vpop.permute.xlu0 %2239 }
 0x27c   : > { %v1985_v26 = vpop.f32.mrf.mxu0  ;;  %v2301_v62 = vmul.f32 %v6067_v9, %v6122_v59  ;;  %v2332_v40 = vadd.f32 %v2300_v60, %v2101_v43  ;;  %v2103_v25 = vadd.f32 %v6087_v15, %v1713_v4  ;;  %v2370_v35 = vadd.f32 %v6085_v22, %v2331_v18 }
 0x27d   : > { %v2328_v2 = vadd.f32 %v2296_v41, %v2097_v51  ;;  %v2096_v39 = vadd.f32 %v1985_v26, %v1706_v11  ;;  %4013 = vmatprep.mubr.f32.mxu1 %v2394_v8  ;;  %v2364_v12 = vadd.f32 %v6085_v22, %v2325_v34  ;;  %v2397_v10 = vmax.f32 %v2365_v28, 0.0  ;;  %v1715_v11 = vld [vmem:[#allocation2 + $0x90] sm:$0xff]  ;;  %v2055_v51 = vpop.f32.mrf.mxu1 }
 0x27e   : > { %v3944_v47 = vpop.f32.mrf.mxu0  ;;  %4014 = vmatmul.mubr.f32.gmra.mxu1 %v2395_v55  ;;  %v2333_v3 = vadd.f32 %v2301_v62, %v2102_v42  ;;  %v2104_v41 = vadd.f32 %v6107_v36, %v1714_v23  ;;  %v1716_v34 = vld [vmem:[#allocation2 + $0x70] sm:$0xff]  ;;  %v2303_v15 = vmul.f32 %v6067_v9, %v6135_v13  ;;  %v2334_v8 = vadd.f32 %v2302_v7, %v2103_v25  ;;  %v2245_v28 = vpop.permute.xlu1 %2244  ;;  %v1717_v36 = vld [vmem:[#allocation2 + $0xc0] sm:$0xff] }
 0x27f   : > { %v2327_v32 = vadd.f32 %v2295_v44, %v2096_v39  ;;  %v2099_v50 = vadd.f32 %v3944_v47, %v1709_v27  ;;  %v2396_v31 = vmax.f32 %v2364_v12, 0.0  ;;  %v2367_v61 = vadd.f32 %v6085_v22, %v2328_v2  ;;  %v3965_v30 = vpop.f32.mrf.mxu1 }
 0x280   : > { %v1995_v21 = vpop.f32.mrf.mxu0  ;;  %v2105_v44 = vadd.f32 %v6097_v5, %v1715_v11  ;;  %v2371_v27 = vadd.f32 %v6085_v22, %v2332_v40  ;;  %v2335_v29 = vadd.f32 %v2303_v15, %v2104_v41  ;;  %v2106_v2 = vadd.f32 %v6127_v16, %v1716_v34  ;;  %v2250_v5 = vpop.permute.xlu0 %2249  ;;  %v1719_v16 = vld [vmem:[#allocation2 + $0xd0] sm:$0xff] }
 0x281   : > { %v2330_v33 = vadd.f32 %v2298_v46, %v2099_v50  ;;  %v2098_v0 = vadd.f32 %v1995_v21, %v1708_v57  ;;  %4016 = vmatprep.mubr.f32.mxu1 %v2396_v31  ;;  %v2366_v38 = vadd.f32 %v6085_v22, %v2327_v32  ;;  %v2399_v14 = vmax.f32 %v2367_v61, 0.0  ;;  %v1718_v46 = vld [vmem:[#allocation2 + $0xa8] sm:$0xff]  ;;  %v2065_v43 = vpop.f32.mrf.mxu1 }
 0x282   : > { %4017 = vmatmul.mubr.f32.gmra.mxu1 %v2397_v10  ;;  %v2402_v39 = vmax.f32 %v2370_v35, 0.0  ;;  %v2372_v55 = vadd.f32 %v6085_v22, %v2333_v3  ;;  %v2304_v12 = vmul.f32 %v6067_v9, %v2225_v17  ;;  %v2305_v13 = vmul.f32 %v6067_v9, %v2230_v20  ;;  %v2255_v10 = vpop.permute.xlu1 %2254  ;;  %v1724_v35 = vld [vmem:[#allocation2 + $0x20] sm:$0xff] }
 0x283   : > { %v2329_v54 = vadd.f32 %v2297_v58, %v2098_v0  ;;  %v2398_v56 = vmax.f32 %v2366_v38, 0.0  ;;  %v2369_v1 = vadd.f32 %v6085_v22, %v2330_v33  ;;  %v2107_v57 = vadd.f32 %v6117_v19, %v1717_v36 }
 0x284   : > { %v2336_v47 = vadd.f32 %v2304_v12, %v2105_v44  ;;  %v2403_v58 = vmax.f32 %v2371_v27, 0.0  ;;  %v2373_v48 = vadd.f32 %v6085_v22, %v2334_v8  ;;  %v2337_v32 = vadd.f32 %v2305_v13, %v2106_v2  ;;  %v2260_v23 = vpop.permute.xlu0 %2259 }
 0x285   : > { %4019 = vmatprep.mubr.f32.mxu1 %v2398_v56  ;;  %v2368_v24 = vadd.f32 %v6085_v22, %v2329_v54  ;;  %v2401_v26 = vmax.f32 %v2369_v1, 0.0  ;;  %v2108_v50 = vadd.f32 %v6148_v49, %v1718_v46  ;;  %v2404_v31 = vmax.f32 %v2372_v55, 0.0  ;;  %v1721_v49 = vld [vmem:[#allocation2 + $0x28] sm:$0xff]  ;;  %v1722_v54 = vld [vmem:[#allocation2 + $0xa0] sm:$0xff]  ;;  %v3968_v56 = vpop.f32.mrf.mxu1 }
 0x286   : > { %4020 = vmatmul.mubr.f32.gmra.mxu1 %v2399_v14  ;;  %v2374_v17 = vadd.f32 %v6085_v22, %v2335_v29  ;;  %v2306_v60 = vmul.f32 %v6067_v9, %v2235_v53  ;;  %v2307_v21 = vmul.f32 %v6067_v9, %v2240_v45  ;;  %v2109_v20 = vadd.f32 %v6137_v6, %v1719_v16  ;;  %v2265_v25 = vpop.permute.xlu1 %2264 }
 0x287   : > { %v2400_v59 = vmax.f32 %v2368_v24, 0.0  ;;  %v2405_v33 = vmax.f32 %v2373_v48, 0.0  ;;  %v2375_v0 = vadd.f32 %v6085_v22, %v2336_v47  ;;  %v2110_v61 = vadd.f32 %v2055_v51, %v1720_v37  ;;  %v1723_v24 = vld [vmem:[#allocation2 + $0xf8] sm:$0xff]  ;;  %v2075_v45 = vpop.f32.mrf.mxu1 }
 0x288   : > { %v2338_v19 = vadd.f32 %v2306_v60, %v2107_v57  ;;  %v2339_v38 = vadd.f32 %v2307_v21, %v2108_v50  ;;  %v2406_v18 = vmax.f32 %v2374_v17, 0.0  ;;  %v2376_v4 = vadd.f32 %v6085_v22, %v2337_v32  ;;  %v2270_v51 = vpop.permute.xlu0 %2269  ;;  %v2698_v21 = vld [vmem:[#allocation7] sm:$0xff] }
 0x289   : > { %4022 = vmatprep.mubr.f32.mxu1 %v2400_v59  ;;  %v2308_v42 = vmul.f32 %v6067_v9, %v2245_v28  ;;  %v2309_v7 = vmul.f32 %v6067_v9, %v2250_v5  ;;  %v2111_v6 = vadd.f32 %v6158_v63, %v1721_v49  ;;  %v2407_v53 = vmax.f32 %v2375_v0, 0.0 }
 0x28a   : > { %4023 = vmatmul.mubr.f32.gmra.mxu1 %v2401_v26  ;;  %v2377_v40 = vadd.f32 %v6085_v22, %v2338_v19  ;;  %v2112_v1 = vadd.f32 %v2065_v43, %v1722_v54  ;;  %v2408_v3 = vmax.f32 %v2376_v4, 0.0  ;;  %v2378_v11 = vadd.f32 %v6085_v22, %v2339_v38  ;;  %v1725_v26 = vld [vmem:[#allocation2 + $0x98] sm:$0xff]  ;;  %v2275_v2 = vpop.permute.xlu1 %2274  ;;  %v2699_v43 = vld [vmem:[#allocation7 + $0x8] sm:$0xff] }
 0x28b   : > { %4025 = vmatprep.mubr.f32.mxu1 %v2402_v39  ;;  %v2340_v62 = vadd.f32 %v2308_v42, %v2109_v20  ;;  %v2341_v14 = vadd.f32 %v2309_v7, %v2110_v61  ;;  %v2310_v41 = vmul.f32 %v6067_v9, %v2255_v10  ;;  %v2311_v34 = vmul.f32 %v6067_v9, %v2260_v23  ;;  %v6205_v10 = vld [vmem:[%s7178_s28] ss:$0 sm:$0xff] }
 0x28c   : > { %v2113_v59 = vadd.f32 %v3965_v30, %v1723_v24  ;;  %v2409_v15 = vmax.f32 %v2377_v40, 0.0  ;;  %v2114_v27 = vadd.f32 %v2075_v45, %v1724_v35  ;;  %v2410_v28 = vmax.f32 %v2378_v11, 0.0 }
 0x28d   : > { %v2342_v63 = vadd.f32 %v2310_v41, %v2111_v6  ;;  %v2379_v8 = vadd.f32 %v6085_v22, %v2340_v62  ;;  %v2343_v44 = vadd.f32 %v2311_v34, %v2112_v1  ;;  %v2380_v29 = vadd.f32 %v6085_v22, %v2341_v14 }
 0x28e   : > { %4026 = vmatmul.mubr.f32.gmra.mxu1 %v2403_v58  ;;  %v2312_v36 = vmul.f32 %v6067_v9, %v2265_v25  ;;  %v2313_v39 = vmul.f32 %v6067_v9, %v2270_v51  ;;  %v2115_v12 = vadd.f32 %v3968_v56, %v1725_v26  ;;  %v2314_v57 = vmul.f32 %v6067_v9, %v2275_v2  ;;  %v2700_v9 = vld [vmem:[#allocation7 + $0x10] sm:$0xff] }
 0x28f   : > { %4028 = vmatprep.mubr.f32.mxu1 %v2404_v31  ;;  %v2411_v46 = vmax.f32 %v2379_v8, 0.0  ;;  %v2381_v30 = vadd.f32 %v6085_v22, %v2342_v63  ;;  %v2412_v5 = vmax.f32 %v2380_v29, 0.0  ;;  %v2382_v47 = vadd.f32 %v6085_v22, %v2343_v44  ;;  %4075 = vmatprep.subr.mxu0 %v2700_v9 }
 0x290   : > { %v2344_v55 = vadd.f32 %v2312_v36, %v2113_v59  ;;  %v2345_v13 = vadd.f32 %v2313_v39, %v2114_v27  ;;  %v2346_v58 = vadd.f32 %v2314_v57, %v2115_v12  ;;  %4076 = vmatpush3.msra.mxu0 %v2700_v9 }
 0x291   : > { %v2413_v48 = vmax.f32 %v2381_v30, 0.0  ;;  %v2414_v16 = vmax.f32 %v2382_v47, 0.0  ;;  %4077 = vmatprep.subr.mxu0 %v2699_v43 }
 0x292   : > { %4029 = vmatmul.mubr.f32.gmra.mxu1 %v2405_v33  ;;  %v2383_v32 = vadd.f32 %v6085_v22, %v2344_v55  ;;  %v2384_v50 = vadd.f32 %v6085_v22, %v2345_v13  ;;  %v2385_v17 = vadd.f32 %v6085_v22, %v2346_v58  ;;  %4078 = vmatpush3.msra.mxu0 %v2699_v43 }
 0x293   : > { %4031 = vmatprep.mubr.f32.mxu1 %v2406_v18  ;;  %4079 = vmatprep.subr.mxu0 %v2698_v21 }
 0x294   : > { %v2415_v31 = vmax.f32 %v2383_v32, 0.0  ;;  %v2416_v60 = vmax.f32 %v2384_v50, 0.0  ;;  %v2417_v37 = vmax.f32 %v2385_v17, 0.0  ;;  %4080 = vmatpush3.msra.mxu0 %v2698_v21 }
 0x296   : > { %4032 = vmatmul.mubr.f32.gmra.mxu1 %v2407_v53 }
 0x297   : > { %4034 = vmatprep.mubr.f32.mxu1 %v2408_v3 }
 0x29a   : > { %4035 = vmatmul.mubr.f32.gmra.mxu1 %v2409_v15 }
 0x29b   : > { %4037 = vmatprep.mubr.f32.mxu1 %v2410_v28 }
 0x29e   : > { %4038 = vmatmul.mubr.f32.gmra.mxu1 %v2411_v46 }
 0x29f   : > { %4040 = vmatprep.mubr.f32.mxu1 %v2412_v5 }
 0x2a2   : > { %4041 = vmatmul.mubr.f32.gmra.mxu1 %v2413_v48 }
 0x2a3   : > { %4043 = vmatprep.mubr.f32.mxu1 %v2414_v16 }
 0x2a6   : > { %4044 = vmatmul.mubr.f32.gmra.mxu1 %v2415_v31 }
 0x2a7   : > { %4046 = vmatprep.mubr.f32.mxu1 %v2416_v60 }
 0x2aa   : > { %4047 = vmatmul.mubr.f32.gmra.mxu1 %v2417_v37 }
 0x32e   : > { %v4003_v22 = vpop.f32.mrf.mxu1 }
 0x32f   : > { %v2513_v19 = vadd.f32 %v4003_v22, %v6205_v10 }
 0x330   : > { %v2507_v20 = vpop.f32.mrf.mxu1 }
 0x331   : > { %v2508_v33 = vadd.f32 %v6205_v10, %v2507_v20  ;;  %v2667_v49 = vmax.f32 %v2513_v19, 0.0 }
 0x332   : > { %v4006_v0 = vpop.f32.mrf.mxu1 }
 0x333   : > { %v2666_v38 = vmax.f32 %v2508_v33, 0.0  ;;  %v2523_v61 = vadd.f32 %v4006_v0, %v6205_v10 }
 0x334   : > { %v2517_v18 = vpop.f32.mrf.mxu1 }
 0x335   : > { %v2518_v4 = vadd.f32 %v6205_v10, %v2517_v18  ;;  %4081 = vmatprep.mubr.f32.mxu0 %v2666_v38  ;;  %v2669_v54 = vmax.f32 %v2523_v61, 0.0 }
 0x336   : > { %v4009_v42 = vpop.f32.mrf.mxu1  ;;  %4082 = vmatmul.mubr.f32.vlgmr.msra.gmra.mxu0 %v2667_v49 }
 0x337   : > { %v2668_v23 = vmax.f32 %v2518_v4, 0.0  ;;  %v2533_v56 = vadd.f32 %v4009_v42, %v6205_v10 }
 0x338   : > { %v2527_v7 = vpop.f32.mrf.mxu1 }
 0x339   : > { %v2528_v62 = vadd.f32 %v6205_v10, %v2527_v7  ;;  %4084 = vmatprep.mubr.f32.mxu0 %v2668_v23  ;;  %v2671_v40 = vmax.f32 %v2533_v56, 0.0 }
 0x33a   : > { %v4012_v6 = vpop.f32.mrf.mxu1  ;;  %4085 = vmatmul.mubr.f32.gmra.mxu0 %v2669_v54 }
 0x33b   : > { %v2670_v53 = vmax.f32 %v2528_v62, 0.0  ;;  %v2543_v25 = vadd.f32 %v4012_v6, %v6205_v10 }
 0x33c   : > { %v2537_v14 = vpop.f32.mrf.mxu1 }
 0x33d   : > { %v2538_v24 = vadd.f32 %v6205_v10, %v2537_v14  ;;  %4087 = vmatprep.mubr.f32.mxu0 %v2670_v53  ;;  %v2673_v11 = vmax.f32 %v2543_v25, 0.0 }
 0x33e   : > { %v4015_v1 = vpop.f32.mrf.mxu1  ;;  %4088 = vmatmul.mubr.f32.gmra.mxu0 %v2671_v40 }
 0x33f   : > { %v2672_v3 = vmax.f32 %v2538_v24, 0.0  ;;  %v2553_v41 = vadd.f32 %v4015_v1, %v6205_v10 }
 0x340   : > { %v2547_v35 = vpop.f32.mrf.mxu1 }
 0x341   : > { %v2548_v45 = vadd.f32 %v6205_v10, %v2547_v35  ;;  %4090 = vmatprep.mubr.f32.mxu0 %v2672_v3  ;;  %v2675_v63 = vmax.f32 %v2553_v41, 0.0 }
 0x342   : > { %v4018_v34 = vpop.f32.mrf.mxu1  ;;  %4091 = vmatmul.mubr.f32.gmra.mxu0 %v2673_v11 }
 0x343   : > { %v2674_v51 = vmax.f32 %v2548_v45, 0.0  ;;  %v2563_v59 = vadd.f32 %v4018_v34, %v6205_v10 }
 0x344   : > { %v2557_v15 = vpop.f32.mrf.mxu1 }
 0x345   : > { %v2558_v8 = vadd.f32 %v6205_v10, %v2557_v15  ;;  %4093 = vmatprep.mubr.f32.mxu0 %v2674_v51  ;;  %v2677_v27 = vmax.f32 %v2563_v59, 0.0 }
 0x346   : > { %v4021_v44 = vpop.f32.mrf.mxu1  ;;  %4094 = vmatmul.mubr.f32.gmra.mxu0 %v2675_v63 }
 0x347   : > { %v2676_v26 = vmax.f32 %v2558_v8, 0.0  ;;  %v2573_v28 = vadd.f32 %v4021_v44, %v6205_v10  ;;  %v6242_v44 = vld [vmem:[%s7179_s8] ss:$0 sm:$0xff] }
 0x348   : > { %v2567_v29 = vpop.f32.mrf.mxu1 }
 0x349   : > { %v2568_v36 = vadd.f32 %v6205_v10, %v2567_v29  ;;  %4096 = vmatprep.mubr.f32.mxu0 %v2676_v26  ;;  %v2679_v55 = vmax.f32 %v2573_v28, 0.0 }
 0x34a   : > { %v4024_v2 = vpop.f32.mrf.mxu1  ;;  %4097 = vmatmul.mubr.f32.gmra.mxu0 %v2677_v27 }
 0x34b   : > { %v2678_v39 = vmax.f32 %v2568_v36, 0.0  ;;  %v2583_v12 = vadd.f32 %v4024_v2, %v6205_v10 }
 0x34c   : > { %v2577_v46 = vpop.f32.mrf.mxu1 }
 0x34d   : > { %v2578_v30 = vadd.f32 %v6205_v10, %v2577_v46  ;;  %4099 = vmatprep.mubr.f32.mxu0 %v2678_v39  ;;  %v2681_v47 = vmax.f32 %v2583_v12, 0.0 }
 0x34e   : > { %v4027_v13 = vpop.f32.mrf.mxu1  ;;  %4100 = vmatmul.mubr.f32.gmra.mxu0 %v2679_v55 }
 0x34f   : > { %v2680_v5 = vmax.f32 %v2578_v30, 0.0  ;;  %v2593_v57 = vadd.f32 %v4027_v13, %v6205_v10 }
 0x350   : > { %v2587_v58 = vpop.f32.mrf.mxu1 }
 0x351   : > { %v2588_v48 = vadd.f32 %v6205_v10, %v2587_v58  ;;  %4102 = vmatprep.mubr.f32.mxu0 %v2680_v5  ;;  %v2683_v50 = vmax.f32 %v2593_v57, 0.0 }
 0x352   : > { %v4030_v32 = vpop.f32.mrf.mxu1  ;;  %4103 = vmatmul.mubr.f32.gmra.mxu0 %v2681_v47 }
 0x353   : > { %v2682_v16 = vmax.f32 %v2588_v48, 0.0  ;;  %v2603_v31 = vadd.f32 %v4030_v32, %v6205_v10 }
 0x354   : > { %v2597_v17 = vpop.f32.mrf.mxu1 }
 0x355   : > { %v2598_v60 = vadd.f32 %v6205_v10, %v2597_v17  ;;  %4105 = vmatprep.mubr.f32.mxu0 %v2682_v16  ;;  %v2685_v43 = vmax.f32 %v2603_v31, 0.0 }
 0x356   : > { %v4033_v37 = vpop.f32.mrf.mxu1  ;;  %4106 = vmatmul.mubr.f32.gmra.mxu0 %v2683_v50 }
 0x357   : > { %v2684_v9 = vmax.f32 %v2598_v60, 0.0  ;;  %v2613_v21 = vadd.f32 %v4033_v37, %v6205_v10 }
 0x358   : > { %v2607_v22 = vpop.f32.mrf.mxu1 }
 0x359   : > { %v2608_v19 = vadd.f32 %v6205_v10, %v2607_v22  ;;  %4108 = vmatprep.mubr.f32.mxu0 %v2684_v9  ;;  %v2687_v0 = vmax.f32 %v2613_v21, 0.0  ;;  %v3397_v9 = vlaneseq }
 0x35a   : > { %v4036_v20 = vpop.f32.mrf.mxu1  ;;  %4109 = vmatmul.mubr.f32.gmra.mxu0 %v2685_v43 }
 0x35b   : > { %v2686_v33 = vmax.f32 %v2608_v19, 0.0  ;;  %v2623_v38 = vadd.f32 %v4036_v20, %v6205_v10 }
 0x35c   : > { %v2617_v49 = vpop.f32.mrf.mxu1 }
 0x35d   : > { %v2618_v61 = vadd.f32 %v6205_v10, %v2617_v49  ;;  %4111 = vmatprep.mubr.f32.mxu0 %v2686_v33  ;;  %v2689_v42 = vmax.f32 %v2623_v38, 0.0  ;;  %v2946_v33 = vld [vmem:[%s7180_s14] sm:$0x1]  ;;  %v3398_v49 = vshrl.u32 %v3397_v9, 7 }
 0x35e   : > { %v4039_v18 = vpop.f32.mrf.mxu1  ;;  %4112 = vmatmul.mubr.f32.gmra.mxu0 %v2687_v0  ;;  %vm2947_vm4 = vcmp.gt.f32.partialorder %v2946_v33, 0.5 }
 0x35f   : > { %v2688_v4 = vmax.f32 %v2618_v61, 0.0  ;;  %v2633_v23 = vadd.f32 %v4039_v18, %v6205_v10 }
 0x360   : > { %v2627_v54 = vpop.f32.mrf.mxu1 }
 0x361   : > { %v2628_v56 = vadd.f32 %v6205_v10, %v2627_v54  ;;  %4114 = vmatprep.mubr.f32.mxu0 %v2688_v4  ;;  %v2691_v6 = vmax.f32 %v2633_v23, 0.0 }
 0x362   : > { %v4042_v7 = vpop.f32.mrf.mxu1  ;;  %4115 = vmatmul.mubr.f32.gmra.mxu0 %v2689_v42 }
 0x363   : > { %v2690_v62 = vmax.f32 %v2628_v56, 0.0  ;;  %v2643_v53 = vadd.f32 %v4042_v7, %v6205_v10 }
 0x364   : > { %v2637_v40 = vpop.f32.mrf.mxu1 }
 0x365   : > { %v2638_v25 = vadd.f32 %v6205_v10, %v2637_v40  ;;  %4117 = vmatprep.mubr.f32.mxu0 %v2690_v62  ;;  %v2693_v1 = vmax.f32 %v2643_v53, 0.0  ;;  %v3399_v53 = vsub.s32 0, %v3398_v49 }
 0x366   : > { %v4045_v14 = vpop.f32.mrf.mxu1  ;;  %4118 = vmatmul.mubr.f32.gmra.mxu0 %v2691_v6 }
 0x367   : > { %v2692_v24 = vmax.f32 %v2638_v25, 0.0  ;;  %v2653_v3 = vadd.f32 %v4045_v14, %v6205_v10  ;;  %v3396_v14 = vsel %vm2947_vm4, 1, %v4728_v52 }
 0x368   : > { %v2647_v11 = vpop.f32.mrf.mxu1 }
 0x369   : > { %v2648_v41 = vadd.f32 %v6205_v10, %v2647_v11  ;;  %4120 = vmatprep.mubr.f32.mxu0 %v2692_v24  ;;  %v2695_v34 = vmax.f32 %v2653_v3, 0.0 }
 0x36a   : > { %v4048_v35 = vpop.f32.mrf.mxu1  ;;  %4121 = vmatmul.mubr.f32.gmra.mxu0 %v2693_v1 }
 0x36b   : > { %v2694_v45 = vmax.f32 %v2648_v41, 0.0  ;;  %v2663_v51 = vadd.f32 %v4048_v35, %v6205_v10  ;;  %v6293_v35 = vrot.slane %v3396_v14, %v3399_v53 }
 0x36c   : > { %v2657_v63 = vpop.f32.mrf.mxu1 }
 0x36d   : > { %v2658_v59 = vadd.f32 %v6205_v10, %v2657_v63  ;;  %4123 = vmatprep.mubr.f32.mxu0 %v2694_v45  ;;  %v2697_v8 = vmax.f32 %v2663_v51, 0.0  ;;  %vm3401_vm5 = vcmp.eq.s32.totalorder %v6293_v35, 1 }
 0x36e   : > { %4124 = vmatmul.mubr.f32.gmra.mxu0 %v2695_v34 }
 0x36f   : > { %v2696_v15 = vmax.f32 %v2658_v59, 0.0 }
 0x371   : > { %4126 = vmatprep.mubr.f32.mxu0 %v2696_v15 }
 0x372   : > { %4127 = vmatmul.mubr.f32.gmra.mxu0 %v2697_v8 }
 0x3f6   : > { %v4083_v26 = vpop.f32.mrf.mxu0 }
 0x3f7   : > { %v6245_v27 = vadd.f32 %v4083_v26, %v6242_v44 }
 0x3f8   : > { %v2787_v28 = vpop.f32.mrf.mxu0 }
 0x3f9   : > { %v2981_v29 = vmin.f32 %v6245_v27, 20.0  ;;  %v6249_v10 = vadd.f32 %v6242_v44, %v2787_v28  ;;  %vm2949_vm6 = vcmp.gt.f32.partialorder %v6245_v27, 20.0 }
 0x3fa   : > { %v4086_v36 = vpop.f32.mrf.mxu0 }
 0x3fb   : > { %v3014_v2 = vmul.f32 1.442695, %v2981_v29  ;;  %v2980_v39 = vmin.f32 %v6249_v10, 20.0  ;;  %v6253_v55 = vadd.f32 %v4086_v36, %v6242_v44  ;;  %vm2948_vm8 = vcmp.gt.f32.partialorder %v6249_v10, 20.0 }
 0x3fc   : > { %v2797_v12 = vpop.f32.mrf.mxu0 }
 0x3fd   : > { %4414 = vpow2.f32 %v3014_v2  ;;  %v3012_v46 = vmul.f32 1.442695, %v2980_v39  ;;  %v2983_v30 = vmin.f32 %v6253_v55, 20.0  ;;  %v6257_v13 = vadd.f32 %v6242_v44, %v2797_v12 }
 0x3fe   : > { %v4089_v5 = vpop.f32.mrf.mxu0  ;;  %vm2951_vm10 = vcmp.gt.f32.partialorder %v6253_v55, 20.0 }
 0x3ff   : > { %4416 = vpow2.f32 %v3012_v46  ;;  %v3018_v47 = vmul.f32 1.442695, %v2983_v30  ;;  %v6260_v57 = vadd.f32 %v4089_v5, %v6242_v44  ;;  %v2982_v58 = vmin.f32 %v6257_v13, 20.0 }
 0x400   : > { %v2807_v48 = vpop.f32.mrf.mxu0  ;;  %vm2950_vm13 = vcmp.gt.f32.partialorder %v6257_v13, 20.0 }
 0x401   : > { %4418 = vpow2.f32 %v3018_v47  ;;  %v2985_v32 = vmin.f32 %v6260_v57, 20.0  ;;  %v6265_v16 = vadd.f32 %v6242_v44, %v2807_v48  ;;  %v3016_v50 = vmul.f32 1.442695, %v2982_v58 }
 0x402   : > { %v4092_v31 = vpop.f32.mrf.mxu0  ;;  %vm2953_vm15 = vcmp.gt.f32.partialorder %v6260_v57, 20.0 }
 0x403   : > { %v3022_v17 = vmul.f32 1.442695, %v2985_v32  ;;  %v2984_v60 = vmin.f32 %v6265_v16, 20.0  ;;  %v6269_v37 = vadd.f32 %v4092_v31, %v6242_v44  ;;  %4420 = vpow2.f32 %v3016_v50 }
 0x404   : > { %v2817_v43 = vpop.f32.mrf.mxu0  ;;  %vm2952_vm1 = vcmp.gt.f32.partialorder %v6265_v16, 20.0 }
 0x405   : > { %4422 = vpow2.f32 %v3022_v17  ;;  %v3020_v21 = vmul.f32 1.442695, %v2984_v60  ;;  %v2987_v22 = vmin.f32 %v6269_v37, 20.0  ;;  %v6273_v19 = vadd.f32 %v6242_v44, %v2817_v43 }
 0x406   : > { %v4095_v20 = vpop.f32.mrf.mxu0  ;;  %vm2955_vm3 = vcmp.gt.f32.partialorder %v6269_v37, 20.0 }
 0x407   : > { %4424 = vpow2.f32 %v3020_v21  ;;  %v3026_v0 = vmul.f32 1.442695, %v2987_v22  ;;  %v6279_v38 = vadd.f32 %v4095_v20, %v6242_v44  ;;  %v2986_v61 = vmin.f32 %v6273_v19, 20.0 }
 0x408   : > { %v2827_v18 = vpop.f32.mrf.mxu0 }
 0x409   : > { %4426 = vpow2.f32 %v3026_v0  ;;  %v2989_v4 = vmin.f32 %v6279_v38, 20.0  ;;  %v6284_v42 = vadd.f32 %v6242_v44, %v2827_v18  ;;  %v3024_v54 = vmul.f32 1.442695, %v2986_v61 }
 0x40a   : > { %v4415_v23 = vpop.eup %4414  ;;  %v4098_v56 = vpop.f32.mrf.mxu0 }
 0x40b   : > { %v3085_v7 = vadd.f32 1.0, %v4415_v23  ;;  %v3030_v62 = vmul.f32 1.442695, %v2989_v4  ;;  %4428 = vpow2.f32 %v3024_v54  ;;  %v2988_v40 = vmin.f32 %v6284_v42, 20.0 }
 0x40c   : > { %v4417_v6 = vpop.eup %4416  ;;  %v6287_v25 = vpop.f32.mrf.mxu0  ;;  %v6291_v1 = vadd.f32 %v4098_v56, %v6242_v44  ;;  %v3088_v45 = vmul.f32 -0.5, %v4415_v23  ;;  %v3091_v15 = vand.u32 2147483647, %v4415_v23 }
 0x40d   : > { %4430 = vlog2.f32 %v3085_v7  ;;  %v3076_v24 = vadd.f32 1.0, %v4417_v6  ;;  %v3028_v11 = vmul.f32 1.442695, %v2988_v40  ;;  %v3079_v63 = vmul.f32 -0.5, %v4417_v6 }
 0x40e   : > { %v4419_v3 = vpop.eup %4418  ;;  %4432 = vpow2.f32 %v3030_v62  ;;  %v6295_v34 = vpop.f32.mrf.mxu0  ;;  %v2991_v52 = vmin.f32 %v6291_v1, 20.0  ;;  %v3089_v39 = vadd.f32 1.0, %v3088_v45  ;;  %v3082_v12 = vand.u32 2147483647, %v4417_v6 }
 0x40f   : > { %4434 = vlog2.f32 %v3076_v24  ;;  %v3103_v41 = vadd.f32 1.0, %v4419_v3  ;;  %v3106_v8 = vmul.f32 -0.5, %v4419_v3  ;;  %v3080_v5 = vadd.f32 1.0, %v3079_v63 }
 0x410   : > { %4436 = vpow2.f32 %v3028_v11  ;;  %v4421_v51 = vpop.eup %4420  ;;  %v3034_v46 = vmul.f32 1.442695, %v2991_v52  ;;  %v6299_v30 = vpop.f32.mrf.mxu0  ;;  %v3109_v47 = vand.u32 2147483647, %v4419_v3  ;;  %vm6304_vm7 = vcmp.lt.f32.partialorder %v3091_v15, 0.0004427343 }
 0x411   : > { %4438 = vlog2.f32 %v3103_v41  ;;  %v3094_v26 = vadd.f32 1.0, %v4421_v51  ;;  %v3097_v28 = vmul.f32 -0.5, %v4421_v51  ;;  %v3107_v50 = vadd.f32 1.0, %v3106_v8 }
 0x412   : > { %v4423_v59 = vpop.eup %4422  ;;  %v3100_v31 = vand.u32 2147483647, %v4421_v51  ;;  %v3090_v21 = vmul.f32 %v4415_v23, %v3089_v39  ;;  %v6311_v33 = vpop.f32.mrf.mxu0  ;;  %v3081_v49 = vmul.f32 %v4417_v6, %v3080_v5  ;;  %vm6315_vm9 = vcmp.lt.f32.partialorder %v3082_v12, 0.0004427343 }
 0x413   : > { %v3121_v29 = vadd.f32 1.0, %v4423_v59  ;;  %v3124_v36 = vmul.f32 -0.5, %v4423_v59  ;;  %4440 = vlog2.f32 %v3094_v26  ;;  %v3098_v60 = vadd.f32 1.0, %v3097_v28 }
 0x414   : > { %v4425_v2 = vpop.eup %4424  ;;  %v3127_v22 = vand.u32 2147483647, %v4423_v59  ;;  %vm6320_vm11 = vcmp.lt.f32.partialorder %v3109_v47, 0.0004427343  ;;  %v3108_v23 = vmul.f32 %v4419_v3, %v3107_v50  ;;  %vm6327_vm12 = vcmp.lt.f32.partialorder %v3100_v31, 0.0004427343 }
 0x415   : > { %4442 = vlog2.f32 %v3121_v29  ;;  %v3112_v58 = vadd.f32 1.0, %v4425_v2  ;;  %v3115_v17 = vmul.f32 -0.5, %v4425_v2  ;;  %v3125_v9 = vadd.f32 1.0, %v3124_v36 }
 0x416   : > { %v6302_v48 = vpop.eup %4426  ;;  %v3118_v56 = vand.u32 2147483647, %v4425_v2  ;;  %v3099_v53 = vmul.f32 %v4421_v51, %v3098_v60  ;;  %vm6334_vm14 = vcmp.lt.f32.partialorder %v3127_v22, 0.0004427343  ;;  %v6340_v51 = vpop.f32.mrf.mxu0  ;;  %v6349_v15 = vadd.f32 %v6242_v44, %v6287_v25 }
 0x417   : > { %4444 = vlog2.f32 %v3112_v58  ;;  %v3139_v43 = vadd.f32 1.0, %v6302_v48  ;;  %v3142_v20 = vmul.f32 -0.5, %v6302_v48  ;;  %v3116_v54 = vadd.f32 1.0, %v3115_v17 }
 0x418   : > { %4446 = vpow2.f32 %v3034_v46  ;;  %v6313_v0 = vpop.eup %4428  ;;  %v6331_v14 = vmul.f32 %v4423_v59, %v3125_v9  ;;  %v3145_v41 = vand.u32 2147483647, %v6302_v48  ;;  %v6353_v8 = vadd.f32 %v6295_v34, %v6242_v44  ;;  %v6380_v58 = vpop.f32.mrf.mxu0 }
 0x419   : > { %4448 = vlog2.f32 %v3139_v43  ;;  %v3130_v7 = vadd.f32 1.0, %v6313_v0  ;;  %v3143_v3 = vadd.f32 1.0, %v3142_v20  ;;  %v3117_v29 = vmul.f32 %v4425_v2, %v3116_v54 }
 0x41a   : > { %v4431_v4 = vpop.eup %4430  ;;  %vm6358_vm0 = vcmp.lt.f32.partialorder %v3118_v56, 0.0004427343  ;;  %v3133_v39 = vmul.f32 -0.5, %v6313_v0  ;;  %v3136_v2 = vand.u32 2147483647, %v6313_v0  ;;  %v2990_v60 = vmin.f32 %v6349_v15, 20.0 }
 0x41b   : > { %v6325_v62 = vpop.eup %4432  ;;  %v3087_v6 = vmul.f32 0.6931472, %v4431_v4  ;;  %4450 = vlog2.f32 %v3130_v7  ;;  %vm6374_vm2 = vcmp.lt.f32.partialorder %v3145_v41, 0.0004427343  ;;  %v3144_v17 = vmul.f32 %v6302_v48, %v3143_v3 }
 0x41c   : > { %v4435_v24 = vpop.eup %4434  ;;  %v3157_v45 = vadd.f32 1.0, %v6325_v62  ;;  %v3134_v22 = vadd.f32 1.0, %v3133_v39  ;;  %vm6397_vm4 = vcmp.lt.f32.partialorder %v3136_v2, 0.0004427343  ;;  %v3032_v48 = vmul.f32 1.442695, %v2990_v60 }
 0x41d   : > { %v6342_v63 = vpop.eup %4436  ;;  %v3093_v52 = vsel %vm6304_vm7, %v3090_v21, %v3087_v6  ;;  %v3078_v59 = vmul.f32 0.6931472, %v4435_v24  ;;  %v2993_v54 = vmin.f32 %v6353_v8, 20.0  ;;  %vm2957_vm7 = vcmp.gt.f32.partialorder %v6279_v38, 20.0 }
 0x41e   : > { %v4439_v26 = vpop.eup %4438  ;;  %v3365_v28 = vsel %vm2949_vm6, %v6245_v27, %v3093_v52  ;;  %4452 = vlog2.f32 %v3157_v45  ;;  %v3148_v47 = vadd.f32 1.0, %v6342_v63  ;;  %vm2954_vm6 = vcmp.gt.f32.partialorder %v6273_v19, 20.0 }
 0x41f   : > { %v3403_v25 = vsel %vm3401_vm5, %v3365_v28, %v6245_v27  ;;  %v3084_v34 = vsel %vm6315_vm9, %v3081_v49, %v3078_v59  ;;  %v3105_v12 = vmul.f32 0.6931472, %v4439_v26  ;;  %v3160_v27 = vmul.f32 -0.5, %v6325_v62 }
 0x420   : > { %3435 = vst [vmem:[%s4977_s6 + $0x8] sm:$0xff] %v3403_v25  ;;  %v3364_v46 = vsel %vm2948_vm8, %v6249_v10, %v3084_v34  ;;  %v4441_v32 = vpop.eup %4440  ;;  %4454 = vlog2.f32 %v3148_v47  ;;  %v3135_v41 = vmul.f32 %v6313_v0, %v3134_v22  ;;  %v3151_v52 = vmul.f32 -0.5, %v6342_v63 }
 0x421   : > { %v3402_v50 = vsel %vm3401_vm5, %v3364_v46, %v6249_v10  ;;  %v3111_v31 = vsel %vm6320_vm11, %v3108_v23, %v3105_v12  ;;  %v3096_v21 = vmul.f32 0.6931472, %v4441_v32  ;;  %v3161_v4 = vadd.f32 1.0, %v3160_v27 }
 0x422   : > { %v4443_v9 = vpop.eup %4442  ;;  %3434 = vst [vmem:[%s4977_s6] sm:$0xff] %v3402_v50  ;;  %v3367_v43 = vsel %vm2951_vm10, %v6253_v55, %v3111_v31  ;;  %v3163_v23 = vand.u32 2147483647, %v6325_v62  ;;  %4456 = vpow2.f32 %v3032_v48  ;;  %v3038_v26 = vmul.f32 1.442695, %v2993_v54 }
 0x423   : > { %v3405_v10 = vsel %vm3401_vm5, %v3367_v43, %v6253_v55  ;;  %v3123_v20 = vmul.f32 0.6931472, %v4443_v9  ;;  %v3102_v18 = vsel %vm6327_vm12, %v3099_v53, %v3096_v21  ;;  %v6407_v55 = vpop.f32.mrf.mxu0  ;;  %v3162_v36 = vmul.f32 %v6325_v62, %v3161_v4 }
 0x424   : > { %v4445_v61 = vpop.eup %4444  ;;  %3437 = vst [vmem:[%s4977_s6 + $0x18] sm:$0xff] %v3405_v10  ;;  %v3366_v7 = vsel %vm2950_vm13, %v6257_v13, %v3102_v18  ;;  %vm6437_vm8 = vcmp.lt.f32.partialorder %v3163_v23, 0.0004427343  ;;  %v6449_v25 = vadd.f32 %v6242_v44, %v6299_v30  ;;  %vm2956_vm9 = vcmp.gt.f32.partialorder %v6284_v42, 20.0 }
 0x425   : > { %v6409_v56 = vpop.eup %4446  ;;  %v3129_v6 = vsel %vm6334_vm14, %v6331_v14, %v3123_v20  ;;  %v3114_v53 = vmul.f32 0.6931472, %v4445_v61  ;;  %v3404_v24 = vsel %vm3401_vm5, %v3366_v7, %v6257_v13  ;;  %v4110_v28 = vpop.f32.mrf.mxu0  ;;  %v3154_v2 = vand.u32 2147483647, %v6342_v63 }
 0x426   : > { %v4449_v40 = vpop.eup %4448  ;;  %v3369_v3 = vsel %vm2953_vm15, %v6260_v57, %v3129_v6  ;;  %v3175_v45 = vadd.f32 1.0, %v6409_v56  ;;  %3436 = vst [vmem:[%s4977_s6 + $0x10] sm:$0xff] %v3404_v24  ;;  %v3152_v46 = vadd.f32 1.0, %v3151_v52  ;;  %v2992_v30 = vmin.f32 %v6449_v25, 20.0 }
 0x427   : > { %v3407_v14 = vsel %vm3401_vm5, %v3369_v3, %v6260_v57  ;;  %v3120_v11 = vsel %vm6358_vm0, %v3117_v29, %v3114_v53  ;;  %v3141_v13 = vmul.f32 0.6931472, %v4449_v40  ;;  %v6463_v5 = vadd.f32 %v6311_v33, %v6242_v44  ;;  %v2877_v50 = vpop.f32.mrf.mxu0 }
 0x428   : > { %3439 = vst [vmem:[%s4977_s6 + $0x28] sm:$0xff] %v3407_v14  ;;  %v3368_v0 = vsel %vm2952_vm1, %v6265_v16, %v3120_v11  ;;  %4458 = vlog2.f32 %v3175_v45  ;;  %v4451_v39 = vpop.eup %4450  ;;  %v6470_v32 = vadd.f32 %v6242_v44, %v6340_v51  ;;  %v3178_v31 = vmul.f32 -0.5, %v6409_v56 }
 0x429   : > { %v3406_v57 = vsel %vm3401_vm5, %v3368_v0, %v6265_v16  ;;  %v3147_v29 = vsel %vm6374_vm2, %v3144_v17, %v3141_v13  ;;  %v3132_v12 = vmul.f32 0.6931472, %v4451_v39  ;;  %4460 = vpow2.f32 %v3038_v26  ;;  %v4113_v18 = vpop.f32.mrf.mxu0 }
 0x42a   : > { %3438 = vst [vmem:[%s4977_s6 + $0x20] sm:$0xff] %v3406_v57  ;;  %v3371_v34 = vsel %vm2955_vm3, %v6269_v37, %v3147_v29  ;;  %v3036_v17 = vmul.f32 1.442695, %v2992_v30  ;;  %v2995_v60 = vmin.f32 %v6463_v5, 20.0  ;;  %vm6486_vm10 = vcmp.lt.f32.partialorder %v3154_v2, 0.0004427343 }
 0x42b   : > { %v4453_v16 = vpop.eup %4452  ;;  %v3409_v62 = vsel %vm3401_vm5, %v3371_v34, %v6269_v37  ;;  %v3138_v27 = vsel %vm6397_vm4, %v3135_v41, %v3132_v12  ;;  %v6474_v37 = vadd.f32 %v6380_v58, %v6242_v44  ;;  %v2994_v43 = vmin.f32 %v6470_v32, 20.0  ;;  %v2887_v14 = vpop.f32.mrf.mxu0 }
 0x42c   : > { %3441 = vst [vmem:[%s4977_s6 + $0x38] sm:$0xff] %v3409_v62  ;;  %v3159_v47 = vmul.f32 0.6931472, %v4453_v16  ;;  %v3370_v33 = vsel %vm2954_vm6, %v6273_v19, %v3138_v27  ;;  %v3153_v10 = vmul.f32 %v6342_v63, %v3152_v46  ;;  %4462 = vpow2.f32 %v3036_v17 }
 0x42d   : > { %v3408_v51 = vsel %vm3401_vm5, %v3370_v33, %v6273_v19  ;;  %v4455_v21 = vpop.eup %4454  ;;  %v3042_v20 = vmul.f32 1.442695, %v2995_v60  ;;  %v3040_v48 = vmul.f32 1.442695, %v2994_v43  ;;  %v2997_v61 = vmin.f32 %v6474_v37, 20.0 }
 0x42e   : > { %v3165_v9 = vsel %vm6437_vm8, %v3162_v36, %v3159_v47  ;;  %3440 = vst [vmem:[%s4977_s6 + $0x30] sm:$0xff] %v3408_v51  ;;  %v3150_v49 = vmul.f32 0.6931472, %v4455_v21  ;;  %v3179_v4 = vadd.f32 1.0, %v3178_v31  ;;  %v3181_v23 = vand.u32 2147483647, %v6409_v56 }
 0x42f   : > { %v3373_v22 = vsel %vm2957_vm7, %v6279_v38, %v3165_v9  ;;  %4464 = vpow2.f32 %v3042_v20  ;;  %v6504_v63 = vadd.f32 %v6242_v44, %v6407_v55  ;;  %v6506_v54 = vpop.eup %4456  ;;  %v3046_v7 = vmul.f32 1.442695, %v2997_v61 }
 0x430   : > { %v3411_v19 = vsel %vm3401_vm5, %v3373_v22, %v6279_v38  ;;  %v3156_v38 = vsel %vm6486_vm10, %v3153_v10, %v3150_v49  ;;  %4466 = vpow2.f32 %v3040_v48  ;;  %v6511_v6 = vadd.f32 %v4110_v28, %v6242_v44 }
 0x431   : > { %3443 = vst [vmem:[%s4977_s6 + $0x48] sm:$0xff] %v3411_v19  ;;  %v3372_v53 = vsel %vm2956_vm9, %v6284_v42, %v3156_v38  ;;  %v3166_v40 = vadd.f32 1.0, %v6506_v54  ;;  %v6518_v24 = vadd.f32 %v6242_v44, %v2877_v50  ;;  %v6521_v55 = vadd.f32 %v4113_v18, %v6242_v44 }
 0x432   : > { %v3410_v3 = vsel %vm3401_vm5, %v3372_v53, %v6284_v42  ;;  %4468 = vpow2.f32 %v3046_v7  ;;  %v2996_v41 = vmin.f32 %v6504_v63, 20.0  ;;  %v3180_v13 = vmul.f32 %v6409_v56, %v3179_v4  ;;  %v4116_v56 = vpop.f32.mrf.mxu0 }
 0x433   : > { %3442 = vst [vmem:[%s4977_s6 + $0x40] sm:$0xff] %v3410_v3  ;;  %4470 = vlog2.f32 %v3166_v40  ;;  %v2999_v0 = vmin.f32 %v6511_v6, 20.0  ;;  %vm3182_vm11 = vcmp.lt.f32.partialorder %v3181_v23, 0.0004427343  ;;  %v2998_v26 = vmin.f32 %v6518_v24, 20.0 }
 0x434   : > { %v3044_v52 = vmul.f32 1.442695, %v2996_v41  ;;  %v3001_v42 = vmin.f32 %v6521_v55, 20.0  ;;  %vm2959_vm12 = vcmp.gt.f32.partialorder %v6291_v1, 20.0  ;;  %v3169_v12 = vmul.f32 -0.5, %v6506_v54 }
 0x435   : > { %v4459_v45 = vpop.eup %4458  ;;  %v3050_v29 = vmul.f32 1.442695, %v2999_v0  ;;  %v3048_v36 = vmul.f32 1.442695, %v2998_v26  ;;  %v6540_v62 = vadd.f32 %v6242_v44, %v2887_v14  ;;  %v3172_v30 = vand.u32 2147483647, %v6506_v54 }
 0x436   : > { %v3177_v11 = vmul.f32 0.6931472, %v4459_v45  ;;  %v4461_v59 = vpop.eup %4460  ;;  %4472 = vpow2.f32 %v3044_v52  ;;  %v3054_v16 = vmul.f32 1.442695, %v3001_v42  ;;  %v6544_v47 = vadd.f32 %v4116_v56, %v6242_v44 }
 0x437   : > { %v3193_v39 = vadd.f32 1.0, %v4461_v59  ;;  %v3196_v2 = vmul.f32 -0.5, %v4461_v59  ;;  %v3170_v33 = vadd.f32 1.0, %v3169_v12  ;;  %v3000_v31 = vmin.f32 %v6540_v62, 20.0 }
 0x438   : > { %v3183_v28 = vsel %vm3182_vm11, %v3180_v13, %v3177_v11  ;;  %v3199_v51 = vand.u32 2147483647, %v4461_v59  ;;  %vm2958_vm13 = vcmp.gt.f32.partialorder %v6349_v15, 20.0  ;;  %vm6556_vm14 = vcmp.lt.f32.partialorder %v3172_v30, 0.0004427343 }
 0x439   : > { %v3375_v57 = vsel %vm2959_vm12, %v6291_v1, %v3183_v28  ;;  %4474 = vlog2.f32 %v3193_v39  ;;  %v4463_v46 = vpop.eup %4462  ;;  %v3197_v60 = vadd.f32 1.0, %v3196_v2  ;;  %v3052_v10 = vmul.f32 1.442695, %v3000_v31 }
 0x43a   : > { %v3413_v34 = vsel %vm3401_vm5, %v3375_v57, %v6291_v1  ;;  %4476 = vpow2.f32 %v3050_v29  ;;  %v3184_v27 = vadd.f32 1.0, %v4463_v46  ;;  %v2897_v1 = vpop.f32.mrf.mxu0  ;;  %v3187_v58 = vmul.f32 -0.5, %v4463_v46 }
 0x43b   : > { %3445 = vst [vmem:[%s4977_s6 + $0x58] sm:$0xff] %v3413_v34  ;;  %4478 = vpow2.f32 %v3048_v36  ;;  %v3003_v20 = vmin.f32 %v6544_v47, 20.0  ;;  %v3171_v48 = vmul.f32 %v6506_v54, %v3170_v33  ;;  %vm2961_vm15 = vcmp.gt.f32.partialorder %v6353_v8, 20.0 }
 0x43c   : > { %4480 = vpow2.f32 %v3054_v16  ;;  %v6546_v50 = vpop.eup %4464  ;;  %v4119_v19 = vpop.f32.mrf.mxu0  ;;  %v3190_v61 = vand.u32 2147483647, %v4463_v46  ;;  %v6564_v18 = vadd.f32 %v6242_v44, %v2897_v1  ;;  %v3198_v23 = vmul.f32 %v4461_v59, %v3197_v60 }
 0x43d   : > { %v6549_v17 = vpop.eup %4466  ;;  %4482 = vlog2.f32 %v3184_v27  ;;  %v3211_v9 = vadd.f32 1.0, %v6546_v50  ;;  %vm6566_vm0 = vcmp.lt.f32.partialorder %v3199_v51, 0.0004427343  ;;  %v3188_v53 = vadd.f32 1.0, %v3187_v58 }
 0x43e   : > { %v3202_v43 = vadd.f32 1.0, %v6549_v17  ;;  %v3214_v40 = vmul.f32 -0.5, %v6546_v50  ;;  %v6573_v54 = vadd.f32 %v4119_v19, %v6242_v44  ;;  %v3205_v41 = vmul.f32 -0.5, %v6549_v17  ;;  %v6604_v16 = vpop.f32.mrf.mxu0 }
 0x43f   : > { %v6554_v21 = vpop.eup %4468  ;;  %4484 = vlog2.f32 %v3211_v9  ;;  %v3058_v45 = vmul.f32 1.442695, %v3003_v20  ;;  %vm6583_vm1 = vcmp.lt.f32.partialorder %v3190_v61, 0.0004427343  ;;  %v3002_v0 = vmin.f32 %v6564_v18, 20.0 }
 0x440   : > { %v4471_v49 = vpop.eup %4470  ;;  %4486 = vlog2.f32 %v3202_v43  ;;  %v3229_v7 = vadd.f32 1.0, %v6554_v21  ;;  %v3232_v52 = vmul.f32 -0.5, %v6554_v21  ;;  %vm2960_vm2 = vcmp.gt.f32.partialorder %v6449_v25, 20.0 }
 0x441   : > { %v3168_v4 = vmul.f32 0.6931472, %v4471_v49  ;;  %4488 = vpow2.f32 %v3052_v10  ;;  %v3217_v42 = vand.u32 2147483647, %v6546_v50  ;;  %v3208_v28 = vand.u32 2147483647, %v6549_v17 }
 0x442   : > { %4490 = vlog2.f32 %v3229_v7  ;;  %v3189_v36 = vmul.f32 %v4463_v46, %v3188_v53  ;;  %v3215_v56 = vadd.f32 1.0, %v3214_v40  ;;  %vm2963_vm3 = vcmp.gt.f32.partialorder %v6463_v5, 20.0 }
 0x443   : > { %v3174_v3 = vsel %vm6556_vm14, %v3171_v48, %v3168_v4  ;;  %v6578_v14 = vpop.eup %4472  ;;  %4492 = vpow2.f32 %v3058_v45  ;;  %v3235_v12 = vand.u32 2147483647, %v6554_v21  ;;  %vm2962_vm4 = vcmp.gt.f32.partialorder %v6470_v32, 20.0  ;;  %v6633_v48 = vpop.f32.mrf.mxu0 }
 0x444   : > { %v3374_v11 = vsel %vm2958_vm13, %v6349_v15, %v3174_v3  ;;  %v3220_v39 = vadd.f32 1.0, %v6578_v14  ;;  %v3233_v27 = vadd.f32 1.0, %v3232_v52  ;;  %v3056_v33 = vmul.f32 1.442695, %v3002_v0 }
 0x445   : > { %v3412_v26 = vsel %vm3401_vm5, %v3374_v11, %v6349_v15  ;;  %v3206_v15 = vadd.f32 1.0, %v3205_v41  ;;  %vm6615_vm6 = vcmp.lt.f32.partialorder %v3217_v42, 0.0004427343  ;;  %vm6619_vm7 = vcmp.lt.f32.partialorder %v3208_v28, 0.0004427343  ;;  %v6657_v0 = vpop.f32.mrf.mxu0 }
 0x446   : > { %v4475_v59 = vpop.eup %4474  ;;  %3444 = vst [vmem:[%s4977_s6 + $0x50] sm:$0xff] %v3412_v26  ;;  %4494 = vlog2.f32 %v3220_v39  ;;  %v3216_v43 = vmul.f32 %v6546_v50, %v3215_v56  ;;  %v3223_v22 = vmul.f32 -0.5, %v6578_v14  ;;  %vm2965_vm8 = vcmp.gt.f32.partialorder %v6474_v37, 20.0 }
 0x447   : > { %v6596_v57 = vpop.eup %4476  ;;  %v3195_v29 = vmul.f32 0.6931472, %v4475_v59  ;;  %v3207_v20 = vmul.f32 %v6549_v17, %v3206_v15  ;;  %vm6636_vm9 = vcmp.lt.f32.partialorder %v3235_v12, 0.0004427343  ;;  %v3226_v7 = vand.u32 2147483647, %v6578_v14 }
 0x448   : > { %v6599_v34 = vpop.eup %4478  ;;  %v3247_v2 = vadd.f32 1.0, %v6596_v57  ;;  %v3250_v19 = vmul.f32 -0.5, %v6596_v57  ;;  %v3224_v40 = vadd.f32 1.0, %v3223_v22  ;;  %v3253_v3 = vand.u32 2147483647, %v6596_v57 }
 0x449   : > { %v6606_v30 = vpop.eup %4480  ;;  %v3201_v46 = vsel %vm6566_vm0, %v3198_v23, %v3195_v29  ;;  %v3238_v1 = vadd.f32 1.0, %v6599_v34  ;;  %v3241_v4 = vmul.f32 -0.5, %v6599_v34  ;;  %vm2964_vm10 = vcmp.gt.f32.partialorder %v6504_v63, 20.0 }
 0x44a   : > { %v3377_v31 = vsel %vm2961_vm15, %v6353_v8, %v3201_v46  ;;  %4496 = vlog2.f32 %v3247_v2  ;;  %v4483_v9 = vpop.eup %4482  ;;  %v3265_v49 = vadd.f32 1.0, %v6606_v30  ;;  %v3251_v13 = vadd.f32 1.0, %v3250_v19 }
 0x44b   : > { %v3415_v58 = vsel %vm3401_vm5, %v3377_v31, %v6353_v8  ;;  %4498 = vlog2.f32 %v3238_v1  ;;  %v3186_v10 = vmul.f32 0.6931472, %v4483_v9  ;;  %v3234_v8 = vmul.f32 %v6554_v21, %v3233_v27 }
 0x44c   : > { %3447 = vst [vmem:[%s4977_s6 + $0x68] sm:$0xff] %v3415_v58  ;;  %v4485_v61 = vpop.eup %4484  ;;  %4500 = vpow2.f32 %v3056_v33  ;;  %v3244_v52 = vand.u32 2147483647, %v6599_v34  ;;  %v3242_v42 = vadd.f32 1.0, %v3241_v4  ;;  %vm2967_vm11 = vcmp.gt.f32.partialorder %v6511_v6, 20.0  ;;  %v4125_v33 = vpop.f32.mrf.mxu0 }
 0x44d   : > { %v4487_v23 = vpop.eup %4486  ;;  %v3192_v17 = vsel %vm6583_vm1, %v3189_v36, %v3186_v10  ;;  %v3213_v38 = vmul.f32 0.6931472, %v4485_v61  ;;  %4502 = vlog2.f32 %v3265_v49  ;;  %v3268_v56 = vmul.f32 -0.5, %v6606_v30 }
 0x44e   : > { %v3376_v21 = vsel %vm2960_vm2, %v6449_v25, %v3192_v17  ;;  %v3204_v53 = vmul.f32 0.6931472, %v4487_v23  ;;  %v6648_v41 = vpop.eup %4488  ;;  %vm2966_vm12 = vcmp.gt.f32.partialorder %v6518_v24, 20.0  ;;  %v3271_v12 = vand.u32 2147483647, %v6606_v30  ;;  %v2927_v4 = vpop.f32.mrf.mxu0 }
 0x44f   : > { %v3414_v45 = vsel %vm3401_vm5, %v3376_v21, %v6449_v25  ;;  %v3219_v11 = vsel %vm6615_vm6, %v3216_v43, %v3213_v38  ;;  %v4491_v59 = vpop.eup %4490  ;;  %v3256_v28 = vadd.f32 1.0, %v6648_v41  ;;  %v3225_v27 = vmul.f32 %v6578_v14, %v3224_v40 }
 0x450   : > { %3446 = vst [vmem:[%s4977_s6 + $0x60] sm:$0xff] %v3414_v45  ;;  %v3379_v26 = vsel %vm2963_vm3, %v6463_v5, %v3219_v11  ;;  %v3210_v25 = vsel %vm6619_vm7, %v3207_v20, %v3204_v53  ;;  %v3231_v36 = vmul.f32 0.6931472, %v4491_v59  ;;  %v6681_v2 = vpop.eup %4492  ;;  %vm6687_vm13 = vcmp.lt.f32.partialorder %v3226_v7, 0.0004427343 }
 0x451   : > { %v3417_v39 = vsel %vm3401_vm5, %v3379_v26, %v6463_v5  ;;  %v3378_v29 = vsel %vm2962_vm4, %v6470_v32, %v3210_v25  ;;  %4504 = vlog2.f32 %v3256_v28  ;;  %v3005_v5 = vmin.f32 %v6573_v54, 20.0  ;;  %v4128_v26 = vpop.f32.mrf.mxu0 }
 0x452   : > { %3449 = vst [vmem:[%s4977_s6 + $0x78] sm:$0xff] %v3417_v39  ;;  %v3416_v15 = vsel %vm3401_vm5, %v3378_v29, %v6470_v32  ;;  %v3237_v46 = vsel %vm6636_vm9, %v3234_v8, %v3231_v36  ;;  %v6693_v32 = vadd.f32 %v6242_v44, %v6604_v16  ;;  %v3252_v51 = vmul.f32 %v6596_v57, %v3251_v13 }
 0x453   : > { %3448 = vst [vmem:[%s4977_s6 + $0x70] sm:$0xff] %v3416_v15  ;;  %v4495_v31 = vpop.eup %4494  ;;  %v3381_v60 = vsel %vm2965_vm8, %v6474_v37, %v3237_v46  ;;  %vm6699_vm14 = vcmp.lt.f32.partialorder %v3253_v3, 0.0004427343  ;;  %v3283_v14 = vadd.f32 1.0, %v6681_v2  ;;  %vm6707_vm15 = vcmp.lt.f32.partialorder %v3244_v52, 0.0004427343 }
 0x454   : > { %v3419_v58 = vsel %vm3401_vm5, %v3381_v60, %v6474_v37  ;;  %v3222_v16 = vmul.f32 0.6931472, %v4495_v31  ;;  %vm2969_vm0 = vcmp.gt.f32.partialorder %v6521_v55, 20.0  ;;  %v3269_v22 = vadd.f32 1.0, %v3268_v56 }
 0x455   : > { %3451 = vst [vmem:[%s4977_s6 + $0x88] sm:$0xff] %v3419_v58  ;;  %v3243_v57 = vmul.f32 %v6599_v34, %v3242_v42  ;;  %vm6714_vm1 = vcmp.lt.f32.partialorder %v3271_v12, 0.0004427343  ;;  %4506 = vlog2.f32 %v3283_v14  ;;  %v3062_v19 = vmul.f32 1.442695, %v3005_v5 }
 0x456   : > { %v3228_v37 = vsel %vm6687_vm13, %v3225_v27, %v3222_v16  ;;  %v3259_v8 = vmul.f32 -0.5, %v6648_v41  ;;  %v3004_v50 = vmin.f32 %v6693_v32, 20.0  ;;  %v6727_v17 = vadd.f32 %v6633_v48, %v6242_v44  ;;  %v2937_v27 = vpop.f32.mrf.mxu0 }
 0x457   : > { %v4497_v10 = vpop.eup %4496  ;;  %v3380_v34 = vsel %vm2964_vm10, %v6504_v63, %v3228_v37  ;;  %4508 = vpow2.f32 %v3062_v19  ;;  %v3270_v53 = vmul.f32 %v6606_v30, %v3269_v22  ;;  %v3262_v11 = vand.u32 2147483647, %v6648_v41 }
 0x458   : > { %v4499_v49 = vpop.eup %4498  ;;  %v3249_v61 = vmul.f32 0.6931472, %v4497_v10  ;;  %v3418_v7 = vsel %vm3401_vm5, %v3380_v34, %v6504_v63  ;;  %v3060_v40 = vmul.f32 1.442695, %v3004_v50  ;;  %v3286_v59 = vmul.f32 -0.5, %v6681_v2 }
 0x459   : > { %v3240_v23 = vmul.f32 0.6931472, %v4499_v49  ;;  %v6729_v38 = vpop.eup %4500  ;;  %3450 = vst [vmem:[%s4977_s6 + $0x80] sm:$0xff] %v3418_v7  ;;  %v3260_v42 = vadd.f32 1.0, %v3259_v8  ;;  %v3007_v28 = vmin.f32 %v6727_v17, 20.0  ;;  %vm2968_vm2 = vcmp.gt.f32.partialorder %v6540_v62, 20.0 }
 0x45a   : > { %v3255_v21 = vsel %vm6699_vm14, %v3252_v51, %v3249_v61  ;;  %v4503_v3 = vpop.eup %4502  ;;  %v3274_v63 = vadd.f32 1.0, %v6729_v38  ;;  %v6763_v39 = vadd.f32 %v6242_v44, %v6657_v0  ;;  %vm6768_vm3 = vcmp.lt.f32.partialorder %v3262_v11, 0.0004427343 }
 0x45b   : > { %v3383_v48 = vsel %vm2967_vm11, %v6511_v6, %v3255_v21  ;;  %v3246_v45 = vsel %vm6707_vm15, %v3243_v57, %v3240_v23  ;;  %v3267_v52 = vmul.f32 0.6931472, %v4503_v3  ;;  %v3066_v36 = vmul.f32 1.442695, %v3007_v28 }
 0x45c   : > { %v3421_v13 = vsel %vm3401_vm5, %v3383_v48, %v6511_v6  ;;  %v3382_v30 = vsel %vm2966_vm12, %v6518_v24, %v3246_v45  ;;  %4510 = vlog2.f32 %v3274_v63  ;;  %v6773_v56 = vadd.f32 %v4125_v33, %v6242_v44 }
 0x45d   : > { %3453 = vst [vmem:[%s4977_s6 + $0x98] sm:$0xff] %v3421_v13  ;;  %v3420_v25 = vsel %vm3401_vm5, %v3382_v30, %v6518_v24  ;;  %v3273_v6 = vsel %vm6714_vm1, %v3270_v53, %v3267_v52  ;;  %4512 = vpow2.f32 %v3060_v40  ;;  %v3287_v5 = vadd.f32 1.0, %v3286_v59 }
 0x45e   : > { %3452 = vst [vmem:[%s4977_s6 + $0x90] sm:$0xff] %v3420_v25  ;;  %v3385_v24 = vsel %vm2969_vm0, %v6521_v55, %v3273_v6  ;;  %v4505_v15 = vpop.eup %4504  ;;  %v3006_v0 = vmin.f32 %v6763_v39, 20.0  ;;  %v6780_v46 = vadd.f32 %v6242_v44, %v2927_v4  ;;  %v3261_v31 = vmul.f32 %v6648_v41, %v3260_v42 }
 0x45f   : > { %v3423_v12 = vsel %vm3401_vm5, %v3385_v24, %v6521_v55  ;;  %v3258_v1 = vmul.f32 0.6931472, %v4505_v15  ;;  %4514 = vpow2.f32 %v3066_v36  ;;  %v3009_v33 = vmin.f32 %v6773_v56, 20.0 }
 0x460   : > { %3455 = vst [vmem:[%s4977_s6 + $0xa8] sm:$0xff] %v3423_v12  ;;  %v3289_v60 = vand.u32 2147483647, %v6681_v2  ;;  %v3064_v51 = vmul.f32 1.442695, %v3006_v0  ;;  %v3008_v9 = vmin.f32 %v6780_v46, 20.0  ;;  %v6788_v55 = vadd.f32 %v4128_v26, %v6242_v44 }
 0x461   : > { %v3264_v14 = vsel %vm6768_vm3, %v3261_v31, %v3258_v1  ;;  %v3277_v58 = vmul.f32 -0.5, %v6729_v38  ;;  %v3070_v16 = vmul.f32 1.442695, %v3009_v33  ;;  %v6794_v41 = vadd.f32 %v6242_v44, %v2937_v27 }
 0x462   : > { %v4507_v43 = vpop.eup %4506  ;;  %v3384_v22 = vsel %vm2968_vm2, %v6540_v62, %v3264_v14  ;;  %v3288_v10 = vmul.f32 %v6681_v2, %v3287_v5  ;;  %4516 = vpow2.f32 %v3064_v51  ;;  %v3068_v57 = vmul.f32 1.442695, %v3008_v9 }
 0x463   : > { %v3422_v20 = vsel %vm3401_vm5, %v3384_v22, %v6540_v62  ;;  %v3285_v19 = vmul.f32 0.6931472, %v4507_v43  ;;  %4518 = vpow2.f32 %v3070_v16  ;;  %v3011_v49 = vmin.f32 %v6788_v55, 20.0 }
 0x464   : > { %v4509_v37 = vpop.eup %4508  ;;  %3454 = vst [vmem:[%s4977_s6 + $0xa0] sm:$0xff] %v3422_v20  ;;  %vm3290_vm4 = vcmp.lt.f32.partialorder %v3289_v60, 0.0004427343  ;;  %4520 = vpow2.f32 %v3068_v57  ;;  %v3010_v44 = vmin.f32 %v6794_v41, 20.0  ;;  %vm2971_vm6 = vcmp.gt.f32.partialorder %v6544_v47, 20.0 }
 0x465   : > { %v3291_v2 = vsel %vm3290_vm4, %v3288_v10, %v3285_v19  ;;  %v3278_v61 = vadd.f32 1.0, %v3277_v58  ;;  %v3301_v8 = vadd.f32 1.0, %v4509_v37  ;;  %v3280_v62 = vand.u32 2147483647, %v6729_v38 }
 0x466   : > { %v3387_v50 = vsel %vm2971_vm6, %v6544_v47, %v3291_v2  ;;  %v3074_v4 = vmul.f32 1.442695, %v3011_v49  ;;  %v3072_v34 = vmul.f32 1.442695, %v3010_v44  ;;  %vm2970_vm8 = vcmp.gt.f32.partialorder %v6564_v18, 20.0 }
 0x467   : > { %v3425_v23 = vsel %vm3401_vm5, %v3387_v50, %v6544_v47  ;;  %4522 = vlog2.f32 %v3301_v8  ;;  %v3279_v40 = vmul.f32 %v6729_v38, %v3278_v61  ;;  %vm3281_vm7 = vcmp.lt.f32.partialorder %v3280_v62, 0.0004427343 }
 0x468   : > { %3457 = vst [vmem:[%s4977_s6 + $0xb8] sm:$0xff] %v3425_v23  ;;  %4524 = vpow2.f32 %v3074_v4  ;;  %v3304_v63 = vmul.f32 -0.5, %v4509_v37  ;;  %v3307_v42 = vand.u32 2147483647, %v4509_v37  ;;  %vm2973_vm9 = vcmp.gt.f32.partialorder %v6573_v54, 20.0 }
 0x469   : > { %v4511_v7 = vpop.eup %4510  ;;  %4526 = vpow2.f32 %v3072_v34  ;;  %vm2972_vm11 = vcmp.gt.f32.partialorder %v6693_v32, 20.0  ;;  %vm2975_vm12 = vcmp.gt.f32.partialorder %v6727_v17, 20.0  ;;  %vm2974_vm14 = vcmp.gt.f32.partialorder %v6763_v39, 20.0 }
 0x46a   : > { %v4513_v21 = vpop.eup %4512  ;;  %v3276_v53 = vmul.f32 0.6931472, %v4511_v7  ;;  %v3305_v26 = vadd.f32 1.0, %v3304_v63  ;;  %vm3308_vm10 = vcmp.lt.f32.partialorder %v3307_v42, 0.0004427343  ;;  %vm2977_vm15 = vcmp.gt.f32.partialorder %v6773_v56, 20.0 }
 0x46b   : > { %v3292_v3 = vadd.f32 1.0, %v4513_v21  ;;  %v3295_v28 = vmul.f32 -0.5, %v4513_v21  ;;  %v3298_v1 = vand.u32 2147483647, %v4513_v21  ;;  %vm2976_vm2 = vcmp.gt.f32.partialorder %v6780_v46, 20.0 }
 0x46c   : > { %v3282_v48 = vsel %vm3281_vm7, %v3279_v40, %v3276_v53  ;;  %v6815_v45 = vpop.eup %4514  ;;  %v3306_v15 = vmul.f32 %v4509_v37, %v3305_v26  ;;  %vm2979_vm7 = vcmp.gt.f32.partialorder %v6788_v55, 20.0 }
 0x46d   : > { %v3386_v11 = vsel %vm2970_vm8, %v6564_v18, %v3282_v48  ;;  %4528 = vlog2.f32 %v3292_v3  ;;  %v3319_v13 = vadd.f32 1.0, %v6815_v45  ;;  %v3322_v24 = vmul.f32 -0.5, %v6815_v45 }
 0x46e   : > { %v3424_v47 = vsel %vm3401_vm5, %v3386_v11, %v6564_v18  ;;  %v3296_v5 = vadd.f32 1.0, %v3295_v28  ;;  %v3325_v22 = vand.u32 2147483647, %v6815_v45  ;;  %vm3299_vm13 = vcmp.lt.f32.partialorder %v3298_v1, 0.0004427343 }
 0x46f   : > { %3456 = vst [vmem:[%s4977_s6 + $0xb0] sm:$0xff] %v3424_v47  ;;  %v6823_v38 = vpop.eup %4516  ;;  %4530 = vlog2.f32 %v3319_v13  ;;  %v3323_v60 = vadd.f32 1.0, %v3322_v24 }
 0x470   : > { %v6825_v30 = vpop.eup %4518  ;;  %v3310_v52 = vadd.f32 1.0, %v6823_v38  ;;  %v3313_v51 = vmul.f32 -0.5, %v6823_v38  ;;  %v3297_v43 = vmul.f32 %v4513_v21, %v3296_v5  ;;  %v3316_v57 = vand.u32 2147483647, %v6823_v38 }
 0x471   : > { %v6828_v59 = vpop.eup %4520  ;;  %v3337_v25 = vadd.f32 1.0, %v6825_v30  ;;  %v3340_v58 = vmul.f32 -0.5, %v6825_v30  ;;  %v3324_v19 = vmul.f32 %v6815_v45, %v3323_v60  ;;  %v3343_v37 = vand.u32 2147483647, %v6825_v30 }
 0x472   : > { %4532 = vlog2.f32 %v3310_v52  ;;  %v3328_v18 = vadd.f32 1.0, %v6828_v59  ;;  %v3331_v10 = vmul.f32 -0.5, %v6828_v59  ;;  %v3314_v49 = vadd.f32 1.0, %v3313_v51 }
 0x473   : > { %4534 = vlog2.f32 %v3337_v25  ;;  %v3341_v61 = vadd.f32 1.0, %v3340_v58  ;;  %v3334_v8 = vand.u32 2147483647, %v6828_v59  ;;  %vm3326_vm0 = vcmp.lt.f32.partialorder %v3325_v22, 0.0004427343 }
 0x474   : > { %v4523_v6 = vpop.eup %4522  ;;  %4536 = vlog2.f32 %v3328_v18  ;;  %v3332_v62 = vadd.f32 1.0, %v3331_v10  ;;  %vm6865_vm1 = vcmp.lt.f32.partialorder %v3316_v57, 0.0004427343  ;;  %v3315_v3 = vmul.f32 %v6823_v38, %v3314_v49 }
 0x475   : > { %v6833_v29 = vpop.eup %4524  ;;  %v3303_v36 = vmul.f32 0.6931472, %v4523_v6  ;;  %vm6875_vm3 = vcmp.lt.f32.partialorder %v3343_v37, 0.0004427343  ;;  %v3342_v63 = vmul.f32 %v6825_v30, %v3341_v61  ;;  %vm6883_vm4 = vcmp.lt.f32.partialorder %v3334_v8, 0.0004427343 }
 0x476   : > { %v6835_v12 = vpop.eup %4526  ;;  %v3355_v0 = vadd.f32 1.0, %v6833_v29  ;;  %v3358_v4 = vmul.f32 -0.5, %v6833_v29  ;;  %v3333_v26 = vmul.f32 %v6828_v59, %v3332_v62  ;;  %v3361_v42 = vand.u32 2147483647, %v6833_v29 }
 0x477   : > { %v3309_v27 = vsel %vm3308_vm10, %v3306_v15, %v3303_v36  ;;  %v3346_v31 = vadd.f32 1.0, %v6835_v12  ;;  %v3349_v21 = vmul.f32 -0.5, %v6835_v12  ;;  %v3352_v24 = vand.u32 2147483647, %v6835_v12 }
 0x478   : > { %v3389_v33 = vsel %vm2973_vm9, %v6573_v54, %v3309_v27  ;;  %4538 = vlog2.f32 %v3355_v0  ;;  %v3359_v25 = vadd.f32 1.0, %v3358_v4  ;;  %vm3362_vm6 = vcmp.lt.f32.partialorder %v3361_v42, 0.0004427343 }
 0x479   : > { %v3427_v14 = vsel %vm3401_vm5, %v3389_v33, %v6573_v54  ;;  %4540 = vlog2.f32 %v3346_v31  ;;  %v3350_v28 = vadd.f32 1.0, %v3349_v21  ;;  %vm3353_vm8 = vcmp.lt.f32.partialorder %v3352_v24, 0.0004427343 }
 0x47a   : > { %v4529_v9 = vpop.eup %4528  ;;  %3459 = vst [vmem:[%s4977_s6 + $0xc8] sm:$0xff] %v3427_v14  ;;  %v3360_v1 = vmul.f32 %v6833_v29, %v3359_v25  ;;  %vm2978_vm9 = vcmp.gt.f32.partialorder %v6794_v41, 20.0 }
 0x47b   : > { %v3294_v16 = vmul.f32 0.6931472, %v4529_v9 }
 0x47c   : > { %v4531_v54 = vpop.eup %4530 }
 0x47d   : > { %v3300_v20 = vsel %vm3299_vm13, %v3297_v43, %v3294_v16  ;;  %v3321_v2 = vmul.f32 0.6931472, %v4531_v54 }
 0x47e   : > { %v3388_v44 = vsel %vm2972_vm11, %v6693_v32, %v3300_v20 }
 0x47f   : > { %v3426_v50 = vsel %vm3401_vm5, %v3388_v44, %v6693_v32  ;;  %v4533_v34 = vpop.eup %4532  ;;  %v3327_v23 = vsel %vm3326_vm0, %v3324_v19, %v3321_v2 }
 0x480   : > { %3458 = vst [vmem:[%s4977_s6 + $0xc0] sm:$0xff] %v3426_v50  ;;  %v4535_v53 = vpop.eup %4534  ;;  %v3391_v32 = vsel %vm2975_vm12, %v6727_v17, %v3327_v23  ;;  %v3312_v40 = vmul.f32 0.6931472, %v4533_v34 }
 0x481   : > { %v4537_v45 = vpop.eup %4536  ;;  %v3429_v11 = vsel %vm3401_vm5, %v3391_v32, %v6727_v17  ;;  %v3339_v47 = vmul.f32 0.6931472, %v4535_v53 }
 0x482   : > { %3461 = vst [vmem:[%s4977_s6 + $0xd8] sm:$0xff] %v3429_v11  ;;  %v3318_v38 = vsel %vm6865_vm1, %v3315_v3, %v3312_v40  ;;  %v3330_v52 = vmul.f32 0.6931472, %v4537_v45 }
 0x483   : > { %v3390_v17 = vsel %vm2974_vm14, %v6763_v39, %v3318_v38  ;;  %v3345_v30 = vsel %vm6875_vm3, %v3342_v63, %v3339_v47 }
 0x484   : > { %v3428_v18 = vsel %vm3401_vm5, %v3390_v17, %v6763_v39  ;;  %v3393_v59 = vsel %vm2977_vm15, %v6773_v56, %v3345_v30  ;;  %v3336_v6 = vsel %vm6883_vm4, %v3333_v26, %v3330_v52 }
 0x485   : > { %v4539_v36 = vpop.eup %4538  ;;  %3460 = vst [vmem:[%s4977_s6 + $0xd0] sm:$0xff] %v3428_v18  ;;  %v3431_v15 = vsel %vm3401_vm5, %v3393_v59, %v6773_v56  ;;  %v3392_v5 = vsel %vm2976_vm2, %v6780_v46, %v3336_v6  ;;  %v3351_v56 = vmul.f32 %v6835_v12, %v3350_v28 }
 0x486   : > { %v4541_v39 = vpop.eup %4540  ;;  %3463 = vst [vmem:[%s4977_s6 + $0xe8] sm:$0xff] %v3431_v15  ;;  %v3430_v0 = vsel %vm3401_vm5, %v3392_v5, %v6780_v46  ;;  %v3357_v27 = vmul.f32 0.6931472, %v4539_v36 }
 0x487   : > { %3462 = vst [vmem:[%s4977_s6 + $0xe0] sm:$0xff] %v3430_v0  ;;  %v3348_v31 = vmul.f32 0.6931472, %v4541_v39 }
 0x488   : > { %v3363_v33 = vsel %vm3362_vm6, %v3360_v1, %v3357_v27 }
 0x489   : > { %v3395_v60 = vsel %vm2979_vm7, %v6788_v55, %v3363_v33  ;;  %v3354_v51 = vsel %vm3353_vm8, %v3351_v56, %v3348_v31 }
 0x48a   : > { %v3433_v46 = vsel %vm3401_vm5, %v3395_v60, %v6788_v55  ;;  %v3394_v29 = vsel %vm2978_vm9, %v6794_v41, %v3354_v51 }
 0x48b   : > { %3465 = vst [vmem:[%s4977_s6 + $0xf8] sm:$0xff] %v3433_v46  ;;  %v3432_v12 = vsel %vm3401_vm5, %v3394_v29, %v6794_v41 }
 0x48c   : > { %3464 = vst [vmem:[%s4977_s6 + $0xf0] sm:$0xff] %v3432_v12 }
 0x48d PF: > { %s7229_s20 = sld [smem:[#allocation16_spill]]  ;;  %s3661_s23 = sshll.u32 %s4708_s24, 12 }
 0x48e   : > { %s7230_s30 = sld [smem:[#allocation27_spill]]  ;;  %s3480_s15 = sshll.u32 %s4977_s6, 4  ;;  %s6939_s15 = int_to_ptr.vmem [resolvable:$true] %s3480_s15 }
 0x48f   : > { %s6943_s11 = scalar_lea.sflag [#allocation6], %s465_s4  ;;  %s4596_s7 = scalar_lea.vmem %s6939_s15, 4096 }
 0x490   : > { %p4597_p0 = scmp.ne.s32.totalorder %s6939_s15, %s4596_s7  ;;  %s4729_s24 = smov [#allocation9]  }
 0x491   : > { %s4600_s28 = sshll.u32 %s4729_s24, 4  ;;  %s4601_s28 = int_to_ptr.vmem [resolvable:$false] %s4600_s28 }
 0x492   : > { %s4602_s12 = scalar_lea.vmem %s4601_s28, 8192  ;;  %p4603_p8 = scmp.lt.s32.totalorder %s6939_s15, %s4601_s28 }
 0x493   : > { %p7231_p1 = scmp.ne.s32.totalorder %s7229_s20, 0  ;;  %p4604_p9 = scmp.lt.s32.totalorder %s4602_s12, %s4596_s7 }
 0x494   : > { %s6936_s29 = scalar_lea.hbm %s7230_s30, %s3661_s23 }
 0x495   : > { %p4598_p2 = pnand %p4597_p0, %p7231_p1  ;;  %p4605_p11 = por %p4604_p9, %p4603_p8 }
 0x497   : > { %p4599_p5 = pneg %p4598_p2 }
 0x499   : > { %p4606_p13 = pnand %p4605_p11, %p4599_p5 }
 0x49b   : > { %4609 = shalt.err (!%p4606_p13)
}
 0x49c   : > { %s4610_s4 = scalar_lea.hbm %s6936_s29, 4096  ;;  %s4614_s8 = scalar_lea.hbm %s7230_s30, 8192 }
 0x49d   : > { %p4611_p4 = scmp.ne.s32.totalorder %s6936_s29, %s4610_s4  ;;  %p4615_p10 = scmp.lt.s32.totalorder %s6936_s29, %s7230_s30 }
 0x49e   : > { %p4616_p3 = scmp.lt.s32.totalorder %s4614_s8, %s4610_s4 }
 0x49f   : > { %p4612_p6 = pnand %p4611_p4, %p7231_p1 }
 0x4a0   : > { %p4617_p12 = por %p4616_p3, %p4615_p10 }
 0x4a1   : > { %p4613_p7 = pneg %p4612_p6 }
 0x4a3   : > { %p4618_p0 = pnand %p4617_p12, %p4613_p7 }
 0x4a5   : > { %4621 = shalt.err (!%p4618_p0)
}
 0x4a6   : > { %s4730_s14 = smov 128   ;;  %s4731_s23 = smov 8  }
 0x4a7   : > { %4170 = dma.vmem_to_hbm [thread:$0]  (%p7231_p1), %s6939_s15, 4096, %s6936_s29, %s6943_s11, %s4730_s14, %s4730_s14, %s4731_s23  }
 0x4a8 PF: > { %s7232_s27 = sld [smem:[#allocation15_spill]] }
 0x4a9   : > { %s7233_s25 = sld [smem:[#allocation13_spill]] }
 0x4aa   : > { %s7234_s7 = sld [smem:[#allocation17_spill]] }
 0x4ae   : > { %p4187_p2 = scmp.ge.s32.totalorder %s7232_s27, 2 }
 0x4af   : > { %s3495_s24 = sand.u32 1, %s7233_s25  }
 0x4b0   : > { %p7235_p5 = scmp.ne.s32.totalorder %s7234_s7, 0  ;;  %s3496_s28 = scalar_lea.sflag [#allocation6], %s3495_s24 }
 0x4b2   : > { %p4181_p8 = pnand %p4187_p2, %p7235_p5 }
 0x4b4   : > { %p4182_p9 = pneg %p4181_p8 }
 0x4b6   : > { %4675 = dma.done.wait (%p4182_p9), %s3496_s28, 4096  }
 0x4b7   : > { %4677 = vsyncadd (%p4182_p9), %s3496_s28, 4294963200  ;;  %s28_s27 = sadd.s32 1, %s7232_s27   ;;  %s7236_s12 = smov %s4932_s17 }
 0x4b8   : > { %p25_p11 = scmp.ge.s32.totalorder %s28_s27, 8   ;;  %s7237_s23 = sld [smem:[#allocation14_spill]] }
 0x4b9   : > { %s7238_s25 = sld [smem:[#allocation18_spill]]  ;;  %s7239_s17 = smov %s4684_s18 }
 0x4ba   : > { %s7240_s18 = smov %s4688_s19  ;;  %s7241_s19 = smov %s7236_s12 }
 0x4bb   : > { %s7242_s20 = smov %s4696_s21  ;;  %s7243_s21 = smov %s4700_s22 }
 0x4bc   : > { %s7244_s22 = smov %s4937_s3  ;;  %s7245_s24 = smov %s4716_s26 }
 0x4bd   : > { %s7246_s26 = smov %s7252_s16  ;;  %27 = sbr.rel (!%p25_p11) target bundleno = 20 (0x14), region = 127 }
 0x4c2   :  { %3501 = vsyncpa [#allocation5], 1 }
 0x4c3   :  { %3503 = vsyncpa [#allocation5 + $0x1], 1 }
 0x4c4   :  { %3504 = vsyncpa [#allocation8], 1 }
 0x4c5   :  { %3505 = vsyncpa [#allocation6], 1 }
 0x4c6   :  { %3507 = vsyncpa [#allocation6 + $0x1], 1 }

// kernel: tpu_custom_call.1
= control target key start
LH: loop header
LB: loop body
LE: loop exit
PB: predicated region body
PF: predicated region fallthrough
CT: control target
= control target key end

     0   :  { %s7003_s0 = inlined_call_operand.hbm [shape: f32[512,384], index: 0, kind: input, shape index: {}]   ;;  %s7004_s1 = inlined_call_operand.vmem [shape: f32[512,2], index: 1, kind: input, shape index: {}]   ;;  %s7005_s2 = inlined_call_operand.vmem [shape: f32[384,128], index: 2, kind: input, shape index: {}]   ;;  %s7006_s3 = inlined_call_operand.vmem [shape: f32[2,128], index: 3, kind: input, shape index: {}]   ;;  %s7007_s4 = inlined_call_operand.vmem [shape: f32[1,128], index: 4, kind: input, shape index: {}]   ;;  %s7008_s5 = inlined_call_operand.vmem [shape: f32[1,128], index: 5, kind: input, shape index: {}]   ;;  %s7009_s6 = inlined_call_operand.vmem [shape: f32[128,128], index: 6, kind: input, shape index: {}]   ;;  %s7010_s7 = inlined_call_operand.vmem [shape: f32[1,128], index: 7, kind: input, shape index: {}]   ;;  %s7011_s8 = inlined_call_operand.hbm [shape: f32[128,128], index: 8, kind: input, shape index: {}]   ;;  %s7012_s9 = inlined_call_operand.vmem [shape: f32[1,128], index: 9, kind: input, shape index: {}]   ;;  %s7013_s10 = inlined_call_operand.vmem [shape: f32[1,128], index: 10, kind: input, shape index: {}]   ;;  %s7014_s11 = inlined_call_operand.hbm [shape: f32[512,128], index: 11, kind: output, shape index: {}]  }
   0x1   :  { %7030 = sst [smem:[#allocation19_spill]] %s7006_s3 }
   0x2   :  { %7031 = sst [smem:[#allocation20_spill]] %s7007_s4 }
   0x3   :  { %7032 = sst [smem:[#allocation21_spill]] %s7008_s5 }
   0x4   :  { %7033 = sst [smem:[#allocation22_spill]] %s7009_s6 }
   0x5   :  { %7034 = sst [smem:[#allocation23_spill]] %s7010_s7 }
   0x6   :  { %7035 = sst [smem:[#allocation24_spill]] %s7011_s8 }
   0x7   :  { %7036 = sst [smem:[#allocation25_spill]] %s7012_s9 }
   0x8   :  { %7037 = sst [smem:[#allocation26_spill]] %s7013_s10 }
   0x9   :  { %7038 = sst [smem:[#allocation27_spill]] %s7014_s11 }
   0xa   :  { %16 = vsyncpa [#allocation5], 0 }
   0xb   :  { %18 = vsyncpa [#allocation5 + $0x1], 0 }
   0xc   :  { %19 = vsyncpa [#allocation8], 0 }
   0xd   :  { %20 = vsyncpa [#allocation6], 0 }
   0xe   :  { %22 = vsyncpa [#allocation6 + $0x1], 0  ;;  %s4792_s17 = smov 0   ;;  %s4794_s18 = smov 0  }
   0xf   :  { %s4796_s19 = smov 0   ;;  %s4798_s20 = smov 0  }
  0x10   :  { %s4800_s21 = smov 0   ;;  %s4802_s22 = smov 0  }
  0x11   :  { %s4804_s23 = smov 0   ;;  %s4806_s24 = smov 0  }
  0x12   :  { %s4808_s25 = smov 0   ;;  %s4810_s26 = smov 0  }
  0x13   :  { %s4812_s27 = smov 0  }
  0x14 LB: > { %7039 = sst [smem:[#allocation13_spill]] %s4680_s17  ;;  %s3600_s28 = sadd.s32 4294967295, %s4720_s27   ;;  %s4720_s27 = sphi %s4812_s27, %s28_s27   ;;  %s4716_s26 = sphi %s4810_s26, %s7246_s26   ;;  %s4712_s25 = sphi %s4808_s25, %s7238_s25   ;;  %s4708_s24 = sphi %s4806_s24, %s7245_s24   ;;  %s4704_s23 = sphi %s4804_s23, %s7237_s23   ;;  %s4700_s22 = sphi %s4802_s22, %s7244_s22   ;;  %s4696_s21 = sphi %s4800_s21, %s7243_s21   ;;  %s4692_s20 = sphi %s4798_s20, %s7242_s20   ;;  %s4688_s19 = sphi %s4796_s19, %s7241_s19   ;;  %s4684_s18 = sphi %s4794_s18, %s7240_s18   ;;  %s4680_s17 = sphi %s4792_s17, %s7239_s17  }
  0x15   : > { %7040 = sst [smem:[#allocation14_spill]] %s4712_s25  ;;  %s3601_s29 = sadd.s32 4294967294, %s4720_s27  }
  0x16   : > { %7041 = sst [smem:[#allocation15_spill]] %s4720_s27  ;;  %p56_p0 = scmp.ne.s32.totalorder %s4700_s22, %s4696_s21 }
  0x17   : > { %p57_p1 = scmp.eq.s32.totalorder %s4720_s27, 0  ;;  %p62_p2 = scmp.ne.s32.totalorder %s4696_s21, %s4692_s20 }
  0x18   : > { %p4852_p3 = scmp.eq.s32.totalorder %s3600_s28, 0  ;;  %p305_p5 = scmp.ne.s32.totalorder %s4688_s19, %s4684_s18 }
  0x19   : > { %p4857_p4 = por %p57_p1, %p56_p0  ;;  %p306_p7 = scmp.eq.s32.totalorder %s3600_s28, 5 }
  0x1a   : > { %p4865_p6 = por %p4852_p3, %p62_p2  ;;  %p311_p8 = scmp.ne.s32.totalorder %s4684_s18, %s4680_s17 }
  0x1b   : > { %p312_p9 = scmp.eq.s32.totalorder %s3601_s29, 5  ;;  %p4871_p10 = por %p306_p7, %p305_p5 }
  0x1c   : > { %s7044_s15 = scalar_select %p4865_p6, 1, 0 }
  0x1d   : > { %s7045_s16 = scalar_select %p4871_p10, 1, 0 }
  0x1e   : > { %p3602_p11 = scmp.ge.s32.totalorder %s4720_s27, 1  ;;  %p4876_p12 = por %p312_p9, %p311_p8 }
  0x1f   : > { %7046 = sst [smem:[#allocation16_spill]] %s7045_s16  ;;  %p319_p13 = scmp.lt.s32.totalorder %s4720_s27, 7 }
  0x20   : > { %s7047_s20 = scalar_select %p4876_p12, 1, 0 }
  0x21   : > { %p4881_p0 = pnand %p3602_p11, %p319_p13  ;;  %s4722_s13 = smov [#allocation7]  }
  0x22   : > { %7048 = sst [smem:[#allocation17_spill]] %s7047_s20  ;;  %s346_s11 = sshll.u32 %s4722_s13, 4  ;;  %s347_s11 = int_to_ptr.vmem [resolvable:$true] %s346_s11 }
  0x23   : > { %s7049_s30 = scalar_select %p4881_p0, 1, 0 }
  0x24   : > { %p4172_p1 = pneg %p4881_p0  ;;  %p4185_p2 = scmp.lt.s32.totalorder %s4720_s27, 6 }
  0x25   : > { %s4553_s20 = scalar_lea.vmem %s347_s11, 2048  ;;  %p4561_p12 = scmp.lt.s32.totalorder %s347_s11, %s347_s11 }
  0x26   : > { %p4890_p5 = pnand %p4172_p1, %p4852_p3  ;;  %p4896_p7 = pnand %p4185_p2, %p4857_p4 }
  0x27   : > { %p4554_p9 = scmp.ne.s32.totalorder %s347_s11, %s4553_s20  ;;  %p4562_p10 = scmp.lt.s32.totalorder %s4553_s20, %s4553_s20 }
  0x28   : > { %p4544_p8 = pneg %p4890_p5 }
  0x29   : > { %p4563_p6 = por %p4562_p10, %p4561_p12 }
  0x2a   : > { %p4556_p11 = pnand %p4554_p9, %p4544_p8 }
  0x2c   : > { %p4557_p13 = pneg %p4556_p11 }
  0x2e   : > { %p4564_p0 = pnand %p4563_p6, %p4557_p13 }
  0x30   : > { %4567 = shalt.err (!%p4564_p0)
}
  0x31   : > { %s7025_s13 = smov 128   ;;  %s7026_s14 = smov 8  }
  0x32   : > { %s7052_s8 = sld [smem:[#allocation24_spill]]  ;;  %s37_s20 = sadd.s32 1, %s4712_s25 }
  0x33   : > { %s40_s16 = sadd.s32 1, %s4716_s26  ;;  %p38_p4 = scmp.ge.s32.totalorder %s37_s20, 3 }
  0x34   : > { %s366_s10 = sand.u32 1, %s4700_s22   ;;  %s4163_s7 = smul.u32 96, %s4716_s26 }
  0x35   : > { %s3605_s9 = sshll.u32 %s366_s10, 8  ;;  %s7248_s20 = smov (%p38_p4, %s37_s20), 0 }
  0x36   : > { %7053 = sst [smem:[#allocation18_spill]] %s7248_s20  ;;  %s7250_s16 = smov (!%p38_p4, %s40_s16), %s4716_s26 }
  0x37   : > { %s45_s28 = ssub.s32 %s4712_s25, %s7248_s20  ;;  %p42_p6 = scmp.ge.s32.totalorder %s7250_s16, 2 }
  0x38   : > { %4175 = dma.hbm_to_vmem [thread:$0]  (!%p4890_p5), %s7052_s8, 2048, %s347_s11, [#allocation8], %s7025_s13, %s7025_s13, %s7026_s14  }
  0x39   : > { %s370_s17 = scalar_lea.vmem [#allocation4], %s3605_s9  ;;  %s7252_s16 = smov (%p42_p6, %s7250_s16), 0 }
  0x3a   : > { %s379_s11 = sshll.u32 %s370_s17, 4  ;;  %s376_s27 = sadd.s32 %s4712_s25, %s4163_s7  ;;  %s4922_s11 = int_to_ptr.vmem [resolvable:$true] %s379_s11 }
  0x3b   : > { %s44_s13 = ssub.s32 %s4716_s26, %s7252_s16  ;;  %s3608_s14 = sshll.u32 %s376_s27, 7 }
  0x3c   : > { %s46_s8 = sor.u32 %s45_s28, %s44_s13  ;;  %p293_p10 = scmp.eq.s32.totalorder %s44_s13, 0 }
  0x3d   : > { %p47_p12 = scmp.eq.s32.totalorder %s46_s8, 0  ;;  %s378_s4 = scalar_lea.hbm %s7003_s0, %s3608_s14 }
  0x3e   : > { %s7054_s9 = sadd.s32 1, %s4688_s19  ;;  %s7055_s6 = sadd.s32 1, %s4700_s22 }
  0x3f   : > { %s4932_s17 = scalar_select %p293_p10, %s4688_s19, %s7054_s9  }
  0x40   : > { %s4937_s3 = scalar_select %p47_p12, %s4700_s22, %s7055_s6  }
  0x41   : > { %s367_s7 = scalar_lea.sflag [#allocation5], %s366_s10  ;;  %p4570_p0 = pneg %p4896_p7 }
  0x42   : > { %s4581_s25 = scalar_lea.vmem %s4922_s11, 4096  ;;  %s4725_s28 = smov [#allocation4]  }
  0x43   : > { %p4582_p1 = scmp.ne.s32.totalorder %s4922_s11, %s4581_s25  ;;  %s4586_s13 = sshll.u32 %s4725_s28, 4  ;;  %s4587_s13 = int_to_ptr.vmem [resolvable:$false] %s4586_s13 }
  0x44   : > { %s4588_s8 = scalar_lea.vmem %s4587_s13, 8192  ;;  %p4589_p8 = scmp.lt.s32.totalorder %s4922_s11, %s4587_s13 }
  0x45   : > { %p4584_p2 = pnand %p4582_p1, %p4570_p0  ;;  %p4590_p9 = scmp.lt.s32.totalorder %s4588_s8, %s4581_s25 }
  0x47   : > { %p4585_p5 = pneg %p4584_p2  ;;  %p4591_p11 = por %p4590_p9, %p4589_p8 }
  0x49   : > { %p4592_p13 = pnand %p4591_p11, %p4585_p5 }
  0x4b   : > { %4595 = shalt.err (!%p4592_p13)
}
  0x4c   : > { %s4726_s5 = smov 384   ;;  %s7056_s6 = smov 8  }
  0x4d   : > { %s7057_s10 = smov 128   ;;  %p7058_p4 = scmp.ne.s32.totalorder %s7049_s30, 0 }
  0x4e   : > { %4179 = dma.hbm_to_vmem [thread:$0]  (!%p4896_p7), %s378_s4, 4096, %s4922_s11, %s367_s7, %s4726_s5, %s7057_s10, %s7056_s6  }
  0x4f   : > { %409 = sbr.rel (%p7058_p4) target bundleno = 1192 (0x4a8), region = 64  ;;  %s411_s14 = sand.u32 (!%p7058_p4), 1, %s4696_s21  }
  0x50   : > { %s3610_s20 = sshll.u32 (!%p7058_p4), %s411_s14, 8  ;;  %s412_s27 = scalar_lea.sflag (!%p7058_p4), [#allocation5], %s411_s14 }
  0x51   : > { %s4952_s9 = scalar_lea.vmem (!%p7058_p4), [#allocation4], %s3610_s20  ;;  %p7059_p6 = scmp.ne.s32.totalorder (!%p7058_p4), %s7044_s15, 0 }
  0x54   : > { %4667 = dma.done.wait (%p7059_p6), %s412_s27, 4096  }
  0x55   : > { %4669 = vsyncadd (%p7059_p6), %s412_s27, 4294963200 }
  0x56   : > { %4671 = dma.done.wait (%p4852_p3), [#allocation8], 2048  }
  0x57   : > { %4673 = vsyncadd (%p4852_p3), [#allocation8], 4294965248  ;;  %s465_s4 = sand.u32 1, %s4684_s18   ;;  %s3613_s25 = sshll.u32 %s4708_s24, 5 }
  0x58   : > { %s3612_s30 = sshll.u32 %s465_s4, 8  ;;  %p470_p7 = scmp.lt.s32.totalorder %s3613_s25, 63 }
  0x59   : > { %s3615_s29 = sshll.u32 %s4704_s23, 4  ;;  %s4977_s6 = scalar_lea.vmem [#allocation9], %s3612_s30 }
  0x5a   : > { %s7254_s25 = smov (!%p470_p7, %s3613_s25), 63  ;;  %p476_p10 = scmp.lt.s32.totalorder %s3615_s29, 47 }
  0x5b   : > { %s3614_s15 = sshll.u32 %s7254_s25, 3  ;;  %p3617_p3 = scmp.ne.s32.totalorder %s4704_s23, 0 }
  0x5c   : > { %s4970_s28 = scalar_lea.vmem %s7004_s1, %s3614_s15  ;;  %s7256_s29 = smov (!%p476_p10, %s3615_s29), 47 }
  0x5d   : > { %s3616_s12 = sshll.u32 %s7256_s29, 3  ;;  %485 = sbr.rel (%p3617_p3) target bundleno = 131 (0x83), region = 76 }
  0x5e   : > { %s4975_s5 = scalar_lea.vmem %s7005_s2, %s3616_s12 }
  0x62   : > { %vm518_vm0 = vcmask 7168   ;;  %v4727_v0 = vmov 0.0  }
  0x63   : > { %486 = vst [vmem:[#allocation2 + $0xb0] sm:$0xff] %v4727_v0  ;;  %487 = vst [vmem:[#allocation2] sm:$0xff] %v4727_v0 }
  0x64   : > { %488 = vst [vmem:[#allocation2 + $0xd8] sm:$0xff] %v4727_v0  ;;  %489 = vst [vmem:[#allocation2 + $0x18] sm:$0xff] %v4727_v0 }
  0x65   : > { %490 = vst [vmem:[#allocation2 + $0x50] sm:$0xff] %v4727_v0  ;;  %491 = vst [vmem:[#allocation2 + $0x68] sm:$0xff] %v4727_v0 }
  0x66   : > { %492 = vst [vmem:[#allocation2 + $0x30] sm:$0xff] %v4727_v0  ;;  %493 = vst [vmem:[#allocation2 + $0x48] sm:$0xff] %v4727_v0 }
  0x67   : > { %494 = vst [vmem:[#allocation2 + $0x80] sm:$0xff] %v4727_v0  ;;  %495 = vst [vmem:[#allocation2 + $0x88] sm:$0xff] %v4727_v0 }
  0x68   : > { %496 = vst [vmem:[#allocation2 + $0xe8] sm:$0xff] %v4727_v0  ;;  %497 = vst [vmem:[#allocation2 + $0xb8] sm:$0xff] %v4727_v0 }
  0x69   : > { %498 = vst [vmem:[#allocation2 + $0x60] sm:$0xff] %v4727_v0  ;;  %499 = vst [vmem:[#allocation2 + $0xf0] sm:$0xff] %v4727_v0 }
  0x6a   : > { %500 = vst [vmem:[#allocation2 + $0x8] sm:$0xff] %v4727_v0  ;;  %501 = vst [vmem:[#allocation2 + $0x78] sm:$0xff] %v4727_v0 }
  0x6b   : > { %502 = vst [vmem:[#allocation2 + $0x38] sm:$0xff] %v4727_v0  ;;  %503 = vst [vmem:[#allocation2 + $0x58] sm:$0xff] %v4727_v0 }
  0x6c   : > { %504 = vst [vmem:[#allocation2 + $0x40] sm:$0xff] %v4727_v0  ;;  %505 = vst [vmem:[#allocation2 + $0xc8] sm:$0xff] %v4727_v0 }
  0x6d   : > { %506 = vst [vmem:[#allocation2 + $0xe0] sm:$0xff] %v4727_v0  ;;  %507 = vst [vmem:[#allocation2 + $0x90] sm:$0xff] %v4727_v0 }
  0x6e   : > { %508 = vst [vmem:[#allocation2 + $0x70] sm:$0xff] %v4727_v0  ;;  %509 = vst [vmem:[#allocation2 + $0xc0] sm:$0xff] %v4727_v0 }
  0x6f   : > { %510 = vst [vmem:[#allocation2 + $0xa8] sm:$0xff] %v4727_v0  ;;  %511 = vst [vmem:[#allocation2 + $0xd0] sm:$0xff] %v4727_v0 }
  0x70   : > { %512 = vst [vmem:[#allocation2 + $0x10] sm:$0xff] %v4727_v0  ;;  %513 = vst [vmem:[#allocation2 + $0x28] sm:$0xff] %v4727_v0 }
  0x71   : > { %514 = vst [vmem:[#allocation2 + $0xa0] sm:$0xff] %v4727_v0  ;;  %515 = vst [vmem:[#allocation2 + $0xf8] sm:$0xff] %v4727_v0 }
  0x72   : > { %516 = vst [vmem:[#allocation2 + $0x20] sm:$0xff] %v4727_v0  ;;  %517 = vst [vmem:[#allocation2 + $0x98] sm:$0xff] %v4727_v0 }
  0x73   : > { %519 = vst.msk [vmem:[#allocation3] sm:$0xff] %vm518_vm0, %v4727_v0  ;;  %520 = vst.msk [vmem:[#allocation3 + $0x8] sm:$0xff] %vm518_vm0, %v4727_v0 }
  0x74   : > { %521 = vst.msk [vmem:[#allocation3 + $0x10] sm:$0xff] %vm518_vm0, %v4727_v0  ;;  %522 = vst.msk [vmem:[#allocation3 + $0x18] sm:$0xff] %vm518_vm0, %v4727_v0 }
  0x75   : > { %523 = vst.msk [vmem:[#allocation3 + $0x20] sm:$0xff] %vm518_vm0, %v4727_v0  ;;  %524 = vst.msk [vmem:[#allocation3 + $0x28] sm:$0xff] %vm518_vm0, %v4727_v0 }
  0x76   : > { %525 = vst.msk [vmem:[#allocation3 + $0x30] sm:$0xff] %vm518_vm0, %v4727_v0  ;;  %526 = vst.msk [vmem:[#allocation3 + $0x38] sm:$0xff] %vm518_vm0, %v4727_v0 }
  0x77   : > { %527 = vst.msk [vmem:[#allocation3 + $0x40] sm:$0xff] %vm518_vm0, %v4727_v0  ;;  %528 = vst.msk [vmem:[#allocation3 + $0x48] sm:$0xff] %vm518_vm0, %v4727_v0 }
  0x78   : > { %529 = vst.msk [vmem:[#allocation3 + $0x50] sm:$0xff] %vm518_vm0, %v4727_v0  ;;  %530 = vst.msk [vmem:[#allocation3 + $0x58] sm:$0xff] %vm518_vm0, %v4727_v0 }
  0x79   : > { %531 = vst.msk [vmem:[#allocation3 + $0x60] sm:$0xff] %vm518_vm0, %v4727_v0  ;;  %532 = vst.msk [vmem:[#allocation3 + $0x68] sm:$0xff] %vm518_vm0, %v4727_v0 }
  0x7a   : > { %533 = vst.msk [vmem:[#allocation3 + $0x70] sm:$0xff] %vm518_vm0, %v4727_v0  ;;  %534 = vst.msk [vmem:[#allocation3 + $0x78] sm:$0xff] %vm518_vm0, %v4727_v0 }
  0x7b   : > { %535 = vst.msk [vmem:[#allocation3 + $0x80] sm:$0xff] %vm518_vm0, %v4727_v0  ;;  %536 = vst.msk [vmem:[#allocation3 + $0x88] sm:$0xff] %vm518_vm0, %v4727_v0 }
  0x7c   : > { %537 = vst.msk [vmem:[#allocation3 + $0x90] sm:$0xff] %vm518_vm0, %v4727_v0  ;;  %538 = vst.msk [vmem:[#allocation3 + $0x98] sm:$0xff] %vm518_vm0, %v4727_v0 }
  0x7d   : > { %539 = vst.msk [vmem:[#allocation3 + $0xa0] sm:$0xff] %vm518_vm0, %v4727_v0  ;;  %540 = vst.msk [vmem:[#allocation3 + $0xa8] sm:$0xff] %vm518_vm0, %v4727_v0 }
  0x7e   : > { %541 = vst.msk [vmem:[#allocation3 + $0xb0] sm:$0xff] %vm518_vm0, %v4727_v0  ;;  %542 = vst.msk [vmem:[#allocation3 + $0xb8] sm:$0xff] %vm518_vm0, %v4727_v0 }
  0x7f   : > { %543 = vst.msk [vmem:[#allocation3 + $0xc0] sm:$0xff] %vm518_vm0, %v4727_v0  ;;  %544 = vst.msk [vmem:[#allocation3 + $0xc8] sm:$0xff] %vm518_vm0, %v4727_v0 }
  0x80   : > { %545 = vst.msk [vmem:[#allocation3 + $0xd0] sm:$0xff] %vm518_vm0, %v4727_v0  ;;  %546 = vst.msk [vmem:[#allocation3 + $0xd8] sm:$0xff] %vm518_vm0, %v4727_v0 }
  0x81   : > { %547 = vst.msk [vmem:[#allocation3 + $0xe0] sm:$0xff] %vm518_vm0, %v4727_v0  ;;  %548 = vst.msk [vmem:[#allocation3 + $0xe8] sm:$0xff] %vm518_vm0, %v4727_v0 }
  0x82   : > { %549 = vst.msk [vmem:[#allocation3 + $0xf0] sm:$0xff] %vm518_vm0, %v4727_v0  ;;  %550 = vst.msk [vmem:[#allocation3 + $0xf8] sm:$0xff] %vm518_vm0, %v4727_v0 }
  0x83 PF: > { %v566_v1 = vld [vmem:[%s4975_s5 + $0x78] sm:$0xff]  ;;  %v565_v2 = vld [vmem:[%s4975_s5 + $0x70] sm:$0xff]  ;;  %v564_v3 = vld [vmem:[%s4975_s5 + $0x68] sm:$0xff]  ;;  %p3618_p12 = scmp.ne.s32.totalorder %s4704_s23, 2 }
  0x84   : > { %3839 = vmatprep.subr.mxu0 %v566_v1  ;;  %4129 = vmatprep.subr.mxu1 %v566_v1  ;;  %v563_v4 = vld [vmem:[%s4975_s5 + $0x60] sm:$0xff]  ;;  %v562_v7 = vld [vmem:[%s4975_s5 + $0x58] sm:$0xff]  ;;  %v5090_v10 = vld [vmem:[%s4952_s9 + $0x8] sm:$0xff]  ;;  %s7116_s20 = sld [smem:[#allocation19_spill]] (!%p3618_p12) }
  0x85   : > { %3840 = vmatpush3.msra.mxu0 %v566_v1  ;;  %4145 = vmatpush3.msra.mxu1 %v566_v1  ;;  %v5081_v5 = vld [vmem:[%s4952_s9] sm:$0xff]  ;;  %v769_v11 = vadd.f32 1.0, %v5090_v10  ;;  %v5094_v12 = vld [vmem:[%s4952_s9 + $0x88] sm:$0xff]  ;;  %v561_v13 = vld [vmem:[%s4975_s5 + $0x50] sm:$0xff]  ;;  %v772_v20 = vmul.f32 -0.5, %v5090_v10  ;;  %s7176_s25 = sld [smem:[#allocation20_spill]] (!%p3618_p12) }
  0x86   : > { %3841 = vmatprep.subr.mxu0 %v565_v2  ;;  %4130 = vmatprep.subr.mxu1 %v565_v2  ;;  %v5084_v6 = vld [vmem:[%s4952_s9 + $0x80] sm:$0xff]  ;;  %v760_v8 = vadd.f32 1.0, %v5081_v5  ;;  %v763_v14 = vmul.f32 -0.5, %v5081_v5  ;;  %v5100_v16 = vld [vmem:[%s4952_s9 + $0x10] sm:$0xff]  ;;  %v560_v17 = vld [vmem:[%s4975_s5 + $0x48] sm:$0xff]  ;;  %v913_v18 = vadd.f32 1.0, %v5094_v12 }
  0x87   : > { %3842 = vmatpush3.msra.mxu0 %v565_v2  ;;  %4146 = vmatpush3.msra.mxu1 %v565_v2  ;;  %v904_v9 = vadd.f32 1.0, %v5084_v6  ;;  %v907_v15 = vmul.f32 -0.5, %v5084_v6  ;;  %v5105_v19 = vld [vmem:[%s4952_s9 + $0x90] sm:$0xff]  ;;  %v559_v21 = vld [vmem:[%s4975_s5 + $0x40] sm:$0xff]  ;;  %v778_v24 = vadd.f32 1.0, %v5100_v16  ;;  %v5111_v25 = vld [vmem:[%s4952_s9 + $0x18] sm:$0xff] }
  0x88   : > { %3843 = vmatprep.subr.mxu0 %v564_v3  ;;  %4131 = vmatprep.subr.mxu1 %v564_v3  ;;  %4284 = vlog2.f32 %v760_v8  ;;  %v764_v22 = vadd.f32 1.0, %v763_v14  ;;  %v922_v26 = vadd.f32 1.0, %v5105_v19  ;;  %v558_v27 = vld [vmem:[%s4975_s5 + $0x38] sm:$0xff]  ;;  %v766_v28 = vand.u32 2147483647, %v5081_v5  ;;  %v5125_v35 = vld [vmem:[%s4952_s9 + $0x20] sm:$0xff] }
  0x89   : > { %3844 = vmatpush3.msra.mxu0 %v564_v3  ;;  %4147 = vmatpush3.msra.mxu1 %v564_v3  ;;  %4286 = vlog2.f32 %v904_v9  ;;  %v908_v23 = vadd.f32 1.0, %v907_v15  ;;  %v916_v29 = vmul.f32 -0.5, %v5094_v12  ;;  %v781_v30 = vmul.f32 -0.5, %v5100_v16  ;;  %v5119_v31 = vld [vmem:[%s4952_s9 + $0x98] sm:$0xff]  ;;  %v557_v36 = vld [vmem:[%s4975_s5 + $0x30] sm:$0xff]  ;;  %v5139_v44 = vld [vmem:[%s4952_s9 + $0xa0] sm:$0xff] }
  0x8a   : > { %3845 = vmatprep.subr.mxu0 %v563_v4  ;;  %4132 = vmatprep.subr.mxu1 %v563_v4  ;;  %4288 = vlog2.f32 %v769_v11  ;;  %v910_v32 = vand.u32 2147483647, %v5084_v6  ;;  %v925_v33 = vmul.f32 -0.5, %v5105_v19  ;;  %v787_v34 = vadd.f32 1.0, %v5111_v25  ;;  %v556_v45 = vld [vmem:[%s4975_s5 + $0x28] sm:$0xff]  ;;  %v555_v56 = vld [vmem:[%s4975_s5 + $0x20] sm:$0xff] }
  0x8b   : > { %3846 = vmatpush3.msra.mxu0 %v563_v4  ;;  %4148 = vmatpush3.msra.mxu1 %v563_v4  ;;  %4290 = vlog2.f32 %v913_v18  ;;  %v5129_v37 = vmul.f32 %v764_v22, %v5081_v5  ;;  %v5132_v38 = vmul.f32 %v908_v23, %v5084_v6  ;;  %v773_v39 = vadd.f32 1.0, %v772_v20  ;;  %v5155_v55 = vld [vmem:[%s4952_s9 + $0x28] sm:$0xff]  ;;  %v554_v2 = vld [vmem:[%s4975_s5 + $0x18] sm:$0xff]  ;;  %v553_v18 = vld [vmem:[%s4975_s5 + $0x10] sm:$0xff]  ;;  %s7177_s15 = sld [smem:[#allocation21_spill]] (!%p3618_p12) }
  0x8c   : > { %3847 = vmatprep.subr.mxu0 %v562_v7  ;;  %4133 = vmatprep.subr.mxu1 %v562_v7  ;;  %4292 = vlog2.f32 %v778_v24  ;;  %v775_v40 = vand.u32 2147483647, %v5090_v10  ;;  %v919_v41 = vand.u32 2147483647, %v5094_v12  ;;  %v790_v42 = vmul.f32 -0.5, %v5111_v25  ;;  %v5191_v15 = vld [vmem:[%s4952_s9 + $0xa8] sm:$0xff] }
  0x8d   : > { %3848 = vmatpush3.msra.mxu0 %v562_v7  ;;  %4149 = vmatpush3.msra.mxu1 %v562_v7  ;;  %4294 = vlog2.f32 %v922_v26  ;;  %v931_v43 = vadd.f32 1.0, %v5119_v31  ;;  %vm5142_vm1 = vcmp.lt.f32.partialorder %v766_v28, 0.0004427343  ;;  %v917_v47 = vadd.f32 1.0, %v916_v29  ;;  %v5202_v23 = vld [vmem:[%s4952_s9 + $0x30] sm:$0xff]  ;;  %v552_v26 = vld [vmem:[%s4975_s5 + $0x8] sm:$0xff] }
  0x8e   : > { %3849 = vmatprep.subr.mxu0 %v561_v13  ;;  %4134 = vmatprep.subr.mxu1 %v561_v13  ;;  %4296 = vlog2.f32 %v787_v34  ;;  %v782_v48 = vadd.f32 1.0, %v781_v30  ;;  %v784_v49 = vand.u32 2147483647, %v5100_v16  ;;  %v796_v50 = vadd.f32 1.0, %v5125_v35  ;;  %s7179_s8 = sld [smem:[#allocation25_spill]] (!%p3618_p12) }
  0x8f   : > { %3850 = vmatpush3.msra.mxu0 %v561_v13  ;;  %4150 = vmatpush3.msra.mxu1 %v561_v13  ;;  %vm5148_vm2 = vcmp.lt.f32.partialorder %v910_v32, 0.0004427343  ;;  %v926_v52 = vadd.f32 1.0, %v925_v33  ;;  %v928_v53 = vand.u32 2147483647, %v5105_v19  ;;  %4298 = vlog2.f32 %v931_v43  ;;  %s7180_s14 = sld [smem:[#allocation26_spill]] (!%p3618_p12) }
  0x90   : > { %3851 = vmatprep.subr.mxu0 %v560_v17  ;;  %4135 = vmatprep.subr.mxu1 %v560_v17  ;;  %v934_v54 = vmul.f32 -0.5, %v5119_v31  ;;  %vm5158_vm3 = vcmp.lt.f32.partialorder %v775_v40, 0.0004427343  ;;  %v793_v58 = vand.u32 2147483647, %v5111_v25  ;;  %4300 = vlog2.f32 %v796_v50 }
  0x91   : > { %3852 = vmatpush3.msra.mxu0 %v560_v17  ;;  %4151 = vmatpush3.msra.mxu1 %v560_v17  ;;  %v799_v59 = vmul.f32 -0.5, %v5125_v35  ;;  %v940_v60 = vadd.f32 1.0, %v5139_v44  ;;  %v5166_v61 = vmul.f32 %v773_v39, %v5090_v10  ;;  %vm5168_vm4 = vcmp.lt.f32.partialorder %v919_v41, 0.0004427343 }
  0x92   : > { %3853 = vmatprep.subr.mxu0 %v559_v21  ;;  %4136 = vmatprep.subr.mxu1 %v559_v21  ;;  %v791_v63 = vadd.f32 1.0, %v790_v42  ;;  %v937_v0 = vand.u32 2147483647, %v5119_v31  ;;  %vm5174_vm5 = vcmp.lt.f32.partialorder %v784_v49, 0.0004427343  ;;  %v805_v7 = vadd.f32 1.0, %v5155_v55 }
  0x93   : > { %3854 = vmatpush3.msra.mxu0 %v559_v21  ;;  %4152 = vmatpush3.msra.mxu1 %v559_v21  ;;  %v802_v4 = vand.u32 2147483647, %v5125_v35  ;;  %4302 = vlog2.f32 %v940_v60  ;;  %v5181_v9 = vmul.f32 %v917_v47, %v5094_v12  ;;  %v5184_v11 = vmul.f32 %v782_v48, %v5100_v16  ;;  %v551_v48 = vld [vmem:[%s4975_s5] sm:$0xff] }
  0x94   : > { %3855 = vmatprep.subr.mxu0 %v558_v27  ;;  %4137 = vmatprep.subr.mxu1 %v558_v27  ;;  %vm5186_vm6 = vcmp.lt.f32.partialorder %v928_v53, 0.0004427343  ;;  %v935_v14 = vadd.f32 1.0, %v934_v54  ;;  %v5195_v20 = vmul.f32 %v926_v52, %v5105_v19  ;;  %vm5197_vm7 = vcmp.lt.f32.partialorder %v793_v58, 0.0004427343  ;;  %v5235_v58 = vld [vmem:[%s4952_s9 + $0x38] sm:$0xff] }
  0x95   : > { %3856 = vmatpush3.msra.mxu0 %v558_v27  ;;  %4153 = vmatpush3.msra.mxu1 %v558_v27  ;;  %v4285_v1 = vpop.eup %4284  ;;  %v800_v22 = vadd.f32 1.0, %v799_v59  ;;  %4304 = vlog2.f32 %v805_v7  ;;  %v5206_v28 = vmul.f32 %v791_v63, %v5111_v25  ;;  %vm5208_vm8 = vcmp.lt.f32.partialorder %v937_v0, 0.0004427343 }
  0x96   : > { %3857 = vmatprep.subr.mxu0 %v557_v36  ;;  %4138 = vmatprep.subr.mxu1 %v557_v36  ;;  %v4287_v8 = vpop.eup %4286  ;;  %v762_v27 = vmul.f32 0.6931472, %v4285_v1  ;;  %v943_v30 = vmul.f32 -0.5, %v5139_v44  ;;  %vm5213_vm9 = vcmp.lt.f32.partialorder %v802_v4, 0.0004427343  ;;  %v808_v34 = vmul.f32 -0.5, %v5155_v55 }
  0x97   : > { %3858 = vmatpush3.msra.mxu0 %v557_v36  ;;  %4154 = vmatpush3.msra.mxu1 %v557_v36  ;;  %v4289_v17 = vpop.eup %4288  ;;  %v906_v32 = vmul.f32 0.6931472, %v4287_v8  ;;  %v949_v36 = vadd.f32 1.0, %v5191_v15  ;;  %v5220_v42 = vmul.f32 %v935_v14, %v5119_v31  ;;  %v814_v43 = vadd.f32 1.0, %v5202_v23 }
  0x98   : > { %3859 = vmatprep.subr.mxu0 %v556_v45  ;;  %4139 = vmatprep.subr.mxu1 %v556_v45  ;;  %v4291_v24 = vpop.eup %4290  ;;  %v771_v40 = vmul.f32 0.6931472, %v4289_v17  ;;  %v5228_v50 = vmul.f32 %v800_v22, %v5125_v35  ;;  %v946_v52 = vand.u32 2147483647, %v5139_v44  ;;  %v768_v53 = vsel %vm5142_vm1, %v5129_v37, %v762_v27 }
  0x99   : > { %3860 = vmatpush3.msra.mxu0 %v556_v45  ;;  %4155 = vmatpush3.msra.mxu1 %v556_v45  ;;  %v4293_v39 = vpop.eup %4292  ;;  %v915_v41 = vmul.f32 0.6931472, %v4291_v24  ;;  %v5224_v45 = vld [vmem:[%s4952_s9 + $0xb0] sm:$0xff]  ;;  %4306 = vlog2.f32 %v949_v36  ;;  %v912_v60 = vsel %vm5148_vm2, %v5132_v38, %v906_v32  ;;  %v809_v63 = vadd.f32 1.0, %v808_v34 }
  0x9a   : > { %3861 = vmatprep.subr.mxu0 %v555_v56  ;;  %4140 = vmatprep.subr.mxu1 %v555_v56  ;;  %v4295_v47 = vpop.eup %4294  ;;  %v780_v49 = vmul.f32 0.6931472, %v4293_v39  ;;  %4308 = vlog2.f32 %v814_v43  ;;  %v811_v0 = vand.u32 2147483647, %v5155_v55  ;;  %v958_v1 = vadd.f32 1.0, %v5224_v45 }
  0x9b   : > { %3862 = vmatpush3.msra.mxu0 %v555_v56  ;;  %4156 = vmatpush3.msra.mxu1 %v555_v56  ;;  %v924_v54 = vmul.f32 0.6931472, %v4295_v47  ;;  %v944_v56 = vadd.f32 1.0, %v943_v30  ;;  %v4297_v59 = vpop.eup %4296  ;;  %v777_v37 = vsel %vm5158_vm3, %v5166_v61, %v771_v40  ;;  %v921_v46 = vsel %vm5168_vm4, %v5181_v9, %v915_v41  ;;  %v5257_v61 = vld [vmem:[%s4952_s9 + $0xb8] sm:$0xff]  ;;  %v5290_v40 = vld [vmem:[%s4952_s9 + $0xc0] sm:$0xff] }
  0x9c   : > { %3863 = vmatprep.subr.mxu0 %v554_v2  ;;  %4141 = vmatprep.subr.mxu1 %v554_v2  ;;  %v952_v51 = vmul.f32 -0.5, %v5191_v15  ;;  %v4299_v38 = vpop.eup %4298  ;;  %v786_v4 = vsel %vm5174_vm5, %v5184_v11, %v780_v49  ;;  %4310 = vlog2.f32 %v958_v1  ;;  %v823_v57 = vadd.f32 1.0, %v5235_v58 }
  0x9d   : > { %3864 = vmatpush3.msra.mxu0 %v554_v2  ;;  %4157 = vmatpush3.msra.mxu1 %v554_v2  ;;  %v789_v2 = vmul.f32 0.6931472, %v4297_v59  ;;  %v930_v7 = vsel %vm5186_vm6, %v5195_v20, %v924_v54  ;;  %v4301_v62 = vpop.eup %4300  ;;  %v933_v8 = vmul.f32 0.6931472, %v4299_v38  ;;  %v945_v9 = vmul.f32 %v944_v56, %v5139_v44 }
  0x9e   : > { %3865 = vmatprep.subr.mxu0 %v553_v18  ;;  %4142 = vmatprep.subr.mxu1 %v553_v18  ;;  %vm5260_vm10 = vcmp.lt.f32.partialorder %v946_v52, 0.0004427343  ;;  %v817_v3 = vmul.f32 -0.5, %v5202_v23  ;;  %v798_v11 = vmul.f32 0.6931472, %v4301_v62  ;;  %v810_v13 = vmul.f32 %v809_v63, %v5155_v55 }
  0x9f   : > { %3866 = vmatpush3.msra.mxu0 %v553_v18  ;;  %4158 = vmatpush3.msra.mxu1 %v553_v18  ;;  %vm5266_vm11 = vcmp.lt.f32.partialorder %v811_v0, 0.0004427343  ;;  %4312 = vlog2.f32 %v823_v57  ;;  %v5271_v18 = vld [vmem:[%s4952_s9 + $0x40] sm:$0xff]  ;;  %v795_v22 = vsel %vm5197_vm7, %v5206_v28, %v789_v2  ;;  %v939_v24 = vsel %vm5208_vm8, %v5220_v42, %v933_v8  ;;  %v5326_v2 = vld [vmem:[%s4952_s9 + $0x50] sm:$0xff] }
  0xa0   : > { %3867 = vmatprep.subr.mxu0 %v552_v26  ;;  %4143 = vmatprep.subr.mxu1 %v552_v26  ;;  %v4303_v20 = vpop.eup %4302  ;;  %v967_v27 = vadd.f32 1.0, %v5257_v61  ;;  %v804_v30 = vsel %vm5213_vm9, %v5228_v50, %v798_v11  ;;  %v953_v34 = vadd.f32 1.0, %v952_v51  ;;  %v961_v36 = vmul.f32 -0.5, %v5224_v45 }
  0xa1   : > { %3868 = vmatpush3.msra.mxu0 %v552_v26  ;;  %4159 = vmatpush3.msra.mxu1 %v552_v26  ;;  %v955_v26 = vand.u32 2147483647, %v5191_v15  ;;  %v942_v32 = vmul.f32 0.6931472, %v4303_v20  ;;  %v818_v28 = vadd.f32 1.0, %v817_v3  ;;  %v832_v39 = vadd.f32 1.0, %v5271_v18 }
  0xa2   : > { %3869 = vmatprep.subr.mxu0 %v551_v48  ;;  %4144 = vmatprep.subr.mxu1 %v551_v48  ;;  %v4305_v21 = vpop.eup %4304  ;;  %v820_v29 = vand.u32 2147483647, %v5202_v23  ;;  %4314 = vlog2.f32 %v967_v27  ;;  %v964_v42 = vand.u32 2147483647, %v5224_v45  ;;  %v962_v49 = vadd.f32 1.0, %v961_v36  ;;  %v5433_v36 = vld [vmem:[%s4952_s9 + $0x70] sm:$0xff] }
  0xa3   : > { %3870 = vmatpush3.msra.mxu0 %v551_v48  ;;  %4160 = vmatpush3.msra.mxu1 %v551_v48  ;;  %v948_v33 = vsel %vm5260_vm10, %v945_v9, %v942_v32  ;;  %v807_v41 = vmul.f32 0.6931472, %v4305_v21  ;;  %vm5299_vm12 = vcmp.lt.f32.partialorder %v955_v26, 0.0004427343  ;;  %4316 = vlog2.f32 %v832_v39  ;;  %v5351_v26 = vld [vmem:[%s4952_s9 + $0x58] sm:$0xff] }
  0xa4   : > { %3871 = vmatprep.mubr.f32.mxu0 %v768_v53  ;;  %3895 = vmatprep.mubr.f32.mxu1 %v912_v60  ;;  %v954_v48 = vmul.f32 %v953_v34, %v5191_v15  ;;  %v976_v50 = vadd.f32 1.0, %v5290_v40  ;;  %v819_v53 = vmul.f32 %v818_v28, %v5202_v23  ;;  %vm5310_vm13 = vcmp.lt.f32.partialorder %v820_v29, 0.0004427343 }
  0xa5   : > { %3872 = vmatmul.mubr.f32.vlgmr.msra.gmra.mxu0 %v777_v37  ;;  %3896 = vmatmul.mubr.f32.vlgmr.msra.gmra.mxu1 %v921_v46  ;;  %v813_v47 = vsel %vm5266_vm11, %v810_v13, %v807_v41  ;;  %v970_v56 = vmul.f32 -0.5, %v5257_v61  ;;  %vm5316_vm14 = vcmp.lt.f32.partialorder %v964_v42, 0.0004427343  ;;  %v829_v37 = vand.u32 2147483647, %v5235_v58  ;;  %v5372_v41 = vld [vmem:[%s4952_s9 + $0xd8] sm:$0xff] }
  0xa6   : > { %3874 = vmatprep.mubr.f32.mxu0 %v786_v4  ;;  %3898 = vmatprep.mubr.f32.mxu1 %v930_v7  ;;  %v4307_v52 = vpop.eup %4306  ;;  %4318 = vlog2.f32 %v976_v50  ;;  %v835_v46 = vmul.f32 -0.5, %v5271_v18  ;;  %v963_v38 = vmul.f32 %v962_v49, %v5224_v45  ;;  %v973_v4 = vand.u32 2147483647, %v5257_v61 }
  0xa7   : > { %635 = vadd.xlane.f32.xlu1 %v5100_v16  ;;  %631 = vadd.xlane.f32.xlu0 %v5081_v5  ;;  %v826_v16 = vmul.f32 -0.5, %v5235_v58  ;;  %v5297_v5 = vld [vmem:[%s4952_s9 + $0x48] sm:$0xff]  ;;  %v4309_v60 = vpop.eup %4308  ;;  %v951_v63 = vmul.f32 0.6931472, %v4307_v52  ;;  %v979_v7 = vmul.f32 -0.5, %v5290_v40  ;;  %v971_v8 = vadd.f32 1.0, %v970_v56 }
  0xa8   : > { %v841_v59 = vadd.f32 1.0, %v5297_v5  ;;  %v816_v1 = vmul.f32 0.6931472, %v4309_v60  ;;  %v838_v9 = vand.u32 2147483647, %v5271_v18  ;;  %v844_v13 = vmul.f32 -0.5, %v5297_v5 }
  0xa9   : > { %3875 = vmatmul.mubr.f32.gmra.mxu0 %v795_v22  ;;  %3899 = vmatmul.mubr.f32.gmra.mxu1 %v939_v24  ;;  %v957_v51 = vsel %vm5299_vm12, %v954_v48, %v951_v63  ;;  %v4311_v57 = vpop.eup %4310  ;;  %vm5345_vm15 = vcmp.lt.f32.partialorder %v829_v37, 0.0004427343  ;;  %v836_v22 = vadd.f32 1.0, %v835_v46  ;;  %v982_v24 = vand.u32 2147483647, %v5290_v40  ;;  %v5383_v52 = vld [vmem:[%s4952_s9 + $0x60] sm:$0xff] }
  0xaa   : > { %3877 = vmatprep.mubr.f32.mxu0 %v804_v30  ;;  %3901 = vmatprep.mubr.f32.mxu1 %v948_v33  ;;  %4320 = vlog2.f32 %v841_v59  ;;  %v822_v62 = vsel %vm5310_vm13, %v819_v53, %v816_v1  ;;  %v960_v3 = vmul.f32 0.6931472, %v4311_v57  ;;  %v980_v32 = vadd.f32 1.0, %v979_v7  ;;  %v5406_v57 = vld [vmem:[%s4952_s9 + $0x68] sm:$0xff] }
  0xab   : > { %637 = vadd.xlane.f32.xlu1 %v5111_v25  ;;  %633 = vadd.xlane.f32.xlu0 %v5090_v10  ;;  %v827_v10 = vadd.f32 1.0, %v826_v16  ;;  %v5321_v25 = vld [vmem:[%s4952_s9 + $0xc8] sm:$0xff]  ;;  %v972_v34 = vmul.f32 %v971_v8, %v5257_v61  ;;  %vm5358_vm0 = vcmp.lt.f32.partialorder %v973_v4, 0.0004427343  ;;  %vm5362_vm1 = vcmp.lt.f32.partialorder %v838_v9, 0.0004427343 }
  0xac   : > { %v985_v14 = vadd.f32 1.0, %v5321_v25  ;;  %v4313_v17 = vpop.eup %4312  ;;  %v966_v27 = vsel %vm5316_vm14, %v963_v38, %v960_v3  ;;  %v845_v39 = vadd.f32 1.0, %v844_v13  ;;  %v859_v33 = vadd.f32 1.0, %v5351_v26  ;;  %v5479_v8 = vld [vmem:[%s4952_s9 + $0xf8] sm:$0xff] }
  0xad   : > { %3878 = vmatmul.mubr.f32.gmra.mxu0 %v813_v47  ;;  %3902 = vmatmul.mubr.f32.gmra.mxu1 %v957_v51  ;;  %v828_v11 = vmul.f32 %v827_v10, %v5235_v58  ;;  %v825_v30 = vmul.f32 0.6931472, %v4313_v17  ;;  %v837_v16 = vmul.f32 %v836_v22, %v5271_v18  ;;  %vm5375_vm2 = vcmp.lt.f32.partialorder %v982_v24, 0.0004427343  ;;  %v5399_v51 = vld [vmem:[%s4952_s9 + $0xe0] sm:$0xff] }
  0xae   : > { %3880 = vmatprep.mubr.f32.mxu0 %v822_v62  ;;  %4322 = vlog2.f32 %v985_v14  ;;  %3904 = vmatprep.mubr.f32.mxu1 %v966_v27  ;;  %v981_v48 = vmul.f32 %v980_v32, %v5290_v40  ;;  %v847_v49 = vand.u32 2147483647, %v5297_v5  ;;  %v853_v50 = vmul.f32 -0.5, %v5326_v2 }
  0xaf   : > { %641 = vadd.xlane.f32.xlu1 %v5155_v55  ;;  %639 = vadd.xlane.f32.xlu0 %v5125_v35  ;;  %v850_v55 = vadd.f32 1.0, %v5326_v2  ;;  %v5343_v35 = vld [vmem:[%s4952_s9 + $0xd0] sm:$0xff]  ;;  %v4315_v29 = vpop.eup %4314  ;;  %v991_v56 = vand.u32 2147483647, %v5321_v25  ;;  %v1003_v59 = vadd.f32 1.0, %v5372_v41  ;;  %v846_v60 = vmul.f32 %v845_v39, %v5297_v5 }
  0xb0   : > { %v994_v28 = vadd.f32 1.0, %v5343_v35  ;;  %v969_v42 = vmul.f32 0.6931472, %v4315_v29  ;;  %v4317_v47 = vpop.eup %4316  ;;  %v856_v0 = vand.u32 2147483647, %v5326_v2  ;;  %v997_v10 = vmul.f32 -0.5, %v5343_v35 }
  0xb1   : > { %4324 = vlog2.f32 %v850_v55  ;;  %v834_v54 = vmul.f32 0.6931472, %v4317_v47  ;;  %v862_v37 = vmul.f32 -0.5, %v5351_v26  ;;  %v868_v46 = vadd.f32 1.0, %v5383_v52  ;;  %v5449_v47 = vld [vmem:[%s4952_s9 + $0x78] sm:$0xff] }
  0xb2   : > { %4326 = vlog2.f32 %v994_v28  ;;  %v975_v53 = vsel %vm5358_vm0, %v972_v34, %v969_v42  ;;  %vm5401_vm3 = vcmp.lt.f32.partialorder %v847_v49, 0.0004427343  ;;  %v854_v7 = vadd.f32 1.0, %v853_v50  ;;  %v5430_v34 = vld [vmem:[%s4952_s9 + $0xe8] sm:$0xff] }
  0xb3   : > { %645 = vadd.xlane.f32.xlu1 %v5235_v58  ;;  %643 = vadd.xlane.f32.xlu0 %v5202_v23  ;;  %v831_v58 = vsel %vm5345_vm15, %v828_v11, %v825_v30  ;;  %v988_v23 = vmul.f32 -0.5, %v5321_v25  ;;  %4328 = vlog2.f32 %v859_v33  ;;  %v4319_v1 = vpop.eup %4318  ;;  %vm5409_vm4 = vcmp.lt.f32.partialorder %v991_v56, 0.0004427343  ;;  %v5456_v56 = vld [vmem:[%s4952_s9 + $0xf0] sm:$0xff]  ;;  %s7151_s9 = sld [smem:[#allocation22_spill]] (!%p3618_p12) }
  0xb4   : > { %3881 = vmatmul.mubr.f32.gmra.mxu0 %v831_v58  ;;  %3905 = vmatmul.mubr.f32.gmra.mxu1 %v975_v53  ;;  %4330 = vlog2.f32 %v1003_v59  ;;  %v978_v4 = vmul.f32 0.6931472, %v4319_v1  ;;  %v1000_v9 = vand.u32 2147483647, %v5343_v35  ;;  %v998_v11 = vadd.f32 1.0, %v997_v10 }
  0xb5   : > { %v989_v63 = vadd.f32 1.0, %v988_v23  ;;  %4332 = vlog2.f32 %v868_v46  ;;  %v1012_v13 = vadd.f32 1.0, %v5399_v51  ;;  %vm5421_vm5 = vcmp.lt.f32.partialorder %v856_v0, 0.0004427343 }
  0xb6   : > { %v984_v14 = vsel %vm5375_vm2, %v981_v48, %v978_v4  ;;  %v863_v20 = vadd.f32 1.0, %v862_v37  ;;  %v1006_v22 = vmul.f32 -0.5, %v5372_v41  ;;  %v855_v27 = vmul.f32 %v854_v7, %v5326_v2 }
  0xb7   : > { %649 = vadd.xlane.f32.xlu1 %v5297_v5  ;;  %647 = vadd.xlane.f32.xlu0 %v5271_v18  ;;  %v840_v18 = vsel %vm5362_vm1, %v837_v16, %v834_v54  ;;  %v4321_v38 = vpop.eup %4320  ;;  %v990_v3 = vmul.f32 %v989_v63, %v5321_v25  ;;  %v871_v30 = vmul.f32 -0.5, %v5383_v52  ;;  %4334 = vlog2.f32 %v1012_v13  ;;  %v600_v13 = vld [vmem:[#allocation3 + $0x8] sm:$0xff] }
  0xb8   : > { %3883 = vmatprep.mubr.f32.mxu0 %v840_v18  ;;  %v843_v62 = vmul.f32 0.6931472, %v4321_v38  ;;  %3907 = vmatprep.mubr.f32.mxu1 %v984_v14  ;;  %v877_v32 = vadd.f32 1.0, %v5406_v57  ;;  %vm5436_vm6 = vcmp.lt.f32.partialorder %v1000_v9, 0.0004427343  ;;  %v999_v39 = vmul.f32 %v998_v11, %v5343_v35 }
  0xb9   : > { %v1009_v23 = vand.u32 2147483647, %v5372_v41  ;;  %v864_v42 = vmul.f32 %v863_v20, %v5351_v26  ;;  %v1007_v16 = vadd.f32 1.0, %v1006_v22  ;;  %v1021_v43 = vadd.f32 1.0, %v5430_v34 }
  0xba   : > { %v849_v55 = vsel %vm5401_vm3, %v846_v60, %v843_v62  ;;  %4336 = vlog2.f32 %v877_v32  ;;  %v872_v50 = vadd.f32 1.0, %v871_v30  ;;  %v1015_v53 = vmul.f32 -0.5, %v5399_v51 }
  0xbb   : > { %653 = vadd.xlane.f32.xlu1 %v5351_v26  ;;  %651 = vadd.xlane.f32.xlu0 %v5326_v2  ;;  %v4323_v24 = vpop.eup %4322  ;;  %v865_v2 = vand.u32 2147483647, %v5351_v26  ;;  %v886_v54 = vadd.f32 1.0, %v5433_v36  ;;  %4338 = vlog2.f32 %v1021_v43  ;;  %v874_v0 = vand.u32 2147483647, %v5383_v52 }
  0xbc   : > { %3884 = vmatmul.mubr.f32.gmra.mxu0 %v849_v55  ;;  %v987_v28 = vmul.f32 0.6931472, %v4323_v24  ;;  %v880_v10 = vmul.f32 -0.5, %v5406_v57  ;;  %v1008_v18 = vmul.f32 %v1007_v16, %v5372_v41  ;;  %vm5469_vm8 = vcmp.lt.f32.partialorder %v1009_v23, 0.0004427343 }
  0xbd   : > { %vm5459_vm7 = vcmp.lt.f32.partialorder %v865_v2, 0.0004427343  ;;  %4340 = vlog2.f32 %v886_v54  ;;  %v1030_v46 = vadd.f32 1.0, %v5456_v56  ;;  %v873_v5 = vmul.f32 %v872_v50, %v5383_v52 }
  0xbe   : > { %v4325_v21 = vpop.eup %4324  ;;  %v993_v33 = vsel %vm5409_vm4, %v990_v3, %v987_v28  ;;  %v1016_v7 = vadd.f32 1.0, %v1015_v53  ;;  %v1018_v62 = vand.u32 2147483647, %v5399_v51  ;;  %v1024_v14 = vmul.f32 -0.5, %v5430_v34 }
  0xbf   : > { %657 = vadd.xlane.f32.xlu1 %v5406_v57  ;;  %655 = vadd.xlane.f32.xlu0 %v5383_v52  ;;  %v852_v58 = vmul.f32 0.6931472, %v4325_v21  ;;  %v4327_v48 = vpop.eup %4326  ;;  %4342 = vlog2.f32 %v1030_v46  ;;  %v895_v3 = vadd.f32 1.0, %v5449_v47  ;;  %vm5485_vm9 = vcmp.lt.f32.partialorder %v874_v0, 0.0004427343 }
  0xc0   : > { %3908 = vmatmul.mubr.f32.gmra.mxu1 %v993_v33  ;;  %v4329_v26 = vpop.eup %4328  ;;  %v996_v59 = vmul.f32 0.6931472, %v4327_v48  ;;  %v881_v52 = vadd.f32 1.0, %v880_v10  ;;  %v883_v55 = vand.u32 2147483647, %v5406_v57  ;;  %v889_v17 = vmul.f32 -0.5, %v5433_v36 }
  0xc1   : > { %v858_v49 = vsel %vm5421_vm5, %v855_v27, %v852_v58  ;;  %v861_v63 = vmul.f32 0.6931472, %v4329_v26  ;;  %v4331_v38 = vpop.eup %4330  ;;  %4344 = vlog2.f32 %v895_v3  ;;  %v1039_v22 = vadd.f32 1.0, %v5479_v8 }
  0xc2   : > { %3886 = vmatprep.mubr.f32.mxu0 %v858_v49  ;;  %v1002_v1 = vsel %vm5436_vm6, %v999_v39, %v996_v59  ;;  %v1005_v9 = vmul.f32 0.6931472, %v4331_v38  ;;  %v4333_v11 = vpop.eup %4332  ;;  %vm5495_vm10 = vcmp.lt.f32.partialorder %v1018_v62, 0.0004427343  ;;  %v1025_v32 = vadd.f32 1.0, %v1024_v14 }
  0xc3   : > { %661 = vadd.xlane.f32.xlu1 %v5449_v47  ;;  %659 = vadd.xlane.f32.xlu0 %v5433_v36  ;;  %v867_v4 = vsel %vm5459_vm7, %v864_v42, %v861_v63  ;;  %v870_v20 = vmul.f32 0.6931472, %v4333_v11  ;;  %v1033_v21 = vmul.f32 -0.5, %v5456_v56  ;;  %4346 = vlog2.f32 %v1039_v22  ;;  %v606_v22 = vld [vmem:[#allocation3 + $0x38] sm:$0xff] }
  0xc4   : > { %3910 = vmatprep.mubr.f32.mxu1 %v1002_v1  ;;  %3887 = vmatmul.mubr.f32.gmra.mxu0 %v867_v4  ;;  %v4335_v27 = vpop.eup %4334  ;;  %v882_v29 = vmul.f32 %v881_v52, %v5406_v57  ;;  %v1027_v2 = vand.u32 2147483647, %v5430_v34  ;;  %v890_v58 = vadd.f32 1.0, %v889_v17  ;;  %vm5506_vm11 = vcmp.lt.f32.partialorder %v883_v55, 0.0004427343  ;;  %v603_v55 = vld [vmem:[#allocation3 + $0x20] sm:$0xff] }
  0xc5   : > { %v876_v30 = vsel %vm5485_vm9, %v873_v5, %v870_v20  ;;  %v1014_v28 = vmul.f32 0.6931472, %v4335_v27  ;;  %v892_v23 = vand.u32 2147483647, %v5433_v36  ;;  %v898_v33 = vmul.f32 -0.5, %v5449_v47 }
  0xc6   : > { %3889 = vmatprep.mubr.f32.mxu0 %v876_v30  ;;  %v1026_v57 = vmul.f32 %v1025_v32, %v5430_v34  ;;  %v1034_v16 = vadd.f32 1.0, %v1033_v21  ;;  %v1042_v43 = vmul.f32 -0.5, %v5479_v8  ;;  %vm5520_vm12 = vcmp.lt.f32.partialorder %v1027_v2, 0.0004427343  ;;  %v608_v21 = vld [vmem:[#allocation3 + $0x48] sm:$0xff] }
  0xc7   : > { %665 = vadd.xlane.f32.xlu1 %v5094_v12  ;;  %663 = vadd.xlane.f32.xlu0 %v5084_v6  ;;  %v1011_v12 = vsel %vm5469_vm8, %v1008_v18, %v1005_v9  ;;  %v1017_v6 = vmul.f32 %v1016_v7, %v5399_v51  ;;  %v4337_v39 = vpop.eup %4336  ;;  %v891_v53 = vmul.f32 %v890_v58, %v5433_v36  ;;  %vm893_vm13 = vcmp.lt.f32.partialorder %v892_v23, 0.0004427343  ;;  %v609_v23 = vld [vmem:[#allocation3 + $0x50] sm:$0xff] }
  0xc8   : > { %3911 = vmatmul.mubr.f32.gmra.mxu1 %v1011_v12  ;;  %v4339_v48 = vpop.eup %4338  ;;  %v899_v59 = vadd.f32 1.0, %v898_v33  ;;  %v1035_v0 = vmul.f32 %v1034_v16, %v5456_v56  ;;  %v1043_v10 = vadd.f32 1.0, %v1042_v43  ;;  %v1045_v18 = vand.u32 2147483647, %v5479_v8  ;;  %v612_v16 = vld [vmem:[#allocation3 + $0x68] sm:$0xff]  ;;  %v611_v43 = vld [vmem:[#allocation3 + $0x60] sm:$0xff] }
  0xc9   : > { %v1020_v42 = vsel %vm5495_vm10, %v1017_v6, %v1014_v28  ;;  %v1023_v26 = vmul.f32 0.6931472, %v4339_v48  ;;  %vm727_vm1 = vcmask 7168   ;;  %v605_v6 = vld [vmem:[#allocation3 + $0x30] sm:$0xff]  ;;  %v607_v28 = vld [vmem:[#allocation3 + $0x40] sm:$0xff] }
  0xca   : > { %3913 = vmatprep.mubr.f32.mxu1 %v1020_v42  ;;  %v4341_v54 = vpop.eup %4340  ;;  %v900_v46 = vmul.f32 %v899_v59, %v5449_v47  ;;  %v1044_v5 = vmul.f32 %v1043_v10, %v5479_v8  ;;  %vm1046_vm0 = vcmp.lt.f32.partialorder %v1045_v18, 0.0004427343 }
  0xcb   : > { %669 = vadd.xlane.f32.xlu1 %v5119_v31  ;;  %667 = vadd.xlane.f32.xlu0 %v5105_v19  ;;  %v879_v19 = vmul.f32 0.6931472, %v4337_v39  ;;  %v888_v60 = vmul.f32 0.6931472, %v4341_v54  ;;  %v1029_v63 = vsel %vm5520_vm12, %v1026_v57, %v1023_v26  ;;  %v610_v31 = vld [vmem:[#allocation3 + $0x58] sm:$0xff]  ;;  %v613_v54 = vld [vmem:[#allocation3 + $0x70] sm:$0xff] }
  0xcc   : > { %v4343_v36 = vpop.eup %4342  ;;  %3914 = vmatmul.mubr.f32.gmra.mxu1 %v1029_v63  ;;  %v616_v63 = vld [vmem:[#allocation3 + $0x88] sm:$0xff] }
  0xcd   : > { %v885_v49 = vsel %vm5506_vm11, %v882_v29, %v879_v19  ;;  %v894_v1 = vsel %vm893_vm13, %v891_v53, %v888_v60  ;;  %v1032_v37 = vmul.f32 0.6931472, %v4343_v36 }
  0xce   : > { %3890 = vmatmul.mubr.f32.gmra.mxu0 %v885_v49  ;;  %v4345_v38 = vpop.eup %4344 }
  0xcf   : > { %673 = vadd.xlane.f32.xlu1 %v5191_v15  ;;  %671 = vadd.xlane.f32.xlu0 %v5139_v44  ;;  %v1036_v15 = vand.u32 2147483647, %v5456_v56  ;;  %v901_v44 = vand.u32 2147483647, %v5449_v47  ;;  %v897_v4 = vmul.f32 0.6931472, %v4345_v38 }
  0xd0   : > { %3892 = vmatprep.mubr.f32.mxu0 %v894_v1 }
  0xd1   : > { %vm1037_vm14 = vcmp.lt.f32.partialorder %v1036_v15, 0.0004427343  ;;  %vm902_vm15 = vcmp.lt.f32.partialorder %v901_v44, 0.0004427343  ;;  %v614_v15 = vld [vmem:[#allocation3 + $0x78] sm:$0xff] }
  0xd2   : > { %v903_v7 = vsel %vm902_vm15, %v900_v46, %v897_v4  ;;  %v617_v46 = vld [vmem:[#allocation3 + $0x90] sm:$0xff] }
  0xd3   : > { %677 = vadd.xlane.f32.xlu1 %v5257_v61  ;;  %675 = vadd.xlane.f32.xlu0 %v5224_v45  ;;  %v1038_v61 = vsel %vm1037_vm14, %v1035_v0, %v1032_v37  ;;  %v4347_v45 = vpop.eup %4346  ;;  %v615_v0 = vld [vmem:[#allocation3 + $0x80] sm:$0xff]  ;;  %v618_v37 = vld [vmem:[#allocation3 + $0x98] sm:$0xff] }
  0xd4   : > { %3916 = vmatprep.mubr.f32.mxu1 %v1038_v61  ;;  %v1041_v62 = vmul.f32 0.6931472, %v4347_v45  ;;  %3893 = vmatmul.mubr.f32.gmra.mxu0 %v903_v7  ;;  %v620_v45 = vld [vmem:[#allocation3 + $0xa8] sm:$0xff]  ;;  %v619_v7 = vld [vmem:[#allocation3 + $0xa0] sm:$0xff] }
  0xd6   : > { %v1047_v9 = vsel %vm1046_vm0, %v1044_v5, %v1041_v62 }
  0xd7   : > { %681 = vadd.xlane.f32.xlu1 %v5321_v25  ;;  %679 = vadd.xlane.f32.xlu0 %v5290_v40  ;;  %v601_v40 = vld [vmem:[#allocation3 + $0x10] sm:$0xff]  ;;  %v599_v25 = vld [vmem:[#allocation3] sm:$0xff] }
  0xd8   : > { %3917 = vmatmul.mubr.f32.gmra.mxu1 %v1047_v9 }
  0xdb   : > { %685 = vadd.xlane.f32.xlu1 %v5372_v41  ;;  %683 = vadd.xlane.f32.xlu0 %v5343_v35  ;;  %v602_v41 = vld [vmem:[#allocation3 + $0x18] sm:$0xff] }
  0xdf   : > { %689 = vadd.xlane.f32.xlu1 %v5430_v34  ;;  %687 = vadd.xlane.f32.xlu0 %v5399_v51 }
  0xe3   : > { %693 = vadd.xlane.f32.xlu1 %v5479_v8  ;;  %691 = vadd.xlane.f32.xlu0 %v5456_v56  ;;  %v604_v8 = vld [vmem:[#allocation3 + $0x28] sm:$0xff] }
 0x130   : > { %v636_v47 = vpop.xlane.xlu1 %635  ;;  %v632_v14 = vpop.xlane.xlu0 %631 }
 0x131   : > { %v697_v3 = vadd.f32 %v636_v47, %v601_v40  ;;  %v695_v11 = vadd.f32 %v632_v14, %v599_v25  ;;  %v622_v47 = vld [vmem:[#allocation3 + $0xb8] sm:$0xff]  ;;  %v621_v14 = vld [vmem:[#allocation3 + $0xb0] sm:$0xff] }
 0x133   : > { %730 = vst.msk [vmem:[#allocation3 + $0x10] sm:$0xff] %vm727_vm1, %v697_v3  ;;  %728 = vst.msk [vmem:[#allocation3] sm:$0xff] %vm727_vm1, %v695_v11 }
 0x134   : > { %v638_v35 = vpop.xlane.xlu1 %637  ;;  %v634_v34 = vpop.xlane.xlu0 %633 }
 0x135   : > { %v698_v51 = vadd.f32 %v638_v35, %v602_v41  ;;  %v696_v52 = vadd.f32 %v634_v34, %v600_v13  ;;  %v624_v35 = vld [vmem:[#allocation3 + $0xc8] sm:$0xff]  ;;  %v623_v34 = vld [vmem:[#allocation3 + $0xc0] sm:$0xff] }
 0x137   : > { %731 = vst.msk [vmem:[#allocation3 + $0x18] sm:$0xff] %vm727_vm1, %v698_v51  ;;  %729 = vst.msk [vmem:[#allocation3 + $0x8] sm:$0xff] %vm727_vm1, %v696_v52 }
 0x138   : > { %v642_v56 = vpop.xlane.xlu1 %641  ;;  %v640_v17 = vpop.xlane.xlu0 %639 }
 0x139   : > { %v700_v12 = vadd.f32 %v642_v56, %v604_v8  ;;  %v699_v20 = vadd.f32 %v640_v17, %v603_v55  ;;  %v626_v56 = vld [vmem:[#allocation3 + $0xd8] sm:$0xff]  ;;  %v1049_v17 = vld [vmem:[#allocation2] sm:$0xff] }
 0x13b   : > { %733 = vst.msk [vmem:[#allocation3 + $0x28] sm:$0xff] %vm727_vm1, %v700_v12  ;;  %732 = vst.msk [vmem:[#allocation3 + $0x20] sm:$0xff] %vm727_vm1, %v699_v20  ;;  %v1065_v12 = vld [vmem:[#allocation2 + $0x58] sm:$0xff] }
 0x13c   : > { %v646_v24 = vpop.xlane.xlu1 %645  ;;  %v644_v27 = vpop.xlane.xlu0 %643 }
 0x13d   : > { %v702_v30 = vadd.f32 %v646_v24, %v606_v22  ;;  %v701_v32 = vadd.f32 %v644_v27, %v605_v6  ;;  %v625_v22 = vld [vmem:[#allocation3 + $0xd0] sm:$0xff] }
 0x13e   : > { %v1048_v27 = vld [vmem:[#allocation2 + $0xb0] sm:$0xff] }
 0x13f   : > { %735 = vst.msk [vmem:[#allocation3 + $0x38] sm:$0xff] %vm727_vm1, %v702_v30  ;;  %734 = vst.msk [vmem:[#allocation3 + $0x30] sm:$0xff] %vm727_vm1, %v701_v32  ;;  %v1064_v30 = vld [vmem:[#allocation2 + $0x38] sm:$0xff] }
 0x140   : > { %v650_v29 = vpop.xlane.xlu1 %649  ;;  %v648_v2 = vpop.xlane.xlu0 %647 }
 0x141   : > { %v704_v58 = vadd.f32 %v650_v29, %v608_v21  ;;  %v703_v39 = vadd.f32 %v648_v2, %v607_v28  ;;  %v628_v2 = vld [vmem:[#allocation3 + $0xe8] sm:$0xff] }
 0x143   : > { %737 = vst.msk [vmem:[#allocation3 + $0x48] sm:$0xff] %vm727_vm1, %v704_v58  ;;  %736 = vst.msk [vmem:[#allocation3 + $0x40] sm:$0xff] %vm727_vm1, %v703_v39 }
 0x144   : > { %v654_v33 = vpop.xlane.xlu1 %653  ;;  %v652_v19 = vpop.xlane.xlu0 %651 }
 0x145   : > { %v706_v42 = vadd.f32 %v654_v33, %v610_v31  ;;  %v705_v57 = vadd.f32 %v652_v19, %v609_v23  ;;  %v1051_v31 = vld [vmem:[#allocation2 + $0x18] sm:$0xff]  ;;  %v1067_v23 = vld [vmem:[#allocation2 + $0xc8] sm:$0xff] }
 0x147   : > { %739 = vst.msk [vmem:[#allocation3 + $0x58] sm:$0xff] %vm727_vm1, %v706_v42  ;;  %738 = vst.msk [vmem:[#allocation3 + $0x50] sm:$0xff] %vm727_vm1, %v705_v57 }
 0x148   : > { %v658_v48 = vpop.xlane.xlu1 %657  ;;  %v656_v50 = vpop.xlane.xlu0 %655 }
 0x149   : > { %v708_v49 = vadd.f32 %v658_v48, %v612_v16  ;;  %v707_v53 = vadd.f32 %v656_v50, %v611_v43  ;;  %v627_v16 = vld [vmem:[#allocation3 + $0xe0] sm:$0xff] }
 0x14a   : > { %v1066_v50 = vld [vmem:[#allocation2 + $0x40] sm:$0xff] }
 0x14b   : > { %741 = vst.msk [vmem:[#allocation3 + $0x68] sm:$0xff] %vm727_vm1, %v708_v49  ;;  %740 = vst.msk [vmem:[#allocation3 + $0x60] sm:$0xff] %vm727_vm1, %v707_v53  ;;  %v1050_v49 = vld [vmem:[#allocation2 + $0xd8] sm:$0xff] }
 0x14c   : > { %v662_v26 = vpop.xlane.xlu1 %661  ;;  %v660_v60 = vpop.xlane.xlu0 %659 }
 0x14d   : > { %v710_v59 = vadd.f32 %v662_v26, %v614_v15  ;;  %v709_v44 = vadd.f32 %v660_v60, %v613_v54 }
 0x14f   : > { %743 = vst.msk [vmem:[#allocation3 + $0x78] sm:$0xff] %vm727_vm1, %v710_v59  ;;  %742 = vst.msk [vmem:[#allocation3 + $0x70] sm:$0xff] %vm727_vm1, %v709_v44  ;;  %v630_v59 = vld [vmem:[#allocation3 + $0xf8] sm:$0xff] }
 0x150   : > { %v666_v10 = vpop.xlane.xlu1 %665  ;;  %v664_v1 = vpop.xlane.xlu0 %663 }
 0x151   : > { %v712_v36 = vadd.f32 %v666_v10, %v616_v63  ;;  %v711_v18 = vadd.f32 %v664_v1, %v615_v0  ;;  %v1053_v63 = vld [vmem:[#allocation2 + $0x68] sm:$0xff] }
 0x153   : > { %745 = vst.msk [vmem:[#allocation3 + $0x88] sm:$0xff] %vm727_vm1, %v712_v36  ;;  %744 = vst.msk [vmem:[#allocation3 + $0x80] sm:$0xff] %vm727_vm1, %v711_v18  ;;  %v629_v18 = vld [vmem:[#allocation3 + $0xf0] sm:$0xff] }
 0x154   : > { %v670_v38 = vpop.xlane.xlu1 %669  ;;  %v668_v4 = vpop.xlane.xlu0 %667 }
 0x155   : > { %v714_v61 = vadd.f32 %v670_v38, %v618_v37  ;;  %v713_v5 = vadd.f32 %v668_v4, %v617_v46  ;;  %v1052_v46 = vld [vmem:[#allocation2 + $0x50] sm:$0xff] }
 0x156   : > { %v1069_v4 = vld [vmem:[#allocation2 + $0x90] sm:$0xff] }
 0x157   : > { %747 = vst.msk [vmem:[#allocation3 + $0x98] sm:$0xff] %vm727_vm1, %v714_v61  ;;  %746 = vst.msk [vmem:[#allocation3 + $0x90] sm:$0xff] %vm727_vm1, %v713_v5 }
 0x158   : > { %v674_v62 = vpop.xlane.xlu1 %673  ;;  %v672_v40 = vpop.xlane.xlu0 %671 }
 0x159   : > { %v716_v9 = vadd.f32 %v674_v62, %v620_v45  ;;  %v715_v25 = vadd.f32 %v672_v40, %v619_v7  ;;  %v1068_v40 = vld [vmem:[#allocation2 + $0xe0] sm:$0xff] }
 0x15b   : > { %749 = vst.msk [vmem:[#allocation3 + $0xa8] sm:$0xff] %vm727_vm1, %v716_v9  ;;  %748 = vst.msk [vmem:[#allocation3 + $0xa0] sm:$0xff] %vm727_vm1, %v715_v25 }
 0x15c   : > { %v678_v3 = vpop.xlane.xlu1 %677  ;;  %v676_v41 = vpop.xlane.xlu0 %675 }
 0x15d   : > { %v718_v11 = vadd.f32 %v678_v3, %v622_v47  ;;  %v717_v13 = vadd.f32 %v676_v41, %v621_v14  ;;  %v1055_v3 = vld [vmem:[#allocation2 + $0x48] sm:$0xff]  ;;  %v1054_v41 = vld [vmem:[#allocation2 + $0x30] sm:$0xff] }
 0x15f   : > { %751 = vst.msk [vmem:[#allocation3 + $0xb8] sm:$0xff] %vm727_vm1, %v718_v11  ;;  %750 = vst.msk [vmem:[#allocation3 + $0xb0] sm:$0xff] %vm727_vm1, %v717_v13 }
 0x160   : > { %v682_v51 = vpop.xlane.xlu1 %681  ;;  %v680_v8 = vpop.xlane.xlu0 %679 }
 0x161   : > { %v720_v52 = vadd.f32 %v682_v51, %v624_v35  ;;  %v719_v55 = vadd.f32 %v680_v8, %v623_v34  ;;  %v1071_v35 = vld [vmem:[#allocation2 + $0xc0] sm:$0xff]  ;;  %v1070_v8 = vld [vmem:[#allocation2 + $0x70] sm:$0xff] }
 0x163   : > { %753 = vst.msk [vmem:[#allocation3 + $0xc8] sm:$0xff] %vm727_vm1, %v720_v52  ;;  %752 = vst.msk [vmem:[#allocation3 + $0xc0] sm:$0xff] %vm727_vm1, %v719_v55 }
 0x164   : > { %v686_v20 = vpop.xlane.xlu1 %685  ;;  %v684_v29 = vpop.xlane.xlu0 %683 }
 0x165   : > { %v3873_v6 = vpop.f32.mrf.mxu0  ;;  %v3897_v24 = vpop.f32.mrf.mxu1  ;;  %v722_v32 = vadd.f32 %v686_v20, %v626_v56  ;;  %v721_v33 = vadd.f32 %v684_v29, %v625_v22  ;;  %v1056_v22 = vld [vmem:[#allocation2 + $0x80] sm:$0xff] }
 0x166   : > { %v1306_v21 = vadd.f32 %v3873_v6, %v1049_v17  ;;  %v1322_v28 = vadd.f32 %v3897_v24, %v1065_v12  ;;  %v1057_v12 = vld [vmem:[#allocation2 + $0x88] sm:$0xff]  ;;  %v1073_v24 = vld [vmem:[#allocation2 + $0xd0] sm:$0xff] }
 0x167   : > { %v1146_v58 = vpop.f32.mrf.mxu0  ;;  %v1226_v39 = vpop.f32.mrf.mxu1  ;;  %755 = vst.msk [vmem:[#allocation3 + $0xd8] sm:$0xff] %vm727_vm1, %v722_v32  ;;  %754 = vst.msk [vmem:[#allocation3 + $0xd0] sm:$0xff] %vm727_vm1, %v721_v33  ;;  %v1075_v33 = vld [vmem:[#allocation2 + $0x28] sm:$0xff] }
 0x168   : > { %1338 = vst [vmem:[#allocation2] sm:$0xff] %v1306_v21  ;;  %1354 = vst [vmem:[#allocation2 + $0x58] sm:$0xff] %v1322_v28  ;;  %v1305_v42 = vadd.f32 %v1146_v58, %v1048_v27  ;;  %v1321_v19 = vadd.f32 %v1226_v39, %v1064_v30  ;;  %v690_v57 = vpop.xlane.xlu1 %689  ;;  %v688_v26 = vpop.xlane.xlu0 %687  ;;  %v1072_v21 = vld [vmem:[#allocation2 + $0xa8] sm:$0xff]  ;;  %v1059_v58 = vld [vmem:[#allocation2 + $0xb8] sm:$0xff] }
 0x169   : > { %v3876_v43 = vpop.f32.mrf.mxu0  ;;  %v3900_v48 = vpop.f32.mrf.mxu1  ;;  %v724_v53 = vadd.f32 %v690_v57, %v628_v2  ;;  %v723_v0 = vadd.f32 %v688_v26, %v627_v16  ;;  %v1074_v16 = vld [vmem:[#allocation2 + $0x10] sm:$0xff]  ;;  %v1077_v26 = vld [vmem:[#allocation2 + $0xf8] sm:$0xff] }
 0x16a   : > { %1337 = vst [vmem:[#allocation2 + $0xb0] sm:$0xff] %v1305_v42  ;;  %1353 = vst [vmem:[#allocation2 + $0x38] sm:$0xff] %v1321_v19  ;;  %v1308_v15 = vadd.f32 %v3876_v43, %v1051_v31  ;;  %v1324_v54 = vadd.f32 %v3900_v48, %v1067_v23  ;;  %v1058_v31 = vld [vmem:[#allocation2 + $0xe8] sm:$0xff] }
 0x16b   : > { %v1156_v60 = vpop.f32.mrf.mxu0  ;;  %v1236_v44 = vpop.f32.mrf.mxu1  ;;  %757 = vst.msk [vmem:[#allocation3 + $0xe8] sm:$0xff] %vm727_vm1, %v724_v53  ;;  %756 = vst.msk [vmem:[#allocation3 + $0xe0] sm:$0xff] %vm727_vm1, %v723_v0 }
 0x16c   : > { %1340 = vst [vmem:[#allocation2 + $0x18] sm:$0xff] %v1308_v15  ;;  %1356 = vst [vmem:[#allocation2 + $0xc8] sm:$0xff] %v1324_v54  ;;  %v1307_v10 = vadd.f32 %v1156_v60, %v1050_v49  ;;  %v1323_v36 = vadd.f32 %v1236_v44, %v1066_v50  ;;  %v694_v1 = vpop.xlane.xlu1 %693  ;;  %v692_v5 = vpop.xlane.xlu0 %691  ;;  %v1061_v50 = vld [vmem:[#allocation2 + $0xf0] sm:$0xff]  ;;  %v1060_v15 = vld [vmem:[#allocation2 + $0x60] sm:$0xff] }
 0x16d   : > { %v3879_v37 = vpop.f32.mrf.mxu0  ;;  %v726_v38 = vadd.f32 %v694_v1, %v630_v59  ;;  %v725_v7 = vadd.f32 %v692_v5, %v629_v18  ;;  %v3903_v62 = vpop.f32.mrf.mxu1  ;;  %v1063_v1 = vld [vmem:[#allocation2 + $0x78] sm:$0xff]  ;;  %v1078_v5 = vld [vmem:[#allocation2 + $0x20] sm:$0xff] }
 0x16e   : > { %1339 = vst [vmem:[#allocation2 + $0xd8] sm:$0xff] %v1307_v10  ;;  %1355 = vst [vmem:[#allocation2 + $0x40] sm:$0xff] %v1323_v36  ;;  %v1310_v61 = vadd.f32 %v3879_v37, %v1053_v63  ;;  %v1326_v25 = vadd.f32 %v3903_v62, %v1069_v4  ;;  %v1076_v63 = vld [vmem:[#allocation2 + $0xa0] sm:$0xff]  ;;  %v1079_v37 = vld [vmem:[#allocation2 + $0x98] sm:$0xff] }
 0x16f   : > { %v1166_v45 = vpop.f32.mrf.mxu0  ;;  %759 = vst.msk [vmem:[#allocation3 + $0xf8] sm:$0xff] %vm727_vm1, %v726_v38  ;;  %758 = vst.msk [vmem:[#allocation3 + $0xf0] sm:$0xff] %vm727_vm1, %v725_v7  ;;  %v1246_v47 = vpop.f32.mrf.mxu1 }
 0x170   : > { %1342 = vst [vmem:[#allocation2 + $0x68] sm:$0xff] %v1310_v61  ;;  %v1309_v9 = vadd.f32 %v1166_v45, %v1052_v46  ;;  %1358 = vst [vmem:[#allocation2 + $0x90] sm:$0xff] %v1326_v25  ;;  %v1325_v14 = vadd.f32 %v1246_v47, %v1068_v40  ;;  %v1062_v46 = vld [vmem:[#allocation2 + $0x8] sm:$0xff] }
 0x172   : > { %1341 = vst [vmem:[#allocation2 + $0x50] sm:$0xff] %v1309_v9  ;;  %1357 = vst [vmem:[#allocation2 + $0xe0] sm:$0xff] %v1325_v14 }
 0x174   : > { %v3882_v11 = vpop.f32.mrf.mxu0  ;;  %v3906_v51 = vpop.f32.mrf.mxu1 }
 0x175   : > { %v1312_v13 = vadd.f32 %v3882_v11, %v1055_v3  ;;  %v1328_v55 = vadd.f32 %v3906_v51, %v1071_v35 }
 0x176   : > { %v1176_v34 = vpop.f32.mrf.mxu0  ;;  %v1256_v56 = vpop.f32.mrf.mxu1 }
 0x177   : > { %1344 = vst [vmem:[#allocation2 + $0x48] sm:$0xff] %v1312_v13  ;;  %v1311_v52 = vadd.f32 %v1176_v34, %v1054_v41  ;;  %1360 = vst [vmem:[#allocation2 + $0xc0] sm:$0xff] %v1328_v55  ;;  %v1327_v17 = vadd.f32 %v1256_v56, %v1070_v8 }
 0x179   : > { %1343 = vst [vmem:[#allocation2 + $0x30] sm:$0xff] %v1311_v52  ;;  %1359 = vst [vmem:[#allocation2 + $0x70] sm:$0xff] %v1327_v17 }
 0x17c   : > { %v3885_v20 = vpop.f32.mrf.mxu0 }
 0x17d   : > { %v1314_v6 = vadd.f32 %v3885_v20, %v1057_v12 }
 0x17e   : > { %v1186_v27 = vpop.f32.mrf.mxu0 }
 0x17f   : > { %1346 = vst [vmem:[#allocation2 + $0x88] sm:$0xff] %v1314_v6  ;;  %v1313_v30 = vadd.f32 %v1186_v27, %v1056_v22 }
 0x180   : > { %v3909_v32 = vpop.f32.mrf.mxu1 }
 0x181   : > { %v1330_v28 = vadd.f32 %v3909_v32, %v1073_v24  ;;  %1345 = vst [vmem:[#allocation2 + $0x80] sm:$0xff] %v1313_v30 }
 0x182   : > { %v1266_v29 = vpop.f32.mrf.mxu1 }
 0x183   : > { %1362 = vst [vmem:[#allocation2 + $0xd0] sm:$0xff] %v1330_v28  ;;  %v1329_v2 = vadd.f32 %v1266_v29, %v1072_v21 }
 0x184   : > { %v3888_v39 = vpop.f32.mrf.mxu0 }
 0x185   : > { %1361 = vst [vmem:[#allocation2 + $0xa8] sm:$0xff] %v1329_v2  ;;  %v1316_v23 = vadd.f32 %v3888_v39, %v1059_v58 }
 0x186   : > { %v1196_v42 = vpop.f32.mrf.mxu0 }
 0x187   : > { %1348 = vst [vmem:[#allocation2 + $0xb8] sm:$0xff] %v1316_v23  ;;  %v1315_v57 = vadd.f32 %v1196_v42, %v1058_v31 }
 0x188   : > { %v3912_v19 = vpop.f32.mrf.mxu1 }
 0x189   : > { %v1332_v43 = vadd.f32 %v3912_v19, %v1075_v33  ;;  %1347 = vst [vmem:[#allocation2 + $0xe8] sm:$0xff] %v1315_v57 }
 0x18a   : > { %v1276_v48 = vpop.f32.mrf.mxu1 }
 0x18b   : > { %1364 = vst [vmem:[#allocation2 + $0x28] sm:$0xff] %v1332_v43  ;;  %v1331_v49 = vadd.f32 %v1276_v48, %v1074_v16 }
 0x18c   : > { %v3915_v60 = vpop.f32.mrf.mxu1 }
 0x18d   : > { %1363 = vst [vmem:[#allocation2 + $0x10] sm:$0xff] %v1331_v49  ;;  %v1334_v0 = vadd.f32 %v3915_v60, %v1077_v26 }
 0x18e   : > { %v3891_v53 = vpop.f32.mrf.mxu0  ;;  %v1286_v10 = vpop.f32.mrf.mxu1 }
 0x18f   : > { %v1318_v54 = vadd.f32 %v3891_v53, %v1061_v50  ;;  %1366 = vst [vmem:[#allocation2 + $0xf8] sm:$0xff] %v1334_v0  ;;  %v1333_v36 = vadd.f32 %v1286_v10, %v1076_v63 }
 0x190   : > { %v1206_v59 = vpop.f32.mrf.mxu0 }
 0x191   : > { %1350 = vst [vmem:[#allocation2 + $0xf0] sm:$0xff] %v1318_v54  ;;  %v1317_v44 = vadd.f32 %v1206_v59, %v1060_v15  ;;  %1365 = vst [vmem:[#allocation2 + $0xa0] sm:$0xff] %v1333_v36 }
 0x193   : > { %1349 = vst [vmem:[#allocation2 + $0x60] sm:$0xff] %v1317_v44 }
 0x194   : > { %v3894_v18 = vpop.f32.mrf.mxu0 }
 0x195   : > { %v1320_v38 = vadd.f32 %v3894_v18, %v1063_v1 }
 0x196   : > { %v1216_v4 = vpop.f32.mrf.mxu0 }
 0x197   : > { %1352 = vst [vmem:[#allocation2 + $0x78] sm:$0xff] %v1320_v38  ;;  %v1319_v7 = vadd.f32 %v1216_v4, %v1062_v46 }
 0x198   : > { %v3918_v61 = vpop.f32.mrf.mxu1 }
 0x199   : > { %v1336_v45 = vadd.f32 %v3918_v61, %v1079_v37  ;;  %1351 = vst [vmem:[#allocation2 + $0x8] sm:$0xff] %v1319_v7  ;;  %1372 = sbr.rel (%p3618_p12) target bundleno = 1165 (0x48d), region = 80 }
 0x19a   : > { %v1296_v62 = vpop.f32.mrf.mxu1 }
 0x19b   : > { %1368 = vst [vmem:[#allocation2 + $0x98] sm:$0xff] %v1336_v45  ;;  %v1335_v9 = vadd.f32 %v1296_v62, %v1078_v5 }
 0x19d   : > { %1367 = vst [vmem:[#allocation2 + $0x20] sm:$0xff] %v1335_v9 }
 0x19e   : > { %v1373_v40 = vld [vmem:[%s7116_s20] sm:$0x3]  ;;  %vm1855_vm2 = vcmask 1041408   ;;  %vm1758_vm3 = vcmask 15360   ;;  %v1727_v14 = vld [vmem:[%s4970_s28 + $0x8] sm:$0xff]  ;;  %v1728_v11 = vld [vmem:[%s4970_s28 + $0x10] sm:$0xff] }
 0x19f   : > { %v1726_v25 = vld [vmem:[%s4970_s28] sm:$0xff]  ;;  %3919 = vmatprep.subr.msk.mxu0 %vm1855_vm2, %v1373_v40  ;;  %4161 = vmatprep.subr.msk.mxu1 %vm1855_vm2, %v1373_v40  ;;  %v1743_v3 = vld [vmem:[%s4970_s28 + $0x88] sm:$0xff]  ;;  %v1744_v41 = vld [vmem:[%s4970_s28 + $0x90] sm:$0xff]  ;;  %v4728_v52 = vmov 0  }
 0x1a0   : > { %v1742_v47 = vld [vmem:[%s4970_s28 + $0x80] sm:$0xff]  ;;  %3920 = vmatpush3.msk.msra.mxu0 %vm1855_vm2, %v1373_v40  ;;  %4162 = vmatpush3.msk.msra.mxu1 %vm1855_vm2, %v1373_v40  ;;  %v1729_v13 = vld [vmem:[%s4970_s28 + $0x18] sm:$0xff]  ;;  %v1376_v8 = vld [vmem:[#allocation3 + $0x10] sm:$0xff] }
 0x1a1   : > { %3921 = vmatprep.mubr.msk.f32.mxu0 %vm1758_vm3, %v1726_v25  ;;  %3945 = vmatprep.mubr.msk.f32.mxu1 %vm1758_vm3, %v1742_v47  ;;  %v1745_v35 = vld [vmem:[%s4970_s28 + $0x98] sm:$0xff]  ;;  %v1730_v34 = vld [vmem:[%s4970_s28 + $0x20] sm:$0xff]  ;;  %v1424_v56 = vadd.f32 1.0, %v1376_v8  ;;  %v1731_v17 = vld [vmem:[%s4970_s28 + $0x28] sm:$0xff]  ;;  %v1427_v30 = vmul.f32 -0.5, %v1376_v8 }
 0x1a2   : > { %3922 = vmatmul.mubr.msk.f32.vlgmr.msra.gmra.mxu0 %vm1758_vm3, %v1727_v14  ;;  %3946 = vmatmul.mubr.msk.f32.vlgmr.msra.gmra.mxu1 %vm1758_vm3, %v1743_v3  ;;  %v1746_v51 = vld [vmem:[%s4970_s28 + $0xa0] sm:$0xff]  ;;  %v1747_v12 = vld [vmem:[%s4970_s28 + $0xa8] sm:$0xff]  ;;  %v1732_v20 = vld [vmem:[%s4970_s28 + $0x30] sm:$0xff]  ;;  %v1430_v28 = vand.u32 2147483647, %v1376_v8 }
 0x1a3   : > { %3924 = vmatprep.mubr.msk.f32.mxu0 %vm1758_vm3, %v1728_v11  ;;  %3948 = vmatprep.mubr.msk.f32.mxu1 %vm1758_vm3, %v1744_v41  ;;  %v1374_v55 = vld [vmem:[#allocation3] sm:$0xff]  ;;  %v1748_v6 = vld [vmem:[%s4970_s28 + $0xb0] sm:$0xff]  ;;  %4350 = vlog2.f32 %v1424_v56  ;;  %v5605_v24 = vld [vmem:[#allocation3 + $0x18] sm:$0xff]  ;;  %v1428_v16 = vadd.f32 1.0, %v1427_v30 }
 0x1a4   : > { %4349 = vset.pattern.permute.xlu1 %v4728_v52  ;;  %4348 = vset.pattern.permute.xlu0 %v4728_v52  ;;  %v1406_v22 = vadd.f32 1.0, %v1374_v55  ;;  %v5607_v27 = vld [vmem:[#allocation3 + $0x8] sm:$0xff]  ;;  %v1409_v32 = vmul.f32 -0.5, %v1374_v55  ;;  %v1733_v21 = vld [vmem:[%s4970_s28 + $0x38] sm:$0xff]  ;;  %v1433_v29 = vadd.f32 1.0, %v5605_v24  ;;  %v5619_v31 = vld [vmem:[#allocation3 + $0x20] sm:$0xff] }
 0x1a5   : > { %v1749_v2 = vld [vmem:[%s4970_s28 + $0xb8] sm:$0xff]  ;;  %v1415_v58 = vadd.f32 1.0, %v5607_v27  ;;  %v5617_v39 = vld [vmem:[#allocation3 + $0x28] sm:$0xff]  ;;  %v1734_v23 = vld [vmem:[%s4970_s28 + $0x40] sm:$0xff]  ;;  %v1436_v42 = vmul.f32 -0.5, %v5605_v24  ;;  %v1418_v19 = vmul.f32 -0.5, %v5607_v27  ;;  %v1429_v37 = vmul.f32 %v1428_v16, %v1376_v8 }
 0x1a6   : > { %3925 = vmatmul.mubr.msk.f32.gmra.mxu0 %vm1758_vm3, %v1729_v13  ;;  %3949 = vmatmul.mubr.msk.f32.gmra.mxu1 %vm1758_vm3, %v1745_v35  ;;  %4352 = vlog2.f32 %v1406_v22  ;;  %v1750_v33 = vld [vmem:[%s4970_s28 + $0xc0] sm:$0xff]  ;;  %v1451_v57 = vadd.f32 1.0, %v5617_v39  ;;  %v1410_v43 = vadd.f32 1.0, %v1409_v32  ;;  %v1412_v48 = vand.u32 2147483647, %v1374_v55  ;;  %v1735_v49 = vld [vmem:[%s4970_s28 + $0x48] sm:$0xff] }
 0x1a7   : > { %3927 = vmatprep.mubr.msk.f32.mxu0 %vm1758_vm3, %v1730_v34  ;;  %3951 = vmatprep.mubr.msk.f32.mxu1 %vm1758_vm3, %v1746_v51  ;;  %4354 = vlog2.f32 %v1433_v29  ;;  %vm5629_vm4 = vcmp.lt.f32.partialorder %v1430_v28, 0.0004427343  ;;  %v1454_v53 = vmul.f32 -0.5, %v5617_v39  ;;  %v1442_v15 = vadd.f32 1.0, %v5619_v31  ;;  %v5635_v54 = vld [vmem:[#allocation3 + $0x38] sm:$0xff]  ;;  %v1751_v26 = vld [vmem:[%s4970_s28 + $0xc8] sm:$0xff] }
 0x1a8   : > { %4356 = vlog2.f32 %v1415_v58  ;;  %v1439_v59 = vand.u32 2147483647, %v5605_v24  ;;  %v1421_v60 = vand.u32 2147483647, %v5607_v27  ;;  %v5642_v44 = vld [vmem:[#allocation3 + $0x30] sm:$0xff]  ;;  %v1437_v10 = vadd.f32 1.0, %v1436_v42 }
 0x1a9   : > { %4358 = vlog2.f32 %v1451_v57  ;;  %v1736_v63 = vld [vmem:[%s4970_s28 + $0x50] sm:$0xff]  ;;  %v1419_v36 = vadd.f32 1.0, %v1418_v19  ;;  %v1469_v1 = vadd.f32 1.0, %v5635_v54  ;;  %v5647_v18 = vld [vmem:[#allocation3 + $0x48] sm:$0xff]  ;;  %v1411_v46 = vmul.f32 %v1410_v43, %v1374_v55  ;;  %v1737_v61 = vld [vmem:[%s4970_s28 + $0x58] sm:$0xff] }
 0x1aa   : > { %3928 = vmatmul.mubr.msk.f32.gmra.mxu0 %vm1758_vm3, %v1731_v17  ;;  %3952 = vmatmul.mubr.msk.f32.gmra.mxu1 %vm1758_vm3, %v1747_v12  ;;  %v1752_v0 = vld [vmem:[%s4970_s28 + $0xd0] sm:$0xff]  ;;  %4360 = vlog2.f32 %v1442_v15  ;;  %vm5649_vm5 = vcmp.lt.f32.partialorder %v1412_v48, 0.0004427343  ;;  %v1445_v4 = vmul.f32 -0.5, %v5619_v31  ;;  %v1753_v5 = vld [vmem:[%s4970_s28 + $0xd8] sm:$0xff]  ;;  %v1455_v45 = vadd.f32 1.0, %v1454_v53 }
 0x1ab   : > { %3930 = vmatprep.mubr.msk.f32.mxu0 %vm1758_vm3, %v1732_v20  ;;  %3954 = vmatprep.mubr.msk.f32.mxu1 %vm1758_vm3, %v1748_v6  ;;  %v1457_v7 = vand.u32 2147483647, %v5617_v39  ;;  %4362 = vlog2.f32 %v1469_v1  ;;  %v1460_v62 = vadd.f32 1.0, %v5642_v44  ;;  %v5660_v9 = vld [vmem:[#allocation3 + $0x40] sm:$0xff]  ;;  %vm5664_vm6 = vcmp.lt.f32.partialorder %v1439_v59, 0.0004427343 }
 0x1ac   : > { %vm5668_vm7 = vcmp.lt.f32.partialorder %v1421_v60, 0.0004427343  ;;  %v1472_v47 = vmul.f32 -0.5, %v5635_v54  ;;  %v1487_v14 = vadd.f32 1.0, %v5647_v18  ;;  %v5675_v3 = vmul.f32 %v1437_v10, %v5605_v24  ;;  %v1738_v41 = vld [vmem:[%s4970_s28 + $0x60] sm:$0xff]  ;;  %v5685_v56 = vld [vmem:[#allocation3 + $0x58] sm:$0xff] }
 0x1ad   : > { %v5678_v11 = vmul.f32 %v1419_v36, %v5607_v27  ;;  %v1754_v13 = vld [vmem:[%s4970_s28 + $0xe0] sm:$0xff]  ;;  %v1448_v35 = vand.u32 2147483647, %v5619_v31  ;;  %4364 = vlog2.f32 %v1460_v62  ;;  %v1446_v51 = vadd.f32 1.0, %v1445_v4  ;;  %v1739_v20 = vld [vmem:[%s4970_s28 + $0x68] sm:$0xff]  ;;  %v1740_v58 = vld [vmem:[%s4970_s28 + $0x70] sm:$0xff] }
 0x1ae   : > { %3931 = vmatmul.mubr.msk.f32.gmra.mxu0 %vm1758_vm3, %v1733_v21  ;;  %3955 = vmatmul.mubr.msk.f32.gmra.mxu1 %vm1758_vm3, %v1749_v2  ;;  %v1475_v8 = vand.u32 2147483647, %v5635_v54  ;;  %4366 = vlog2.f32 %v1487_v14  ;;  %v1478_v55 = vadd.f32 1.0, %v5660_v9  ;;  %v5691_v22 = vmul.f32 %v1455_v45, %v5617_v39  ;;  %v5701_v21 = vld [vmem:[#allocation3 + $0x50] sm:$0xff]  ;;  %v1755_v29 = vld [vmem:[%s4970_s28 + $0xe8] sm:$0xff]  ;;  %v1741_v50 = vld [vmem:[%s4970_s28 + $0x78] sm:$0xff] }
 0x1af   : > { %3933 = vmatprep.mubr.msk.f32.mxu0 %vm1758_vm3, %v1734_v23  ;;  %3957 = vmatprep.mubr.msk.f32.mxu1 %vm1758_vm3, %v1750_v33  ;;  %vm5693_vm8 = vcmp.lt.f32.partialorder %v1457_v7, 0.0004427343  ;;  %v1463_v24 = vmul.f32 -0.5, %v5642_v44  ;;  %v1473_v30 = vadd.f32 1.0, %v1472_v47  ;;  %v1466_v32 = vand.u32 2147483647, %v5642_v44 }
 0x1b0   : > { %v4351_v34 = vpop.eup %4350  ;;  %4368 = vlog2.f32 %v1478_v55  ;;  %vm5706_vm9 = vcmp.lt.f32.partialorder %v1448_v35, 0.0004427343  ;;  %v1490_v39 = vmul.f32 -0.5, %v5647_v18  ;;  %v1505_v23 = vadd.f32 1.0, %v5685_v56  ;;  %v1756_v57 = vld [vmem:[%s4970_s28 + $0xf0] sm:$0xff]  ;;  %v1757_v1 = vld [vmem:[%s4970_s28 + $0xf8] sm:$0xff] }
 0x1b1   : > { %v1426_v12 = vmul.f32 0.6931472, %v4351_v34  ;;  %v1447_v19 = vmul.f32 %v1446_v51, %v5619_v31  ;;  %vm5717_vm10 = vcmp.lt.f32.partialorder %v1475_v8, 0.0004427343  ;;  %v1481_v43 = vmul.f32 -0.5, %v5660_v9  ;;  %v5753_v47 = vld [vmem:[#allocation3 + $0x78] sm:$0xff] }
 0x1b2   : > { %3934 = vmatmul.mubr.msk.f32.gmra.mxu0 %vm1758_vm3, %v1735_v49  ;;  %3958 = vmatmul.mubr.msk.f32.gmra.mxu1 %vm1758_vm3, %v1751_v26  ;;  %v1464_v53 = vadd.f32 1.0, %v1463_v24  ;;  %4370 = vlog2.f32 %v1505_v23  ;;  %v1496_v15 = vadd.f32 1.0, %v5701_v21  ;;  %v5725_v26 = vld [vmem:[#allocation3 + $0x68] sm:$0xff]  ;;  %v1474_v60 = vmul.f32 %v1473_v30, %v5635_v54  ;;  %v5794_v16 = vld [vmem:[#allocation3 + $0x80] sm:$0xff]  ;;  %s7178_s28 = sld [smem:[#allocation23_spill]] }
 0x1b3   : > { %3936 = vmatprep.mubr.msk.f32.mxu0 %vm1758_vm3, %v1736_v63  ;;  %3960 = vmatprep.mubr.msk.f32.mxu1 %vm1758_vm3, %v1752_v0  ;;  %v4353_v17 = vpop.eup %4352  ;;  %v1432_v28 = vsel %vm5629_vm4, %v1429_v37, %v1426_v12  ;;  %vm5730_vm11 = vcmp.lt.f32.partialorder %v1466_v32, 0.0004427343  ;;  %v1493_v0 = vand.u32 2147483647, %v5647_v18  ;;  %v1491_v37 = vadd.f32 1.0, %v1490_v39  ;;  %v5781_v30 = vld [vmem:[#allocation3 + $0x88] sm:$0xff] }
 0x1b4   : > { %v1408_v27 = vmul.f32 0.6931472, %v4353_v17  ;;  %v4355_v33 = vpop.eup %4354  ;;  %2129 = vperm.xlu1 %4349, %v1432_v28   ;;  %4372 = vlog2.f32 %v1496_v15  ;;  %v1484_v4 = vand.u32 2147483647, %v5660_v9  ;;  %v1508_v62 = vmul.f32 -0.5, %v5685_v56  ;;  %v5772_v17 = vld [vmem:[#allocation3 + $0x70] sm:$0xff] }
 0x1b5   : > { %v4357_v48 = vpop.eup %4356  ;;  %v1435_v49 = vmul.f32 0.6931472, %v4355_v33  ;;  %v1511_v40 = vand.u32 2147483647, %v5685_v56  ;;  %v1465_v14 = vmul.f32 %v1464_v53, %v5642_v44  ;;  %v1492_v35 = vmul.f32 %v1491_v37, %v5647_v18 }
 0x1b6   : > { %3937 = vmatmul.mubr.msk.f32.gmra.mxu0 %vm1758_vm3, %v1737_v61  ;;  %3961 = vmatmul.mubr.msk.f32.gmra.mxu1 %vm1758_vm3, %v1753_v5  ;;  %v1414_v42 = vsel %vm5649_vm5, %v1411_v46, %v1408_v27  ;;  %v4359_v31 = vpop.eup %4358  ;;  %v1417_v59 = vmul.f32 0.6931472, %v4357_v48  ;;  %v5740_v46 = vld [vmem:[#allocation3 + $0x60] sm:$0xff]  ;;  %v1482_v61 = vadd.f32 1.0, %v1481_v43  ;;  %v1523_v5 = vadd.f32 1.0, %v5725_v26 }
 0x1b7   : > { %3939 = vmatprep.mubr.msk.f32.mxu0 %vm1758_vm3, %v1738_v41  ;;  %3963 = vmatprep.mubr.msk.f32.mxu1 %vm1758_vm3, %v1754_v13  ;;  %v1441_v10 = vsel %vm5664_vm6, %v5675_v3, %v1435_v49  ;;  %v1453_v36 = vmul.f32 0.6931472, %v4359_v31  ;;  %v4361_v38 = vpop.eup %4360  ;;  %v1499_v3 = vmul.f32 -0.5, %v5701_v21  ;;  %vm5762_vm12 = vcmp.lt.f32.partialorder %v1493_v0, 0.0004427343 }
 0x1b8   : > { %2119 = vperm.xlu0 %4348, %v1414_v42   ;;  %2134 = vperm.xlu1 %4349, %v1441_v10   ;;  %v1423_v54 = vsel %vm5668_vm7, %v5678_v11, %v1417_v59  ;;  %v1444_v7 = vmul.f32 0.6931472, %v4361_v38  ;;  %v4363_v25 = vpop.eup %4362  ;;  %4374 = vlog2.f32 %v1523_v5  ;;  %v1514_v11 = vadd.f32 1.0, %v5740_v46 }
 0x1b9   : > { %v1459_v45 = vsel %vm5693_vm8, %v5691_v22, %v1453_v36  ;;  %v1471_v13 = vmul.f32 0.6931472, %v4363_v25  ;;  %v1483_v8 = vmul.f32 %v1482_v61, %v5660_v9  ;;  %vm5767_vm13 = vcmp.lt.f32.partialorder %v1484_v4, 0.0004427343  ;;  %v2431_v4 = vld [vmem:[%s7151_s9 + $0x68] sm:$0xff] }
 0x1ba   : > { %3940 = vmatmul.mubr.msk.f32.gmra.mxu0 %vm1758_vm3, %v1739_v20  ;;  %3964 = vmatmul.mubr.msk.f32.gmra.mxu1 %vm1758_vm3, %v1755_v29  ;;  %v1450_v41 = vsel %vm5706_vm9, %v1447_v19, %v1444_v7  ;;  %v4365_v51 = vpop.eup %4364  ;;  %4376 = vlog2.f32 %v1514_v11  ;;  %v1541_v55 = vadd.f32 1.0, %v5753_v47  ;;  %v1509_v22 = vadd.f32 1.0, %v1508_v62 }
 0x1bb   : > { %3942 = vmatprep.mubr.msk.f32.mxu0 %vm1758_vm3, %v1740_v58  ;;  %3966 = vmatprep.mubr.msk.f32.mxu1 %vm1758_vm3, %v1756_v57  ;;  %v4367_v12 = vpop.eup %4366  ;;  %v1477_v18 = vsel %vm5717_vm10, %v1474_v60, %v1471_v13  ;;  %v1462_v20 = vmul.f32 0.6931472, %v4365_v51  ;;  %vm5776_vm14 = vcmp.lt.f32.partialorder %v1511_v40, 0.0004427343  ;;  %v1500_v24 = vadd.f32 1.0, %v1499_v3 }
 0x1bc   : > { %2124 = vperm.xlu0 %4348, %v1423_v54   ;;  %2144 = vperm.xlu1 %4349, %v1459_v45   ;;  %v1489_v9 = vmul.f32 0.6931472, %v4367_v12  ;;  %v1526_v27 = vmul.f32 -0.5, %v5725_v26  ;;  %4378 = vlog2.f32 %v1541_v55  ;;  %v1502_v29 = vand.u32 2147483647, %v5701_v21  ;;  %v5816_v54 = vld [vmem:[#allocation3 + $0x90] sm:$0xff] }
 0x1bd   : > { %v4369_v32 = vpop.eup %4368  ;;  %v1468_v28 = vsel %vm5730_vm11, %v1465_v14, %v1462_v20  ;;  %v1517_v2 = vmul.f32 -0.5, %v5740_v46  ;;  %v1532_v58 = vadd.f32 1.0, %v5772_v17  ;;  %v1529_v23 = vand.u32 2147483647, %v5725_v26  ;;  %v5841_v55 = vld [vmem:[#allocation3 + $0xa0] sm:$0xff] }
 0x1be   : > { %3943 = vmatmul.mubr.msk.f32.gmra.mxu0 %vm1758_vm3, %v1741_v50  ;;  %3967 = vmatmul.mubr.msk.f32.gmra.mxu1 %vm1758_vm3, %v1757_v1  ;;  %v1480_v39 = vmul.f32 0.6931472, %v4369_v32  ;;  %v1544_v33 = vmul.f32 -0.5, %v5753_v47  ;;  %v1495_v42 = vsel %vm5762_vm12, %v1492_v35, %v1489_v9  ;;  %v1510_v19 = vmul.f32 %v1509_v22, %v5685_v56  ;;  %v5801_v56 = vld [vmem:[#allocation3 + $0x98] sm:$0xff] }
 0x1bf   : > { %4380 = vlog2.f32 %v1532_v58  ;;  %v1559_v57 = vadd.f32 1.0, %v5781_v30  ;;  %v4371_v43 = vpop.eup %4370  ;;  %v1501_v49 = vmul.f32 %v1500_v24, %v5701_v21  ;;  %v1527_v50 = vadd.f32 1.0, %v1526_v27  ;;  %v5849_v22 = vld [vmem:[#allocation3 + $0xb8] sm:$0xff] }
 0x1c0   : > { %2139 = vperm.xlu0 %4348, %v1450_v41   ;;  %2154 = vperm.xlu1 %4349, %v1477_v18   ;;  %v1486_v48 = vsel %vm5767_vm13, %v1483_v8, %v1480_v39  ;;  %v1520_v53 = vand.u32 2147483647, %v5740_v46  ;;  %v1507_v15 = vmul.f32 0.6931472, %v4371_v43  ;;  %v1518_v31 = vadd.f32 1.0, %v1517_v2 }
 0x1c1   : > { %v1547_v59 = vand.u32 2147483647, %v5753_v47  ;;  %4382 = vlog2.f32 %v1559_v57  ;;  %v4373_v60 = vpop.eup %4372  ;;  %vm5803_vm15 = vcmp.lt.f32.partialorder %v1502_v29, 0.0004427343  ;;  %vm5807_vm0 = vcmp.lt.f32.partialorder %v1529_v23, 0.0004427343 }
 0x1c2   : > { %v1545_v21 = vadd.f32 1.0, %v1544_v33  ;;  %v1550_v10 = vadd.f32 1.0, %v5794_v16  ;;  %v1513_v36 = vsel %vm5776_vm14, %v1510_v19, %v1507_v15  ;;  %v1498_v1 = vmul.f32 0.6931472, %v4373_v60 }
 0x1c3   : > { %v1535_v37 = vmul.f32 -0.5, %v5772_v17  ;;  %v1562_v38 = vmul.f32 -0.5, %v5781_v30  ;;  %v1528_v61 = vmul.f32 %v1527_v50, %v5725_v26  ;;  %vm5819_vm1 = vcmp.lt.f32.partialorder %v1520_v53, 0.0004427343  ;;  %v5832_v26 = vld [vmem:[#allocation3 + $0xa8] sm:$0xff] }
 0x1c4   : > { %2149 = vperm.xlu0 %4348, %v1468_v28   ;;  %2164 = vperm.xlu1 %4349, %v1495_v42   ;;  %4384 = vlog2.f32 %v1550_v10  ;;  %v1577_v5 = vadd.f32 1.0, %v5801_v56  ;;  %v1504_v7 = vsel %vm5803_vm15, %v1501_v49, %v1498_v1  ;;  %v1519_v62 = vmul.f32 %v1518_v31, %v5740_v46  ;;  %v5865_v42 = vld [vmem:[#allocation3 + $0xb0] sm:$0xff]  ;;  %v5876_v53 = vld [vmem:[#allocation3 + $0xc8] sm:$0xff] }
 0x1c5   : > { %v4375_v45 = vpop.eup %4374  ;;  %vm5827_vm2 = vcmp.lt.f32.partialorder %v1547_v59, 0.0004427343  ;;  %v1538_v25 = vand.u32 2147483647, %v5772_v17  ;;  %v1546_v3 = vmul.f32 %v1545_v21, %v5753_v47  ;;  %v1568_v11 = vadd.f32 1.0, %v5816_v54 }
 0x1c6   : > { %v1525_v14 = vmul.f32 0.6931472, %v4375_v45  ;;  %4386 = vlog2.f32 %v1577_v5  ;;  %v1536_v13 = vadd.f32 1.0, %v1535_v37  ;;  %v1563_v35 = vadd.f32 1.0, %v1562_v38 }
 0x1c7   : > { %v4377_v41 = vpop.eup %4376  ;;  %v1565_v46 = vand.u32 2147483647, %v5781_v30  ;;  %v1553_v34 = vmul.f32 -0.5, %v5794_v16  ;;  %4388 = vlog2.f32 %v1568_v11  ;;  %v1595_v44 = vadd.f32 1.0, %v5832_v26 }
 0x1c8   : > { %2159 = vperm.xlu0 %4348, %v1486_v48   ;;  %2174 = vperm.xlu1 %4349, %v1513_v36   ;;  %v1531_v51 = vsel %vm5807_vm0, %v1528_v61, %v1525_v14  ;;  %v1516_v8 = vmul.f32 0.6931472, %v4377_v41  ;;  %vm5843_vm3 = vcmp.lt.f32.partialorder %v1538_v25, 0.0004427343  ;;  %v1556_v18 = vand.u32 2147483647, %v5794_v16 }
 0x1c9   : > { %v4379_v47 = vpop.eup %4378  ;;  %v1580_v20 = vmul.f32 -0.5, %v5801_v56  ;;  %v1571_v24 = vmul.f32 -0.5, %v5816_v54  ;;  %4390 = vlog2.f32 %v1595_v44  ;;  %v1537_v27 = vmul.f32 %v1536_v13, %v5772_v17  ;;  %v2433_v17 = vld [vmem:[%s7151_s9 + $0x78] sm:$0xff]  ;;  %v5885_v36 = vld [vmem:[#allocation3 + $0xc0] sm:$0xff] }
 0x1ca   : > { %v1522_v6 = vsel %vm5819_vm1, %v1519_v62, %v1516_v8  ;;  %v1543_v9 = vmul.f32 0.6931472, %v4379_v47  ;;  %v1564_v32 = vmul.f32 %v1563_v35, %v5781_v30  ;;  %vm5856_vm4 = vcmp.lt.f32.partialorder %v1565_v46, 0.0004427343  ;;  %3969 = vmatprep.subr.mxu1 %v2433_v17  ;;  %v5917_v46 = vld [vmem:[#allocation3 + $0xd0] sm:$0xff]  ;;  %v2430_v44 = vld [vmem:[%s7151_s9 + $0x60] sm:$0xff] }
 0x1cb   : > { %v1586_v29 = vadd.f32 1.0, %v5841_v55  ;;  %v1554_v39 = vadd.f32 1.0, %v1553_v34  ;;  %v1598_v23 = vmul.f32 -0.5, %v5832_v26  ;;  %v1613_v33 = vadd.f32 1.0, %v5849_v22  ;;  %3970 = vmatpush3.msra.mxu1 %v2433_v17  ;;  %v2701_v34 = vld [vmem:[#allocation7 + $0x18] sm:$0xff] }
 0x1cc   : > { %2169 = vperm.xlu0 %4348, %v1504_v7   ;;  %2184 = vperm.xlu1 %4349, %v1531_v51   ;;  %v4381_v2 = vpop.eup %4380  ;;  %v1549_v58 = vsel %vm5827_vm2, %v1546_v3, %v1543_v9  ;;  %vm5870_vm5 = vcmp.lt.f32.partialorder %v1556_v18, 0.0004427343  ;;  %v1583_v57 = vand.u32 2147483647, %v5801_v56  ;;  %v1581_v48 = vadd.f32 1.0, %v1580_v20 }
 0x1cd   : > { %v1534_v30 = vmul.f32 0.6931472, %v4381_v2  ;;  %4392 = vlog2.f32 %v1586_v29  ;;  %v1572_v49 = vadd.f32 1.0, %v1571_v24  ;;  %v1574_v50 = vand.u32 2147483647, %v5816_v54 }
 0x1ce   : > { %v4383_v43 = vpop.eup %4382  ;;  %4394 = vlog2.f32 %v1613_v33  ;;  %v1601_v59 = vand.u32 2147483647, %v5832_v26  ;;  %v1604_v60 = vadd.f32 1.0, %v5865_v42  ;;  %v1555_v63 = vmul.f32 %v1554_v39, %v5794_v16  ;;  %v2432_v16 = vld [vmem:[%s7151_s9 + $0x70] sm:$0xff]  ;;  %v5944_v33 = vld [vmem:[#allocation3 + $0xe0] sm:$0xff] }
 0x1cf   : > { %v1540_v15 = vsel %vm5843_vm3, %v1537_v27, %v1534_v30  ;;  %v1561_v31 = vmul.f32 0.6931472, %v4383_v43  ;;  %v1599_v0 = vadd.f32 1.0, %v1598_v23  ;;  %v1589_v21 = vmul.f32 -0.5, %v5841_v55  ;;  %3971 = vmatprep.subr.mxu1 %v2432_v16 }
 0x1d0   : > { %2179 = vperm.xlu0 %4348, %v1522_v6   ;;  %2194 = vperm.xlu1 %4349, %v1549_v58   ;;  %v1592_v10 = vand.u32 2147483647, %v5841_v55  ;;  %v1616_v38 = vmul.f32 -0.5, %v5849_v22  ;;  %4396 = vlog2.f32 %v1604_v60  ;;  %v1631_v61 = vadd.f32 1.0, %v5876_v53 }
 0x1d1   : > { %v4385_v1 = vpop.eup %4384  ;;  %v1567_v37 = vsel %vm5856_vm4, %v1564_v32, %v1561_v31  ;;  %v1582_v45 = vmul.f32 %v1581_v48, %v5801_v56  ;;  %vm5898_vm6 = vcmp.lt.f32.partialorder %v1583_v57, 0.0004427343  ;;  %vm5902_vm7 = vcmp.lt.f32.partialorder %v1574_v50, 0.0004427343  ;;  %v5912_v56 = vld [vmem:[#allocation3 + $0xd8] sm:$0xff]  ;;  %3972 = vmatpush3.msra.mxu1 %v2432_v16  ;;  %v5937_v32 = vld [vmem:[#allocation3 + $0xe8] sm:$0xff] }
 0x1d2   : > { %v1552_v5 = vmul.f32 0.6931472, %v4385_v1  ;;  %v1573_v25 = vmul.f32 %v1572_v49, %v5816_v54  ;;  %vm5907_vm8 = vcmp.lt.f32.partialorder %v1601_v59, 0.0004427343  ;;  %4398 = vlog2.f32 %v1631_v61  ;;  %3973 = vmatprep.subr.mxu1 %v2431_v4 }
 0x1d3   : > { %v4387_v40 = vpop.eup %4386  ;;  %v1622_v3 = vadd.f32 1.0, %v5885_v36  ;;  %v1600_v13 = vmul.f32 %v1599_v0, %v5832_v26  ;;  %v1590_v35 = vadd.f32 1.0, %v1589_v21  ;;  %vm5919_vm9 = vcmp.lt.f32.partialorder %v1592_v10, 0.0004427343  ;;  %3974 = vmatpush3.msra.mxu1 %v2431_v4  ;;  %v2429_v26 = vld [vmem:[%s7151_s9 + $0x58] sm:$0xff] }
 0x1d4   : > { %2189 = vperm.xlu0 %4348, %v1540_v15   ;;  %2204 = vperm.xlu1 %4349, %v1567_v37   ;;  %v1558_v11 = vsel %vm5870_vm5, %v1555_v63, %v1552_v5  ;;  %v1579_v41 = vmul.f32 0.6931472, %v4387_v40  ;;  %v4389_v54 = vpop.eup %4388  ;;  %v1617_v51 = vadd.f32 1.0, %v1616_v38  ;;  %v1607_v8 = vmul.f32 -0.5, %v5865_v42  ;;  %v5965_v63 = vld [vmem:[#allocation3 + $0xf8] sm:$0xff]  ;;  %v5972_v37 = vld [vmem:[#allocation3 + $0xf0] sm:$0xff] }
 0x1d5   : > { %4400 = vlog2.f32 %v1622_v3  ;;  %v1570_v12 = vmul.f32 0.6931472, %v4389_v54  ;;  %v1634_v18 = vmul.f32 -0.5, %v5876_v53  ;;  %v1649_v20 = vadd.f32 1.0, %v5912_v56  ;;  %3975 = vmatprep.subr.mxu1 %v2430_v44  ;;  %v2426_v5 = vld [vmem:[%s7151_s9 + $0x40] sm:$0xff] }
 0x1d6   : > { %v1585_v47 = vsel %vm5898_vm6, %v1582_v45, %v1579_v41  ;;  %v4391_v6 = vpop.eup %4390  ;;  %v1619_v9 = vand.u32 2147483647, %v5849_v22  ;;  %v1610_v24 = vand.u32 2147483647, %v5865_v42  ;;  %v1640_v27 = vadd.f32 1.0, %v5917_v46  ;;  %3976 = vmatpush3.msra.mxu1 %v2430_v44  ;;  %v2425_v45 = vld [vmem:[%s7151_s9 + $0x38] sm:$0xff] }
 0x1d7   : > { %v1576_v28 = vsel %vm5902_vm7, %v1573_v25, %v1570_v12  ;;  %v1597_v29 = vmul.f32 0.6931472, %v4391_v6  ;;  %v1625_v2 = vmul.f32 -0.5, %v5885_v36  ;;  %4402 = vlog2.f32 %v1649_v20  ;;  %3977 = vmatprep.subr.mxu1 %v2429_v26 }
 0x1d8   : > { %2199 = vperm.xlu0 %4348, %v1558_v11   ;;  %2214 = vperm.xlu1 %4349, %v1585_v47   ;;  %v1591_v58 = vmul.f32 %v1590_v35, %v5841_v55  ;;  %v1618_v39 = vmul.f32 %v1617_v51, %v5849_v22  ;;  %v1608_v23 = vadd.f32 1.0, %v1607_v8  ;;  %4404 = vlog2.f32 %v1640_v27  ;;  %v2428_v55 = vld [vmem:[%s7151_s9 + $0x50] sm:$0xff]  ;;  %v2427_v22 = vld [vmem:[%s7151_s9 + $0x48] sm:$0xff] }
 0x1d9   : > { %3978 = vmatpush3.msra.mxu1 %v2429_v26  ;;  %v1603_v30 = vsel %vm5907_vm8, %v1600_v13, %v1597_v29  ;;  %v1635_v19 = vadd.f32 1.0, %v1634_v18  ;;  %v1637_v57 = vand.u32 2147483647, %v5876_v53  ;;  %v1667_v43 = vadd.f32 1.0, %v5937_v32  ;;  %v2424_v51 = vld [vmem:[%s7151_s9 + $0x30] sm:$0xff]  ;;  %v2423_v8 = vld [vmem:[%s7151_s9 + $0x28] sm:$0xff] }
 0x1da   : > { %v4393_v17 = vpop.eup %4392  ;;  %vm5956_vm10 = vcmp.lt.f32.partialorder %v1619_v9, 0.0004427343  ;;  %vm5960_vm11 = vcmp.lt.f32.partialorder %v1610_v24, 0.0004427343  ;;  %3979 = vmatprep.subr.mxu1 %v2428_v55  ;;  %v1626_v59 = vadd.f32 1.0, %v1625_v2  ;;  %v1652_v60 = vmul.f32 -0.5, %v5912_v56 }
 0x1db   : > { %v4395_v48 = vpop.eup %4394  ;;  %v1588_v49 = vmul.f32 0.6931472, %v4393_v17  ;;  %4406 = vlog2.f32 %v1667_v43  ;;  %3980 = vmatpush3.msra.mxu1 %v2428_v55  ;;  %v1609_v21 = vmul.f32 %v1608_v23, %v5865_v42  ;;  %v1643_v10 = vmul.f32 -0.5, %v5917_v46  ;;  %v1694_v2 = vld [vmem:[#allocation2 + $0xb0] sm:$0xff] }
 0x1dc   : > { %2209 = vperm.xlu0 %4348, %v1576_v28   ;;  %2224 = vperm.xlu1 %4349, %v1603_v30   ;;  %v1615_v31 = vmul.f32 0.6931472, %v4395_v48  ;;  %v1658_v1 = vadd.f32 1.0, %v5944_v33  ;;  %v1636_v16 = vmul.f32 %v1635_v19, %v5876_v53  ;;  %vm5977_vm12 = vcmp.lt.f32.partialorder %v1637_v57, 0.0004427343  ;;  %v2421_v57 = vld [vmem:[%s7151_s9 + $0x18] sm:$0xff] }
 0x1dd   : > { %v1594_v0 = vsel %vm5919_vm9, %v1591_v58, %v1588_v49  ;;  %3981 = vmatprep.subr.mxu1 %v2427_v22  ;;  %v4397_v38 = vpop.eup %4396  ;;  %v1628_v42 = vand.u32 2147483647, %v5885_v36  ;;  %v1655_v62 = vand.u32 2147483647, %v5912_v56  ;;  %v1685_v53 = vadd.f32 1.0, %v5965_v63 }
 0x1de   : > { %v1621_v61 = vsel %vm5956_vm10, %v1618_v39, %v1615_v31  ;;  %3982 = vmatpush3.msra.mxu1 %v2427_v22  ;;  %v1606_v7 = vmul.f32 0.6931472, %v4397_v38  ;;  %4408 = vlog2.f32 %v1658_v1  ;;  %v1627_v25 = vmul.f32 %v1626_v59, %v5885_v36 }
 0x1df   : > { %3983 = vmatprep.subr.mxu1 %v2426_v5  ;;  %v4399_v40 = vpop.eup %4398  ;;  %v1653_v14 = vadd.f32 1.0, %v1652_v60  ;;  %v1670_v3 = vmul.f32 -0.5, %v5937_v32  ;;  %v1676_v11 = vadd.f32 1.0, %v5972_v37  ;;  %v1644_v35 = vadd.f32 1.0, %v1643_v10 }
 0x1e0   : > { %2219 = vperm.xlu0 %4348, %v1594_v0   ;;  %2234 = vperm.xlu1 %4349, %v1621_v61   ;;  %v1612_v41 = vsel %vm5960_vm11, %v1609_v21, %v1606_v7  ;;  %v1633_v13 = vmul.f32 0.6931472, %v4399_v40  ;;  %4410 = vlog2.f32 %v1685_v53  ;;  %vm5995_vm13 = vcmp.lt.f32.partialorder %v1628_v42, 0.0004427343  ;;  %v2420_v0 = vld [vmem:[%s7151_s9 + $0x10] sm:$0xff]  ;;  %v2710_v53 = vld [vmem:[#allocation7 + $0x60] sm:$0xff] }
 0x1e1   : > { %3984 = vmatpush3.msra.mxu1 %v2426_v5  ;;  %v1646_v36 = vand.u32 2147483647, %v5917_v46  ;;  %4412 = vlog2.f32 %v1676_v11  ;;  %v1661_v47 = vmul.f32 -0.5, %v5944_v33  ;;  %v1654_v12 = vmul.f32 %v1653_v14, %v5912_v56  ;;  %v2712_v7 = vld [vmem:[#allocation7 + $0x70] sm:$0xff]  ;;  %v2709_v40 = vld [vmem:[#allocation7 + $0x58] sm:$0xff]  ;;  %v2707_v14 = vld [vmem:[#allocation7 + $0x48] sm:$0xff] }
 0x1e2   : > { %3985 = vmatprep.subr.mxu1 %v2425_v45  ;;  %v4401_v54 = vpop.eup %4400  ;;  %v1639_v44 = vsel %vm5977_vm12, %v1636_v16, %v1633_v13  ;;  %vm6010_vm14 = vcmp.lt.f32.partialorder %v1655_v62, 0.0004427343  ;;  %v1671_v20 = vadd.f32 1.0, %v1670_v3  ;;  %v1645_v24 = vmul.f32 %v1644_v35, %v5917_v46  ;;  %v2422_v46 = vld [vmem:[%s7151_s9 + $0x20] sm:$0xff]  ;;  %v2711_v62 = vld [vmem:[#allocation7 + $0x68] sm:$0xff]  ;;  %v2705_v11 = vld [vmem:[#allocation7 + $0x38] sm:$0xff] }
 0x1e3   : > { %3986 = vmatpush3.msra.mxu1 %v2425_v45  ;;  %v1624_v26 = vmul.f32 0.6931472, %v4401_v54  ;;  %v1673_v27 = vand.u32 2147483647, %v5937_v32  ;;  %v1688_v28 = vmul.f32 -0.5, %v5965_v63  ;;  %v1679_v58 = vmul.f32 -0.5, %v5972_v37 }
 0x1e4   : > { %2229 = vperm.xlu0 %4348, %v1612_v41   ;;  %3987 = vmatprep.subr.mxu1 %v2424_v51  ;;  %v4403_v6 = vpop.eup %4402  ;;  %vm6019_vm15 = vcmp.lt.f32.partialorder %v1646_v36, 0.0004427343  ;;  %v1662_v23 = vadd.f32 1.0, %v1661_v47  ;;  %v1672_v30 = vmul.f32 %v1671_v20, %v5937_v32  ;;  %v1664_v19 = vand.u32 2147483647, %v5944_v33  ;;  %v2706_v3 = vld [vmem:[#allocation7 + $0x40] sm:$0xff] }
 0x1e5   : > { %2244 = vperm.xlu1 %4349, %v1639_v44   ;;  %3988 = vmatpush3.msra.mxu1 %v2424_v51  ;;  %v1630_v9 = vsel %vm5995_vm13, %v1627_v25, %v1624_v26  ;;  %v4405_v29 = vpop.eup %4404  ;;  %v1651_v56 = vmul.f32 0.6931472, %v4403_v6  ;;  %vm1674_vm0 = vcmp.lt.f32.partialorder %v1673_v27, 0.0004427343  ;;  %v1689_v22 = vadd.f32 1.0, %v1688_v28  ;;  %v2708_v25 = vld [vmem:[#allocation7 + $0x50] sm:$0xff] }
 0x1e6   : > { %3989 = vmatprep.subr.mxu1 %v2423_v8  ;;  %v1642_v39 = vmul.f32 0.6931472, %v4405_v29  ;;  %v1691_v49 = vand.u32 2147483647, %v5965_v63  ;;  %v1680_v32 = vadd.f32 1.0, %v1679_v58  ;;  %v1663_v50 = vmul.f32 %v1662_v23, %v5944_v33  ;;  %v2419_v33 = vld [vmem:[%s7151_s9 + $0x8] sm:$0xff] }
 0x1e7   : > { %3990 = vmatpush3.msra.mxu1 %v2423_v8  ;;  %v1657_v17 = vsel %vm6010_vm14, %v1654_v12, %v1651_v56  ;;  %v1682_v15 = vand.u32 2147483647, %v5972_v37  ;;  %vm6039_vm1 = vcmp.lt.f32.partialorder %v1664_v19, 0.0004427343  ;;  %v1690_v10 = vmul.f32 %v1689_v22, %v5965_v63  ;;  %v2418_v63 = vld [vmem:[%s7151_s9] sm:$0xff]  ;;  %v2704_v41 = vld [vmem:[#allocation7 + $0x30] sm:$0xff] }
 0x1e8   : > { %2239 = vperm.xlu0 %4348, %v1630_v9   ;;  %3991 = vmatprep.subr.mxu1 %v2422_v46  ;;  %v4407_v43 = vpop.eup %4406  ;;  %v1648_v55 = vsel %vm6019_vm15, %v1645_v24, %v1642_v39  ;;  %vm1692_vm2 = vcmp.lt.f32.partialorder %v1691_v49, 0.0004427343  ;;  %v1681_v38 = vmul.f32 %v1680_v32, %v5972_v37  ;;  %v2713_v37 = vld [vmem:[#allocation7 + $0x78] sm:$0xff]  ;;  %v2703_v13 = vld [vmem:[#allocation7 + $0x28] sm:$0xff]  ;;  %v2702_v54 = vld [vmem:[#allocation7 + $0x20] sm:$0xff] }
 0x1e9   : > { %2254 = vperm.xlu1 %4349, %v1657_v17   ;;  %3992 = vmatpush3.msra.mxu1 %v2422_v46  ;;  %v1669_v48 = vmul.f32 0.6931472, %v4407_v43  ;;  %vm1683_vm3 = vcmp.lt.f32.partialorder %v1682_v15, 0.0004427343  ;;  %v6067_v9 = vld [vmem:[%s7176_s25] ss:$0 sm:$0xff] }
 0x1ea   : > { %3993 = vmatprep.subr.mxu1 %v2421_v57  ;;  %4049 = vmatprep.subr.mxu0 %v2713_v37  ;;  %v1695_v27 = vld [vmem:[#allocation2] sm:$0xff]  ;;  %v1697_v46 = vld [vmem:[#allocation2 + $0x18] sm:$0xff] }
 0x1eb   : > { %3994 = vmatpush3.msra.mxu1 %v2421_v57  ;;  %v4409_v31 = vpop.eup %4408  ;;  %v1675_v59 = vsel %vm1674_vm0, %v1672_v30, %v1669_v48  ;;  %4050 = vmatpush3.msra.mxu0 %v2713_v37  ;;  %v6085_v22 = vld [vmem:[%s7177_s15] ss:$0 sm:$0xff]  ;;  %v1696_v49 = vld [vmem:[#allocation2 + $0xd8] sm:$0xff] }
 0x1ec   : > { %2249 = vperm.xlu0 %4348, %v1648_v55   ;;  %v1660_v21 = vmul.f32 0.6931472, %v4409_v31  ;;  %3995 = vmatprep.subr.mxu1 %v2420_v0 }
 0x1ed   : > { %2264 = vperm.xlu1 %4349, %v1675_v59   ;;  %v4411_v1 = vpop.eup %4410  ;;  %3996 = vmatpush3.msra.mxu1 %v2420_v0  ;;  %v1699_v59 = vld [vmem:[#allocation2 + $0x68] sm:$0xff] }
 0x1ee   : > { %v4413_v61 = vpop.eup %4412  ;;  %v1666_v16 = vsel %vm6039_vm1, %v1663_v50, %v1660_v21  ;;  %v1687_v4 = vmul.f32 0.6931472, %v4411_v1  ;;  %3997 = vmatprep.subr.mxu1 %v2419_v33  ;;  %4051 = vmatprep.subr.mxu0 %v2712_v7 }
 0x1ef   : > { %v1678_v42 = vmul.f32 0.6931472, %v4413_v61  ;;  %3998 = vmatpush3.msra.mxu1 %v2419_v33  ;;  %4052 = vmatpush3.msra.mxu0 %v2712_v7  ;;  %v1698_v61 = vld [vmem:[#allocation2 + $0x50] sm:$0xff] }
 0x1f0   : > { %2259 = vperm.xlu0 %4348, %v1666_v16   ;;  %v1693_v5 = vsel %vm1692_vm2, %v1690_v10, %v1687_v4  ;;  %3999 = vmatprep.subr.mxu1 %v2418_v63 }
 0x1f1   : > { %2274 = vperm.xlu1 %4349, %v1693_v5   ;;  %v1684_v45 = vsel %vm1683_vm3, %v1681_v38, %v1678_v42  ;;  %4000 = vmatpush3.msra.mxu1 %v2418_v63 }
 0x1f2   : > { %4053 = vmatprep.subr.mxu0 %v2711_v62 }
 0x1f3   : > { %4054 = vmatpush3.msra.mxu0 %v2711_v62 }
 0x1f4   : > { %2269 = vperm.xlu0 %4348, %v1684_v45   ;;  %4055 = vmatprep.subr.mxu0 %v2710_v53 }
 0x1f5   : > { %4056 = vmatpush3.msra.mxu0 %v2710_v53  ;;  %v1701_v53 = vld [vmem:[#allocation2 + $0x48] sm:$0xff] }
 0x1f6   : > { %4057 = vmatprep.subr.mxu0 %v2709_v40 }
 0x1f7   : > { %4058 = vmatpush3.msra.mxu0 %v2709_v40 }
 0x1f8   : > { %4059 = vmatprep.subr.mxu0 %v2708_v25 }
 0x1f9   : > { %4060 = vmatpush3.msra.mxu0 %v2708_v25 }
 0x1fa   : > { %4061 = vmatprep.subr.mxu0 %v2707_v14 }
 0x1fb   : > { %4062 = vmatpush3.msra.mxu0 %v2707_v14 }
 0x1fc   : > { %4063 = vmatprep.subr.mxu0 %v2706_v3 }
 0x1fd   : > { %4064 = vmatpush3.msra.mxu0 %v2706_v3 }
 0x1fe   : > { %4065 = vmatprep.subr.mxu0 %v2705_v11 }
 0x1ff   : > { %4066 = vmatpush3.msra.mxu0 %v2705_v11 }
 0x200   : > { %4067 = vmatprep.subr.mxu0 %v2704_v41 }
 0x201   : > { %4068 = vmatpush3.msra.mxu0 %v2704_v41 }
 0x202   : > { %4069 = vmatprep.subr.mxu0 %v2703_v13 }
 0x203   : > { %4070 = vmatpush3.msra.mxu0 %v2703_v13  ;;  %v1700_v13 = vld [vmem:[#allocation2 + $0x30] sm:$0xff] }
 0x204   : > { %4071 = vmatprep.subr.mxu0 %v2702_v54 }
 0x205   : > { %4072 = vmatpush3.msra.mxu0 %v2702_v54 }
 0x206   : > { %4073 = vmatprep.subr.mxu0 %v2701_v34 }
 0x207   : > { %4074 = vmatpush3.msra.mxu0 %v2701_v34 }
 0x22f   : > { %v2130_v36 = vpop.permute.xlu1 %2129 }
 0x230   : > { %v2285_v60 = vmul.f32 %v6067_v9, %v2130_v36 }
 0x233   : > { %v2120_v35 = vpop.permute.xlu0 %2119  ;;  %v2135_v8 = vpop.permute.xlu1 %2134 }
 0x234   : > { %v2283_v17 = vmul.f32 %v6067_v9, %v2120_v35  ;;  %v2286_v30 = vmul.f32 %v6067_v9, %v2135_v8 }
 0x237   : > { %v2125_v51 = vpop.permute.xlu0 %2124  ;;  %v2145_v26 = vpop.permute.xlu1 %2144 }
 0x238   : > { %v2284_v28 = vmul.f32 %v6067_v9, %v2125_v51  ;;  %v2288_v4 = vmul.f32 %v6067_v9, %v2145_v26 }
 0x23b   : > { %v2140_v44 = vpop.permute.xlu0 %2139  ;;  %v2155_v12 = vpop.permute.xlu1 %2154 }
 0x23c   : > { %v2287_v45 = vmul.f32 %v6067_v9, %v2140_v44  ;;  %v2290_v35 = vmul.f32 %v6067_v9, %v2155_v12 }
 0x23f   : > { %v6056_v47 = vpop.permute.xlu0 %2149  ;;  %v6060_v20 = vpop.permute.xlu1 %2164 }
 0x240   : > { %v2289_v44 = vmul.f32 %v6067_v9, %v6056_v47 }
 0x243   : > { %v6058_v18 = vpop.permute.xlu0 %2159  ;;  %v6069_v24 = vpop.permute.xlu1 %2174 }
 0x247   : > { %v6062_v6 = vpop.permute.xlu0 %2169  ;;  %v6080_v55 = vpop.permute.xlu1 %2184 }
 0x24b   : > { %v6074_v58 = vpop.permute.xlu0 %2179  ;;  %v6100_v37 = vpop.permute.xlu1 %2194 }
 0x24f   : > { %v6090_v0 = vpop.permute.xlu0 %2189 }
 0x253   : > { %v6105_v54 = vpop.permute.xlu0 %2199 }
 0x262   : > { %v3923_v29 = vpop.f32.mrf.mxu0  ;;  %v6072_v56 = vpop.f32.mrf.mxu1 }
 0x263   : > { %v2085_v39 = vadd.f32 %v3923_v29, %v1695_v27  ;;  %v1703_v27 = vld [vmem:[#allocation2 + $0x88] sm:$0xff] }
 0x264   : > { %v1925_v23 = vpop.f32.mrf.mxu0  ;;  %v6078_v43 = vpop.f32.mrf.mxu1 }
 0x265   : > { %v2316_v19 = vadd.f32 %v2284_v28, %v2085_v39  ;;  %v2084_v57 = vadd.f32 %v1925_v23, %v1694_v2  ;;  %v6113_v23 = vpop.permute.xlu1 %2204 }
 0x266   : > { %v3926_v48 = vpop.f32.mrf.mxu0  ;;  %v6087_v15 = vpop.f32.mrf.mxu1 }
 0x267   : > { %v2315_v32 = vadd.f32 %v2283_v17, %v2084_v57  ;;  %v2087_v50 = vadd.f32 %v3926_v48, %v1697_v46  ;;  %v2355_v21 = vadd.f32 %v6085_v22, %v2316_v19  ;;  %v1702_v17 = vld [vmem:[#allocation2 + $0x80] sm:$0xff] }
 0x268   : > { %v1935_v31 = vpop.f32.mrf.mxu0  ;;  %v6093_v1 = vpop.f32.mrf.mxu1 }
 0x269   : > { %v2318_v10 = vadd.f32 %v2286_v30, %v2087_v50  ;;  %v2086_v33 = vadd.f32 %v1935_v31, %v1696_v49  ;;  %v2354_v16 = vadd.f32 %v6085_v22, %v2315_v32  ;;  %v2387_v25 = vmax.f32 %v2355_v21, 0.0  ;;  %v1705_v50 = vld [vmem:[#allocation2 + $0xb8] sm:$0xff] }
 0x26a   : > { %v3929_v38 = vpop.f32.mrf.mxu0  ;;  %v6097_v5 = vpop.f32.mrf.mxu1  ;;  %v2292_v30 = vmul.f32 %v6067_v9, %v6060_v20  ;;  %v2291_v49 = vmul.f32 %v6067_v9, %v6058_v18 }
 0x26b   : > { %v2317_v42 = vadd.f32 %v2285_v60, %v2086_v33  ;;  %v2089_v63 = vadd.f32 %v3929_v38, %v1699_v59  ;;  %v2386_v62 = vmax.f32 %v2354_v16, 0.0  ;;  %v2357_v40 = vadd.f32 %v6085_v22, %v2318_v10  ;;  %v6122_v59 = vpop.permute.xlu0 %2209  ;;  %v1704_v38 = vld [vmem:[#allocation2 + $0xe8] sm:$0xff] }
 0x26c   : > { %v1945_v7 = vpop.f32.mrf.mxu0  ;;  %v6107_v36 = vpop.f32.mrf.mxu1 }
 0x26d   : > { %v2320_v14 = vadd.f32 %v2288_v4, %v2089_v63  ;;  %v2088_v3 = vadd.f32 %v1945_v7, %v1698_v61  ;;  %v2356_v11 = vadd.f32 %v6085_v22, %v2317_v42  ;;  %4001 = vmatprep.mubr.f32.mxu1 %v2386_v62  ;;  %v2389_v28 = vmax.f32 %v2357_v40, 0.0  ;;  %v1707_v62 = vld [vmem:[#allocation2 + $0xf0] sm:$0xff] }
 0x26e   : > { %v3932_v41 = vpop.f32.mrf.mxu0  ;;  %4002 = vmatmul.mubr.f32.vlgmr.msra.gmra.mxu1 %v2387_v25  ;;  %v6117_v19 = vpop.f32.mrf.mxu1  ;;  %v2294_v61 = vmul.f32 %v6067_v9, %v6069_v24  ;;  %v2293_v63 = vmul.f32 %v6067_v9, %v6062_v6 }
 0x26f   : > { %v2319_v34 = vadd.f32 %v2287_v45, %v2088_v3  ;;  %v2091_v51 = vadd.f32 %v3932_v41, %v1701_v53  ;;  %v2388_v8 = vmax.f32 %v2356_v11, 0.0  ;;  %v2359_v12 = vadd.f32 %v6085_v22, %v2320_v14  ;;  %v2215_v45 = vpop.permute.xlu1 %2214  ;;  %v1706_v11 = vld [vmem:[#allocation2 + $0x60] sm:$0xff] }
 0x270   : > { %v1955_v26 = vpop.f32.mrf.mxu0  ;;  %v6127_v16 = vpop.f32.mrf.mxu1  ;;  %v2296_v41 = vmul.f32 %v6067_v9, %v6080_v55 }
 0x271   : > { %v2322_v29 = vadd.f32 %v2290_v35, %v2091_v51  ;;  %v2090_v2 = vadd.f32 %v1955_v26, %v1700_v13  ;;  %4004 = vmatprep.mubr.f32.mxu1 %v2388_v8  ;;  %v2358_v39 = vadd.f32 %v6085_v22, %v2319_v34  ;;  %v2391_v10 = vmax.f32 %v2359_v12, 0.0  ;;  %v6135_v13 = vpop.permute.xlu0 %2219  ;;  %v1710_v35 = vld [vmem:[#allocation2 + $0x38] sm:$0xff] }
 0x272   : > { %v3935_v46 = vpop.f32.mrf.mxu0  ;;  %4005 = vmatmul.mubr.f32.gmra.mxu1 %v2389_v28  ;;  %v6137_v6 = vpop.f32.mrf.mxu1 }
 0x273   : > { %v2321_v47 = vadd.f32 %v2289_v44, %v2090_v2  ;;  %v2093_v57 = vadd.f32 %v3935_v46, %v1703_v27  ;;  %v2390_v48 = vmax.f32 %v2358_v39, 0.0  ;;  %v2361_v31 = vadd.f32 %v6085_v22, %v2322_v29  ;;  %v1709_v27 = vld [vmem:[#allocation2 + $0x78] sm:$0xff] }
 0x274   : > { %v1965_v32 = vpop.f32.mrf.mxu0  ;;  %v2295_v44 = vmul.f32 %v6067_v9, %v6074_v58  ;;  %v1711_v29 = vld [vmem:[#allocation2 + $0x58] sm:$0xff]  ;;  %v2298_v46 = vmul.f32 %v6067_v9, %v6100_v37  ;;  %v2297_v58 = vmul.f32 %v6067_v9, %v6090_v0  ;;  %v2299_v37 = vmul.f32 %v6067_v9, %v6105_v54 }
 0x275   : > { %v2324_v60 = vadd.f32 %v2292_v30, %v2093_v57  ;;  %v2092_v21 = vadd.f32 %v1965_v32, %v1702_v17  ;;  %4007 = vmatprep.mubr.f32.mxu1 %v2390_v48  ;;  %v2360_v20 = vadd.f32 %v6085_v22, %v2321_v47  ;;  %v2393_v53 = vmax.f32 %v2361_v31, 0.0  ;;  %v2225_v17 = vpop.permute.xlu1 %2224  ;;  %v1708_v57 = vld [vmem:[#allocation2 + $0x8] sm:$0xff]  ;;  %v1712_v48 = vld [vmem:[#allocation2 + $0x40] sm:$0xff] }
 0x276   : > { %v3938_v33 = vpop.f32.mrf.mxu0  ;;  %4008 = vmatmul.mubr.f32.gmra.mxu1 %v2391_v10  ;;  %v2100_v30 = vadd.f32 %v6078_v43, %v1710_v35  ;;  %v2101_v43 = vadd.f32 %v6072_v56, %v1711_v29 }
 0x277   : > { %v2323_v18 = vadd.f32 %v2291_v49, %v2092_v21  ;;  %v2095_v4 = vadd.f32 %v3938_v33, %v1705_v50  ;;  %v2392_v42 = vmax.f32 %v2360_v20, 0.0  ;;  %v2363_v24 = vadd.f32 %v6085_v22, %v2324_v60  ;;  %v6148_v49 = vpop.f32.mrf.mxu1  ;;  %v2230_v20 = vpop.permute.xlu0 %2229 }
 0x278   : > { %v1975_v7 = vpop.f32.mrf.mxu0  ;;  %v2300_v60 = vmul.f32 %v6067_v9, %v6113_v23  ;;  %v1714_v23 = vld [vmem:[#allocation2 + $0xe0] sm:$0xff] }
 0x279   : > { %v2326_v40 = vadd.f32 %v2294_v61, %v2095_v4  ;;  %v2094_v25 = vadd.f32 %v1975_v7, %v1704_v38  ;;  %4010 = vmatprep.mubr.f32.mxu1 %v2392_v42  ;;  %v2362_v14 = vadd.f32 %v6085_v22, %v2323_v18  ;;  %v2395_v55 = vmax.f32 %v2363_v24, 0.0  ;;  %v1713_v4 = vld [vmem:[#allocation2 + $0xc8] sm:$0xff] }
 0x27a   : > { %v3941_v3 = vpop.f32.mrf.mxu0  ;;  %4011 = vmatmul.mubr.f32.gmra.mxu1 %v2393_v53  ;;  %v2331_v18 = vadd.f32 %v2299_v37, %v2100_v30  ;;  %v2102_v42 = vadd.f32 %v6093_v1, %v1712_v48  ;;  %v2302_v7 = vmul.f32 %v6067_v9, %v2215_v45  ;;  %v2235_v53 = vpop.permute.xlu1 %2234  ;;  %v1720_v37 = vld [vmem:[#allocation2 + $0x10] sm:$0xff] }
 0x27b   : > { %v2325_v34 = vadd.f32 %v2293_v63, %v2094_v25  ;;  %v2097_v51 = vadd.f32 %v3941_v3, %v1707_v62  ;;  %v2394_v8 = vmax.f32 %v2362_v14, 0.0  ;;  %v2365_v28 = vadd.f32 %v6085_v22, %v2326_v40  ;;  %v6158_v63 = vpop.f32.mrf.mxu1  ;;  %v2240_v45 = vpop.permute.xlu0 %2239 }
 0x27c   : > { %v1985_v26 = vpop.f32.mrf.mxu0  ;;  %v2301_v62 = vmul.f32 %v6067_v9, %v6122_v59  ;;  %v2332_v40 = vadd.f32 %v2300_v60, %v2101_v43  ;;  %v2103_v25 = vadd.f32 %v6087_v15, %v1713_v4  ;;  %v2370_v35 = vadd.f32 %v6085_v22, %v2331_v18 }
 0x27d   : > { %v2328_v2 = vadd.f32 %v2296_v41, %v2097_v51  ;;  %v2096_v39 = vadd.f32 %v1985_v26, %v1706_v11  ;;  %4013 = vmatprep.mubr.f32.mxu1 %v2394_v8  ;;  %v2364_v12 = vadd.f32 %v6085_v22, %v2325_v34  ;;  %v2397_v10 = vmax.f32 %v2365_v28, 0.0  ;;  %v1715_v11 = vld [vmem:[#allocation2 + $0x90] sm:$0xff]  ;;  %v2055_v51 = vpop.f32.mrf.mxu1 }
 0x27e   : > { %v3944_v47 = vpop.f32.mrf.mxu0  ;;  %4014 = vmatmul.mubr.f32.gmra.mxu1 %v2395_v55  ;;  %v2333_v3 = vadd.f32 %v2301_v62, %v2102_v42  ;;  %v2104_v41 = vadd.f32 %v6107_v36, %v1714_v23  ;;  %v1716_v34 = vld [vmem:[#allocation2 + $0x70] sm:$0xff]  ;;  %v2303_v15 = vmul.f32 %v6067_v9, %v6135_v13  ;;  %v2334_v8 = vadd.f32 %v2302_v7, %v2103_v25  ;;  %v2245_v28 = vpop.permute.xlu1 %2244  ;;  %v1717_v36 = vld [vmem:[#allocation2 + $0xc0] sm:$0xff] }
 0x27f   : > { %v2327_v32 = vadd.f32 %v2295_v44, %v2096_v39  ;;  %v2099_v50 = vadd.f32 %v3944_v47, %v1709_v27  ;;  %v2396_v31 = vmax.f32 %v2364_v12, 0.0  ;;  %v2367_v61 = vadd.f32 %v6085_v22, %v2328_v2  ;;  %v3965_v30 = vpop.f32.mrf.mxu1 }
 0x280   : > { %v1995_v21 = vpop.f32.mrf.mxu0  ;;  %v2105_v44 = vadd.f32 %v6097_v5, %v1715_v11  ;;  %v2371_v27 = vadd.f32 %v6085_v22, %v2332_v40  ;;  %v2335_v29 = vadd.f32 %v2303_v15, %v2104_v41  ;;  %v2106_v2 = vadd.f32 %v6127_v16, %v1716_v34  ;;  %v2250_v5 = vpop.permute.xlu0 %2249  ;;  %v1719_v16 = vld [vmem:[#allocation2 + $0xd0] sm:$0xff] }
 0x281   : > { %v2330_v33 = vadd.f32 %v2298_v46, %v2099_v50  ;;  %v2098_v0 = vadd.f32 %v1995_v21, %v1708_v57  ;;  %4016 = vmatprep.mubr.f32.mxu1 %v2396_v31  ;;  %v2366_v38 = vadd.f32 %v6085_v22, %v2327_v32  ;;  %v2399_v14 = vmax.f32 %v2367_v61, 0.0  ;;  %v1718_v46 = vld [vmem:[#allocation2 + $0xa8] sm:$0xff]  ;;  %v2065_v43 = vpop.f32.mrf.mxu1 }
 0x282   : > { %4017 = vmatmul.mubr.f32.gmra.mxu1 %v2397_v10  ;;  %v2402_v39 = vmax.f32 %v2370_v35, 0.0  ;;  %v2372_v55 = vadd.f32 %v6085_v22, %v2333_v3  ;;  %v2304_v12 = vmul.f32 %v6067_v9, %v2225_v17  ;;  %v2305_v13 = vmul.f32 %v6067_v9, %v2230_v20  ;;  %v2255_v10 = vpop.permute.xlu1 %2254  ;;  %v1724_v35 = vld [vmem:[#allocation2 + $0x20] sm:$0xff] }
 0x283   : > { %v2329_v54 = vadd.f32 %v2297_v58, %v2098_v0  ;;  %v2398_v56 = vmax.f32 %v2366_v38, 0.0  ;;  %v2369_v1 = vadd.f32 %v6085_v22, %v2330_v33  ;;  %v2107_v57 = vadd.f32 %v6117_v19, %v1717_v36 }
 0x284   : > { %v2336_v47 = vadd.f32 %v2304_v12, %v2105_v44  ;;  %v2403_v58 = vmax.f32 %v2371_v27, 0.0  ;;  %v2373_v48 = vadd.f32 %v6085_v22, %v2334_v8  ;;  %v2337_v32 = vadd.f32 %v2305_v13, %v2106_v2  ;;  %v2260_v23 = vpop.permute.xlu0 %2259 }
 0x285   : > { %4019 = vmatprep.mubr.f32.mxu1 %v2398_v56  ;;  %v2368_v24 = vadd.f32 %v6085_v22, %v2329_v54  ;;  %v2401_v26 = vmax.f32 %v2369_v1, 0.0  ;;  %v2108_v50 = vadd.f32 %v6148_v49, %v1718_v46  ;;  %v2404_v31 = vmax.f32 %v2372_v55, 0.0  ;;  %v1721_v49 = vld [vmem:[#allocation2 + $0x28] sm:$0xff]  ;;  %v1722_v54 = vld [vmem:[#allocation2 + $0xa0] sm:$0xff]  ;;  %v3968_v56 = vpop.f32.mrf.mxu1 }
 0x286   : > { %4020 = vmatmul.mubr.f32.gmra.mxu1 %v2399_v14  ;;  %v2374_v17 = vadd.f32 %v6085_v22, %v2335_v29  ;;  %v2306_v60 = vmul.f32 %v6067_v9, %v2235_v53  ;;  %v2307_v21 = vmul.f32 %v6067_v9, %v2240_v45  ;;  %v2109_v20 = vadd.f32 %v6137_v6, %v1719_v16  ;;  %v2265_v25 = vpop.permute.xlu1 %2264 }
 0x287   : > { %v2400_v59 = vmax.f32 %v2368_v24, 0.0  ;;  %v2405_v33 = vmax.f32 %v2373_v48, 0.0  ;;  %v2375_v0 = vadd.f32 %v6085_v22, %v2336_v47  ;;  %v2110_v61 = vadd.f32 %v2055_v51, %v1720_v37  ;;  %v1723_v24 = vld [vmem:[#allocation2 + $0xf8] sm:$0xff]  ;;  %v2075_v45 = vpop.f32.mrf.mxu1 }
 0x288   : > { %v2338_v19 = vadd.f32 %v2306_v60, %v2107_v57  ;;  %v2339_v38 = vadd.f32 %v2307_v21, %v2108_v50  ;;  %v2406_v18 = vmax.f32 %v2374_v17, 0.0  ;;  %v2376_v4 = vadd.f32 %v6085_v22, %v2337_v32  ;;  %v2270_v51 = vpop.permute.xlu0 %2269  ;;  %v2698_v21 = vld [vmem:[#allocation7] sm:$0xff] }
 0x289   : > { %4022 = vmatprep.mubr.f32.mxu1 %v2400_v59  ;;  %v2308_v42 = vmul.f32 %v6067_v9, %v2245_v28  ;;  %v2309_v7 = vmul.f32 %v6067_v9, %v2250_v5  ;;  %v2111_v6 = vadd.f32 %v6158_v63, %v1721_v49  ;;  %v2407_v53 = vmax.f32 %v2375_v0, 0.0 }
 0x28a   : > { %4023 = vmatmul.mubr.f32.gmra.mxu1 %v2401_v26  ;;  %v2377_v40 = vadd.f32 %v6085_v22, %v2338_v19  ;;  %v2112_v1 = vadd.f32 %v2065_v43, %v1722_v54  ;;  %v2408_v3 = vmax.f32 %v2376_v4, 0.0  ;;  %v2378_v11 = vadd.f32 %v6085_v22, %v2339_v38  ;;  %v1725_v26 = vld [vmem:[#allocation2 + $0x98] sm:$0xff]  ;;  %v2275_v2 = vpop.permute.xlu1 %2274  ;;  %v2699_v43 = vld [vmem:[#allocation7 + $0x8] sm:$0xff] }
 0x28b   : > { %4025 = vmatprep.mubr.f32.mxu1 %v2402_v39  ;;  %v2340_v62 = vadd.f32 %v2308_v42, %v2109_v20  ;;  %v2341_v14 = vadd.f32 %v2309_v7, %v2110_v61  ;;  %v2310_v41 = vmul.f32 %v6067_v9, %v2255_v10  ;;  %v2311_v34 = vmul.f32 %v6067_v9, %v2260_v23  ;;  %v6205_v10 = vld [vmem:[%s7178_s28] ss:$0 sm:$0xff] }
 0x28c   : > { %v2113_v59 = vadd.f32 %v3965_v30, %v1723_v24  ;;  %v2409_v15 = vmax.f32 %v2377_v40, 0.0  ;;  %v2114_v27 = vadd.f32 %v2075_v45, %v1724_v35  ;;  %v2410_v28 = vmax.f32 %v2378_v11, 0.0 }
 0x28d   : > { %v2342_v63 = vadd.f32 %v2310_v41, %v2111_v6  ;;  %v2379_v8 = vadd.f32 %v6085_v22, %v2340_v62  ;;  %v2343_v44 = vadd.f32 %v2311_v34, %v2112_v1  ;;  %v2380_v29 = vadd.f32 %v6085_v22, %v2341_v14 }
 0x28e   : > { %4026 = vmatmul.mubr.f32.gmra.mxu1 %v2403_v58  ;;  %v2312_v36 = vmul.f32 %v6067_v9, %v2265_v25  ;;  %v2313_v39 = vmul.f32 %v6067_v9, %v2270_v51  ;;  %v2115_v12 = vadd.f32 %v3968_v56, %v1725_v26  ;;  %v2314_v57 = vmul.f32 %v6067_v9, %v2275_v2  ;;  %v2700_v9 = vld [vmem:[#allocation7 + $0x10] sm:$0xff] }
 0x28f   : > { %4028 = vmatprep.mubr.f32.mxu1 %v2404_v31  ;;  %v2411_v46 = vmax.f32 %v2379_v8, 0.0  ;;  %v2381_v30 = vadd.f32 %v6085_v22, %v2342_v63  ;;  %v2412_v5 = vmax.f32 %v2380_v29, 0.0  ;;  %v2382_v47 = vadd.f32 %v6085_v22, %v2343_v44  ;;  %4075 = vmatprep.subr.mxu0 %v2700_v9 }
 0x290   : > { %v2344_v55 = vadd.f32 %v2312_v36, %v2113_v59  ;;  %v2345_v13 = vadd.f32 %v2313_v39, %v2114_v27  ;;  %v2346_v58 = vadd.f32 %v2314_v57, %v2115_v12  ;;  %4076 = vmatpush3.msra.mxu0 %v2700_v9 }
 0x291   : > { %v2413_v48 = vmax.f32 %v2381_v30, 0.0  ;;  %v2414_v16 = vmax.f32 %v2382_v47, 0.0  ;;  %4077 = vmatprep.subr.mxu0 %v2699_v43 }
 0x292   : > { %4029 = vmatmul.mubr.f32.gmra.mxu1 %v2405_v33  ;;  %v2383_v32 = vadd.f32 %v6085_v22, %v2344_v55  ;;  %v2384_v50 = vadd.f32 %v6085_v22, %v2345_v13  ;;  %v2385_v17 = vadd.f32 %v6085_v22, %v2346_v58  ;;  %4078 = vmatpush3.msra.mxu0 %v2699_v43 }
 0x293   : > { %4031 = vmatprep.mubr.f32.mxu1 %v2406_v18  ;;  %4079 = vmatprep.subr.mxu0 %v2698_v21 }
 0x294   : > { %v2415_v31 = vmax.f32 %v2383_v32, 0.0  ;;  %v2416_v60 = vmax.f32 %v2384_v50, 0.0  ;;  %v2417_v37 = vmax.f32 %v2385_v17, 0.0  ;;  %4080 = vmatpush3.msra.mxu0 %v2698_v21 }
 0x296   : > { %4032 = vmatmul.mubr.f32.gmra.mxu1 %v2407_v53 }
 0x297   : > { %4034 = vmatprep.mubr.f32.mxu1 %v2408_v3 }
 0x29a   : > { %4035 = vmatmul.mubr.f32.gmra.mxu1 %v2409_v15 }
 0x29b   : > { %4037 = vmatprep.mubr.f32.mxu1 %v2410_v28 }
 0x29e   : > { %4038 = vmatmul.mubr.f32.gmra.mxu1 %v2411_v46 }
 0x29f   : > { %4040 = vmatprep.mubr.f32.mxu1 %v2412_v5 }
 0x2a2   : > { %4041 = vmatmul.mubr.f32.gmra.mxu1 %v2413_v48 }
 0x2a3   : > { %4043 = vmatprep.mubr.f32.mxu1 %v2414_v16 }
 0x2a6   : > { %4044 = vmatmul.mubr.f32.gmra.mxu1 %v2415_v31 }
 0x2a7   : > { %4046 = vmatprep.mubr.f32.mxu1 %v2416_v60 }
 0x2aa   : > { %4047 = vmatmul.mubr.f32.gmra.mxu1 %v2417_v37 }
 0x32e   : > { %v4003_v22 = vpop.f32.mrf.mxu1 }
 0x32f   : > { %v2513_v19 = vadd.f32 %v4003_v22, %v6205_v10 }
 0x330   : > { %v2507_v20 = vpop.f32.mrf.mxu1 }
 0x331   : > { %v2508_v33 = vadd.f32 %v6205_v10, %v2507_v20  ;;  %v2667_v49 = vmax.f32 %v2513_v19, 0.0 }
 0x332   : > { %v4006_v0 = vpop.f32.mrf.mxu1 }
 0x333   : > { %v2666_v38 = vmax.f32 %v2508_v33, 0.0  ;;  %v2523_v61 = vadd.f32 %v4006_v0, %v6205_v10 }
 0x334   : > { %v2517_v18 = vpop.f32.mrf.mxu1 }
 0x335   : > { %v2518_v4 = vadd.f32 %v6205_v10, %v2517_v18  ;;  %4081 = vmatprep.mubr.f32.mxu0 %v2666_v38  ;;  %v2669_v54 = vmax.f32 %v2523_v61, 0.0 }
 0x336   : > { %v4009_v42 = vpop.f32.mrf.mxu1  ;;  %4082 = vmatmul.mubr.f32.vlgmr.msra.gmra.mxu0 %v2667_v49 }
 0x337   : > { %v2668_v23 = vmax.f32 %v2518_v4, 0.0  ;;  %v2533_v56 = vadd.f32 %v4009_v42, %v6205_v10 }
 0x338   : > { %v2527_v7 = vpop.f32.mrf.mxu1 }
 0x339   : > { %v2528_v62 = vadd.f32 %v6205_v10, %v2527_v7  ;;  %4084 = vmatprep.mubr.f32.mxu0 %v2668_v23  ;;  %v2671_v40 = vmax.f32 %v2533_v56, 0.0 }
 0x33a   : > { %v4012_v6 = vpop.f32.mrf.mxu1  ;;  %4085 = vmatmul.mubr.f32.gmra.mxu0 %v2669_v54 }
 0x33b   : > { %v2670_v53 = vmax.f32 %v2528_v62, 0.0  ;;  %v2543_v25 = vadd.f32 %v4012_v6, %v6205_v10 }
 0x33c   : > { %v2537_v14 = vpop.f32.mrf.mxu1 }
 0x33d   : > { %v2538_v24 = vadd.f32 %v6205_v10, %v2537_v14  ;;  %4087 = vmatprep.mubr.f32.mxu0 %v2670_v53  ;;  %v2673_v11 = vmax.f32 %v2543_v25, 0.0 }
 0x33e   : > { %v4015_v1 = vpop.f32.mrf.mxu1  ;;  %4088 = vmatmul.mubr.f32.gmra.mxu0 %v2671_v40 }
 0x33f   : > { %v2672_v3 = vmax.f32 %v2538_v24, 0.0  ;;  %v2553_v41 = vadd.f32 %v4015_v1, %v6205_v10 }
 0x340   : > { %v2547_v35 = vpop.f32.mrf.mxu1 }
 0x341   : > { %v2548_v45 = vadd.f32 %v6205_v10, %v2547_v35  ;;  %4090 = vmatprep.mubr.f32.mxu0 %v2672_v3  ;;  %v2675_v63 = vmax.f32 %v2553_v41, 0.0 }
 0x342   : > { %v4018_v34 = vpop.f32.mrf.mxu1  ;;  %4091 = vmatmul.mubr.f32.gmra.mxu0 %v2673_v11 }
 0x343   : > { %v2674_v51 = vmax.f32 %v2548_v45, 0.0  ;;  %v2563_v59 = vadd.f32 %v4018_v34, %v6205_v10 }
 0x344   : > { %v2557_v15 = vpop.f32.mrf.mxu1 }
 0x345   : > { %v2558_v8 = vadd.f32 %v6205_v10, %v2557_v15  ;;  %4093 = vmatprep.mubr.f32.mxu0 %v2674_v51  ;;  %v2677_v27 = vmax.f32 %v2563_v59, 0.0 }
 0x346   : > { %v4021_v44 = vpop.f32.mrf.mxu1  ;;  %4094 = vmatmul.mubr.f32.gmra.mxu0 %v2675_v63 }
 0x347   : > { %v2676_v26 = vmax.f32 %v2558_v8, 0.0  ;;  %v2573_v28 = vadd.f32 %v4021_v44, %v6205_v10  ;;  %v6242_v44 = vld [vmem:[%s7179_s8] ss:$0 sm:$0xff] }
 0x348   : > { %v2567_v29 = vpop.f32.mrf.mxu1 }
 0x349   : > { %v2568_v36 = vadd.f32 %v6205_v10, %v2567_v29  ;;  %4096 = vmatprep.mubr.f32.mxu0 %v2676_v26  ;;  %v2679_v55 = vmax.f32 %v2573_v28, 0.0 }
 0x34a   : > { %v4024_v2 = vpop.f32.mrf.mxu1  ;;  %4097 = vmatmul.mubr.f32.gmra.mxu0 %v2677_v27 }
 0x34b   : > { %v2678_v39 = vmax.f32 %v2568_v36, 0.0  ;;  %v2583_v12 = vadd.f32 %v4024_v2, %v6205_v10 }
 0x34c   : > { %v2577_v46 = vpop.f32.mrf.mxu1 }
 0x34d   : > { %v2578_v30 = vadd.f32 %v6205_v10, %v2577_v46  ;;  %4099 = vmatprep.mubr.f32.mxu0 %v2678_v39  ;;  %v2681_v47 = vmax.f32 %v2583_v12, 0.0 }
 0x34e   : > { %v4027_v13 = vpop.f32.mrf.mxu1  ;;  %4100 = vmatmul.mubr.f32.gmra.mxu0 %v2679_v55 }
 0x34f   : > { %v2680_v5 = vmax.f32 %v2578_v30, 0.0  ;;  %v2593_v57 = vadd.f32 %v4027_v13, %v6205_v10 }
 0x350   : > { %v2587_v58 = vpop.f32.mrf.mxu1 }
 0x351   : > { %v2588_v48 = vadd.f32 %v6205_v10, %v2587_v58  ;;  %4102 = vmatprep.mubr.f32.mxu0 %v2680_v5  ;;  %v2683_v50 = vmax.f32 %v2593_v57, 0.0 }
 0x352   : > { %v4030_v32 = vpop.f32.mrf.mxu1  ;;  %4103 = vmatmul.mubr.f32.gmra.mxu0 %v2681_v47 }
 0x353   : > { %v2682_v16 = vmax.f32 %v2588_v48, 0.0  ;;  %v2603_v31 = vadd.f32 %v4030_v32, %v6205_v10 }
 0x354   : > { %v2597_v17 = vpop.f32.mrf.mxu1 }
 0x355   : > { %v2598_v60 = vadd.f32 %v6205_v10, %v2597_v17  ;;  %4105 = vmatprep.mubr.f32.mxu0 %v2682_v16  ;;  %v2685_v43 = vmax.f32 %v2603_v31, 0.0 }
 0x356   : > { %v4033_v37 = vpop.f32.mrf.mxu1  ;;  %4106 = vmatmul.mubr.f32.gmra.mxu0 %v2683_v50 }
 0x357   : > { %v2684_v9 = vmax.f32 %v2598_v60, 0.0  ;;  %v2613_v21 = vadd.f32 %v4033_v37, %v6205_v10 }
 0x358   : > { %v2607_v22 = vpop.f32.mrf.mxu1 }
 0x359   : > { %v2608_v19 = vadd.f32 %v6205_v10, %v2607_v22  ;;  %4108 = vmatprep.mubr.f32.mxu0 %v2684_v9  ;;  %v2687_v0 = vmax.f32 %v2613_v21, 0.0  ;;  %v3397_v9 = vlaneseq }
 0x35a   : > { %v4036_v20 = vpop.f32.mrf.mxu1  ;;  %4109 = vmatmul.mubr.f32.gmra.mxu0 %v2685_v43 }
 0x35b   : > { %v2686_v33 = vmax.f32 %v2608_v19, 0.0  ;;  %v2623_v38 = vadd.f32 %v4036_v20, %v6205_v10 }
 0x35c   : > { %v2617_v49 = vpop.f32.mrf.mxu1 }
 0x35d   : > { %v2618_v61 = vadd.f32 %v6205_v10, %v2617_v49  ;;  %4111 = vmatprep.mubr.f32.mxu0 %v2686_v33  ;;  %v2689_v42 = vmax.f32 %v2623_v38, 0.0  ;;  %v2946_v33 = vld [vmem:[%s7180_s14] sm:$0x1]  ;;  %v3398_v49 = vshrl.u32 %v3397_v9, 7 }
 0x35e   : > { %v4039_v18 = vpop.f32.mrf.mxu1  ;;  %4112 = vmatmul.mubr.f32.gmra.mxu0 %v2687_v0  ;;  %vm2947_vm4 = vcmp.gt.f32.partialorder %v2946_v33, 0.5 }
 0x35f   : > { %v2688_v4 = vmax.f32 %v2618_v61, 0.0  ;;  %v2633_v23 = vadd.f32 %v4039_v18, %v6205_v10 }
 0x360   : > { %v2627_v54 = vpop.f32.mrf.mxu1 }
 0x361   : > { %v2628_v56 = vadd.f32 %v6205_v10, %v2627_v54  ;;  %4114 = vmatprep.mubr.f32.mxu0 %v2688_v4  ;;  %v2691_v6 = vmax.f32 %v2633_v23, 0.0 }
 0x362   : > { %v4042_v7 = vpop.f32.mrf.mxu1  ;;  %4115 = vmatmul.mubr.f32.gmra.mxu0 %v2689_v42 }
 0x363   : > { %v2690_v62 = vmax.f32 %v2628_v56, 0.0  ;;  %v2643_v53 = vadd.f32 %v4042_v7, %v6205_v10 }
 0x364   : > { %v2637_v40 = vpop.f32.mrf.mxu1 }
 0x365   : > { %v2638_v25 = vadd.f32 %v6205_v10, %v2637_v40  ;;  %4117 = vmatprep.mubr.f32.mxu0 %v2690_v62  ;;  %v2693_v1 = vmax.f32 %v2643_v53, 0.0  ;;  %v3399_v53 = vsub.s32 0, %v3398_v49 }
 0x366   : > { %v4045_v14 = vpop.f32.mrf.mxu1  ;;  %4118 = vmatmul.mubr.f32.gmra.mxu0 %v2691_v6 }
 0x367   : > { %v2692_v24 = vmax.f32 %v2638_v25, 0.0  ;;  %v2653_v3 = vadd.f32 %v4045_v14, %v6205_v10  ;;  %v3396_v14 = vsel %vm2947_vm4, 1, %v4728_v52 }
 0x368   : > { %v2647_v11 = vpop.f32.mrf.mxu1 }
 0x369   : > { %v2648_v41 = vadd.f32 %v6205_v10, %v2647_v11  ;;  %4120 = vmatprep.mubr.f32.mxu0 %v2692_v24  ;;  %v2695_v34 = vmax.f32 %v2653_v3, 0.0 }
 0x36a   : > { %v4048_v35 = vpop.f32.mrf.mxu1  ;;  %4121 = vmatmul.mubr.f32.gmra.mxu0 %v2693_v1 }
 0x36b   : > { %v2694_v45 = vmax.f32 %v2648_v41, 0.0  ;;  %v2663_v51 = vadd.f32 %v4048_v35, %v6205_v10  ;;  %v6293_v35 = vrot.slane %v3396_v14, %v3399_v53 }
 0x36c   : > { %v2657_v63 = vpop.f32.mrf.mxu1 }
 0x36d   : > { %v2658_v59 = vadd.f32 %v6205_v10, %v2657_v63  ;;  %4123 = vmatprep.mubr.f32.mxu0 %v2694_v45  ;;  %v2697_v8 = vmax.f32 %v2663_v51, 0.0  ;;  %vm3401_vm5 = vcmp.eq.s32.totalorder %v6293_v35, 1 }
 0x36e   : > { %4124 = vmatmul.mubr.f32.gmra.mxu0 %v2695_v34 }
 0x36f   : > { %v2696_v15 = vmax.f32 %v2658_v59, 0.0 }
 0x371   : > { %4126 = vmatprep.mubr.f32.mxu0 %v2696_v15 }
 0x372   : > { %4127 = vmatmul.mubr.f32.gmra.mxu0 %v2697_v8 }
 0x3f6   : > { %v4083_v26 = vpop.f32.mrf.mxu0 }
 0x3f7   : > { %v6245_v27 = vadd.f32 %v4083_v26, %v6242_v44 }
 0x3f8   : > { %v2787_v28 = vpop.f32.mrf.mxu0 }
 0x3f9   : > { %v2981_v29 = vmin.f32 %v6245_v27, 20.0  ;;  %v6249_v10 = vadd.f32 %v6242_v44, %v2787_v28  ;;  %vm2949_vm6 = vcmp.gt.f32.partialorder %v6245_v27, 20.0 }
 0x3fa   : > { %v4086_v36 = vpop.f32.mrf.mxu0 }
 0x3fb   : > { %v3014_v2 = vmul.f32 1.442695, %v2981_v29  ;;  %v2980_v39 = vmin.f32 %v6249_v10, 20.0  ;;  %v6253_v55 = vadd.f32 %v4086_v36, %v6242_v44  ;;  %vm2948_vm8 = vcmp.gt.f32.partialorder %v6249_v10, 20.0 }
 0x3fc   : > { %v2797_v12 = vpop.f32.mrf.mxu0 }
 0x3fd   : > { %4414 = vpow2.f32 %v3014_v2  ;;  %v3012_v46 = vmul.f32 1.442695, %v2980_v39  ;;  %v2983_v30 = vmin.f32 %v6253_v55, 20.0  ;;  %v6257_v13 = vadd.f32 %v6242_v44, %v2797_v12 }
 0x3fe   : > { %v4089_v5 = vpop.f32.mrf.mxu0  ;;  %vm2951_vm10 = vcmp.gt.f32.partialorder %v6253_v55, 20.0 }
 0x3ff   : > { %4416 = vpow2.f32 %v3012_v46  ;;  %v3018_v47 = vmul.f32 1.442695, %v2983_v30  ;;  %v6260_v57 = vadd.f32 %v4089_v5, %v6242_v44  ;;  %v2982_v58 = vmin.f32 %v6257_v13, 20.0 }
 0x400   : > { %v2807_v48 = vpop.f32.mrf.mxu0  ;;  %vm2950_vm13 = vcmp.gt.f32.partialorder %v6257_v13, 20.0 }
 0x401   : > { %4418 = vpow2.f32 %v3018_v47  ;;  %v2985_v32 = vmin.f32 %v6260_v57, 20.0  ;;  %v6265_v16 = vadd.f32 %v6242_v44, %v2807_v48  ;;  %v3016_v50 = vmul.f32 1.442695, %v2982_v58 }
 0x402   : > { %v4092_v31 = vpop.f32.mrf.mxu0  ;;  %vm2953_vm15 = vcmp.gt.f32.partialorder %v6260_v57, 20.0 }
 0x403   : > { %v3022_v17 = vmul.f32 1.442695, %v2985_v32  ;;  %v2984_v60 = vmin.f32 %v6265_v16, 20.0  ;;  %v6269_v37 = vadd.f32 %v4092_v31, %v6242_v44  ;;  %4420 = vpow2.f32 %v3016_v50 }
 0x404   : > { %v2817_v43 = vpop.f32.mrf.mxu0  ;;  %vm2952_vm1 = vcmp.gt.f32.partialorder %v6265_v16, 20.0 }
 0x405   : > { %4422 = vpow2.f32 %v3022_v17  ;;  %v3020_v21 = vmul.f32 1.442695, %v2984_v60  ;;  %v2987_v22 = vmin.f32 %v6269_v37, 20.0  ;;  %v6273_v19 = vadd.f32 %v6242_v44, %v2817_v43 }
 0x406   : > { %v4095_v20 = vpop.f32.mrf.mxu0  ;;  %vm2955_vm3 = vcmp.gt.f32.partialorder %v6269_v37, 20.0 }
 0x407   : > { %4424 = vpow2.f32 %v3020_v21  ;;  %v3026_v0 = vmul.f32 1.442695, %v2987_v22  ;;  %v6279_v38 = vadd.f32 %v4095_v20, %v6242_v44  ;;  %v2986_v61 = vmin.f32 %v6273_v19, 20.0 }
 0x408   : > { %v2827_v18 = vpop.f32.mrf.mxu0 }
 0x409   : > { %4426 = vpow2.f32 %v3026_v0  ;;  %v2989_v4 = vmin.f32 %v6279_v38, 20.0  ;;  %v6284_v42 = vadd.f32 %v6242_v44, %v2827_v18  ;;  %v3024_v54 = vmul.f32 1.442695, %v2986_v61 }
 0x40a   : > { %v4415_v23 = vpop.eup %4414  ;;  %v4098_v56 = vpop.f32.mrf.mxu0 }
 0x40b   : > { %v3085_v7 = vadd.f32 1.0, %v4415_v23  ;;  %v3030_v62 = vmul.f32 1.442695, %v2989_v4  ;;  %4428 = vpow2.f32 %v3024_v54  ;;  %v2988_v40 = vmin.f32 %v6284_v42, 20.0 }
 0x40c   : > { %v4417_v6 = vpop.eup %4416  ;;  %v6287_v25 = vpop.f32.mrf.mxu0  ;;  %v6291_v1 = vadd.f32 %v4098_v56, %v6242_v44  ;;  %v3088_v45 = vmul.f32 -0.5, %v4415_v23  ;;  %v3091_v15 = vand.u32 2147483647, %v4415_v23 }
 0x40d   : > { %4430 = vlog2.f32 %v3085_v7  ;;  %v3076_v24 = vadd.f32 1.0, %v4417_v6  ;;  %v3028_v11 = vmul.f32 1.442695, %v2988_v40  ;;  %v3079_v63 = vmul.f32 -0.5, %v4417_v6 }
 0x40e   : > { %v4419_v3 = vpop.eup %4418  ;;  %4432 = vpow2.f32 %v3030_v62  ;;  %v6295_v34 = vpop.f32.mrf.mxu0  ;;  %v2991_v52 = vmin.f32 %v6291_v1, 20.0  ;;  %v3089_v39 = vadd.f32 1.0, %v3088_v45  ;;  %v3082_v12 = vand.u32 2147483647, %v4417_v6 }
 0x40f   : > { %4434 = vlog2.f32 %v3076_v24  ;;  %v3103_v41 = vadd.f32 1.0, %v4419_v3  ;;  %v3106_v8 = vmul.f32 -0.5, %v4419_v3  ;;  %v3080_v5 = vadd.f32 1.0, %v3079_v63 }
 0x410   : > { %4436 = vpow2.f32 %v3028_v11  ;;  %v4421_v51 = vpop.eup %4420  ;;  %v3034_v46 = vmul.f32 1.442695, %v2991_v52  ;;  %v6299_v30 = vpop.f32.mrf.mxu0  ;;  %v3109_v47 = vand.u32 2147483647, %v4419_v3  ;;  %vm6304_vm7 = vcmp.lt.f32.partialorder %v3091_v15, 0.0004427343 }
 0x411   : > { %4438 = vlog2.f32 %v3103_v41  ;;  %v3094_v26 = vadd.f32 1.0, %v4421_v51  ;;  %v3097_v28 = vmul.f32 -0.5, %v4421_v51  ;;  %v3107_v50 = vadd.f32 1.0, %v3106_v8 }
 0x412   : > { %v4423_v59 = vpop.eup %4422  ;;  %v3100_v31 = vand.u32 2147483647, %v4421_v51  ;;  %v3090_v21 = vmul.f32 %v4415_v23, %v3089_v39  ;;  %v6311_v33 = vpop.f32.mrf.mxu0  ;;  %v3081_v49 = vmul.f32 %v4417_v6, %v3080_v5  ;;  %vm6315_vm9 = vcmp.lt.f32.partialorder %v3082_v12, 0.0004427343 }
 0x413   : > { %v3121_v29 = vadd.f32 1.0, %v4423_v59  ;;  %v3124_v36 = vmul.f32 -0.5, %v4423_v59  ;;  %4440 = vlog2.f32 %v3094_v26  ;;  %v3098_v60 = vadd.f32 1.0, %v3097_v28 }
 0x414   : > { %v4425_v2 = vpop.eup %4424  ;;  %v3127_v22 = vand.u32 2147483647, %v4423_v59  ;;  %vm6320_vm11 = vcmp.lt.f32.partialorder %v3109_v47, 0.0004427343  ;;  %v3108_v23 = vmul.f32 %v4419_v3, %v3107_v50  ;;  %vm6327_vm12 = vcmp.lt.f32.partialorder %v3100_v31, 0.0004427343 }
 0x415   : > { %4442 = vlog2.f32 %v3121_v29  ;;  %v3112_v58 = vadd.f32 1.0, %v4425_v2  ;;  %v3115_v17 = vmul.f32 -0.5, %v4425_v2  ;;  %v3125_v9 = vadd.f32 1.0, %v3124_v36 }
 0x416   : > { %v6302_v48 = vpop.eup %4426  ;;  %v3118_v56 = vand.u32 2147483647, %v4425_v2  ;;  %v3099_v53 = vmul.f32 %v4421_v51, %v3098_v60  ;;  %vm6334_vm14 = vcmp.lt.f32.partialorder %v3127_v22, 0.0004427343  ;;  %v6340_v51 = vpop.f32.mrf.mxu0  ;;  %v6349_v15 = vadd.f32 %v6242_v44, %v6287_v25 }
 0x417   : > { %4444 = vlog2.f32 %v3112_v58  ;;  %v3139_v43 = vadd.f32 1.0, %v6302_v48  ;;  %v3142_v20 = vmul.f32 -0.5, %v6302_v48  ;;  %v3116_v54 = vadd.f32 1.0, %v3115_v17 }
 0x418   : > { %4446 = vpow2.f32 %v3034_v46  ;;  %v6313_v0 = vpop.eup %4428  ;;  %v6331_v14 = vmul.f32 %v4423_v59, %v3125_v9  ;;  %v3145_v41 = vand.u32 2147483647, %v6302_v48  ;;  %v6353_v8 = vadd.f32 %v6295_v34, %v6242_v44  ;;  %v6380_v58 = vpop.f32.mrf.mxu0 }
 0x419   : > { %4448 = vlog2.f32 %v3139_v43  ;;  %v3130_v7 = vadd.f32 1.0, %v6313_v0  ;;  %v3143_v3 = vadd.f32 1.0, %v3142_v20  ;;  %v3117_v29 = vmul.f32 %v4425_v2, %v3116_v54 }
 0x41a   : > { %v4431_v4 = vpop.eup %4430  ;;  %vm6358_vm0 = vcmp.lt.f32.partialorder %v3118_v56, 0.0004427343  ;;  %v3133_v39 = vmul.f32 -0.5, %v6313_v0  ;;  %v3136_v2 = vand.u32 2147483647, %v6313_v0  ;;  %v2990_v60 = vmin.f32 %v6349_v15, 20.0 }
 0x41b   : > { %v6325_v62 = vpop.eup %4432  ;;  %v3087_v6 = vmul.f32 0.6931472, %v4431_v4  ;;  %4450 = vlog2.f32 %v3130_v7  ;;  %vm6374_vm2 = vcmp.lt.f32.partialorder %v3145_v41, 0.0004427343  ;;  %v3144_v17 = vmul.f32 %v6302_v48, %v3143_v3 }
 0x41c   : > { %v4435_v24 = vpop.eup %4434  ;;  %v3157_v45 = vadd.f32 1.0, %v6325_v62  ;;  %v3134_v22 = vadd.f32 1.0, %v3133_v39  ;;  %vm6397_vm4 = vcmp.lt.f32.partialorder %v3136_v2, 0.0004427343  ;;  %v3032_v48 = vmul.f32 1.442695, %v2990_v60 }
 0x41d   : > { %v6342_v63 = vpop.eup %4436  ;;  %v3093_v52 = vsel %vm6304_vm7, %v3090_v21, %v3087_v6  ;;  %v3078_v59 = vmul.f32 0.6931472, %v4435_v24  ;;  %v2993_v54 = vmin.f32 %v6353_v8, 20.0  ;;  %vm2957_vm7 = vcmp.gt.f32.partialorder %v6279_v38, 20.0 }
 0x41e   : > { %v4439_v26 = vpop.eup %4438  ;;  %v3365_v28 = vsel %vm2949_vm6, %v6245_v27, %v3093_v52  ;;  %4452 = vlog2.f32 %v3157_v45  ;;  %v3148_v47 = vadd.f32 1.0, %v6342_v63  ;;  %vm2954_vm6 = vcmp.gt.f32.partialorder %v6273_v19, 20.0 }
 0x41f   : > { %v3403_v25 = vsel %vm3401_vm5, %v3365_v28, %v6245_v27  ;;  %v3084_v34 = vsel %vm6315_vm9, %v3081_v49, %v3078_v59  ;;  %v3105_v12 = vmul.f32 0.6931472, %v4439_v26  ;;  %v3160_v27 = vmul.f32 -0.5, %v6325_v62 }
 0x420   : > { %3435 = vst [vmem:[%s4977_s6 + $0x8] sm:$0xff] %v3403_v25  ;;  %v3364_v46 = vsel %vm2948_vm8, %v6249_v10, %v3084_v34  ;;  %v4441_v32 = vpop.eup %4440  ;;  %4454 = vlog2.f32 %v3148_v47  ;;  %v3135_v41 = vmul.f32 %v6313_v0, %v3134_v22  ;;  %v3151_v52 = vmul.f32 -0.5, %v6342_v63 }
 0x421   : > { %v3402_v50 = vsel %vm3401_vm5, %v3364_v46, %v6249_v10  ;;  %v3111_v31 = vsel %vm6320_vm11, %v3108_v23, %v3105_v12  ;;  %v3096_v21 = vmul.f32 0.6931472, %v4441_v32  ;;  %v3161_v4 = vadd.f32 1.0, %v3160_v27 }
 0x422   : > { %v4443_v9 = vpop.eup %4442  ;;  %3434 = vst [vmem:[%s4977_s6] sm:$0xff] %v3402_v50  ;;  %v3367_v43 = vsel %vm2951_vm10, %v6253_v55, %v3111_v31  ;;  %v3163_v23 = vand.u32 2147483647, %v6325_v62  ;;  %4456 = vpow2.f32 %v3032_v48  ;;  %v3038_v26 = vmul.f32 1.442695, %v2993_v54 }
 0x423   : > { %v3405_v10 = vsel %vm3401_vm5, %v3367_v43, %v6253_v55  ;;  %v3123_v20 = vmul.f32 0.6931472, %v4443_v9  ;;  %v3102_v18 = vsel %vm6327_vm12, %v3099_v53, %v3096_v21  ;;  %v6407_v55 = vpop.f32.mrf.mxu0  ;;  %v3162_v36 = vmul.f32 %v6325_v62, %v3161_v4 }
 0x424   : > { %v4445_v61 = vpop.eup %4444  ;;  %3437 = vst [vmem:[%s4977_s6 + $0x18] sm:$0xff] %v3405_v10  ;;  %v3366_v7 = vsel %vm2950_vm13, %v6257_v13, %v3102_v18  ;;  %vm6437_vm8 = vcmp.lt.f32.partialorder %v3163_v23, 0.0004427343  ;;  %v6449_v25 = vadd.f32 %v6242_v44, %v6299_v30  ;;  %vm2956_vm9 = vcmp.gt.f32.partialorder %v6284_v42, 20.0 }
 0x425   : > { %v6409_v56 = vpop.eup %4446  ;;  %v3129_v6 = vsel %vm6334_vm14, %v6331_v14, %v3123_v20  ;;  %v3114_v53 = vmul.f32 0.6931472, %v4445_v61  ;;  %v3404_v24 = vsel %vm3401_vm5, %v3366_v7, %v6257_v13  ;;  %v4110_v28 = vpop.f32.mrf.mxu0  ;;  %v3154_v2 = vand.u32 2147483647, %v6342_v63 }
 0x426   : > { %v4449_v40 = vpop.eup %4448  ;;  %v3369_v3 = vsel %vm2953_vm15, %v6260_v57, %v3129_v6  ;;  %v3175_v45 = vadd.f32 1.0, %v6409_v56  ;;  %3436 = vst [vmem:[%s4977_s6 + $0x10] sm:$0xff] %v3404_v24  ;;  %v3152_v46 = vadd.f32 1.0, %v3151_v52  ;;  %v2992_v30 = vmin.f32 %v6449_v25, 20.0 }
 0x427   : > { %v3407_v14 = vsel %vm3401_vm5, %v3369_v3, %v6260_v57  ;;  %v3120_v11 = vsel %vm6358_vm0, %v3117_v29, %v3114_v53  ;;  %v3141_v13 = vmul.f32 0.6931472, %v4449_v40  ;;  %v6463_v5 = vadd.f32 %v6311_v33, %v6242_v44  ;;  %v2877_v50 = vpop.f32.mrf.mxu0 }
 0x428   : > { %3439 = vst [vmem:[%s4977_s6 + $0x28] sm:$0xff] %v3407_v14  ;;  %v3368_v0 = vsel %vm2952_vm1, %v6265_v16, %v3120_v11  ;;  %4458 = vlog2.f32 %v3175_v45  ;;  %v4451_v39 = vpop.eup %4450  ;;  %v6470_v32 = vadd.f32 %v6242_v44, %v6340_v51  ;;  %v3178_v31 = vmul.f32 -0.5, %v6409_v56 }
 0x429   : > { %v3406_v57 = vsel %vm3401_vm5, %v3368_v0, %v6265_v16  ;;  %v3147_v29 = vsel %vm6374_vm2, %v3144_v17, %v3141_v13  ;;  %v3132_v12 = vmul.f32 0.6931472, %v4451_v39  ;;  %4460 = vpow2.f32 %v3038_v26  ;;  %v4113_v18 = vpop.f32.mrf.mxu0 }
 0x42a   : > { %3438 = vst [vmem:[%s4977_s6 + $0x20] sm:$0xff] %v3406_v57  ;;  %v3371_v34 = vsel %vm2955_vm3, %v6269_v37, %v3147_v29  ;;  %v3036_v17 = vmul.f32 1.442695, %v2992_v30  ;;  %v2995_v60 = vmin.f32 %v6463_v5, 20.0  ;;  %vm6486_vm10 = vcmp.lt.f32.partialorder %v3154_v2, 0.0004427343 }
 0x42b   : > { %v4453_v16 = vpop.eup %4452  ;;  %v3409_v62 = vsel %vm3401_vm5, %v3371_v34, %v6269_v37  ;;  %v3138_v27 = vsel %vm6397_vm4, %v3135_v41, %v3132_v12  ;;  %v6474_v37 = vadd.f32 %v6380_v58, %v6242_v44  ;;  %v2994_v43 = vmin.f32 %v6470_v32, 20.0  ;;  %v2887_v14 = vpop.f32.mrf.mxu0 }
 0x42c   : > { %3441 = vst [vmem:[%s4977_s6 + $0x38] sm:$0xff] %v3409_v62  ;;  %v3159_v47 = vmul.f32 0.6931472, %v4453_v16  ;;  %v3370_v33 = vsel %vm2954_vm6, %v6273_v19, %v3138_v27  ;;  %v3153_v10 = vmul.f32 %v6342_v63, %v3152_v46  ;;  %4462 = vpow2.f32 %v3036_v17 }
 0x42d   : > { %v3408_v51 = vsel %vm3401_vm5, %v3370_v33, %v6273_v19  ;;  %v4455_v21 = vpop.eup %4454  ;;  %v3042_v20 = vmul.f32 1.442695, %v2995_v60  ;;  %v3040_v48 = vmul.f32 1.442695, %v2994_v43  ;;  %v2997_v61 = vmin.f32 %v6474_v37, 20.0 }
 0x42e   : > { %v3165_v9 = vsel %vm6437_vm8, %v3162_v36, %v3159_v47  ;;  %3440 = vst [vmem:[%s4977_s6 + $0x30] sm:$0xff] %v3408_v51  ;;  %v3150_v49 = vmul.f32 0.6931472, %v4455_v21  ;;  %v3179_v4 = vadd.f32 1.0, %v3178_v31  ;;  %v3181_v23 = vand.u32 2147483647, %v6409_v56 }
 0x42f   : > { %v3373_v22 = vsel %vm2957_vm7, %v6279_v38, %v3165_v9  ;;  %4464 = vpow2.f32 %v3042_v20  ;;  %v6504_v63 = vadd.f32 %v6242_v44, %v6407_v55  ;;  %v6506_v54 = vpop.eup %4456  ;;  %v3046_v7 = vmul.f32 1.442695, %v2997_v61 }
 0x430   : > { %v3411_v19 = vsel %vm3401_vm5, %v3373_v22, %v6279_v38  ;;  %v3156_v38 = vsel %vm6486_vm10, %v3153_v10, %v3150_v49  ;;  %4466 = vpow2.f32 %v3040_v48  ;;  %v6511_v6 = vadd.f32 %v4110_v28, %v6242_v44 }
 0x431   : > { %3443 = vst [vmem:[%s4977_s6 + $0x48] sm:$0xff] %v3411_v19  ;;  %v3372_v53 = vsel %vm2956_vm9, %v6284_v42, %v3156_v38  ;;  %v3166_v40 = vadd.f32 1.0, %v6506_v54  ;;  %v6518_v24 = vadd.f32 %v6242_v44, %v2877_v50  ;;  %v6521_v55 = vadd.f32 %v4113_v18, %v6242_v44 }
 0x432   : > { %v3410_v3 = vsel %vm3401_vm5, %v3372_v53, %v6284_v42  ;;  %4468 = vpow2.f32 %v3046_v7  ;;  %v2996_v41 = vmin.f32 %v6504_v63, 20.0  ;;  %v3180_v13 = vmul.f32 %v6409_v56, %v3179_v4  ;;  %v4116_v56 = vpop.f32.mrf.mxu0 }
 0x433   : > { %3442 = vst [vmem:[%s4977_s6 + $0x40] sm:$0xff] %v3410_v3  ;;  %4470 = vlog2.f32 %v3166_v40  ;;  %v2999_v0 = vmin.f32 %v6511_v6, 20.0  ;;  %vm3182_vm11 = vcmp.lt.f32.partialorder %v3181_v23, 0.0004427343  ;;  %v2998_v26 = vmin.f32 %v6518_v24, 20.0 }
 0x434   : > { %v3044_v52 = vmul.f32 1.442695, %v2996_v41  ;;  %v3001_v42 = vmin.f32 %v6521_v55, 20.0  ;;  %vm2959_vm12 = vcmp.gt.f32.partialorder %v6291_v1, 20.0  ;;  %v3169_v12 = vmul.f32 -0.5, %v6506_v54 }
 0x435   : > { %v4459_v45 = vpop.eup %4458  ;;  %v3050_v29 = vmul.f32 1.442695, %v2999_v0  ;;  %v3048_v36 = vmul.f32 1.442695, %v2998_v26  ;;  %v6540_v62 = vadd.f32 %v6242_v44, %v2887_v14  ;;  %v3172_v30 = vand.u32 2147483647, %v6506_v54 }
 0x436   : > { %v3177_v11 = vmul.f32 0.6931472, %v4459_v45  ;;  %v4461_v59 = vpop.eup %4460  ;;  %4472 = vpow2.f32 %v3044_v52  ;;  %v3054_v16 = vmul.f32 1.442695, %v3001_v42  ;;  %v6544_v47 = vadd.f32 %v4116_v56, %v6242_v44 }
 0x437   : > { %v3193_v39 = vadd.f32 1.0, %v4461_v59  ;;  %v3196_v2 = vmul.f32 -0.5, %v4461_v59  ;;  %v3170_v33 = vadd.f32 1.0, %v3169_v12  ;;  %v3000_v31 = vmin.f32 %v6540_v62, 20.0 }
 0x438   : > { %v3183_v28 = vsel %vm3182_vm11, %v3180_v13, %v3177_v11  ;;  %v3199_v51 = vand.u32 2147483647, %v4461_v59  ;;  %vm2958_vm13 = vcmp.gt.f32.partialorder %v6349_v15, 20.0  ;;  %vm6556_vm14 = vcmp.lt.f32.partialorder %v3172_v30, 0.0004427343 }
 0x439   : > { %v3375_v57 = vsel %vm2959_vm12, %v6291_v1, %v3183_v28  ;;  %4474 = vlog2.f32 %v3193_v39  ;;  %v4463_v46 = vpop.eup %4462  ;;  %v3197_v60 = vadd.f32 1.0, %v3196_v2  ;;  %v3052_v10 = vmul.f32 1.442695, %v3000_v31 }
 0x43a   : > { %v3413_v34 = vsel %vm3401_vm5, %v3375_v57, %v6291_v1  ;;  %4476 = vpow2.f32 %v3050_v29  ;;  %v3184_v27 = vadd.f32 1.0, %v4463_v46  ;;  %v2897_v1 = vpop.f32.mrf.mxu0  ;;  %v3187_v58 = vmul.f32 -0.5, %v4463_v46 }
 0x43b   : > { %3445 = vst [vmem:[%s4977_s6 + $0x58] sm:$0xff] %v3413_v34  ;;  %4478 = vpow2.f32 %v3048_v36  ;;  %v3003_v20 = vmin.f32 %v6544_v47, 20.0  ;;  %v3171_v48 = vmul.f32 %v6506_v54, %v3170_v33  ;;  %vm2961_vm15 = vcmp.gt.f32.partialorder %v6353_v8, 20.0 }
 0x43c   : > { %4480 = vpow2.f32 %v3054_v16  ;;  %v6546_v50 = vpop.eup %4464  ;;  %v4119_v19 = vpop.f32.mrf.mxu0  ;;  %v3190_v61 = vand.u32 2147483647, %v4463_v46  ;;  %v6564_v18 = vadd.f32 %v6242_v44, %v2897_v1  ;;  %v3198_v23 = vmul.f32 %v4461_v59, %v3197_v60 }
 0x43d   : > { %v6549_v17 = vpop.eup %4466  ;;  %4482 = vlog2.f32 %v3184_v27  ;;  %v3211_v9 = vadd.f32 1.0, %v6546_v50  ;;  %vm6566_vm0 = vcmp.lt.f32.partialorder %v3199_v51, 0.0004427343  ;;  %v3188_v53 = vadd.f32 1.0, %v3187_v58 }
 0x43e   : > { %v3202_v43 = vadd.f32 1.0, %v6549_v17  ;;  %v3214_v40 = vmul.f32 -0.5, %v6546_v50  ;;  %v6573_v54 = vadd.f32 %v4119_v19, %v6242_v44  ;;  %v3205_v41 = vmul.f32 -0.5, %v6549_v17  ;;  %v6604_v16 = vpop.f32.mrf.mxu0 }
 0x43f   : > { %v6554_v21 = vpop.eup %4468  ;;  %4484 = vlog2.f32 %v3211_v9  ;;  %v3058_v45 = vmul.f32 1.442695, %v3003_v20  ;;  %vm6583_vm1 = vcmp.lt.f32.partialorder %v3190_v61, 0.0004427343  ;;  %v3002_v0 = vmin.f32 %v6564_v18, 20.0 }
 0x440   : > { %v4471_v49 = vpop.eup %4470  ;;  %4486 = vlog2.f32 %v3202_v43  ;;  %v3229_v7 = vadd.f32 1.0, %v6554_v21  ;;  %v3232_v52 = vmul.f32 -0.5, %v6554_v21  ;;  %vm2960_vm2 = vcmp.gt.f32.partialorder %v6449_v25, 20.0 }
 0x441   : > { %v3168_v4 = vmul.f32 0.6931472, %v4471_v49  ;;  %4488 = vpow2.f32 %v3052_v10  ;;  %v3217_v42 = vand.u32 2147483647, %v6546_v50  ;;  %v3208_v28 = vand.u32 2147483647, %v6549_v17 }
 0x442   : > { %4490 = vlog2.f32 %v3229_v7  ;;  %v3189_v36 = vmul.f32 %v4463_v46, %v3188_v53  ;;  %v3215_v56 = vadd.f32 1.0, %v3214_v40  ;;  %vm2963_vm3 = vcmp.gt.f32.partialorder %v6463_v5, 20.0 }
 0x443   : > { %v3174_v3 = vsel %vm6556_vm14, %v3171_v48, %v3168_v4  ;;  %v6578_v14 = vpop.eup %4472  ;;  %4492 = vpow2.f32 %v3058_v45  ;;  %v3235_v12 = vand.u32 2147483647, %v6554_v21  ;;  %vm2962_vm4 = vcmp.gt.f32.partialorder %v6470_v32, 20.0  ;;  %v6633_v48 = vpop.f32.mrf.mxu0 }
 0x444   : > { %v3374_v11 = vsel %vm2958_vm13, %v6349_v15, %v3174_v3  ;;  %v3220_v39 = vadd.f32 1.0, %v6578_v14  ;;  %v3233_v27 = vadd.f32 1.0, %v3232_v52  ;;  %v3056_v33 = vmul.f32 1.442695, %v3002_v0 }
 0x445   : > { %v3412_v26 = vsel %vm3401_vm5, %v3374_v11, %v6349_v15  ;;  %v3206_v15 = vadd.f32 1.0, %v3205_v41  ;;  %vm6615_vm6 = vcmp.lt.f32.partialorder %v3217_v42, 0.0004427343  ;;  %vm6619_vm7 = vcmp.lt.f32.partialorder %v3208_v28, 0.0004427343  ;;  %v6657_v0 = vpop.f32.mrf.mxu0 }
 0x446   : > { %v4475_v59 = vpop.eup %4474  ;;  %3444 = vst [vmem:[%s4977_s6 + $0x50] sm:$0xff] %v3412_v26  ;;  %4494 = vlog2.f32 %v3220_v39  ;;  %v3216_v43 = vmul.f32 %v6546_v50, %v3215_v56  ;;  %v3223_v22 = vmul.f32 -0.5, %v6578_v14  ;;  %vm2965_vm8 = vcmp.gt.f32.partialorder %v6474_v37, 20.0 }
 0x447   : > { %v6596_v57 = vpop.eup %4476  ;;  %v3195_v29 = vmul.f32 0.6931472, %v4475_v59  ;;  %v3207_v20 = vmul.f32 %v6549_v17, %v3206_v15  ;;  %vm6636_vm9 = vcmp.lt.f32.partialorder %v3235_v12, 0.0004427343  ;;  %v3226_v7 = vand.u32 2147483647, %v6578_v14 }
 0x448   : > { %v6599_v34 = vpop.eup %4478  ;;  %v3247_v2 = vadd.f32 1.0, %v6596_v57  ;;  %v3250_v19 = vmul.f32 -0.5, %v6596_v57  ;;  %v3224_v40 = vadd.f32 1.0, %v3223_v22  ;;  %v3253_v3 = vand.u32 2147483647, %v6596_v57 }
 0x449   : > { %v6606_v30 = vpop.eup %4480  ;;  %v3201_v46 = vsel %vm6566_vm0, %v3198_v23, %v3195_v29  ;;  %v3238_v1 = vadd.f32 1.0, %v6599_v34  ;;  %v3241_v4 = vmul.f32 -0.5, %v6599_v34  ;;  %vm2964_vm10 = vcmp.gt.f32.partialorder %v6504_v63, 20.0 }
 0x44a   : > { %v3377_v31 = vsel %vm2961_vm15, %v6353_v8, %v3201_v46  ;;  %4496 = vlog2.f32 %v3247_v2  ;;  %v4483_v9 = vpop.eup %4482  ;;  %v3265_v49 = vadd.f32 1.0, %v6606_v30  ;;  %v3251_v13 = vadd.f32 1.0, %v3250_v19 }
 0x44b   : > { %v3415_v58 = vsel %vm3401_vm5, %v3377_v31, %v6353_v8  ;;  %4498 = vlog2.f32 %v3238_v1  ;;  %v3186_v10 = vmul.f32 0.6931472, %v4483_v9  ;;  %v3234_v8 = vmul.f32 %v6554_v21, %v3233_v27 }
 0x44c   : > { %3447 = vst [vmem:[%s4977_s6 + $0x68] sm:$0xff] %v3415_v58  ;;  %v4485_v61 = vpop.eup %4484  ;;  %4500 = vpow2.f32 %v3056_v33  ;;  %v3244_v52 = vand.u32 2147483647, %v6599_v34  ;;  %v3242_v42 = vadd.f32 1.0, %v3241_v4  ;;  %vm2967_vm11 = vcmp.gt.f32.partialorder %v6511_v6, 20.0  ;;  %v4125_v33 = vpop.f32.mrf.mxu0 }
 0x44d   : > { %v4487_v23 = vpop.eup %4486  ;;  %v3192_v17 = vsel %vm6583_vm1, %v3189_v36, %v3186_v10  ;;  %v3213_v38 = vmul.f32 0.6931472, %v4485_v61  ;;  %4502 = vlog2.f32 %v3265_v49  ;;  %v3268_v56 = vmul.f32 -0.5, %v6606_v30 }
 0x44e   : > { %v3376_v21 = vsel %vm2960_vm2, %v6449_v25, %v3192_v17  ;;  %v3204_v53 = vmul.f32 0.6931472, %v4487_v23  ;;  %v6648_v41 = vpop.eup %4488  ;;  %vm2966_vm12 = vcmp.gt.f32.partialorder %v6518_v24, 20.0  ;;  %v3271_v12 = vand.u32 2147483647, %v6606_v30  ;;  %v2927_v4 = vpop.f32.mrf.mxu0 }
 0x44f   : > { %v3414_v45 = vsel %vm3401_vm5, %v3376_v21, %v6449_v25  ;;  %v3219_v11 = vsel %vm6615_vm6, %v3216_v43, %v3213_v38  ;;  %v4491_v59 = vpop.eup %4490  ;;  %v3256_v28 = vadd.f32 1.0, %v6648_v41  ;;  %v3225_v27 = vmul.f32 %v6578_v14, %v3224_v40 }
 0x450   : > { %3446 = vst [vmem:[%s4977_s6 + $0x60] sm:$0xff] %v3414_v45  ;;  %v3379_v26 = vsel %vm2963_vm3, %v6463_v5, %v3219_v11  ;;  %v3210_v25 = vsel %vm6619_vm7, %v3207_v20, %v3204_v53  ;;  %v3231_v36 = vmul.f32 0.6931472, %v4491_v59  ;;  %v6681_v2 = vpop.eup %4492  ;;  %vm6687_vm13 = vcmp.lt.f32.partialorder %v3226_v7, 0.0004427343 }
 0x451   : > { %v3417_v39 = vsel %vm3401_vm5, %v3379_v26, %v6463_v5  ;;  %v3378_v29 = vsel %vm2962_vm4, %v6470_v32, %v3210_v25  ;;  %4504 = vlog2.f32 %v3256_v28  ;;  %v3005_v5 = vmin.f32 %v6573_v54, 20.0  ;;  %v4128_v26 = vpop.f32.mrf.mxu0 }
 0x452   : > { %3449 = vst [vmem:[%s4977_s6 + $0x78] sm:$0xff] %v3417_v39  ;;  %v3416_v15 = vsel %vm3401_vm5, %v3378_v29, %v6470_v32  ;;  %v3237_v46 = vsel %vm6636_vm9, %v3234_v8, %v3231_v36  ;;  %v6693_v32 = vadd.f32 %v6242_v44, %v6604_v16  ;;  %v3252_v51 = vmul.f32 %v6596_v57, %v3251_v13 }
 0x453   : > { %3448 = vst [vmem:[%s4977_s6 + $0x70] sm:$0xff] %v3416_v15  ;;  %v4495_v31 = vpop.eup %4494  ;;  %v3381_v60 = vsel %vm2965_vm8, %v6474_v37, %v3237_v46  ;;  %vm6699_vm14 = vcmp.lt.f32.partialorder %v3253_v3, 0.0004427343  ;;  %v3283_v14 = vadd.f32 1.0, %v6681_v2  ;;  %vm6707_vm15 = vcmp.lt.f32.partialorder %v3244_v52, 0.0004427343 }
 0x454   : > { %v3419_v58 = vsel %vm3401_vm5, %v3381_v60, %v6474_v37  ;;  %v3222_v16 = vmul.f32 0.6931472, %v4495_v31  ;;  %vm2969_vm0 = vcmp.gt.f32.partialorder %v6521_v55, 20.0  ;;  %v3269_v22 = vadd.f32 1.0, %v3268_v56 }
 0x455   : > { %3451 = vst [vmem:[%s4977_s6 + $0x88] sm:$0xff] %v3419_v58  ;;  %v3243_v57 = vmul.f32 %v6599_v34, %v3242_v42  ;;  %vm6714_vm1 = vcmp.lt.f32.partialorder %v3271_v12, 0.0004427343  ;;  %4506 = vlog2.f32 %v3283_v14  ;;  %v3062_v19 = vmul.f32 1.442695, %v3005_v5 }
 0x456   : > { %v3228_v37 = vsel %vm6687_vm13, %v3225_v27, %v3222_v16  ;;  %v3259_v8 = vmul.f32 -0.5, %v6648_v41  ;;  %v3004_v50 = vmin.f32 %v6693_v32, 20.0  ;;  %v6727_v17 = vadd.f32 %v6633_v48, %v6242_v44  ;;  %v2937_v27 = vpop.f32.mrf.mxu0 }
 0x457   : > { %v4497_v10 = vpop.eup %4496  ;;  %v3380_v34 = vsel %vm2964_vm10, %v6504_v63, %v3228_v37  ;;  %4508 = vpow2.f32 %v3062_v19  ;;  %v3270_v53 = vmul.f32 %v6606_v30, %v3269_v22  ;;  %v3262_v11 = vand.u32 2147483647, %v6648_v41 }
 0x458   : > { %v4499_v49 = vpop.eup %4498  ;;  %v3249_v61 = vmul.f32 0.6931472, %v4497_v10  ;;  %v3418_v7 = vsel %vm3401_vm5, %v3380_v34, %v6504_v63  ;;  %v3060_v40 = vmul.f32 1.442695, %v3004_v50  ;;  %v3286_v59 = vmul.f32 -0.5, %v6681_v2 }
 0x459   : > { %v3240_v23 = vmul.f32 0.6931472, %v4499_v49  ;;  %v6729_v38 = vpop.eup %4500  ;;  %3450 = vst [vmem:[%s4977_s6 + $0x80] sm:$0xff] %v3418_v7  ;;  %v3260_v42 = vadd.f32 1.0, %v3259_v8  ;;  %v3007_v28 = vmin.f32 %v6727_v17, 20.0  ;;  %vm2968_vm2 = vcmp.gt.f32.partialorder %v6540_v62, 20.0 }
 0x45a   : > { %v3255_v21 = vsel %vm6699_vm14, %v3252_v51, %v3249_v61  ;;  %v4503_v3 = vpop.eup %4502  ;;  %v3274_v63 = vadd.f32 1.0, %v6729_v38  ;;  %v6763_v39 = vadd.f32 %v6242_v44, %v6657_v0  ;;  %vm6768_vm3 = vcmp.lt.f32.partialorder %v3262_v11, 0.0004427343 }
 0x45b   : > { %v3383_v48 = vsel %vm2967_vm11, %v6511_v6, %v3255_v21  ;;  %v3246_v45 = vsel %vm6707_vm15, %v3243_v57, %v3240_v23  ;;  %v3267_v52 = vmul.f32 0.6931472, %v4503_v3  ;;  %v3066_v36 = vmul.f32 1.442695, %v3007_v28 }
 0x45c   : > { %v3421_v13 = vsel %vm3401_vm5, %v3383_v48, %v6511_v6  ;;  %v3382_v30 = vsel %vm2966_vm12, %v6518_v24, %v3246_v45  ;;  %4510 = vlog2.f32 %v3274_v63  ;;  %v6773_v56 = vadd.f32 %v4125_v33, %v6242_v44 }
 0x45d   : > { %3453 = vst [vmem:[%s4977_s6 + $0x98] sm:$0xff] %v3421_v13  ;;  %v3420_v25 = vsel %vm3401_vm5, %v3382_v30, %v6518_v24  ;;  %v3273_v6 = vsel %vm6714_vm1, %v3270_v53, %v3267_v52  ;;  %4512 = vpow2.f32 %v3060_v40  ;;  %v3287_v5 = vadd.f32 1.0, %v3286_v59 }
 0x45e   : > { %3452 = vst [vmem:[%s4977_s6 + $0x90] sm:$0xff] %v3420_v25  ;;  %v3385_v24 = vsel %vm2969_vm0, %v6521_v55, %v3273_v6  ;;  %v4505_v15 = vpop.eup %4504  ;;  %v3006_v0 = vmin.f32 %v6763_v39, 20.0  ;;  %v6780_v46 = vadd.f32 %v6242_v44, %v2927_v4  ;;  %v3261_v31 = vmul.f32 %v6648_v41, %v3260_v42 }
 0x45f   : > { %v3423_v12 = vsel %vm3401_vm5, %v3385_v24, %v6521_v55  ;;  %v3258_v1 = vmul.f32 0.6931472, %v4505_v15  ;;  %4514 = vpow2.f32 %v3066_v36  ;;  %v3009_v33 = vmin.f32 %v6773_v56, 20.0 }
 0x460   : > { %3455 = vst [vmem:[%s4977_s6 + $0xa8] sm:$0xff] %v3423_v12  ;;  %v3289_v60 = vand.u32 2147483647, %v6681_v2  ;;  %v3064_v51 = vmul.f32 1.442695, %v3006_v0  ;;  %v3008_v9 = vmin.f32 %v6780_v46, 20.0  ;;  %v6788_v55 = vadd.f32 %v4128_v26, %v6242_v44 }
 0x461   : > { %v3264_v14 = vsel %vm6768_vm3, %v3261_v31, %v3258_v1  ;;  %v3277_v58 = vmul.f32 -0.5, %v6729_v38  ;;  %v3070_v16 = vmul.f32 1.442695, %v3009_v33  ;;  %v6794_v41 = vadd.f32 %v6242_v44, %v2937_v27 }
 0x462   : > { %v4507_v43 = vpop.eup %4506  ;;  %v3384_v22 = vsel %vm2968_vm2, %v6540_v62, %v3264_v14  ;;  %v3288_v10 = vmul.f32 %v6681_v2, %v3287_v5  ;;  %4516 = vpow2.f32 %v3064_v51  ;;  %v3068_v57 = vmul.f32 1.442695, %v3008_v9 }
 0x463   : > { %v3422_v20 = vsel %vm3401_vm5, %v3384_v22, %v6540_v62  ;;  %v3285_v19 = vmul.f32 0.6931472, %v4507_v43  ;;  %4518 = vpow2.f32 %v3070_v16  ;;  %v3011_v49 = vmin.f32 %v6788_v55, 20.0 }
 0x464   : > { %v4509_v37 = vpop.eup %4508  ;;  %3454 = vst [vmem:[%s4977_s6 + $0xa0] sm:$0xff] %v3422_v20  ;;  %vm3290_vm4 = vcmp.lt.f32.partialorder %v3289_v60, 0.0004427343  ;;  %4520 = vpow2.f32 %v3068_v57  ;;  %v3010_v44 = vmin.f32 %v6794_v41, 20.0  ;;  %vm2971_vm6 = vcmp.gt.f32.partialorder %v6544_v47, 20.0 }
 0x465   : > { %v3291_v2 = vsel %vm3290_vm4, %v3288_v10, %v3285_v19  ;;  %v3278_v61 = vadd.f32 1.0, %v3277_v58  ;;  %v3301_v8 = vadd.f32 1.0, %v4509_v37  ;;  %v3280_v62 = vand.u32 2147483647, %v6729_v38 }
 0x466   : > { %v3387_v50 = vsel %vm2971_vm6, %v6544_v47, %v3291_v2  ;;  %v3074_v4 = vmul.f32 1.442695, %v3011_v49  ;;  %v3072_v34 = vmul.f32 1.442695, %v3010_v44  ;;  %vm2970_vm8 = vcmp.gt.f32.partialorder %v6564_v18, 20.0 }
 0x467   : > { %v3425_v23 = vsel %vm3401_vm5, %v3387_v50, %v6544_v47  ;;  %4522 = vlog2.f32 %v3301_v8  ;;  %v3279_v40 = vmul.f32 %v6729_v38, %v3278_v61  ;;  %vm3281_vm7 = vcmp.lt.f32.partialorder %v3280_v62, 0.0004427343 }
 0x468   : > { %3457 = vst [vmem:[%s4977_s6 + $0xb8] sm:$0xff] %v3425_v23  ;;  %4524 = vpow2.f32 %v3074_v4  ;;  %v3304_v63 = vmul.f32 -0.5, %v4509_v37  ;;  %v3307_v42 = vand.u32 2147483647, %v4509_v37  ;;  %vm2973_vm9 = vcmp.gt.f32.partialorder %v6573_v54, 20.0 }
 0x469   : > { %v4511_v7 = vpop.eup %4510  ;;  %4526 = vpow2.f32 %v3072_v34  ;;  %vm2972_vm11 = vcmp.gt.f32.partialorder %v6693_v32, 20.0  ;;  %vm2975_vm12 = vcmp.gt.f32.partialorder %v6727_v17, 20.0  ;;  %vm2974_vm14 = vcmp.gt.f32.partialorder %v6763_v39, 20.0 }
 0x46a   : > { %v4513_v21 = vpop.eup %4512  ;;  %v3276_v53 = vmul.f32 0.6931472, %v4511_v7  ;;  %v3305_v26 = vadd.f32 1.0, %v3304_v63  ;;  %vm3308_vm10 = vcmp.lt.f32.partialorder %v3307_v42, 0.0004427343  ;;  %vm2977_vm15 = vcmp.gt.f32.partialorder %v6773_v56, 20.0 }
 0x46b   : > { %v3292_v3 = vadd.f32 1.0, %v4513_v21  ;;  %v3295_v28 = vmul.f32 -0.5, %v4513_v21  ;;  %v3298_v1 = vand.u32 2147483647, %v4513_v21  ;;  %vm2976_vm2 = vcmp.gt.f32.partialorder %v6780_v46, 20.0 }
 0x46c   : > { %v3282_v48 = vsel %vm3281_vm7, %v3279_v40, %v3276_v53  ;;  %v6815_v45 = vpop.eup %4514  ;;  %v3306_v15 = vmul.f32 %v4509_v37, %v3305_v26  ;;  %vm2979_vm7 = vcmp.gt.f32.partialorder %v6788_v55, 20.0 }
 0x46d   : > { %v3386_v11 = vsel %vm2970_vm8, %v6564_v18, %v3282_v48  ;;  %4528 = vlog2.f32 %v3292_v3  ;;  %v3319_v13 = vadd.f32 1.0, %v6815_v45  ;;  %v3322_v24 = vmul.f32 -0.5, %v6815_v45 }
 0x46e   : > { %v3424_v47 = vsel %vm3401_vm5, %v3386_v11, %v6564_v18  ;;  %v3296_v5 = vadd.f32 1.0, %v3295_v28  ;;  %v3325_v22 = vand.u32 2147483647, %v6815_v45  ;;  %vm3299_vm13 = vcmp.lt.f32.partialorder %v3298_v1, 0.0004427343 }
 0x46f   : > { %3456 = vst [vmem:[%s4977_s6 + $0xb0] sm:$0xff] %v3424_v47  ;;  %v6823_v38 = vpop.eup %4516  ;;  %4530 = vlog2.f32 %v3319_v13  ;;  %v3323_v60 = vadd.f32 1.0, %v3322_v24 }
 0x470   : > { %v6825_v30 = vpop.eup %4518  ;;  %v3310_v52 = vadd.f32 1.0, %v6823_v38  ;;  %v3313_v51 = vmul.f32 -0.5, %v6823_v38  ;;  %v3297_v43 = vmul.f32 %v4513_v21, %v3296_v5  ;;  %v3316_v57 = vand.u32 2147483647, %v6823_v38 }
 0x471   : > { %v6828_v59 = vpop.eup %4520  ;;  %v3337_v25 = vadd.f32 1.0, %v6825_v30  ;;  %v3340_v58 = vmul.f32 -0.5, %v6825_v30  ;;  %v3324_v19 = vmul.f32 %v6815_v45, %v3323_v60  ;;  %v3343_v37 = vand.u32 2147483647, %v6825_v30 }
 0x472   : > { %4532 = vlog2.f32 %v3310_v52  ;;  %v3328_v18 = vadd.f32 1.0, %v6828_v59  ;;  %v3331_v10 = vmul.f32 -0.5, %v6828_v59  ;;  %v3314_v49 = vadd.f32 1.0, %v3313_v51 }
 0x473   : > { %4534 = vlog2.f32 %v3337_v25  ;;  %v3341_v61 = vadd.f32 1.0, %v3340_v58  ;;  %v3334_v8 = vand.u32 2147483647, %v6828_v59  ;;  %vm3326_vm0 = vcmp.lt.f32.partialorder %v3325_v22, 0.0004427343 }
 0x474   : > { %v4523_v6 = vpop.eup %4522  ;;  %4536 = vlog2.f32 %v3328_v18  ;;  %v3332_v62 = vadd.f32 1.0, %v3331_v10  ;;  %vm6865_vm1 = vcmp.lt.f32.partialorder %v3316_v57, 0.0004427343  ;;  %v3315_v3 = vmul.f32 %v6823_v38, %v3314_v49 }
 0x475   : > { %v6833_v29 = vpop.eup %4524  ;;  %v3303_v36 = vmul.f32 0.6931472, %v4523_v6  ;;  %vm6875_vm3 = vcmp.lt.f32.partialorder %v3343_v37, 0.0004427343  ;;  %v3342_v63 = vmul.f32 %v6825_v30, %v3341_v61  ;;  %vm6883_vm4 = vcmp.lt.f32.partialorder %v3334_v8, 0.0004427343 }
 0x476   : > { %v6835_v12 = vpop.eup %4526  ;;  %v3355_v0 = vadd.f32 1.0, %v6833_v29  ;;  %v3358_v4 = vmul.f32 -0.5, %v6833_v29  ;;  %v3333_v26 = vmul.f32 %v6828_v59, %v3332_v62  ;;  %v3361_v42 = vand.u32 2147483647, %v6833_v29 }
 0x477   : > { %v3309_v27 = vsel %vm3308_vm10, %v3306_v15, %v3303_v36  ;;  %v3346_v31 = vadd.f32 1.0, %v6835_v12  ;;  %v3349_v21 = vmul.f32 -0.5, %v6835_v12  ;;  %v3352_v24 = vand.u32 2147483647, %v6835_v12 }
 0x478   : > { %v3389_v33 = vsel %vm2973_vm9, %v6573_v54, %v3309_v27  ;;  %4538 = vlog2.f32 %v3355_v0  ;;  %v3359_v25 = vadd.f32 1.0, %v3358_v4  ;;  %vm3362_vm6 = vcmp.lt.f32.partialorder %v3361_v42, 0.0004427343 }
 0x479   : > { %v3427_v14 = vsel %vm3401_vm5, %v3389_v33, %v6573_v54  ;;  %4540 = vlog2.f32 %v3346_v31  ;;  %v3350_v28 = vadd.f32 1.0, %v3349_v21  ;;  %vm3353_vm8 = vcmp.lt.f32.partialorder %v3352_v24, 0.0004427343 }
 0x47a   : > { %v4529_v9 = vpop.eup %4528  ;;  %3459 = vst [vmem:[%s4977_s6 + $0xc8] sm:$0xff] %v3427_v14  ;;  %v3360_v1 = vmul.f32 %v6833_v29, %v3359_v25  ;;  %vm2978_vm9 = vcmp.gt.f32.partialorder %v6794_v41, 20.0 }
 0x47b   : > { %v3294_v16 = vmul.f32 0.6931472, %v4529_v9 }
 0x47c   : > { %v4531_v54 = vpop.eup %4530 }
 0x47d   : > { %v3300_v20 = vsel %vm3299_vm13, %v3297_v43, %v3294_v16  ;;  %v3321_v2 = vmul.f32 0.6931472, %v4531_v54 }
 0x47e   : > { %v3388_v44 = vsel %vm2972_vm11, %v6693_v32, %v3300_v20 }
 0x47f   : > { %v3426_v50 = vsel %vm3401_vm5, %v3388_v44, %v6693_v32  ;;  %v4533_v34 = vpop.eup %4532  ;;  %v3327_v23 = vsel %vm3326_vm0, %v3324_v19, %v3321_v2 }
 0x480   : > { %3458 = vst [vmem:[%s4977_s6 + $0xc0] sm:$0xff] %v3426_v50  ;;  %v4535_v53 = vpop.eup %4534  ;;  %v3391_v32 = vsel %vm2975_vm12, %v6727_v17, %v3327_v23  ;;  %v3312_v40 = vmul.f32 0.6931472, %v4533_v34 }
 0x481   : > { %v4537_v45 = vpop.eup %4536  ;;  %v3429_v11 = vsel %vm3401_vm5, %v3391_v32, %v6727_v17  ;;  %v3339_v47 = vmul.f32 0.6931472, %v4535_v53 }
 0x482   : > { %3461 = vst [vmem:[%s4977_s6 + $0xd8] sm:$0xff] %v3429_v11  ;;  %v3318_v38 = vsel %vm6865_vm1, %v3315_v3, %v3312_v40  ;;  %v3330_v52 = vmul.f32 0.6931472, %v4537_v45 }
 0x483   : > { %v3390_v17 = vsel %vm2974_vm14, %v6763_v39, %v3318_v38  ;;  %v3345_v30 = vsel %vm6875_vm3, %v3342_v63, %v3339_v47 }
 0x484   : > { %v3428_v18 = vsel %vm3401_vm5, %v3390_v17, %v6763_v39  ;;  %v3393_v59 = vsel %vm2977_vm15, %v6773_v56, %v3345_v30  ;;  %v3336_v6 = vsel %vm6883_vm4, %v3333_v26, %v3330_v52 }
 0x485   : > { %v4539_v36 = vpop.eup %4538  ;;  %3460 = vst [vmem:[%s4977_s6 + $0xd0] sm:$0xff] %v3428_v18  ;;  %v3431_v15 = vsel %vm3401_vm5, %v3393_v59, %v6773_v56  ;;  %v3392_v5 = vsel %vm2976_vm2, %v6780_v46, %v3336_v6  ;;  %v3351_v56 = vmul.f32 %v6835_v12, %v3350_v28 }
 0x486   : > { %v4541_v39 = vpop.eup %4540  ;;  %3463 = vst [vmem:[%s4977_s6 + $0xe8] sm:$0xff] %v3431_v15  ;;  %v3430_v0 = vsel %vm3401_vm5, %v3392_v5, %v6780_v46  ;;  %v3357_v27 = vmul.f32 0.6931472, %v4539_v36 }
 0x487   : > { %3462 = vst [vmem:[%s4977_s6 + $0xe0] sm:$0xff] %v3430_v0  ;;  %v3348_v31 = vmul.f32 0.6931472, %v4541_v39 }
 0x488   : > { %v3363_v33 = vsel %vm3362_vm6, %v3360_v1, %v3357_v27 }
 0x489   : > { %v3395_v60 = vsel %vm2979_vm7, %v6788_v55, %v3363_v33  ;;  %v3354_v51 = vsel %vm3353_vm8, %v3351_v56, %v3348_v31 }
 0x48a   : > { %v3433_v46 = vsel %vm3401_vm5, %v3395_v60, %v6788_v55  ;;  %v3394_v29 = vsel %vm2978_vm9, %v6794_v41, %v3354_v51 }
 0x48b   : > { %3465 = vst [vmem:[%s4977_s6 + $0xf8] sm:$0xff] %v3433_v46  ;;  %v3432_v12 = vsel %vm3401_vm5, %v3394_v29, %v6794_v41 }
 0x48c   : > { %3464 = vst [vmem:[%s4977_s6 + $0xf0] sm:$0xff] %v3432_v12 }
 0x48d PF: > { %s7229_s20 = sld [smem:[#allocation16_spill]]  ;;  %s3661_s23 = sshll.u32 %s4708_s24, 12 }
 0x48e   : > { %s7230_s30 = sld [smem:[#allocation27_spill]]  ;;  %s3480_s15 = sshll.u32 %s4977_s6, 4  ;;  %s6939_s15 = int_to_ptr.vmem [resolvable:$true] %s3480_s15 }
 0x48f   : > { %s6943_s11 = scalar_lea.sflag [#allocation6], %s465_s4  ;;  %s4596_s7 = scalar_lea.vmem %s6939_s15, 4096 }
 0x490   : > { %p4597_p0 = scmp.ne.s32.totalorder %s6939_s15, %s4596_s7  ;;  %s4729_s24 = smov [#allocation9]  }
 0x491   : > { %s4600_s28 = sshll.u32 %s4729_s24, 4  ;;  %s4601_s28 = int_to_ptr.vmem [resolvable:$false] %s4600_s28 }
 0x492   : > { %s4602_s12 = scalar_lea.vmem %s4601_s28, 8192  ;;  %p4603_p8 = scmp.lt.s32.totalorder %s6939_s15, %s4601_s28 }
 0x493   : > { %p7231_p1 = scmp.ne.s32.totalorder %s7229_s20, 0  ;;  %p4604_p9 = scmp.lt.s32.totalorder %s4602_s12, %s4596_s7 }
 0x494   : > { %s6936_s29 = scalar_lea.hbm %s7230_s30, %s3661_s23 }
 0x495   : > { %p4598_p2 = pnand %p4597_p0, %p7231_p1  ;;  %p4605_p11 = por %p4604_p9, %p4603_p8 }
 0x497   : > { %p4599_p5 = pneg %p4598_p2 }
 0x499   : > { %p4606_p13 = pnand %p4605_p11, %p4599_p5 }
 0x49b   : > { %4609 = shalt.err (!%p4606_p13)
}
 0x49c   : > { %s4610_s4 = scalar_lea.hbm %s6936_s29, 4096  ;;  %s4614_s8 = scalar_lea.hbm %s7230_s30, 8192 }
 0x49d   : > { %p4611_p4 = scmp.ne.s32.totalorder %s6936_s29, %s4610_s4  ;;  %p4615_p10 = scmp.lt.s32.totalorder %s6936_s29, %s7230_s30 }
 0x49e   : > { %p4616_p3 = scmp.lt.s32.totalorder %s4614_s8, %s4610_s4 }
 0x49f   : > { %p4612_p6 = pnand %p4611_p4, %p7231_p1 }
 0x4a0   : > { %p4617_p12 = por %p4616_p3, %p4615_p10 }
 0x4a1   : > { %p4613_p7 = pneg %p4612_p6 }
 0x4a3   : > { %p4618_p0 = pnand %p4617_p12, %p4613_p7 }
 0x4a5   : > { %4621 = shalt.err (!%p4618_p0)
}
 0x4a6   : > { %s4730_s14 = smov 128   ;;  %s4731_s23 = smov 8  }
 0x4a7   : > { %4170 = dma.vmem_to_hbm [thread:$0]  (%p7231_p1), %s6939_s15, 4096, %s6936_s29, %s6943_s11, %s4730_s14, %s4730_s14, %s4731_s23  }
 0x4a8 PF: > { %s7232_s27 = sld [smem:[#allocation15_spill]] }
 0x4a9   : > { %s7233_s25 = sld [smem:[#allocation13_spill]] }
 0x4aa   : > { %s7234_s7 = sld [smem:[#allocation17_spill]] }
 0x4ae   : > { %p4187_p2 = scmp.ge.s32.totalorder %s7232_s27, 2 }
 0x4af   : > { %s3495_s24 = sand.u32 1, %s7233_s25  }
 0x4b0   : > { %p7235_p5 = scmp.ne.s32.totalorder %s7234_s7, 0  ;;  %s3496_s28 = scalar_lea.sflag [#allocation6], %s3495_s24 }
 0x4b2   : > { %p4181_p8 = pnand %p4187_p2, %p7235_p5 }
 0x4b4   : > { %p4182_p9 = pneg %p4181_p8 }
 0x4b6   : > { %4675 = dma.done.wait (%p4182_p9), %s3496_s28, 4096  }
 0x4b7   : > { %4677 = vsyncadd (%p4182_p9), %s3496_s28, 4294963200  ;;  %s28_s27 = sadd.s32 1, %s7232_s27   ;;  %s7236_s12 = smov %s4932_s17 }
 0x4b8   : > { %p25_p11 = scmp.ge.s32.totalorder %s28_s27, 8   ;;  %s7237_s23 = sld [smem:[#allocation14_spill]] }
 0x4b9   : > { %s7238_s25 = sld [smem:[#allocation18_spill]]  ;;  %s7239_s17 = smov %s4684_s18 }
 0x4ba   : > { %s7240_s18 = smov %s4688_s19  ;;  %s7241_s19 = smov %s7236_s12 }
 0x4bb   : > { %s7242_s20 = smov %s4696_s21  ;;  %s7243_s21 = smov %s4700_s22 }
 0x4bc   : > { %s7244_s22 = smov %s4937_s3  ;;  %s7245_s24 = smov %s4716_s26 }
 0x4bd   : > { %s7246_s26 = smov %s7252_s16  ;;  %27 = sbr.rel (!%p25_p11) target bundleno = 20 (0x14), region = 127 }
 0x4c2   :  { %3501 = vsyncpa [#allocation5], 1 }
 0x4c3   :  { %3503 = vsyncpa [#allocation5 + $0x1], 1 }
 0x4c4   :  { %3504 = vsyncpa [#allocation8], 1 }
 0x4c5   :  { %3505 = vsyncpa [#allocation6], 1 }
 0x4c6   :  { %3507 = vsyncpa [#allocation6 + $0x1], 1 }

</bundles_post_ra>
